<compile_context>
chip_gen: v7x
topology: tpu7x:2x2x1
jax: 0.10.0
libtpu: 0.0.40
codegen_flags: <defaults>
</compile_context>

<pallas_src>
import functools
import math

import jax
import jax.numpy as jnp
from jax.experimental import pallas as pl
from jax.experimental.pallas import tpu as pltpu


# Geometry fixed by the PyTorch module (60x60 input -> 27*27*128 flatten).
CONV_OUT = 27 * 27 * 128                  # 93312
STREAM0_K_STEPS = 6                       # total K tiles (even -> splits over 2 TCs)
STREAM0_K_TILE = 15616                    # 122 * 128
STREAM0_K_PAD = STREAM0_K_TILE * STREAM0_K_STEPS   # 93696 (zero-padded K)

WEIGHT_DTYPE = jnp.bfloat16
ACT_DTYPE = jnp.bfloat16


@functools.lru_cache(maxsize=1)
def _tensorcores_per_device():
    """Best-effort TensorCores-per-device (2 on v7x / megacore parts, else 1)."""
    try:
        dev = jax.devices()[0]
    except Exception:
        return 1
    n = getattr(dev, "num_cores", None)
    if isinstance(n, int) and n > 0:
        return min(int(n), 2)
    kind = str(getattr(dev, "device_kind", "")).lower()
    if "7" in kind or "v4" in kind or "v5p" in kind:
        return 2
    return 1


# ----------------------------------------------------------------------------
# Fused matmul + bias + ReLU (conv im2col matmuls, single K step)
# ----------------------------------------------------------------------------
def _matmul_bias_relu_kernel(x_ref, w_ref, b_ref, o_ref):
    """o = relu(x @ w + b); f32 MXU accumulation, direct write (no scratch)."""
    acc = jnp.dot(x_ref[...], w_ref[...], preferred_element_type=jnp.float32)
    o_ref[...] = jnp.maximum(acc + b_ref[...], 0.0).astype(o_ref.dtype)


def matmul_bias_relu(x, w, b, *, m_tiles):
    """(M,K)@(K,N)+b, ReLU.  M padded to x16; tiled over 'parallel' only if >1 TC."""
    M, K = x.shape
    K2, N = w.shape
    assert K == K2
    tm = (M + m_tiles - 1) // m_tiles
    tm = ((tm + 15) // 16) * 16           # bf16 sublane-friendly, unmasked edges
    m_pad = tm * m_tiles
    if m_pad != M:
        x = jnp.pad(x, ((0, m_pad - M), (0, 0)))
    cost = pl.CostEstimate(
        flops=2 * m_pad * K * N,
        transcendentals=0,
        bytes_accessed=(m_pad * K + K * N + m_pad * N) * 2)
    out = pl.pallas_call(
        _matmul_bias_relu_kernel,
        out_shape=jax.ShapeDtypeStruct((m_pad, N), ACT_DTYPE),
        grid_spec=pltpu.PrefetchScalarGridSpec(
            num_scalar_prefetch=0,
            grid=(m_tiles,),
            in_specs=[
                pl.BlockSpec((tm, K), lambda i: (i, 0)),
                pl.BlockSpec((K, N), lambda i: (0, 0)),
                pl.BlockSpec((1, N), lambda i: (0, 0)),
            ],
            out_specs=pl.BlockSpec((tm, N), lambda i: (i, 0)),
        ),
        compiler_params=pltpu.CompilerParams(
            dimension_semantics=("parallel",)),
        cost_estimate=cost,
    )(x, w, b.reshape(1, N))
    return out[:M] if m_pad != M else out


# ----------------------------------------------------------------------------
# Conv via im2col (JAX layout glue) + Pallas matmul (hot path)
# ----------------------------------------------------------------------------
def conv2d_relu(x_nhwc, wm, b, *, k, stride, m_tiles):
    """Valid conv.  x: (B,H,W,Cin) bf16; wm: (k*k*Cin, Cout) in (kh,kw,cin) row order."""
    # TODO(synk): the conv trunk could be fused into one Pallas call doing the
    # (kh,kw) shifts on VMEM slices instead of materializing im2col patch
    # buffers in HBM; at B=2 these layers are far from the bottleneck (stream0
    # dominates), so im2col + a single-step Pallas matmul is kept for robustness.
    B, H, W, C = x_nhwc.shape
    cout = wm.shape[1]
    OH = (H - k) // stride + 1
    OW = (W - k) // stride + 1
    patches = []
    for kh in range(k):
        for kw in range(k):
            patches.append(
                x_nhwc[:, kh:kh + stride * OH:stride, kw:kw + stride * OW:stride, :])
    p = jnp.stack(patches, axis=3).reshape(B * OH * OW, k * k * C)
    out = matmul_bias_relu(p, wm, b, m_tiles=m_tiles)
    return out.reshape(B, OH, OW, cout)


# ----------------------------------------------------------------------------
# Dueling-head math shared by both stream0 variants (all in f32)
# ----------------------------------------------------------------------------
def _dueling_from_s(s, wa_ref, ba_ref, wv_ref, bv_ref,
                    waw_ref, baw_ref, wvw_ref, bvw_ref):
    """s: (B,128) f32 post-ReLU stream0 activation -> (B, A) Q values (f32)."""
    sA = jnp.maximum(
        jnp.dot(s, wa_ref[...].astype(jnp.float32),
                preferred_element_type=jnp.float32) + ba_ref[...], 0.0)
    sV = jnp.maximum(
        jnp.dot(s, wv_ref[...].astype(jnp.float32),
                preferred_element_type=jnp.float32) + bv_ref[...], 0.0)
    adv = jnp.dot(sA, waw_ref[...].astype(jnp.float32),
                  preferred_element_type=jnp.float32) + baw_ref[...]
    val = jnp.dot(sV, wvw_ref[...].astype(jnp.float32),
                  preferred_element_type=jnp.float32) + bvw_ref[...]
    # PyTorch-exact combine: unbiased (N-1) std over the action dim, eps added
    # to the std, then a second mean subtraction of the normalized advantage.
    n = adv.shape[1]
    mean = jnp.mean(adv, axis=1, keepdims=True)
    centered = adv - mean
    std = jnp.sqrt(jnp.sum(centered * centered, axis=1, keepdims=True) / (n - 1))
    advn = centered / (std + 1e-5)
    return val + (advn - jnp.mean(advn, axis=1, keepdims=True))


def _full_spec(shape):
    return pl.BlockSpec(shape, lambda i: (0,) * len(shape))


def _head_specs(H, hs, A):
    return [_full_spec((1, H)),
            _full_spec((H, hs)), _full_spec((1, hs)),
            _full_spec((H, hs)), _full_spec((1, hs)),
            _full_spec((hs, A)), _full_spec((1, A)),
            _full_spec((hs, 1)), _full_spec((1, 1))]


def _head_args(b_s0, w_A0, b_A0, w_V0, b_V0, w_AW, b_AW, w_VW, b_VW):
    H = w_A0.shape[0]
    hs = w_A0.shape[1]
    A = w_AW.shape[1]
    return (b_s0.reshape(1, H),
            w_A0, b_A0.reshape(1, hs),
            w_V0, b_V0.reshape(1, hs),
            w_AW, b_AW.reshape(1, A),
            w_VW, b_VW.reshape(1, 1))


# ----------------------------------------------------------------------------
# Single-TC path (v5e / v6e): stream0 + full dueling head fused in ONE kernel
# ----------------------------------------------------------------------------
def _stream0_head_fused_kernel(x_ref, w_ref, bs_ref, wa_ref, ba_ref, wv_ref, bv_ref,
                               waw_ref, baw_ref, wvw_ref, bvw_ref, o_ref, acc_ref):
    k = pl.program_id(0)

    @pl.when(k == 0)
    def _():
        acc_ref[...] = jnp.zeros_like(acc_ref)

    acc_ref[...] += jnp.dot(x_ref[...], w_ref[...],
                            preferred_element_type=jnp.float32)

    @pl.when(k == pl.num_programs(0) - 1)
    def _():
        s = jnp.maximum(acc_ref[...] + bs_ref[...], 0.0)
        q = _dueling_from_s(s, wa_ref, ba_ref, wv_ref, bv_ref,
                            waw_ref, baw_ref, wvw_ref, bvw_ref)
        o_ref[...] = q.astype(o_ref.dtype)


def stream0_dueling_fused(x_flat, b_s0, w_s0, w_A0, b_A0, w_V0, b_V0,
                          w_AW, b_AW, w_VW, b_VW):
    B, Kp = x_flat.shape
    Kp2, H = w_s0.shape
    hs = w_A0.shape[1]
    A = w_AW.shape[1]
    assert Kp == STREAM0_K_PAD and Kp2 == STREAM0_K_PAD and H == 128
    assert A >= 2, "dueling std over a single action is undefined (N-1 = 0)"
    cost = pl.CostEstimate(
        flops=2 * B * Kp * H + 4 * B * H * hs + 2 * B * hs * (A + 1),
        transcendentals=0,
        bytes_accessed=Kp * H * 2 + B * Kp * 2 + 2 * H * hs * 2 + B * A * 4)
    return pl.pallas_call(
        _stream0_head_fused_kernel,
        out_shape=jax.ShapeDtypeStruct((B, A), jnp.float32),
        grid_spec=pltpu.PrefetchScalarGridSpec(
            num_scalar_prefetch=0,
            grid=(STREAM0_K_STEPS,),
            in_specs=[
                pl.BlockSpec((B, STREAM0_K_TILE), lambda k: (0, k)),
                pl.BlockSpec((STREAM0_K_TILE, H), lambda k: (k, 0)),
            ] + _head_specs(H, hs, A),
            out_specs=pl.BlockSpec((B, A), lambda k: (0, 0)),
            scratch_shapes=[pltpu.VMEM((B, H), jnp.float32)],
        ),
        compiler_params=pltpu.CompilerParams(
            dimension_semantics=("arbitrary",)),
        cost_estimate=cost,
    )(x_flat, w_s0,
      *_head_args(b_s0, w_A0, b_A0, w_V0, b_V0, w_AW, b_AW, w_VW, b_VW))


# ----------------------------------------------------------------------------
# Multi-TC path (v7x / megacore): K split over a 'parallel' axis + fused head
# ----------------------------------------------------------------------------
def _stream0_partial_kernel(x_ref, w_ref, o_ref):
    """Each 'parallel' index j owns half the K axis; accumulate into its f32 block."""
    k = pl.program_id(1)
    part = jnp.dot(x_ref[...], w_ref[...], preferred_element_type=jnp.float32)

    @pl.when(k == 0)
    def _():
        o_ref[0] = part

    @pl.when(k > 0)
    def _():
        o_ref[0] = o_ref[0] + part


def stream0_partial(x_flat, w):
    """Returns (2, B, 128) f32 partial sums (one per K-half)."""
    B, Kp = x_flat.shape
    Kp2, N = w.shape
    assert Kp == STREAM0_K_PAD and Kp2 == STREAM0_K_PAD and N == 128
    nk_half = STREAM0_K_STEPS // 2
    cost = pl.CostEstimate(
        flops=2 * B * Kp * N,
        transcendentals=0,
        bytes_accessed=Kp * N * 2 + B * Kp * 2 + 2 * B * N * 4)
    return pl.pallas_call(
        _stream0_partial_kernel,
        out_shape=jax.ShapeDtypeStruct((2, B, N), jnp.float32),
        grid_spec=pltpu.PrefetchScalarGridSpec(
            num_scalar_prefetch=0,
            grid=(2, nk_half),
            in_specs=[
                pl.BlockSpec((B, STREAM0_K_TILE),
                             lambda j, k: (0, j * nk_half + k)),
                pl.BlockSpec((STREAM0_K_TILE, N),
                             lambda j, k: (j * nk_half + k, 0)),
            ],
            out_specs=pl.BlockSpec((1, B, N), lambda j, k: (j, 0, 0)),
        ),
        compiler_params=pltpu.CompilerParams(
            dimension_semantics=("parallel", "arbitrary")),
        cost_estimate=cost,
    )(x_flat, w)


def _dueling_head_kernel(p_ref, bs_ref, wa_ref, ba_ref, wv_ref, bv_ref,
                         waw_ref, baw_ref, wvw_ref, bvw_ref, o_ref):
    # stream0 finalize: sum the two K-half partials, add bias, ReLU (f32).
    s = jnp.maximum(p_ref[0] + p_ref[1] + bs_ref[...], 0.0)
    q = _dueling_from_s(s, wa_ref, ba_ref, wv_ref, bv_ref,
                        waw_ref, baw_ref, wvw_ref, bvw_ref)
    o_ref[...] = q.astype(o_ref.dtype)


def dueling_head(partials, b_s0, w_A0, b_A0, w_V0, b_V0, w_AW, b_AW, w_VW, b_VW):
    two, B, H = partials.shape
    hs = w_A0.shape[1]
    A = w_AW.shape[1]
    assert A >= 2, "dueling std over a single action is undefined (N-1 = 0)"
    return pl.pallas_call(
        _dueling_head_kernel,
        out_shape=jax.ShapeDtypeStruct((B, A), jnp.float32),
        grid_spec=pltpu.PrefetchScalarGridSpec(
            num_scalar_prefetch=0,
            grid=(1,),
            in_specs=[_full_spec((two, B, H))] + _head_specs(H, hs, A),
            out_specs=_full_spec((B, A)),
        ),
    )(partials,
      *_head_args(b_s0, w_A0, b_A0, w_V0, b_V0, w_AW, b_AW, w_VW, b_VW))


# ----------------------------------------------------------------------------
# Parameter init (deterministic, in-script; mirrors the PyTorch module shapes)
# ----------------------------------------------------------------------------
def _xavier_uniform(key, fan_in, fan_out):
    bound = math.sqrt(6.0 / (fan_in + fan_out))
    return jax.random.uniform(key, (fan_in, fan_out), jnp.float32, -bound, bound)


def _conv_weight_matrix(key, k, cin, cout):
    fan_in = cin * k * k
    bound = 1.0 / math.sqrt(fan_in)
    w = jax.random.uniform(key, (k, k, cin, cout), jnp.float32, -bound, bound)
    return w.reshape(k * k * cin, cout).astype(WEIGHT_DTYPE)   # (kh,kw,cin) row order


def init_params(key, h_size, action_num):
    ks = jax.random.split(key, 8)
    # stream0 rows are laid out for the NHWC (h, w, c) flatten of the conv trunk
    # (a PyTorch NCHW-flatten checkpoint would be row-permuted once at load time)
    # and zero-padded along K so it divides into STREAM0_K_STEPS tiles.
    # TODO(synk): int8 (v5e/v6e) / fp8 (v7x) weight-only quantization of w_s0
    # would halve the dominant ~24 MB weight stream but changes numerics; kept
    # bf16 to preserve the reference module's semantics.
    w_s0 = _xavier_uniform(ks[3], CONV_OUT, 128)
    w_s0 = jnp.pad(w_s0, ((0, STREAM0_K_PAD - CONV_OUT), (0, 0))).astype(WEIGHT_DTYPE)
    return dict(
        w1=_conv_weight_matrix(ks[0], 4, 2, 32),   b1=jnp.zeros((32,), jnp.float32),
        w2=_conv_weight_matrix(ks[1], 2, 32, 64),  b2=jnp.zeros((64,), jnp.float32),
        w3=_conv_weight_matrix(ks[2], 2, 64, 128), b3=jnp.zeros((128,), jnp.float32),
        w_s0=w_s0,                                 b_s0=jnp.zeros((128,), jnp.float32),
        w_A0=_xavier_uniform(ks[4], 128, h_size).astype(WEIGHT_DTYPE),
        b_A0=jnp.zeros((h_size,), jnp.float32),
        w_V0=_xavier_uniform(ks[5], 128, h_size).astype(WEIGHT_DTYPE),
        b_V0=jnp.zeros((h_size,), jnp.float32),
        w_AW=_xavier_uniform(ks[6], h_size, action_num).astype(WEIGHT_DTYPE),
        b_AW=jnp.zeros((action_num,), jnp.float32),
        w_VW=_xavier_uniform(ks[7], h_size, 1).astype(WEIGHT_DTYPE),
        b_VW=jnp.zeros((1,), jnp.float32),
    )


# ----------------------------------------------------------------------------
# Forward pass
# ----------------------------------------------------------------------------
def qnetwork_forward(x, params):
    x = x.reshape(-1, 2, 60, 60)                              # PyTorch view(-1,2,60,60)
    B = x.shape[0]
    x = jnp.transpose(x, (0, 2, 3, 1)).astype(ACT_DTYPE)      # NCHW -> NHWC, bf16

    ncores = _tensorcores_per_device()                        # trace-time constant
    mt = 2 if ncores >= 2 else 1

    x = conv2d_relu(x, params['w1'], params['b1'], k=4, stride=2, m_tiles=mt)  # (B,29,29,32)
    x = conv2d_relu(x, params['w2'], params['b2'], k=2, stride=1, m_tiles=mt)  # (B,28,28,64)
    x = conv2d_relu(x, params['w3'], params['b3'], k=2, stride=1, m_tiles=mt)  # (B,27,27,128)

    # NHWC flatten consumed directly by w_s0 (rows pre-permuted at init):
    # no runtime NCHW transpose.  Zero-pad K to the padded weight length.
    x = x.reshape(B, CONV_OUT)
    x = jnp.pad(x, ((0, 0), (0, STREAM0_K_PAD - CONV_OUT)))

    if ncores >= 2:
        # 2 TensorCores: each core streams half of the stream0 weight.
        partials = stream0_partial(x, params['w_s0'])          # (2, B, 128) f32
        q = dueling_head(partials, params['b_s0'],
                         params['w_A0'], params['b_A0'],
                         params['w_V0'], params['b_V0'],
                         params['w_AW'], params['b_AW'],
                         params['w_VW'], params['b_VW'])
    else:
        # Single TensorCore: stream0 + dueling head fused in one kernel.
        q = stream0_dueling_fused(x, params['b_s0'], params['w_s0'],
                                  params['w_A0'], params['b_A0'],
                                  params['w_V0'], params['b_V0'],
                                  params['w_AW'], params['b_AW'],
                                  params['w_VW'], params['b_VW'])
    return q


# ----------------------------------------------------------------------------
if __name__ == "__main__":
    key = jax.random.PRNGKey(0)
    k_x, k_p = jax.random.split(key)

    H_SIZE = 32
    ACTION_NUM = 4
    B = 2

    x = jax.random.normal(k_x, (B, 2, 60, 60), jnp.float32)   # NCHW like PyTorch
    params = init_params(k_p, H_SIZE, ACTION_NUM)

    fwd = jax.jit(qnetwork_forward)
    q = jax.block_until_ready(fwd(x, params))

    assert q.shape == (B, ACTION_NUM), q.shape
    assert bool(jnp.all(jnp.isfinite(q))), "non-finite output"
    print("KERNEL_OK")
</pallas_src>

<mosaic_0001>
module attributes {stable_mosaic.version = 11 : i64} {
  func.func @_matmul_bias_relu_kernel(%arg0: i32, %arg1: memref<1696x32xbf16, #tpu.memory_space<vmem>>, %arg2: memref<32x32xbf16, #tpu.memory_space<vmem>>, %arg3: memref<1x32xf32, #tpu.memory_space<vmem>>, %arg4: memref<1696x32xbf16, #tpu.memory_space<vmem>>) attributes {dimension_semantics = [#tpu.dimension_semantics<parallel>], iteration_bounds = array<i64: 1>, scalar_prefetch = 0 : i64, scratch_operands = 0 : i64, tpu.core_type = #tpu.core_type<tc>, window_params = [{transform_indices = @transform_0, window_bounds = array<i64: 1696, 32>}, {pipeline_mode = #tpu.pipeline_mode<synchronous>, transform_indices = @transform_1, window_bounds = array<i64: 32, 32>}, {pipeline_mode = #tpu.pipeline_mode<synchronous>, transform_indices = @transform_2, window_bounds = array<i64: 1, 32>}, {transform_indices = @transform_3, window_bounds = array<i64: 1696, 32>}]} {
    %c0 = arith.constant 0 : index
    %c0_0 = arith.constant 0 : index
    %0 = vector.load %arg1[%c0, %c0_0] : memref<1696x32xbf16, #tpu.memory_space<vmem>>, vector<1696x32xbf16>
    %c0_1 = arith.constant 0 : index
    %c0_2 = arith.constant 0 : index
    %1 = vector.load %arg2[%c0_1, %c0_2] : memref<32x32xbf16, #tpu.memory_space<vmem>>, vector<32x32xbf16>
    %cst = arith.constant dense<0.000000e+00> : vector<1696x32xf32>
    %2 = tpu.matmul %0, %1, %cst {dimension_numbers = #tpu.dot_dimension_numbers<[1], [0], [0], [1], [0, 0, 1, 1], [], []>} : vector<1696x32xbf16>, vector<32x32xbf16>, vector<1696x32xf32> -> vector<1696x32xf32>
    %c0_3 = arith.constant 0 : index
    %c0_4 = arith.constant 0 : index
    %3 = vector.load %arg3[%c0_3, %c0_4] : memref<1x32xf32, #tpu.memory_space<vmem>>, vector<1x32xf32>
    %4 = vector.broadcast %3 : vector<1x32xf32> to vector<1696x32xf32>
    %5 = arith.addf %2, %4 : vector<1696x32xf32>
    %cst_5 = arith.constant 0.000000e+00 : f32
    %6 = vector.broadcast %cst_5 : f32 to vector<1696x32xf32>
    %7 = arith.maximumf %5, %6 : vector<1696x32xf32>
    %8 = arith.truncf %7 : vector<1696x32xf32> to vector<1696x32xbf16>
    %c0_6 = arith.constant 0 : index
    %c0_7 = arith.constant 0 : index
    %9 = vector.load %arg4[%c0_6, %c0_7] : memref<1696x32xbf16, #tpu.memory_space<vmem>>, vector<1696x32xbf16>
    tpu.vector_store %arg4[%c0_6, %c0_7], %8 {strides = array<i32>} : memref<1696x32xbf16, #tpu.memory_space<vmem>>, vector<1696x32xbf16>,
    return
  }
  func.func @transform_0(%arg0: i32) -> (i32, i32) {
    %c0_i32 = arith.constant 0 : i32
    %c0_i32_0 = arith.constant 0 : i32
    return %arg0, %c0_i32 : i32, i32
  }
  func.func @transform_1(%arg0: i32) -> (i32, i32) {
    %c0_i32 = arith.constant 0 : i32
    %c0_i32_0 = arith.constant 0 : i32
    %c0_i32_1 = arith.constant 0 : i32
    return %c0_i32, %c0_i32_0 : i32, i32
  }
  func.func @transform_2(%arg0: i32) -> (i32, i32) {
    %c0_i32 = arith.constant 0 : i32
    %c0_i32_0 = arith.constant 0 : i32
    %c0_i32_1 = arith.constant 0 : i32
    return %c0_i32, %c0_i32_0 : i32, i32
  }
  func.func @transform_3(%arg0: i32) -> (i32, i32) {
    %c0_i32 = arith.constant 0 : i32
    %c0_i32_0 = arith.constant 0 : i32
    return %arg0, %c0_i32 : i32, i32
  }
}

module attributes {stable_mosaic.version = 11 : i64} {
  func.func @_matmul_bias_relu_kernel(%arg0: i32, %arg1: memref<1568x128xbf16, #tpu.memory_space<vmem>>, %arg2: memref<128x64xbf16, #tpu.memory_space<vmem>>, %arg3: memref<1x64xf32, #tpu.memory_space<vmem>>, %arg4: memref<1568x64xbf16, #tpu.memory_space<vmem>>) attributes {dimension_semantics = [#tpu.dimension_semantics<parallel>], iteration_bounds = array<i64: 1>, scalar_prefetch = 0 : i64, scratch_operands = 0 : i64, tpu.core_type = #tpu.core_type<tc>, window_params = [{transform_indices = @transform_0, window_bounds = array<i64: 1568, 128>}, {pipeline_mode = #tpu.pipeline_mode<synchronous>, transform_indices = @transform_1, window_bounds = array<i64: 128, 64>}, {pipeline_mode = #tpu.pipeline_mode<synchronous>, transform_indices = @transform_2, window_bounds = array<i64: 1, 64>}, {transform_indices = @transform_3, window_bounds = array<i64: 1568, 64>}]} {
    %c0 = arith.constant 0 : index
    %c0_0 = arith.constant 0 : index
    %0 = vector.load %arg1[%c0, %c0_0] : memref<1568x128xbf16, #tpu.memory_space<vmem>>, vector<1568x128xbf16>
    %c0_1 = arith.constant 0 : index
    %c0_2 = arith.constant 0 : index
    %1 = vector.load %arg2[%c0_1, %c0_2] : memref<128x64xbf16, #tpu.memory_space<vmem>>, vector<128x64xbf16>
    %cst = arith.constant dense<0.000000e+00> : vector<1568x64xf32>
    %2 = tpu.matmul %0, %1, %cst {dimension_numbers = #tpu.dot_dimension_numbers<[1], [0], [0], [1], [0, 0, 1, 1], [], []>} : vector<1568x128xbf16>, vector<128x64xbf16>, vector<1568x64xf32> -> vector<1568x64xf32>
    %c0_3 = arith.constant 0 : index
    %c0_4 = arith.constant 0 : index
    %3 = vector.load %arg3[%c0_3, %c0_4] : memref<1x64xf32, #tpu.memory_space<vmem>>, vector<1x64xf32>
    %4 = vector.broadcast %3 : vector<1x64xf32> to vector<1568x64xf32>
    %5 = arith.addf %2, %4 : vector<1568x64xf32>
    %cst_5 = arith.constant 0.000000e+00 : f32
    %6 = vector.broadcast %cst_5 : f32 to vector<1568x64xf32>
    %7 = arith.maximumf %5, %6 : vector<1568x64xf32>
    %8 = arith.truncf %7 : vector<1568x64xf32> to vector<1568x64xbf16>
    %c0_6 = arith.constant 0 : index
    %c0_7 = arith.constant 0 : index
    %9 = vector.load %arg4[%c0_6, %c0_7] : memref<1568x64xbf16, #tpu.memory_space<vmem>>, vector<1568x64xbf16>
    tpu.vector_store %arg4[%c0_6, %c0_7], %8 {strides = array<i32>} : memref<1568x64xbf16, #tpu.memory_space<vmem>>, vector<1568x64xbf16>,
    return
  }
  func.func @transform_0(%arg0: i32) -> (i32, i32) {
    %c0_i32 = arith.constant 0 : i32
    %c0_i32_0 = arith.constant 0 : i32
    return %arg0, %c0_i32 : i32, i32
  }
  func.func @transform_1(%arg0: i32) -> (i32, i32) {
    %c0_i32 = arith.constant 0 : i32
    %c0_i32_0 = arith.constant 0 : i32
    %c0_i32_1 = arith.constant 0 : i32
    return %c0_i32, %c0_i32_0 : i32, i32
  }
  func.func @transform_2(%arg0: i32) -> (i32, i32) {
    %c0_i32 = arith.constant 0 : i32
    %c0_i32_0 = arith.constant 0 : i32
    %c0_i32_1 = arith.constant 0 : i32
    return %c0_i32, %c0_i32_0 : i32, i32
  }
  func.func @transform_3(%arg0: i32) -> (i32, i32) {
    %c0_i32 = arith.constant 0 : i32
    %c0_i32_0 = arith.constant 0 : i32
    return %arg0, %c0_i32 : i32, i32
  }
}

module attributes {stable_mosaic.version = 11 : i64} {
  func.func @_matmul_bias_relu_kernel(%arg0: i32, %arg1: memref<1472x256xbf16, #tpu.memory_space<vmem>>, %arg2: memref<256x128xbf16, #tpu.memory_space<vmem>>, %arg3: memref<1x128xf32, #tpu.memory_space<vmem>>, %arg4: memref<1472x128xbf16, #tpu.memory_space<vmem>>) attributes {dimension_semantics = [#tpu.dimension_semantics<parallel>], iteration_bounds = array<i64: 1>, scalar_prefetch = 0 : i64, scratch_operands = 0 : i64, tpu.core_type = #tpu.core_type<tc>, window_params = [{transform_indices = @transform_0, window_bounds = array<i64: 1472, 256>}, {pipeline_mode = #tpu.pipeline_mode<synchronous>, transform_indices = @transform_1, window_bounds = array<i64: 256, 128>}, {pipeline_mode = #tpu.pipeline_mode<synchronous>, transform_indices = @transform_2, window_bounds = array<i64: 1, 128>}, {transform_indices = @transform_3, window_bounds = array<i64: 1472, 128>}]} {
    %c0 = arith.constant 0 : index
    %c0_0 = arith.constant 0 : index
    %0 = vector.load %arg1[%c0, %c0_0] : memref<1472x256xbf16, #tpu.memory_space<vmem>>, vector<1472x256xbf16>
    %c0_1 = arith.constant 0 : index
    %c0_2 = arith.constant 0 : index
    %1 = vector.load %arg2[%c0_1, %c0_2] : memref<256x128xbf16, #tpu.memory_space<vmem>>, vector<256x128xbf16>
    %cst = arith.constant dense<0.000000e+00> : vector<1472x128xf32>
    %2 = tpu.matmul %0, %1, %cst {dimension_numbers = #tpu.dot_dimension_numbers<[1], [0], [0], [1], [0, 0, 1, 1], [], []>} : vector<1472x256xbf16>, vector<256x128xbf16>, vector<1472x128xf32> -> vector<1472x128xf32>
    %c0_3 = arith.constant 0 : index
    %c0_4 = arith.constant 0 : index
    %3 = vector.load %arg3[%c0_3, %c0_4] : memref<1x128xf32, #tpu.memory_space<vmem>>, vector<1x128xf32>
    %4 = vector.broadcast %3 : vector<1x128xf32> to vector<1472x128xf32>
    %5 = arith.addf %2, %4 : vector<1472x128xf32>
    %cst_5 = arith.constant 0.000000e+00 : f32
    %6 = vector.broadcast %cst_5 : f32 to vector<1472x128xf32>
    %7 = arith.maximumf %5, %6 : vector<1472x128xf32>
    %8 = arith.truncf %7 : vector<1472x128xf32> to vector<1472x128xbf16>
    %c0_6 = arith.constant 0 : index
    %c0_7 = arith.constant 0 : index
    %9 = vector.load %arg4[%c0_6, %c0_7] : memref<1472x128xbf16, #tpu.memory_space<vmem>>, vector<1472x128xbf16>
    tpu.vector_store %arg4[%c0_6, %c0_7], %8 {strides = array<i32>} : memref<1472x128xbf16, #tpu.memory_space<vmem>>, vector<1472x128xbf16>,
    return
  }
  func.func @transform_0(%arg0: i32) -> (i32, i32) {
    %c0_i32 = arith.constant 0 : i32
    %c0_i32_0 = arith.constant 0 : i32
    return %arg0, %c0_i32 : i32, i32
  }
  func.func @transform_1(%arg0: i32) -> (i32, i32) {
    %c0_i32 = arith.constant 0 : i32
    %c0_i32_0 = arith.constant 0 : i32
    %c0_i32_1 = arith.constant 0 : i32
    return %c0_i32, %c0_i32_0 : i32, i32
  }
  func.func @transform_2(%arg0: i32) -> (i32, i32) {
    %c0_i32 = arith.constant 0 : i32
    %c0_i32_0 = arith.constant 0 : i32
    %c0_i32_1 = arith.constant 0 : i32
    return %c0_i32, %c0_i32_0 : i32, i32
  }
  func.func @transform_3(%arg0: i32) -> (i32, i32) {
    %c0_i32 = arith.constant 0 : i32
    %c0_i32_0 = arith.constant 0 : i32
    return %arg0, %c0_i32 : i32, i32
  }
}

module attributes {stable_mosaic.version = 11 : i64} {
  func.func @_stream0_head_fused_kernel(%arg0: i32, %arg1: memref<2x15616xbf16, #tpu.memory_space<vmem>>, %arg2: memref<15616x128xbf16, #tpu.memory_space<vmem>>, %arg3: memref<1x128xf32, #tpu.memory_space<vmem>>, %arg4: memref<128x32xbf16, #tpu.memory_space<vmem>>, %arg5: memref<1x32xf32, #tpu.memory_space<vmem>>, %arg6: memref<128x32xbf16, #tpu.memory_space<vmem>>, %arg7: memref<1x32xf32, #tpu.memory_space<vmem>>, %arg8: memref<32x4xbf16, #tpu.memory_space<vmem>>, %arg9: memref<1x4xf32, #tpu.memory_space<vmem>>, %arg10: memref<32x1xbf16, #tpu.memory_space<vmem>>, %arg11: memref<1x1xf32, #tpu.memory_space<vmem>>, %arg12: memref<2x4xf32, #tpu.memory_space<vmem>>, %arg13: memref<2x128xf32, #tpu.memory_space<vmem>>) attributes {dimension_semantics = [#tpu.dimension_semantics<arbitrary>], iteration_bounds = array<i64: 6>, scalar_prefetch = 0 : i64, scratch_operands = 1 : i64, tpu.core_type = #tpu.core_type<tc>, window_params = [{transform_indices = @transform_0, window_bounds = array<i64: 2, 15616>}, {transform_indices = @transform_1, window_bounds = array<i64: 15616, 128>}, {pipeline_mode = #tpu.pipeline_mode<synchronous>, transform_indices = @transform_2, window_bounds = array<i64: 1, 128>}, {pipeline_mode = #tpu.pipeline_mode<synchronous>, transform_indices = @transform_3, window_bounds = array<i64: 128, 32>}, {pipeline_mode = #tpu.pipeline_mode<synchronous>, transform_indices = @transform_4, window_bounds = array<i64: 1, 32>}, {pipeline_mode = #tpu.pipeline_mode<synchronous>, transform_indices = @transform_5, window_bounds = array<i64: 128, 32>}, {pipeline_mode = #tpu.pipeline_mode<synchronous>, transform_indices = @transform_6, window_bounds = array<i64: 1, 32>}, {pipeline_mode = #tpu.pipeline_mode<synchronous>, transform_indices = @transform_7, window_bounds = array<i64: 32, 4>}, {pipeline_mode = #tpu.pipeline_mode<synchronous>, transform_indices = @transform_8, window_bounds = array<i64: 1, 4>}, {pipeline_mode = #tpu.pipeline_mode<synchronous>, transform_indices = @transform_9, window_bounds = array<i64: 32, 1>}, {pipeline_mode = #tpu.pipeline_mode<synchronous>, transform_indices = @transform_10, window_bounds = array<i64: 1, 1>}, {pipeline_mode = #tpu.pipeline_mode<synchronous>, transform_indices = @transform_11, window_bounds = array<i64: 2, 4>}]} {
    %c0_i32 = arith.constant 0 : i32
    %0 = arith.cmpi eq, %arg0, %c0_i32 : i32
    %1 = arith.extui %0 : i1 to i32
    %c0_i32_0 = arith.constant 0 : i32
    %2 = arith.cmpi ne, %1, %c0_i32_0 : i32
    scf.if %2 {
      %cst_9 = arith.constant 0.000000e+00 : f32
      %12 = vector.broadcast %cst_9 : f32 to vector<2x128xf32>
      %c0_10 = arith.constant 0 : index
      %c0_11 = arith.constant 0 : index
      %13 = vector.load %arg13[%c0_10, %c0_11] : memref<2x128xf32, #tpu.memory_space<vmem>>, vector<2x128xf32>
      tpu.vector_store %arg13[%c0_10, %c0_11], %12 {strides = array<i32>} : memref<2x128xf32, #tpu.memory_space<vmem>>, vector<2x128xf32>,
    } else {
    }
    %c0 = arith.constant 0 : index
    %c0_1 = arith.constant 0 : index
    %3 = vector.load %arg13[%c0, %c0_1] : memref<2x128xf32, #tpu.memory_space<vmem>>, vector<2x128xf32>
    %c0_2 = arith.constant 0 : index
    %c0_3 = arith.constant 0 : index
    %4 = vector.load %arg1[%c0_2, %c0_3] : memref<2x15616xbf16, #tpu.memory_space<vmem>>, vector<2x15616xbf16>
    %c0_4 = arith.constant 0 : index
    %c0_5 = arith.constant 0 : index
    %5 = vector.load %arg2[%c0_4, %c0_5] : memref<15616x128xbf16, #tpu.memory_space<vmem>>, vector<15616x128xbf16>
    %cst = arith.constant dense<0.000000e+00> : vector<2x128xf32>
    %6 = tpu.matmul %4, %5, %cst {dimension_numbers = #tpu.dot_dimension_numbers<[1], [0], [0], [1], [0, 0, 1, 1], [], []>} : vector<2x15616xbf16>, vector<15616x128xbf16>, vector<2x128xf32> -> vector<2x128xf32>
    %7 = arith.addf %3, %6 : vector<2x128xf32>
    %c0_6 = arith.constant 0 : index
    %c0_7 = arith.constant 0 : index
    %8 = vector.load %arg13[%c0_6, %c0_7] : memref<2x128xf32, #tpu.memory_space<vmem>>, vector<2x128xf32>
    tpu.vector_store %arg13[%c0_6, %c0_7], %7 {strides = array<i32>} : memref<2x128xf32, #tpu.memory_space<vmem>>, vector<2x128xf32>,
    %c5_i32 = arith.constant 5 : i32
    %9 = arith.cmpi eq, %arg0, %c5_i32 : i32
    %10 = arith.extui %9 : i1 to i32
    %c0_i32_8 = arith.constant 0 : i32
    %11 = arith.cmpi ne, %10, %c0_i32_8 : i32
    scf.if %11 {
      %c0_9 = arith.constant 0 : index
      %c0_10 = arith.constant 0 : index
      %12 = vector.load %arg13[%c0_9, %c0_10] : memref<2x128xf32, #tpu.memory_space<vmem>>, vector<2x128xf32>
      %c0_11 = arith.constant 0 : index
      %c0_12 = arith.constant 0 : index
      %13 = vector.load %arg3[%c0_11, %c0_12] : memref<1x128xf32, #tpu.memory_space<vmem>>, vector<1x128xf32>
      %14 = vector.broadcast %13 : vector<1x128xf32> to vector<2x128xf32>
      %15 = arith.addf %12, %14 : vector<2x128xf32>
      %cst_13 = arith.constant 0.000000e+00 : f32
      %16 = vector.broadcast %cst_13 : f32 to vector<2x128xf32>
      %17 = arith.maximumf %15, %16 : vector<2x128xf32>
      %c0_14 = arith.constant 0 : index
      %c0_15 = arith.constant 0 : index
      %18 = vector.load %arg4[%c0_14, %c0_15] : memref<128x32xbf16, #tpu.memory_space<vmem>>, vector<128x32xbf16>
      %19 = arith.extf %18 : vector<128x32xbf16> to vector<128x32xf32>
      %cst_16 = arith.constant dense<0.000000e+00> : vector<2x32xf32>
      %20 = tpu.matmul %17, %19, %cst_16 {dimension_numbers = #tpu.dot_dimension_numbers<[1], [0], [0], [1], [0, 0, 1, 1], [], []>} : vector<2x128xf32>, vector<128x32xf32>, vector<2x32xf32> -> vector<2x32xf32>
      %c0_17 = arith.constant 0 : index
      %c0_18 = arith.constant 0 : index
      %21 = vector.load %arg5[%c0_17, %c0_18] : memref<1x32xf32, #tpu.memory_space<vmem>>, vector<1x32xf32>
      %22 = vector.broadcast %21 : vector<1x32xf32> to vector<2x32xf32>
      %23 = arith.addf %20, %22 : vector<2x32xf32>
      %cst_19 = arith.constant 0.000000e+00 : f32
      %24 = vector.broadcast %cst_19 : f32 to vector<2x32xf32>
      %25 = arith.maximumf %23, %24 : vector<2x32xf32>
      %c0_20 = arith.constant 0 : index
      %c0_21 = arith.constant 0 : index
      %26 = vector.load %arg6[%c0_20, %c0_21] : memref<128x32xbf16, #tpu.memory_space<vmem>>, vector<128x32xbf16>
      %27 = arith.extf %26 : vector<128x32xbf16> to vector<128x32xf32>
      %cst_22 = arith.constant dense<0.000000e+00> : vector<2x32xf32>
      %28 = tpu.matmul %17, %27, %cst_22 {dimension_numbers = #tpu.dot_dimension_numbers<[1], [0], [0], [1], [0, 0, 1, 1], [], []>} : vector<2x128xf32>, vector<128x32xf32>, vector<2x32xf32> -> vector<2x32xf32>
      %c0_23 = arith.constant 0 : index
      %c0_24 = arith.constant 0 : index
      %29 = vector.load %arg7[%c0_23, %c0_24] : memref<1x32xf32, #tpu.memory_space<vmem>>, vector<1x32xf32>
      %30 = vector.broadcast %29 : vector<1x32xf32> to vector<2x32xf32>
      %31 = arith.addf %28, %30 : vector<2x32xf32>
      %cst_25 = arith.constant 0.000000e+00 : f32
      %32 = vector.broadcast %cst_25 : f32 to vector<2x32xf32>
      %33 = arith.maximumf %31, %32 : vector<2x32xf32>
      %c0_26 = arith.constant 0 : index
      %c0_27 = arith.constant 0 : index
      %34 = vector.load %arg8[%c0_26, %c0_27] : memref<32x4xbf16, #tpu.memory_space<vmem>>, vector<32x4xbf16>
      %35 = arith.extf %34 : vector<32x4xbf16> to vector<32x4xf32>
      %cst_28 = arith.constant dense<0.000000e+00> : vector<2x4xf32>
      %36 = tpu.matmul %25, %35, %cst_28 {dimension_numbers = #tpu.dot_dimension_numbers<[1], [0], [0], [1], [0, 0, 1, 1], [], []>} : vector<2x32xf32>, vector<32x4xf32>, vector<2x4xf32> -> vector<2x4xf32>
      %c0_29 = arith.constant 0 : index
      %c0_30 = arith.constant 0 : index
      %37 = vector.load %arg9[%c0_29, %c0_30] : memref<1x4xf32, #tpu.memory_space<vmem>>, vector<1x4xf32>
      %38 = vector.broadcast %37 : vector<1x4xf32> to vector<2x4xf32>
      %39 = arith.addf %36, %38 : vector<2x4xf32>
      %c0_31 = arith.constant 0 : index
      %c0_32 = arith.constant 0 : index
      %40 = vector.load %arg10[%c0_31, %c0_32] : memref<32x1xbf16, #tpu.memory_space<vmem>>, vector<32x1xbf16>
      %41 = arith.extf %40 : vector<32x1xbf16> to vector<32x1xf32>
      %cst_33 = arith.constant dense<0.000000e+00> : vector<2x1xf32>
      %42 = tpu.matmul %33, %41, %cst_33 {dimension_numbers = #tpu.dot_dimension_numbers<[1], [0], [0], [1], [0, 0, 1, 1], [], []>} : vector<2x32xf32>, vector<32x1xf32>, vector<2x1xf32> -> vector<2x1xf32>
      %c0_34 = arith.constant 0 : index
      %c0_35 = arith.constant 0 : index
      %43 = vector.load %arg11[%c0_34, %c0_35] : memref<1x1xf32, #tpu.memory_space<vmem>>, vector<1x1xf32>
      %44 = vector.broadcast %43 : vector<1x1xf32> to vector<2x1xf32>
      %45 = arith.addf %42, %44 : vector<2x1xf32>
      %cst_36 = arith.constant dense<0.000000e+00> : vector<2xf32>
      %46 = vector.multi_reduction <add>, %39, %cst_36 [1] : vector<2x4xf32> to vector<2xf32>
      %47 = vector.shape_cast %46 : vector<2xf32> to vector<2x1xf32>
      %cst_37 = arith.constant 4.000000e+00 : f32
      %48 = vector.broadcast %cst_37 : f32 to vector<2x1xf32>
      %49 = arith.divf %47, %48 : vector<2x1xf32>
      %50 = vector.broadcast %49 : vector<2x1xf32> to vector<2x4xf32>
      %51 = arith.subf %39, %50 : vector<2x4xf32>
      %52 = arith.mulf %51, %51 : vector<2x4xf32>
      %cst_38 = arith.constant dense<0.000000e+00> : vector<2xf32>
      %53 = vector.multi_reduction <add>, %52, %cst_38 [1] : vector<2x4xf32> to vector<2xf32>
      %54 = vector.shape_cast %53 : vector<2xf32> to vector<2x1xf32>
      %cst_39 = arith.constant 3.000000e+00 : f32
      %55 = vector.broadcast %cst_39 : f32 to vector<2x1xf32>
      %56 = arith.divf %54, %55 : vector<2x1xf32>
      %57 = math.sqrt %56 : vector<2x1xf32>
      %cst_40 = arith.constant 9.99999974E-6 : f32
      %58 = vector.broadcast %cst_40 : f32 to vector<2x1xf32>
      %59 = arith.addf %57, %58 : vector<2x1xf32>
      %60 = vector.broadcast %59 : vector<2x1xf32> to vector<2x4xf32>
      %61 = arith.divf %51, %60 : vector<2x4xf32>
      %cst_41 = arith.constant dense<0.000000e+00> : vector<2xf32>
      %62 = vector.multi_reduction <add>, %61, %cst_41 [1] : vector<2x4xf32> to vector<2xf32>
      %63 = vector.shape_cast %62 : vector<2xf32> to vector<2x1xf32>
      %cst_42 = arith.constant 4.000000e+00 : f32
      %64 = vector.broadcast %cst_42 : f32 to vector<2x1xf32>
      %65 = arith.divf %63, %64 : vector<2x1xf32>
      %66 = vector.broadcast %65 : vector<2x1xf32> to vector<2x4xf32>
      %67 = arith.subf %61, %66 : vector<2x4xf32>
      %68 = vector.broadcast %45 : vector<2x1xf32> to vector<2x4xf32>
      %69 = arith.addf %68, %67 : vector<2x4xf32>
      %c0_43 = arith.constant 0 : index
      %c0_44 = arith.constant 0 : index
      %70 = vector.load %arg12[%c0_43, %c0_44] : memref<2x4xf32, #tpu.memory_space<vmem>>, vector<2x4xf32>
      tpu.vector_store %arg12[%c0_43, %c0_44], %69 {strides = array<i32>} : memref<2x4xf32, #tpu.memory_space<vmem>>, vector<2x4xf32>,
    } else {
    }
    return
  }
  func.func @transform_0(%arg0: i32) -> (i32, i32) {
    %c0_i32 = arith.constant 0 : i32
    %c0_i32_0 = arith.constant 0 : i32
    return %c0_i32, %arg0 : i32, i32
  }
  func.func @transform_1(%arg0: i32) -> (i32, i32) {
    %c0_i32 = arith.constant 0 : i32
    %c0_i32_0 = arith.constant 0 : i32
    return %arg0, %c0_i32 : i32, i32
  }
  func.func @transform_2(%arg0: i32) -> (i32, i32) {
    %c0_i32 = arith.constant 0 : i32
    %c0_i32_0 = arith.constant 0 : i32
    %c0_i32_1 = arith.constant 0 : i32
    return %c0_i32, %c0_i32_0 : i32, i32
  }
  func.func @transform_3(%arg0: i32) -> (i32, i32) {
    %c0_i32 = arith.constant 0 : i32
    %c0_i32_0 = arith.constant 0 : i32
    %c0_i32_1 = arith.constant 0 : i32
    return %c0_i32, %c0_i32_0 : i32, i32
  }
  func.func @transform_4(%arg0: i32) -> (i32, i32) {
    %c0_i32 = arith.constant 0 : i32
    %c0_i32_0 = arith.constant 0 : i32
    %c0_i32_1 = arith.constant 0 : i32
    return %c0_i32, %c0_i32_0 : i32, i32
  }
  func.func @transform_5(%arg0: i32) -> (i32, i32) {
    %c0_i32 = arith.constant 0 : i32
    %c0_i32_0 = arith.constant 0 : i32
    %c0_i32_1 = arith.constant 0 : i32
    return %c0_i32, %c0_i32_0 : i32, i32
  }
  func.func @transform_6(%arg0: i32) -> (i32, i32) {
    %c0_i32 = arith.constant 0 : i32
    %c0_i32_0 = arith.constant 0 : i32
    %c0_i32_1 = arith.constant 0 : i32
    return %c0_i32, %c0_i32_0 : i32, i32
  }
  func.func @transform_7(%arg0: i32) -> (i32, i32) {
    %c0_i32 = arith.constant 0 : i32
    %c0_i32_0 = arith.constant 0 : i32
    %c0_i32_1 = arith.constant 0 : i32
    return %c0_i32, %c0_i32_0 : i32, i32
  }
  func.func @transform_8(%arg0: i32) -> (i32, i32) {
    %c0_i32 = arith.constant 0 : i32
    %c0_i32_0 = arith.constant 0 : i32
    %c0_i32_1 = arith.constant 0 : i32
    return %c0_i32, %c0_i32_0 : i32, i32
  }
  func.func @transform_9(%arg0: i32) -> (i32, i32) {
    %c0_i32 = arith.constant 0 : i32
    %c0_i32_0 = arith.constant 0 : i32
    %c0_i32_1 = arith.constant 0 : i32
    return %c0_i32, %c0_i32_0 : i32, i32
  }
  func.func @transform_10(%arg0: i32) -> (i32, i32) {
    %c0_i32 = arith.constant 0 : i32
    %c0_i32_0 = arith.constant 0 : i32
    %c0_i32_1 = arith.constant 0 : i32
    return %c0_i32, %c0_i32_0 : i32, i32
  }
  func.func @transform_11(%arg0: i32) -> (i32, i32) {
    %c0_i32 = arith.constant 0 : i32
    %c0_i32_0 = arith.constant 0 : i32
    %c0_i32_1 = arith.constant 0 : i32
    return %c0_i32, %c0_i32_0 : i32, i32
  }
}

</mosaic_0001>

<bundles_post_ra>
// kernel: qnetwork_forward.4
= control target key start
LH: loop header
LB: loop body
LE: loop exit
PB: predicated region body
PF: predicated region fallthrough
CT: control target
= control target key end

     0   :  { %vm780_vm0 = vcmask 261120   ;;  %vm3040_vm1 = vcmask 257024   ;;  %s5853_s1 = inlined_call_operand.vmem [shape: bf16[32,32], index: 1, kind: input, shape index: {}]   ;;  %s5854_s0 = inlined_call_operand.vmem [shape: bf16[1696,32], index: 0, kind: input, shape index: {}]   ;;  %s5855_s2 = inlined_call_operand.vmem [shape: f32[1,32], index: 2, kind: input, shape index: {}]   ;;  %s5856_s3 = inlined_call_operand.vmem [shape: bf16[1696,32], index: 3, kind: output, shape index: {}]  }
   0x1   :  { %v4224_v0 = vld [vmem:[%s5853_s1] sm:$0xff]   ;;  %v4225_v1 = vld [vmem:[%s5853_s1 + $0x8] sm:$0xff]   ;;  %v4228_v3 = vld [vmem:[%s5854_s0 + $0x1b0] sm:$0xff]  }
   0x2   :  { %4004 = vmatprep.subr.bf16.mxu0 %v4224_v0  ;;  %4220 = vmatprep.subr.bf16.mxu1 %v4224_v0  ;;  %v4226_v2 = vld [vmem:[%s5854_s0] sm:$0xff]   ;;  %v4227_v4 = vld [vmem:[%s5854_s0 + $0x8] sm:$0xff]   ;;  %v4229_v5 = vld [vmem:[%s5854_s0 + $0x1b8] sm:$0xff]  }
   0x3   :  { %4005 = vmatpush3.bf16.msra.mxu0 %v4224_v0  ;;  %4222 = vmatpush3.bf16.msra.mxu1 %v4224_v0  ;;  %v4230_v6 = vld [vmem:[%s5854_s0 + $0x10] sm:$0xff]   ;;  %v4232_v7 = vld [vmem:[%s5854_s0 + $0x1c0] sm:$0xff]   ;;  %v4231_v8 = vld [vmem:[%s5854_s0 + $0x18] sm:$0xff]  }
   0x4   :  { %4006 = vmatprep.subr.bf16.mxu0 %v4225_v1  ;;  %4008 = vmatprep.mubr.msk.bf16.mxu0 %vm780_vm0, %v4226_v2  ;;  %v4233_v9 = vld [vmem:[%s5854_s0 + $0x1c8] sm:$0xff]   ;;  %v4234_v10 = vld [vmem:[%s5854_s0 + $0x20] sm:$0xff]   ;;  %v4236_v11 = vld [vmem:[%s5854_s0 + $0x1d0] sm:$0xff]  }
   0x5   :  { %4221 = vmatprep.subr.bf16.mxu1 %v4225_v1  ;;  %4116 = vmatprep.mubr.msk.bf16.mxu1 %vm780_vm0, %v4228_v3  ;;  %v4235_v12 = vld [vmem:[%s5854_s0 + $0x28] sm:$0xff]   ;;  %v4237_v13 = vld [vmem:[%s5854_s0 + $0x1d8] sm:$0xff]   ;;  %v4238_v14 = vld [vmem:[%s5854_s0 + $0x30] sm:$0xff]  }
   0x6   :  { %v4240_v15 = vld [vmem:[%s5854_s0 + $0x1e0] sm:$0xff]   ;;  %v4239_v16 = vld [vmem:[%s5854_s0 + $0x38] sm:$0xff]   ;;  %v4241_v17 = vld [vmem:[%s5854_s0 + $0x1e8] sm:$0xff]  }
   0x7   :  { %4007 = vmatpush3.bf16.msra.mxu0 %v4225_v1  ;;  %4223 = vmatpush3.bf16.msra.mxu1 %v4225_v1  ;;  %v4242_v18 = vld [vmem:[%s5854_s0 + $0x40] sm:$0xff]   ;;  %v4244_v19 = vld [vmem:[%s5854_s0 + $0x1f0] sm:$0xff]   ;;  %v4243_v20 = vld [vmem:[%s5854_s0 + $0x48] sm:$0xff]  }
   0x8   :  { %v4245_v21 = vld [vmem:[%s5854_s0 + $0x1f8] sm:$0xff]   ;;  %v4246_v22 = vld [vmem:[%s5854_s0 + $0x50] sm:$0xff]   ;;  %v4248_v23 = vld [vmem:[%s5854_s0 + $0x200] sm:$0xff]  }
   0x9   :  { %v4247_v24 = vld [vmem:[%s5854_s0 + $0x58] sm:$0xff]   ;;  %v4249_v25 = vld [vmem:[%s5854_s0 + $0x208] sm:$0xff]   ;;  %v4250_v26 = vld [vmem:[%s5854_s0 + $0x60] sm:$0xff]  }
   0xa   :  { %4009 = vmatmul.mubr.msk.bf16.vlgmr.msra.gmra.mrb[0].mxu0 %vm780_vm0, %v4227_v4  ;;  %4117 = vmatmul.mubr.msk.bf16.vlgmr.msra.gmra.mrb[0].mxu1 %vm780_vm0, %v4229_v5  ;;  %v4252_v27 = vld [vmem:[%s5854_s0 + $0x210] sm:$0xff]   ;;  %v4251_v28 = vld [vmem:[%s5854_s0 + $0x68] sm:$0xff]   ;;  %v4253_v29 = vld [vmem:[%s5854_s0 + $0x218] sm:$0xff]  }
   0xb   :  { %4012 = vmatprep.mubr.msk.bf16.mxu0 %vm780_vm0, %v4230_v6  ;;  %4120 = vmatprep.mubr.msk.bf16.mxu1 %vm780_vm0, %v4232_v7  ;;  %v4254_v30 = vld [vmem:[%s5854_s0 + $0x70] sm:$0xff]   ;;  %v4256_v31 = vld [vmem:[%s5854_s0 + $0x220] sm:$0xff]   ;;  %v4255_v32 = vld [vmem:[%s5854_s0 + $0x78] sm:$0xff]  }
   0xc   :  { %v4257_v33 = vld [vmem:[%s5854_s0 + $0x228] sm:$0xff]   ;;  %v4258_v34 = vld [vmem:[%s5854_s0 + $0x80] sm:$0xff]   ;;  %v4260_v35 = vld [vmem:[%s5854_s0 + $0x230] sm:$0xff]  }
   0xd   :  { %v4259_v36 = vld [vmem:[%s5854_s0 + $0x88] sm:$0xff]   ;;  %v4261_v37 = vld [vmem:[%s5854_s0 + $0x238] sm:$0xff]   ;;  %v4262_v38 = vld [vmem:[%s5854_s0 + $0x90] sm:$0xff]  }
   0xe   :  { %v4264_v39 = vld [vmem:[%s5854_s0 + $0x240] sm:$0xff]   ;;  %v4263_v40 = vld [vmem:[%s5854_s0 + $0x98] sm:$0xff]   ;;  %v4265_v41 = vld [vmem:[%s5854_s0 + $0x248] sm:$0xff]  }
   0xf   :  { %v4266_v42 = vld [vmem:[%s5854_s0 + $0xa0] sm:$0xff]   ;;  %v4268_v43 = vld [vmem:[%s5854_s0 + $0x250] sm:$0xff]   ;;  %v4267_v44 = vld [vmem:[%s5854_s0 + $0xa8] sm:$0xff]  }
  0x10   :  { %v4269_v45 = vld [vmem:[%s5854_s0 + $0x258] sm:$0xff]   ;;  %v4270_v46 = vld [vmem:[%s5854_s0 + $0xb0] sm:$0xff]   ;;  %v4272_v47 = vld [vmem:[%s5854_s0 + $0x260] sm:$0xff]  }
  0x11   :  { %v4271_v48 = vld [vmem:[%s5854_s0 + $0xb8] sm:$0xff]   ;;  %v4273_v49 = vld [vmem:[%s5854_s0 + $0x268] sm:$0xff]   ;;  %v4274_v50 = vld [vmem:[%s5854_s0 + $0xc0] sm:$0xff]  }
  0x12   :  { %4013 = vmatmul.mubr.msk.bf16.gmra.mrb[4].mxu0 %vm780_vm0, %v4231_v8  ;;  %4121 = vmatmul.mubr.msk.bf16.gmra.mrb[4].mxu1 %vm780_vm0, %v4233_v9  ;;  %v4276_v51 = vld [vmem:[%s5854_s0 + $0x270] sm:$0xff]   ;;  %v4275_v52 = vld [vmem:[%s5854_s0 + $0xc8] sm:$0xff]   ;;  %v4277_v53 = vld [vmem:[%s5854_s0 + $0x278] sm:$0xff]  }
  0x13   :  { %4016 = vmatprep.mubr.msk.bf16.mxu0 %vm780_vm0, %v4234_v10  ;;  %4124 = vmatprep.mubr.msk.bf16.mxu1 %vm780_vm0, %v4236_v11  ;;  %v4278_v54 = vld [vmem:[%s5854_s0 + $0xd0] sm:$0xff]   ;;  %v4280_v55 = vld [vmem:[%s5854_s0 + $0x280] sm:$0xff]   ;;  %v4279_v56 = vld [vmem:[%s5854_s0 + $0xd8] sm:$0xff]  }
  0x14   :  { %v4281_v57 = vld [vmem:[%s5854_s0 + $0x288] sm:$0xff]   ;;  %v4282_v58 = vld [vmem:[%s5854_s0 + $0xe0] sm:$0xff]   ;;  %v4284_v59 = vld [vmem:[%s5854_s0 + $0x290] sm:$0xff]  }
  0x15   :  { %v4283_v60 = vld [vmem:[%s5854_s0 + $0xe8] sm:$0xff]   ;;  %v4285_v61 = vld [vmem:[%s5854_s0 + $0x298] sm:$0xff]   ;;  %v4286_v62 = vld [vmem:[%s5854_s0 + $0xf0] sm:$0xff]  }
  0x16   :  { %v4288_v63 = vld [vmem:[%s5854_s0 + $0x2a0] sm:$0xff]   ;;  %v4287_v0 = vld [vmem:[%s5854_s0 + $0xf8] sm:$0xff]   ;;  %v4289_v1 = vld [vmem:[%s5854_s0 + $0x2a8] sm:$0xff]  }
  0x17   :  { %v4290_v2 = vld [vmem:[%s5854_s0 + $0x100] sm:$0xff]   ;;  %v4292_v3 = vld [vmem:[%s5854_s0 + $0x2b0] sm:$0xff]   ;;  %v4291_v4 = vld [vmem:[%s5854_s0 + $0x108] sm:$0xff]  }
  0x18   :  { %v4293_v5 = vld [vmem:[%s5854_s0 + $0x2b8] sm:$0xff]   ;;  %v4294_v6 = vld [vmem:[%s5854_s0 + $0x110] sm:$0xff]   ;;  %v4296_v7 = vld [vmem:[%s5854_s0 + $0x2c0] sm:$0xff]  }
  0x19   :  { %v4295_v8 = vld [vmem:[%s5854_s0 + $0x118] sm:$0xff]   ;;  %v4297_v9 = vld [vmem:[%s5854_s0 + $0x2c8] sm:$0xff]   ;;  %v4298_v10 = vld [vmem:[%s5854_s0 + $0x120] sm:$0xff]  }
  0x1a   :  { %4017 = vmatmul.mubr.msk.bf16.gmra.mrb[8].mxu0 %vm780_vm0, %v4235_v12  ;;  %4125 = vmatmul.mubr.msk.bf16.gmra.mrb[8].mxu1 %vm780_vm0, %v4237_v13  ;;  %v4300_v11 = vld [vmem:[%s5854_s0 + $0x2d0] sm:$0xff]   ;;  %v4299_v12 = vld [vmem:[%s5854_s0 + $0x128] sm:$0xff]   ;;  %v4301_v13 = vld [vmem:[%s5854_s0 + $0x2d8] sm:$0xff]  }
  0x1b   :  { %4020 = vmatprep.mubr.msk.bf16.mxu0 %vm780_vm0, %v4238_v14  ;;  %4128 = vmatprep.mubr.msk.bf16.mxu1 %vm780_vm0, %v4240_v15  ;;  %v4302_v14 = vld [vmem:[%s5854_s0 + $0x130] sm:$0xff]   ;;  %v4304_v15 = vld [vmem:[%s5854_s0 + $0x2e0] sm:$0xff]  }
  0x22   :  { %4021 = vmatmul.mubr.msk.bf16.gmra.mrb[12].mxu0 %vm780_vm0, %v4239_v16  ;;  %4129 = vmatmul.mubr.msk.bf16.gmra.mrb[12].mxu1 %vm780_vm0, %v4241_v17  ;;  %v4303_v16 = vld [vmem:[%s5854_s0 + $0x138] sm:$0xff]   ;;  %v4305_v17 = vld [vmem:[%s5854_s0 + $0x2e8] sm:$0xff]  }
  0x23   :  { %4024 = vmatprep.mubr.msk.bf16.mxu0 %vm780_vm0, %v4242_v18  ;;  %4132 = vmatprep.mubr.msk.bf16.mxu1 %vm780_vm0, %v4244_v19  ;;  %v4306_v18 = vld [vmem:[%s5854_s0 + $0x140] sm:$0xff]   ;;  %v4308_v19 = vld [vmem:[%s5854_s0 + $0x2f0] sm:$0xff]  }
  0x2a   :  { %4025 = vmatmul.mubr.msk.bf16.gmra.mrb[16].mxu0 %vm780_vm0, %v4243_v20  ;;  %4133 = vmatmul.mubr.msk.bf16.gmra.mrb[16].mxu1 %vm780_vm0, %v4245_v21  ;;  %v4307_v20 = vld [vmem:[%s5854_s0 + $0x148] sm:$0xff]   ;;  %v4309_v21 = vld [vmem:[%s5854_s0 + $0x2f8] sm:$0xff]  }
  0x2b   :  { %4028 = vmatprep.mubr.msk.bf16.mxu0 %vm780_vm0, %v4246_v22  ;;  %4136 = vmatprep.mubr.msk.bf16.mxu1 %vm780_vm0, %v4248_v23  ;;  %v4310_v22 = vld [vmem:[%s5854_s0 + $0x150] sm:$0xff]   ;;  %v4312_v23 = vld [vmem:[%s5854_s0 + $0x300] sm:$0xff]  }
  0x32   :  { %4029 = vmatmul.mubr.msk.bf16.gmra.mrb[20].mxu0 %vm780_vm0, %v4247_v24  ;;  %4137 = vmatmul.mubr.msk.bf16.gmra.mrb[20].mxu1 %vm780_vm0, %v4249_v25  ;;  %v4311_v24 = vld [vmem:[%s5854_s0 + $0x158] sm:$0xff]   ;;  %v4313_v25 = vld [vmem:[%s5854_s0 + $0x308] sm:$0xff]  }
  0x33   :  { %4032 = vmatprep.mubr.msk.bf16.mxu0 %vm780_vm0, %v4250_v26  ;;  %4140 = vmatprep.mubr.msk.bf16.mxu1 %vm780_vm0, %v4252_v27  ;;  %v4314_v26 = vld [vmem:[%s5854_s0 + $0x160] sm:$0xff]   ;;  %v4316_v27 = vld [vmem:[%s5854_s0 + $0x310] sm:$0xff]  }
  0x3a   :  { %4033 = vmatmul.mubr.msk.bf16.gmra.mrb[24].mxu0 %vm780_vm0, %v4251_v28  ;;  %4141 = vmatmul.mubr.msk.bf16.gmra.mrb[24].mxu1 %vm780_vm0, %v4253_v29  ;;  %v4315_v28 = vld [vmem:[%s5854_s0 + $0x168] sm:$0xff]   ;;  %v4317_v29 = vld [vmem:[%s5854_s0 + $0x318] sm:$0xff]  }
  0x3b   :  { %4036 = vmatprep.mubr.msk.bf16.mxu0 %vm780_vm0, %v4254_v30  ;;  %4144 = vmatprep.mubr.msk.bf16.mxu1 %vm780_vm0, %v4256_v31  ;;  %v4318_v30 = vld [vmem:[%s5854_s0 + $0x170] sm:$0xff]   ;;  %v4320_v31 = vld [vmem:[%s5854_s0 + $0x320] sm:$0xff]  }
  0x42   :  { %4037 = vmatmul.mubr.msk.bf16.gmra.mrb[28].mxu0 %vm780_vm0, %v4255_v32  ;;  %4145 = vmatmul.mubr.msk.bf16.gmra.mrb[28].mxu1 %vm780_vm0, %v4257_v33  ;;  %v4319_v32 = vld [vmem:[%s5854_s0 + $0x178] sm:$0xff]   ;;  %v4321_v33 = vld [vmem:[%s5854_s0 + $0x328] sm:$0xff]  }
  0x43   :  { %4040 = vmatprep.mubr.msk.bf16.mxu0 %vm780_vm0, %v4258_v34  ;;  %4148 = vmatprep.mubr.msk.bf16.mxu1 %vm780_vm0, %v4260_v35  ;;  %v4322_v34 = vld [vmem:[%s5854_s0 + $0x180] sm:$0xff]   ;;  %v4324_v35 = vld [vmem:[%s5854_s0 + $0x330] sm:$0xff]  }
  0x4a   :  { %4041 = vmatmul.mubr.msk.bf16.gmra.mrb[32].mxu0 %vm780_vm0, %v4259_v36  ;;  %4149 = vmatmul.mubr.msk.bf16.gmra.mrb[32].mxu1 %vm780_vm0, %v4261_v37  ;;  %v4323_v36 = vld [vmem:[%s5854_s0 + $0x188] sm:$0xff]   ;;  %v4325_v37 = vld [vmem:[%s5854_s0 + $0x338] sm:$0xff]  }
  0x4b   :  { %4044 = vmatprep.mubr.msk.bf16.mxu0 %vm780_vm0, %v4262_v38  ;;  %4152 = vmatprep.mubr.msk.bf16.mxu1 %vm780_vm0, %v4264_v39  ;;  %v4326_v38 = vld [vmem:[%s5854_s0 + $0x190] sm:$0xff]   ;;  %v4328_v39 = vld [vmem:[%s5854_s0 + $0x340] sm:$0xff]  }
  0x52   :  { %4045 = vmatmul.mubr.msk.bf16.gmra.mrb[36].mxu0 %vm780_vm0, %v4263_v40  ;;  %4153 = vmatmul.mubr.msk.bf16.gmra.mrb[36].mxu1 %vm780_vm0, %v4265_v41  ;;  %v4327_v40 = vld [vmem:[%s5854_s0 + $0x198] sm:$0xff]   ;;  %v4329_v41 = vld [vmem:[%s5854_s0 + $0x348] sm:$0xff]  }
  0x53   :  { %4048 = vmatprep.mubr.msk.bf16.mxu0 %vm780_vm0, %v4266_v42  ;;  %4156 = vmatprep.mubr.msk.bf16.mxu1 %vm780_vm0, %v4268_v43  ;;  %v4330_v42 = vld [vmem:[%s5854_s0 + $0x1a0] sm:$0xff]   ;;  %v4331_v43 = vld [vmem:[%s5854_s0 + $0x1a8] sm:$0xff]  }
  0x5a   :  { %4049 = vmatmul.mubr.msk.bf16.gmra.mrb[40].mxu0 %vm780_vm0, %v4267_v44  ;;  %4157 = vmatmul.mubr.msk.bf16.gmra.mrb[40].mxu1 %vm780_vm0, %v4269_v45  ;;  %v4787_v44 = vld [vmem:[%s5855_s2] ss:$0 sm:$0xff] }
  0x5b   :  { %4052 = vmatprep.mubr.msk.bf16.mxu0 %vm780_vm0, %v4270_v46  ;;  %4160 = vmatprep.mubr.msk.bf16.mxu1 %vm780_vm0, %v4272_v47 }
  0x62   :  { %4053 = vmatmul.mubr.msk.bf16.gmra.mrb[44].mxu0 %vm780_vm0, %v4271_v48  ;;  %4161 = vmatmul.mubr.msk.bf16.gmra.mrb[44].mxu1 %vm780_vm0, %v4273_v49 }
  0x63   :  { %4056 = vmatprep.mubr.msk.bf16.mxu0 %vm780_vm0, %v4274_v50  ;;  %4164 = vmatprep.mubr.msk.bf16.mxu1 %vm780_vm0, %v4276_v51 }
  0x6a   :  { %4057 = vmatmul.mubr.msk.bf16.gmra.mrb[48].mxu0 %vm780_vm0, %v4275_v52  ;;  %4165 = vmatmul.mubr.msk.bf16.gmra.mrb[48].mxu1 %vm780_vm0, %v4277_v53 }
  0x6b   :  { %4060 = vmatprep.mubr.msk.bf16.mxu0 %vm780_vm0, %v4278_v54  ;;  %4168 = vmatprep.mubr.msk.bf16.mxu1 %vm780_vm0, %v4280_v55 }
  0x72   :  { %4061 = vmatmul.mubr.msk.bf16.gmra.mrb[52].mxu0 %vm780_vm0, %v4279_v56  ;;  %4169 = vmatmul.mubr.msk.bf16.gmra.mrb[52].mxu1 %vm780_vm0, %v4281_v57 }
  0x73   :  { %4064 = vmatprep.mubr.msk.bf16.mxu0 %vm780_vm0, %v4282_v58  ;;  %4172 = vmatprep.mubr.msk.bf16.mxu1 %vm780_vm0, %v4284_v59 }
  0x7a   :  { %4065 = vmatmul.mubr.msk.bf16.gmra.mrb[56].mxu0 %vm780_vm0, %v4283_v60  ;;  %4173 = vmatmul.mubr.msk.bf16.gmra.mrb[56].mxu1 %vm780_vm0, %v4285_v61 }
  0x7b   :  { %4068 = vmatprep.mubr.msk.bf16.mxu0 %vm780_vm0, %v4286_v62  ;;  %4176 = vmatprep.mubr.msk.bf16.mxu1 %vm780_vm0, %v4288_v63 }
  0x82   :  { %4069 = vmatmul.mubr.msk.bf16.gmra.mrb[60].mxu0 %vm780_vm0, %v4287_v0  ;;  %4177 = vmatmul.mubr.msk.bf16.gmra.mrb[60].mxu1 %vm780_vm0, %v4289_v1 }
  0x83   :  { %4072 = vmatprep.mubr.msk.bf16.mxu0 %vm780_vm0, %v4290_v2  ;;  %4180 = vmatprep.mubr.msk.bf16.mxu1 %vm780_vm0, %v4292_v3 }
  0x8a   :  { %4073 = vmatmul.mubr.msk.bf16.gmra.mrb[64].mxu0 %vm780_vm0, %v4291_v4  ;;  %4181 = vmatmul.mubr.msk.bf16.gmra.mrb[64].mxu1 %vm780_vm0, %v4293_v5 }
  0x8b   :  { %4076 = vmatprep.mubr.msk.bf16.mxu0 %vm780_vm0, %v4294_v6  ;;  %4184 = vmatprep.mubr.msk.bf16.mxu1 %vm780_vm0, %v4296_v7 }
  0x92   :  { %4077 = vmatmul.mubr.msk.bf16.gmra.mrb[68].mxu0 %vm780_vm0, %v4295_v8  ;;  %4185 = vmatmul.mubr.msk.bf16.gmra.mrb[68].mxu1 %vm780_vm0, %v4297_v9 }
  0x93   :  { %4080 = vmatprep.mubr.msk.bf16.mxu0 %vm780_vm0, %v4298_v10  ;;  %4188 = vmatprep.mubr.msk.bf16.mxu1 %vm780_vm0, %v4300_v11 }
  0x9a   :  { %4081 = vmatmul.mubr.msk.bf16.gmra.mrb[72].mxu0 %vm780_vm0, %v4299_v12  ;;  %4189 = vmatmul.mubr.msk.bf16.gmra.mrb[72].mxu1 %vm780_vm0, %v4301_v13 }
  0x9b   :  { %4084 = vmatprep.mubr.msk.bf16.mxu0 %vm780_vm0, %v4302_v14  ;;  %4192 = vmatprep.mubr.msk.bf16.mxu1 %vm780_vm0, %v4304_v15 }
  0xa2   :  { %4085 = vmatmul.mubr.msk.bf16.gmra.mrb[76].mxu0 %vm780_vm0, %v4303_v16  ;;  %4193 = vmatmul.mubr.msk.bf16.gmra.mrb[76].mxu1 %vm780_vm0, %v4305_v17 }
  0xa3   :  { %4088 = vmatprep.mubr.msk.bf16.mxu0 %vm780_vm0, %v4306_v18  ;;  %4196 = vmatprep.mubr.msk.bf16.mxu1 %vm780_vm0, %v4308_v19 }
  0xaa   :  { %4089 = vmatmul.mubr.msk.bf16.gmra.mrb[80].mxu0 %vm780_vm0, %v4307_v20  ;;  %4197 = vmatmul.mubr.msk.bf16.gmra.mrb[80].mxu1 %vm780_vm0, %v4309_v21 }
  0xab   :  { %4092 = vmatprep.mubr.msk.bf16.mxu0 %vm780_vm0, %v4310_v22  ;;  %4200 = vmatprep.mubr.msk.bf16.mxu1 %vm780_vm0, %v4312_v23 }
  0xb2   :  { %4093 = vmatmul.mubr.msk.bf16.gmra.mrb[84].mxu0 %vm780_vm0, %v4311_v24  ;;  %4201 = vmatmul.mubr.msk.bf16.gmra.mrb[84].mxu1 %vm780_vm0, %v4313_v25 }
  0xb3   :  { %4096 = vmatprep.mubr.msk.bf16.mxu0 %vm780_vm0, %v4314_v26  ;;  %4204 = vmatprep.mubr.msk.bf16.mxu1 %vm780_vm0, %v4316_v27 }
  0xba   :  { %4097 = vmatmul.mubr.msk.bf16.gmra.mrb[88].mxu0 %vm780_vm0, %v4315_v28  ;;  %4205 = vmatmul.mubr.msk.bf16.gmra.mrb[88].mxu1 %vm780_vm0, %v4317_v29 }
  0xbb   :  { %4100 = vmatprep.mubr.msk.bf16.mxu0 %vm780_vm0, %v4318_v30  ;;  %4208 = vmatprep.mubr.msk.bf16.mxu1 %vm780_vm0, %v4320_v31 }
  0xc2   :  { %4101 = vmatmul.mubr.msk.bf16.gmra.mrb[92].mxu0 %vm780_vm0, %v4319_v32  ;;  %4209 = vmatmul.mubr.msk.bf16.gmra.mrb[92].mxu1 %vm780_vm0, %v4321_v33 }
  0xc3   :  { %4104 = vmatprep.mubr.msk.bf16.mxu0 %vm780_vm0, %v4322_v34  ;;  %4212 = vmatprep.mubr.msk.bf16.mxu1 %vm780_vm0, %v4324_v35 }
  0xca   :  { %4105 = vmatmul.mubr.msk.bf16.gmra.mrb[96].mxu0 %vm780_vm0, %v4323_v36  ;;  %4213 = vmatmul.mubr.msk.bf16.gmra.mrb[96].mxu1 %vm780_vm0, %v4325_v37 }
  0xcb   :  { %4108 = vmatprep.mubr.msk.bf16.mxu0 %vm780_vm0, %v4326_v38  ;;  %4216 = vmatprep.mubr.msk.bf16.mxu1 %vm780_vm0, %v4328_v39 }
  0xd2   :  { %4109 = vmatmul.mubr.msk.bf16.gmra.mrb[100].mxu0 %vm780_vm0, %v4327_v40  ;;  %4217 = vmatmul.mubr.msk.bf16.gmra.mrb[100].mxu1 %vm780_vm0, %v4329_v41 }
  0xd3   :  { %4112 = vmatprep.mubr.msk.bf16.mxu0 %vm780_vm0, %v4330_v42 }
  0xda   :  { %4113 = vmatmul.mubr.msk.bf16.gmra.mrb[104].mxu0 %vm780_vm0, %v4331_v43 }
  0xdd   :  { %v4010_v45 = vpop.f32.mrb[0].mxu0  ;;  %v4118_v46 = vpop.f32.mrb[0].mxu1 }
  0xde   :  { %v1142_v47 = vadd.f32 %v4010_v45, %v4787_v44  ;;  %v1133_v48 = vpop.f32.mrb[1].mxu0  ;;  %v1574_v49 = vadd.f32 %v4118_v46, %v4787_v44  ;;  %v1565_v50 = vpop.f32.mrb[1].mxu1 }
  0xdf   :  { %v1134_v51 = vadd.f32 %v4787_v44, %v1133_v48  ;;  %v4011_v52 = vpop.f32.mrb[2].mxu0  ;;  %v1566_v53 = vadd.f32 %v4787_v44, %v1565_v50  ;;  %v4119_v54 = vpop.f32.mrb[2].mxu1 }
  0xe0   :  { %v1982_v55 = vmax.f32 %v1142_v47, 0.0  ;;  %v1145_v56 = vadd.f32 %v4011_v52, %v4787_v44  ;;  %v1136_v57 = vpop.f32.mrb[3].mxu0  ;;  %v2090_v58 = vmax.f32 %v1574_v49, 0.0  ;;  %v1577_v59 = vadd.f32 %v4119_v54, %v4787_v44  ;;  %v1568_v60 = vpop.f32.mrb[3].mxu1 }
  0xe1   :  { %v1980_v61 = vmax.f32 %v1134_v51, 0.0  ;;  %v1137_v62 = vadd.f32 %v4787_v44, %v1136_v57  ;;  %v2088_v63 = vmax.f32 %v1566_v53, 0.0  ;;  %v1569_v0 = vadd.f32 %v4787_v44, %v1568_v60 }
  0xe2   :  { %v3686_v1 = vpack.c.bf16 %v1982_v55, %v1982_v55  ;;  %v1983_v2 = vmax.f32 %v1145_v56, 0.0  ;;  %v3794_v3 = vpack.c.bf16 %v2090_v58, %v2090_v58  ;;  %v2091_v4 = vmax.f32 %v1577_v59, 0.0 }
  0xe3   :  { %v3684_v5 = vpack.c.bf16 %v1980_v61, %v1980_v61  ;;  %v1981_v6 = vmax.f32 %v1137_v62, 0.0  ;;  %v3792_v7 = vpack.c.bf16 %v2088_v63, %v2088_v63  ;;  %v2089_v8 = vmax.f32 %v1569_v0, 0.0 }
  0xe4   :  { %3043 = vst.msk [vmem:[%s5856_s3 + $0x8] sm:$0xf] %vm3040_vm1, %v3686_v1  ;;  %v3687_v9 = vpack.c.bf16 %v1983_v2, %v1983_v2  ;;  %3151 = vst.msk [vmem:[%s5856_s3 + $0x1b8] sm:$0xf] %vm3040_vm1, %v3794_v3  ;;  %v3795_v10 = vpack.c.bf16 %v2091_v4, %v2091_v4 }
  0xe5   :  { %3041 = vst.msk [vmem:[%s5856_s3] sm:$0xf] %vm3040_vm1, %v3684_v5  ;;  %v3685_v11 = vpack.c.bf16 %v1981_v6, %v1981_v6  ;;  %3149 = vst.msk [vmem:[%s5856_s3 + $0x1b0] sm:$0xf] %vm3040_vm1, %v3792_v7  ;;  %v4014_v12 = vpop.f32.mrb[4].mxu0  ;;  %v3793_v13 = vpack.c.bf16 %v2089_v8, %v2089_v8  ;;  %v4122_v14 = vpop.f32.mrb[4].mxu1 }
  0xe6   :  { %3044 = vst.msk [vmem:[%s5856_s3 + $0xc] sm:$0xf] %vm3040_vm1, %v3687_v9  ;;  %3152 = vst.msk [vmem:[%s5856_s3 + $0x1bc] sm:$0xf] %vm3040_vm1, %v3795_v10  ;;  %v1158_v15 = vadd.f32 %v4014_v12, %v4787_v44  ;;  %v1149_v16 = vpop.f32.mrb[5].mxu0  ;;  %v1590_v17 = vadd.f32 %v4122_v14, %v4787_v44  ;;  %v1581_v18 = vpop.f32.mrb[5].mxu1 }
  0xe7   :  { %3042 = vst.msk [vmem:[%s5856_s3 + $0x4] sm:$0xf] %vm3040_vm1, %v3685_v11  ;;  %3150 = vst.msk [vmem:[%s5856_s3 + $0x1b4] sm:$0xf] %vm3040_vm1, %v3793_v13  ;;  %v1150_v19 = vadd.f32 %v4787_v44, %v1149_v16  ;;  %v4015_v20 = vpop.f32.mrb[6].mxu0  ;;  %v1582_v21 = vadd.f32 %v4787_v44, %v1581_v18  ;;  %v4123_v22 = vpop.f32.mrb[6].mxu1 }
  0xe8   :  { %v1986_v23 = vmax.f32 %v1158_v15, 0.0  ;;  %v1161_v24 = vadd.f32 %v4015_v20, %v4787_v44  ;;  %v1152_v25 = vpop.f32.mrb[7].mxu0  ;;  %v2094_v26 = vmax.f32 %v1590_v17, 0.0  ;;  %v1593_v27 = vadd.f32 %v4123_v22, %v4787_v44  ;;  %v1584_v28 = vpop.f32.mrb[7].mxu1 }
  0xe9   :  { %v1984_v29 = vmax.f32 %v1150_v19, 0.0  ;;  %v1153_v30 = vadd.f32 %v4787_v44, %v1152_v25  ;;  %v2092_v31 = vmax.f32 %v1582_v21, 0.0  ;;  %v1585_v32 = vadd.f32 %v4787_v44, %v1584_v28 }
  0xea   :  { %v3690_v33 = vpack.c.bf16 %v1986_v23, %v1986_v23  ;;  %v1987_v34 = vmax.f32 %v1161_v24, 0.0  ;;  %v3798_v35 = vpack.c.bf16 %v2094_v26, %v2094_v26  ;;  %v2095_v36 = vmax.f32 %v1593_v27, 0.0 }
  0xeb   :  { %v3688_v37 = vpack.c.bf16 %v1984_v29, %v1984_v29  ;;  %v1985_v38 = vmax.f32 %v1153_v30, 0.0  ;;  %v3796_v39 = vpack.c.bf16 %v2092_v31, %v2092_v31  ;;  %v2093_v40 = vmax.f32 %v1585_v32, 0.0 }
  0xec   :  { %3047 = vst.msk [vmem:[%s5856_s3 + $0x18] sm:$0xf] %vm3040_vm1, %v3690_v33  ;;  %v3691_v41 = vpack.c.bf16 %v1987_v34, %v1987_v34  ;;  %3155 = vst.msk [vmem:[%s5856_s3 + $0x1c8] sm:$0xf] %vm3040_vm1, %v3798_v35  ;;  %v3799_v42 = vpack.c.bf16 %v2095_v36, %v2095_v36 }
  0xed   :  { %3045 = vst.msk [vmem:[%s5856_s3 + $0x10] sm:$0xf] %vm3040_vm1, %v3688_v37  ;;  %v3689_v43 = vpack.c.bf16 %v1985_v38, %v1985_v38  ;;  %3153 = vst.msk [vmem:[%s5856_s3 + $0x1c0] sm:$0xf] %vm3040_vm1, %v3796_v39  ;;  %v4018_v45 = vpop.f32.mrb[8].mxu0  ;;  %v3797_v46 = vpack.c.bf16 %v2093_v40, %v2093_v40  ;;  %v4126_v47 = vpop.f32.mrb[8].mxu1 }
  0xee   :  { %3048 = vst.msk [vmem:[%s5856_s3 + $0x1c] sm:$0xf] %vm3040_vm1, %v3691_v41  ;;  %3156 = vst.msk [vmem:[%s5856_s3 + $0x1cc] sm:$0xf] %vm3040_vm1, %v3799_v42  ;;  %v1174_v48 = vadd.f32 %v4018_v45, %v4787_v44  ;;  %v1165_v49 = vpop.f32.mrb[9].mxu0  ;;  %v1606_v50 = vadd.f32 %v4126_v47, %v4787_v44  ;;  %v1597_v51 = vpop.f32.mrb[9].mxu1 }
  0xef   :  { %3046 = vst.msk [vmem:[%s5856_s3 + $0x14] sm:$0xf] %vm3040_vm1, %v3689_v43  ;;  %3154 = vst.msk [vmem:[%s5856_s3 + $0x1c4] sm:$0xf] %vm3040_vm1, %v3797_v46  ;;  %v1166_v52 = vadd.f32 %v4787_v44, %v1165_v49  ;;  %v4019_v53 = vpop.f32.mrb[10].mxu0  ;;  %v1598_v54 = vadd.f32 %v4787_v44, %v1597_v51  ;;  %v4127_v55 = vpop.f32.mrb[10].mxu1 }
  0xf0   :  { %v1990_v56 = vmax.f32 %v1174_v48, 0.0  ;;  %v1177_v57 = vadd.f32 %v4019_v53, %v4787_v44  ;;  %v1168_v58 = vpop.f32.mrb[11].mxu0  ;;  %v2098_v59 = vmax.f32 %v1606_v50, 0.0  ;;  %v1609_v60 = vadd.f32 %v4127_v55, %v4787_v44  ;;  %v1600_v61 = vpop.f32.mrb[11].mxu1 }
  0xf1   :  { %v1988_v62 = vmax.f32 %v1166_v52, 0.0  ;;  %v1169_v63 = vadd.f32 %v4787_v44, %v1168_v58  ;;  %v2096_v0 = vmax.f32 %v1598_v54, 0.0  ;;  %v1601_v1 = vadd.f32 %v4787_v44, %v1600_v61 }
  0xf2   :  { %v3694_v2 = vpack.c.bf16 %v1990_v56, %v1990_v56  ;;  %v1991_v3 = vmax.f32 %v1177_v57, 0.0  ;;  %v3802_v4 = vpack.c.bf16 %v2098_v59, %v2098_v59  ;;  %v2099_v5 = vmax.f32 %v1609_v60, 0.0 }
  0xf3   :  { %v3692_v6 = vpack.c.bf16 %v1988_v62, %v1988_v62  ;;  %v1989_v7 = vmax.f32 %v1169_v63, 0.0  ;;  %v3800_v8 = vpack.c.bf16 %v2096_v0, %v2096_v0  ;;  %v2097_v9 = vmax.f32 %v1601_v1, 0.0 }
  0xf4   :  { %3051 = vst.msk [vmem:[%s5856_s3 + $0x28] sm:$0xf] %vm3040_vm1, %v3694_v2  ;;  %v3695_v10 = vpack.c.bf16 %v1991_v3, %v1991_v3  ;;  %3159 = vst.msk [vmem:[%s5856_s3 + $0x1d8] sm:$0xf] %vm3040_vm1, %v3802_v4  ;;  %v3803_v11 = vpack.c.bf16 %v2099_v5, %v2099_v5 }
  0xf5   :  { %3049 = vst.msk [vmem:[%s5856_s3 + $0x20] sm:$0xf] %vm3040_vm1, %v3692_v6  ;;  %v3693_v12 = vpack.c.bf16 %v1989_v7, %v1989_v7  ;;  %3157 = vst.msk [vmem:[%s5856_s3 + $0x1d0] sm:$0xf] %vm3040_vm1, %v3800_v8  ;;  %v4022_v13 = vpop.f32.mrb[12].mxu0  ;;  %v3801_v14 = vpack.c.bf16 %v2097_v9, %v2097_v9  ;;  %v4130_v15 = vpop.f32.mrb[12].mxu1 }
  0xf6   :  { %3052 = vst.msk [vmem:[%s5856_s3 + $0x2c] sm:$0xf] %vm3040_vm1, %v3695_v10  ;;  %3160 = vst.msk [vmem:[%s5856_s3 + $0x1dc] sm:$0xf] %vm3040_vm1, %v3803_v11  ;;  %v1190_v16 = vadd.f32 %v4022_v13, %v4787_v44  ;;  %v1181_v17 = vpop.f32.mrb[13].mxu0  ;;  %v1622_v18 = vadd.f32 %v4130_v15, %v4787_v44  ;;  %v1613_v19 = vpop.f32.mrb[13].mxu1 }
  0xf7   :  { %3050 = vst.msk [vmem:[%s5856_s3 + $0x24] sm:$0xf] %vm3040_vm1, %v3693_v12  ;;  %3158 = vst.msk [vmem:[%s5856_s3 + $0x1d4] sm:$0xf] %vm3040_vm1, %v3801_v14  ;;  %v1182_v20 = vadd.f32 %v4787_v44, %v1181_v17  ;;  %v4023_v21 = vpop.f32.mrb[14].mxu0  ;;  %v1614_v22 = vadd.f32 %v4787_v44, %v1613_v19  ;;  %v4131_v23 = vpop.f32.mrb[14].mxu1 }
  0xf8   :  { %v1994_v24 = vmax.f32 %v1190_v16, 0.0  ;;  %v1193_v25 = vadd.f32 %v4023_v21, %v4787_v44  ;;  %v1184_v26 = vpop.f32.mrb[15].mxu0  ;;  %v2102_v27 = vmax.f32 %v1622_v18, 0.0  ;;  %v1625_v28 = vadd.f32 %v4131_v23, %v4787_v44  ;;  %v1616_v29 = vpop.f32.mrb[15].mxu1 }
  0xf9   :  { %v1992_v30 = vmax.f32 %v1182_v20, 0.0  ;;  %v1185_v31 = vadd.f32 %v4787_v44, %v1184_v26  ;;  %v2100_v32 = vmax.f32 %v1614_v22, 0.0  ;;  %v1617_v33 = vadd.f32 %v4787_v44, %v1616_v29 }
  0xfa   :  { %v3698_v34 = vpack.c.bf16 %v1994_v24, %v1994_v24  ;;  %v1995_v35 = vmax.f32 %v1193_v25, 0.0  ;;  %v3806_v36 = vpack.c.bf16 %v2102_v27, %v2102_v27  ;;  %v2103_v37 = vmax.f32 %v1625_v28, 0.0 }
  0xfb   :  { %v3696_v38 = vpack.c.bf16 %v1992_v30, %v1992_v30  ;;  %v1993_v39 = vmax.f32 %v1185_v31, 0.0  ;;  %v3804_v40 = vpack.c.bf16 %v2100_v32, %v2100_v32  ;;  %v2101_v41 = vmax.f32 %v1617_v33, 0.0 }
  0xfc   :  { %3055 = vst.msk [vmem:[%s5856_s3 + $0x38] sm:$0xf] %vm3040_vm1, %v3698_v34  ;;  %v3699_v42 = vpack.c.bf16 %v1995_v35, %v1995_v35  ;;  %3163 = vst.msk [vmem:[%s5856_s3 + $0x1e8] sm:$0xf] %vm3040_vm1, %v3806_v36  ;;  %v3807_v43 = vpack.c.bf16 %v2103_v37, %v2103_v37 }
  0xfd   :  { %3053 = vst.msk [vmem:[%s5856_s3 + $0x30] sm:$0xf] %vm3040_vm1, %v3696_v38  ;;  %v3697_v45 = vpack.c.bf16 %v1993_v39, %v1993_v39  ;;  %3161 = vst.msk [vmem:[%s5856_s3 + $0x1e0] sm:$0xf] %vm3040_vm1, %v3804_v40  ;;  %v4026_v46 = vpop.f32.mrb[16].mxu0  ;;  %v3805_v47 = vpack.c.bf16 %v2101_v41, %v2101_v41  ;;  %v4134_v48 = vpop.f32.mrb[16].mxu1 }
  0xfe   :  { %3056 = vst.msk [vmem:[%s5856_s3 + $0x3c] sm:$0xf] %vm3040_vm1, %v3699_v42  ;;  %3164 = vst.msk [vmem:[%s5856_s3 + $0x1ec] sm:$0xf] %vm3040_vm1, %v3807_v43  ;;  %v1206_v49 = vadd.f32 %v4026_v46, %v4787_v44  ;;  %v1197_v50 = vpop.f32.mrb[17].mxu0  ;;  %v1638_v51 = vadd.f32 %v4134_v48, %v4787_v44  ;;  %v1629_v52 = vpop.f32.mrb[17].mxu1 }
  0xff   :  { %3054 = vst.msk [vmem:[%s5856_s3 + $0x34] sm:$0xf] %vm3040_vm1, %v3697_v45  ;;  %3162 = vst.msk [vmem:[%s5856_s3 + $0x1e4] sm:$0xf] %vm3040_vm1, %v3805_v47  ;;  %v1198_v53 = vadd.f32 %v4787_v44, %v1197_v50  ;;  %v4027_v54 = vpop.f32.mrb[18].mxu0  ;;  %v1630_v55 = vadd.f32 %v4787_v44, %v1629_v52  ;;  %v4135_v56 = vpop.f32.mrb[18].mxu1 }
 0x100   :  { %v1998_v57 = vmax.f32 %v1206_v49, 0.0  ;;  %v1209_v58 = vadd.f32 %v4027_v54, %v4787_v44  ;;  %v1200_v59 = vpop.f32.mrb[19].mxu0  ;;  %v2106_v60 = vmax.f32 %v1638_v51, 0.0  ;;  %v1641_v61 = vadd.f32 %v4135_v56, %v4787_v44  ;;  %v1632_v62 = vpop.f32.mrb[19].mxu1 }
 0x101   :  { %v1996_v63 = vmax.f32 %v1198_v53, 0.0  ;;  %v1201_v0 = vadd.f32 %v4787_v44, %v1200_v59  ;;  %v2104_v1 = vmax.f32 %v1630_v55, 0.0  ;;  %v1633_v2 = vadd.f32 %v4787_v44, %v1632_v62 }
 0x102   :  { %v3702_v3 = vpack.c.bf16 %v1998_v57, %v1998_v57  ;;  %v1999_v4 = vmax.f32 %v1209_v58, 0.0  ;;  %v3810_v5 = vpack.c.bf16 %v2106_v60, %v2106_v60  ;;  %v2107_v6 = vmax.f32 %v1641_v61, 0.0 }
 0x103   :  { %v3700_v7 = vpack.c.bf16 %v1996_v63, %v1996_v63  ;;  %v1997_v8 = vmax.f32 %v1201_v0, 0.0  ;;  %v3808_v9 = vpack.c.bf16 %v2104_v1, %v2104_v1  ;;  %v2105_v10 = vmax.f32 %v1633_v2, 0.0 }
 0x104   :  { %3059 = vst.msk [vmem:[%s5856_s3 + $0x48] sm:$0xf] %vm3040_vm1, %v3702_v3  ;;  %v3703_v11 = vpack.c.bf16 %v1999_v4, %v1999_v4  ;;  %3167 = vst.msk [vmem:[%s5856_s3 + $0x1f8] sm:$0xf] %vm3040_vm1, %v3810_v5  ;;  %v3811_v12 = vpack.c.bf16 %v2107_v6, %v2107_v6 }
 0x105   :  { %3057 = vst.msk [vmem:[%s5856_s3 + $0x40] sm:$0xf] %vm3040_vm1, %v3700_v7  ;;  %v3701_v13 = vpack.c.bf16 %v1997_v8, %v1997_v8  ;;  %3165 = vst.msk [vmem:[%s5856_s3 + $0x1f0] sm:$0xf] %vm3040_vm1, %v3808_v9  ;;  %v4030_v14 = vpop.f32.mrb[20].mxu0  ;;  %v3809_v15 = vpack.c.bf16 %v2105_v10, %v2105_v10  ;;  %v4138_v16 = vpop.f32.mrb[20].mxu1 }
 0x106   :  { %3060 = vst.msk [vmem:[%s5856_s3 + $0x4c] sm:$0xf] %vm3040_vm1, %v3703_v11  ;;  %3168 = vst.msk [vmem:[%s5856_s3 + $0x1fc] sm:$0xf] %vm3040_vm1, %v3811_v12  ;;  %v1222_v17 = vadd.f32 %v4030_v14, %v4787_v44  ;;  %v1213_v18 = vpop.f32.mrb[21].mxu0  ;;  %v1654_v19 = vadd.f32 %v4138_v16, %v4787_v44  ;;  %v1645_v20 = vpop.f32.mrb[21].mxu1 }
 0x107   :  { %3058 = vst.msk [vmem:[%s5856_s3 + $0x44] sm:$0xf] %vm3040_vm1, %v3701_v13  ;;  %3166 = vst.msk [vmem:[%s5856_s3 + $0x1f4] sm:$0xf] %vm3040_vm1, %v3809_v15  ;;  %v1214_v21 = vadd.f32 %v4787_v44, %v1213_v18  ;;  %v4031_v22 = vpop.f32.mrb[22].mxu0  ;;  %v1646_v23 = vadd.f32 %v4787_v44, %v1645_v20  ;;  %v4139_v24 = vpop.f32.mrb[22].mxu1 }
 0x108   :  { %v2002_v25 = vmax.f32 %v1222_v17, 0.0  ;;  %v1225_v26 = vadd.f32 %v4031_v22, %v4787_v44  ;;  %v1216_v27 = vpop.f32.mrb[23].mxu0  ;;  %v2110_v28 = vmax.f32 %v1654_v19, 0.0  ;;  %v1657_v29 = vadd.f32 %v4139_v24, %v4787_v44  ;;  %v1648_v30 = vpop.f32.mrb[23].mxu1 }
 0x109   :  { %v2000_v31 = vmax.f32 %v1214_v21, 0.0  ;;  %v1217_v32 = vadd.f32 %v4787_v44, %v1216_v27  ;;  %v2108_v33 = vmax.f32 %v1646_v23, 0.0  ;;  %v1649_v34 = vadd.f32 %v4787_v44, %v1648_v30 }
 0x10a   :  { %v3706_v35 = vpack.c.bf16 %v2002_v25, %v2002_v25  ;;  %v2003_v36 = vmax.f32 %v1225_v26, 0.0  ;;  %v3814_v37 = vpack.c.bf16 %v2110_v28, %v2110_v28  ;;  %v2111_v38 = vmax.f32 %v1657_v29, 0.0 }
 0x10b   :  { %v3704_v39 = vpack.c.bf16 %v2000_v31, %v2000_v31  ;;  %v2001_v40 = vmax.f32 %v1217_v32, 0.0  ;;  %v3812_v41 = vpack.c.bf16 %v2108_v33, %v2108_v33  ;;  %v2109_v42 = vmax.f32 %v1649_v34, 0.0 }
 0x10c   :  { %3063 = vst.msk [vmem:[%s5856_s3 + $0x58] sm:$0xf] %vm3040_vm1, %v3706_v35  ;;  %v3707_v43 = vpack.c.bf16 %v2003_v36, %v2003_v36  ;;  %3171 = vst.msk [vmem:[%s5856_s3 + $0x208] sm:$0xf] %vm3040_vm1, %v3814_v37  ;;  %v3815_v45 = vpack.c.bf16 %v2111_v38, %v2111_v38 }
 0x10d   :  { %3061 = vst.msk [vmem:[%s5856_s3 + $0x50] sm:$0xf] %vm3040_vm1, %v3704_v39  ;;  %v3705_v46 = vpack.c.bf16 %v2001_v40, %v2001_v40  ;;  %3169 = vst.msk [vmem:[%s5856_s3 + $0x200] sm:$0xf] %vm3040_vm1, %v3812_v41  ;;  %v4034_v47 = vpop.f32.mrb[24].mxu0  ;;  %v3813_v48 = vpack.c.bf16 %v2109_v42, %v2109_v42  ;;  %v4142_v49 = vpop.f32.mrb[24].mxu1 }
 0x10e   :  { %3064 = vst.msk [vmem:[%s5856_s3 + $0x5c] sm:$0xf] %vm3040_vm1, %v3707_v43  ;;  %3172 = vst.msk [vmem:[%s5856_s3 + $0x20c] sm:$0xf] %vm3040_vm1, %v3815_v45  ;;  %v1238_v50 = vadd.f32 %v4034_v47, %v4787_v44  ;;  %v1229_v51 = vpop.f32.mrb[25].mxu0  ;;  %v1670_v52 = vadd.f32 %v4142_v49, %v4787_v44  ;;  %v1661_v53 = vpop.f32.mrb[25].mxu1 }
 0x10f   :  { %3062 = vst.msk [vmem:[%s5856_s3 + $0x54] sm:$0xf] %vm3040_vm1, %v3705_v46  ;;  %3170 = vst.msk [vmem:[%s5856_s3 + $0x204] sm:$0xf] %vm3040_vm1, %v3813_v48  ;;  %v1230_v54 = vadd.f32 %v4787_v44, %v1229_v51  ;;  %v4035_v55 = vpop.f32.mrb[26].mxu0  ;;  %v1662_v56 = vadd.f32 %v4787_v44, %v1661_v53  ;;  %v4143_v57 = vpop.f32.mrb[26].mxu1 }
 0x110   :  { %v2006_v58 = vmax.f32 %v1238_v50, 0.0  ;;  %v1241_v59 = vadd.f32 %v4035_v55, %v4787_v44  ;;  %v1232_v60 = vpop.f32.mrb[27].mxu0  ;;  %v2114_v61 = vmax.f32 %v1670_v52, 0.0  ;;  %v1673_v62 = vadd.f32 %v4143_v57, %v4787_v44  ;;  %v1664_v63 = vpop.f32.mrb[27].mxu1 }
 0x111   :  { %v2004_v0 = vmax.f32 %v1230_v54, 0.0  ;;  %v1233_v1 = vadd.f32 %v4787_v44, %v1232_v60  ;;  %v2112_v2 = vmax.f32 %v1662_v56, 0.0  ;;  %v1665_v3 = vadd.f32 %v4787_v44, %v1664_v63 }
 0x112   :  { %v3710_v4 = vpack.c.bf16 %v2006_v58, %v2006_v58  ;;  %v2007_v5 = vmax.f32 %v1241_v59, 0.0  ;;  %v3818_v6 = vpack.c.bf16 %v2114_v61, %v2114_v61  ;;  %v2115_v7 = vmax.f32 %v1673_v62, 0.0 }
 0x113   :  { %v3708_v8 = vpack.c.bf16 %v2004_v0, %v2004_v0  ;;  %v2005_v9 = vmax.f32 %v1233_v1, 0.0  ;;  %v3816_v10 = vpack.c.bf16 %v2112_v2, %v2112_v2  ;;  %v2113_v11 = vmax.f32 %v1665_v3, 0.0 }
 0x114   :  { %3067 = vst.msk [vmem:[%s5856_s3 + $0x68] sm:$0xf] %vm3040_vm1, %v3710_v4  ;;  %v3711_v12 = vpack.c.bf16 %v2007_v5, %v2007_v5  ;;  %3175 = vst.msk [vmem:[%s5856_s3 + $0x218] sm:$0xf] %vm3040_vm1, %v3818_v6  ;;  %v3819_v13 = vpack.c.bf16 %v2115_v7, %v2115_v7 }
 0x115   :  { %3065 = vst.msk [vmem:[%s5856_s3 + $0x60] sm:$0xf] %vm3040_vm1, %v3708_v8  ;;  %v3709_v14 = vpack.c.bf16 %v2005_v9, %v2005_v9  ;;  %3173 = vst.msk [vmem:[%s5856_s3 + $0x210] sm:$0xf] %vm3040_vm1, %v3816_v10  ;;  %v4038_v15 = vpop.f32.mrb[28].mxu0  ;;  %v3817_v16 = vpack.c.bf16 %v2113_v11, %v2113_v11  ;;  %v4146_v17 = vpop.f32.mrb[28].mxu1 }
 0x116   :  { %3068 = vst.msk [vmem:[%s5856_s3 + $0x6c] sm:$0xf] %vm3040_vm1, %v3711_v12  ;;  %3176 = vst.msk [vmem:[%s5856_s3 + $0x21c] sm:$0xf] %vm3040_vm1, %v3819_v13  ;;  %v1254_v18 = vadd.f32 %v4038_v15, %v4787_v44  ;;  %v1245_v19 = vpop.f32.mrb[29].mxu0  ;;  %v1686_v20 = vadd.f32 %v4146_v17, %v4787_v44  ;;  %v1677_v21 = vpop.f32.mrb[29].mxu1 }
 0x117   :  { %3066 = vst.msk [vmem:[%s5856_s3 + $0x64] sm:$0xf] %vm3040_vm1, %v3709_v14  ;;  %3174 = vst.msk [vmem:[%s5856_s3 + $0x214] sm:$0xf] %vm3040_vm1, %v3817_v16  ;;  %v1246_v22 = vadd.f32 %v4787_v44, %v1245_v19  ;;  %v4039_v23 = vpop.f32.mrb[30].mxu0  ;;  %v1678_v24 = vadd.f32 %v4787_v44, %v1677_v21  ;;  %v4147_v25 = vpop.f32.mrb[30].mxu1 }
 0x118   :  { %v2010_v26 = vmax.f32 %v1254_v18, 0.0  ;;  %v1257_v27 = vadd.f32 %v4039_v23, %v4787_v44  ;;  %v1248_v28 = vpop.f32.mrb[31].mxu0  ;;  %v2118_v29 = vmax.f32 %v1686_v20, 0.0  ;;  %v1689_v30 = vadd.f32 %v4147_v25, %v4787_v44  ;;  %v1680_v31 = vpop.f32.mrb[31].mxu1 }
 0x119   :  { %v2008_v32 = vmax.f32 %v1246_v22, 0.0  ;;  %v1249_v33 = vadd.f32 %v4787_v44, %v1248_v28  ;;  %v2116_v34 = vmax.f32 %v1678_v24, 0.0  ;;  %v1681_v35 = vadd.f32 %v4787_v44, %v1680_v31 }
 0x11a   :  { %v3714_v36 = vpack.c.bf16 %v2010_v26, %v2010_v26  ;;  %v2011_v37 = vmax.f32 %v1257_v27, 0.0  ;;  %v3822_v38 = vpack.c.bf16 %v2118_v29, %v2118_v29  ;;  %v2119_v39 = vmax.f32 %v1689_v30, 0.0 }
 0x11b   :  { %v3712_v40 = vpack.c.bf16 %v2008_v32, %v2008_v32  ;;  %v2009_v41 = vmax.f32 %v1249_v33, 0.0  ;;  %v3820_v42 = vpack.c.bf16 %v2116_v34, %v2116_v34  ;;  %v2117_v43 = vmax.f32 %v1681_v35, 0.0 }
 0x11c   :  { %3071 = vst.msk [vmem:[%s5856_s3 + $0x78] sm:$0xf] %vm3040_vm1, %v3714_v36  ;;  %v3715_v45 = vpack.c.bf16 %v2011_v37, %v2011_v37  ;;  %3179 = vst.msk [vmem:[%s5856_s3 + $0x228] sm:$0xf] %vm3040_vm1, %v3822_v38  ;;  %v3823_v46 = vpack.c.bf16 %v2119_v39, %v2119_v39 }
 0x11d   :  { %3069 = vst.msk [vmem:[%s5856_s3 + $0x70] sm:$0xf] %vm3040_vm1, %v3712_v40  ;;  %v3713_v47 = vpack.c.bf16 %v2009_v41, %v2009_v41  ;;  %3177 = vst.msk [vmem:[%s5856_s3 + $0x220] sm:$0xf] %vm3040_vm1, %v3820_v42  ;;  %v4042_v48 = vpop.f32.mrb[32].mxu0  ;;  %v3821_v49 = vpack.c.bf16 %v2117_v43, %v2117_v43  ;;  %v4150_v50 = vpop.f32.mrb[32].mxu1 }
 0x11e   :  { %3072 = vst.msk [vmem:[%s5856_s3 + $0x7c] sm:$0xf] %vm3040_vm1, %v3715_v45  ;;  %3180 = vst.msk [vmem:[%s5856_s3 + $0x22c] sm:$0xf] %vm3040_vm1, %v3823_v46  ;;  %v1270_v51 = vadd.f32 %v4042_v48, %v4787_v44  ;;  %v1261_v52 = vpop.f32.mrb[33].mxu0  ;;  %v1702_v53 = vadd.f32 %v4150_v50, %v4787_v44  ;;  %v1693_v54 = vpop.f32.mrb[33].mxu1 }
 0x11f   :  { %3070 = vst.msk [vmem:[%s5856_s3 + $0x74] sm:$0xf] %vm3040_vm1, %v3713_v47  ;;  %3178 = vst.msk [vmem:[%s5856_s3 + $0x224] sm:$0xf] %vm3040_vm1, %v3821_v49  ;;  %v1262_v55 = vadd.f32 %v4787_v44, %v1261_v52  ;;  %v4043_v56 = vpop.f32.mrb[34].mxu0  ;;  %v1694_v57 = vadd.f32 %v4787_v44, %v1693_v54  ;;  %v4151_v58 = vpop.f32.mrb[34].mxu1 }
 0x120   :  { %v2014_v59 = vmax.f32 %v1270_v51, 0.0  ;;  %v1273_v60 = vadd.f32 %v4043_v56, %v4787_v44  ;;  %v1264_v61 = vpop.f32.mrb[35].mxu0  ;;  %v2122_v62 = vmax.f32 %v1702_v53, 0.0  ;;  %v1705_v63 = vadd.f32 %v4151_v58, %v4787_v44  ;;  %v1696_v0 = vpop.f32.mrb[35].mxu1 }
 0x121   :  { %v2012_v1 = vmax.f32 %v1262_v55, 0.0  ;;  %v1265_v2 = vadd.f32 %v4787_v44, %v1264_v61  ;;  %v2120_v3 = vmax.f32 %v1694_v57, 0.0  ;;  %v1697_v4 = vadd.f32 %v4787_v44, %v1696_v0 }
 0x122   :  { %v3718_v5 = vpack.c.bf16 %v2014_v59, %v2014_v59  ;;  %v2015_v6 = vmax.f32 %v1273_v60, 0.0  ;;  %v3826_v7 = vpack.c.bf16 %v2122_v62, %v2122_v62  ;;  %v2123_v8 = vmax.f32 %v1705_v63, 0.0 }
 0x123   :  { %v3716_v9 = vpack.c.bf16 %v2012_v1, %v2012_v1  ;;  %v2013_v10 = vmax.f32 %v1265_v2, 0.0  ;;  %v3824_v11 = vpack.c.bf16 %v2120_v3, %v2120_v3  ;;  %v2121_v12 = vmax.f32 %v1697_v4, 0.0 }
 0x124   :  { %3075 = vst.msk [vmem:[%s5856_s3 + $0x88] sm:$0xf] %vm3040_vm1, %v3718_v5  ;;  %v3719_v13 = vpack.c.bf16 %v2015_v6, %v2015_v6  ;;  %3183 = vst.msk [vmem:[%s5856_s3 + $0x238] sm:$0xf] %vm3040_vm1, %v3826_v7  ;;  %v3827_v14 = vpack.c.bf16 %v2123_v8, %v2123_v8 }
 0x125   :  { %3073 = vst.msk [vmem:[%s5856_s3 + $0x80] sm:$0xf] %vm3040_vm1, %v3716_v9  ;;  %v3717_v15 = vpack.c.bf16 %v2013_v10, %v2013_v10  ;;  %3181 = vst.msk [vmem:[%s5856_s3 + $0x230] sm:$0xf] %vm3040_vm1, %v3824_v11  ;;  %v4046_v16 = vpop.f32.mrb[36].mxu0  ;;  %v3825_v17 = vpack.c.bf16 %v2121_v12, %v2121_v12  ;;  %v4154_v18 = vpop.f32.mrb[36].mxu1 }
 0x126   :  { %3076 = vst.msk [vmem:[%s5856_s3 + $0x8c] sm:$0xf] %vm3040_vm1, %v3719_v13  ;;  %3184 = vst.msk [vmem:[%s5856_s3 + $0x23c] sm:$0xf] %vm3040_vm1, %v3827_v14  ;;  %v1286_v19 = vadd.f32 %v4046_v16, %v4787_v44  ;;  %v1277_v20 = vpop.f32.mrb[37].mxu0  ;;  %v1718_v21 = vadd.f32 %v4154_v18, %v4787_v44  ;;  %v1709_v22 = vpop.f32.mrb[37].mxu1 }
 0x127   :  { %3074 = vst.msk [vmem:[%s5856_s3 + $0x84] sm:$0xf] %vm3040_vm1, %v3717_v15  ;;  %3182 = vst.msk [vmem:[%s5856_s3 + $0x234] sm:$0xf] %vm3040_vm1, %v3825_v17  ;;  %v1278_v23 = vadd.f32 %v4787_v44, %v1277_v20  ;;  %v4047_v24 = vpop.f32.mrb[38].mxu0  ;;  %v1710_v25 = vadd.f32 %v4787_v44, %v1709_v22  ;;  %v4155_v26 = vpop.f32.mrb[38].mxu1 }
 0x128   :  { %v2018_v27 = vmax.f32 %v1286_v19, 0.0  ;;  %v1289_v28 = vadd.f32 %v4047_v24, %v4787_v44  ;;  %v1280_v29 = vpop.f32.mrb[39].mxu0  ;;  %v2126_v30 = vmax.f32 %v1718_v21, 0.0  ;;  %v1721_v31 = vadd.f32 %v4155_v26, %v4787_v44  ;;  %v1712_v32 = vpop.f32.mrb[39].mxu1 }
 0x129   :  { %v2016_v33 = vmax.f32 %v1278_v23, 0.0  ;;  %v1281_v34 = vadd.f32 %v4787_v44, %v1280_v29  ;;  %v2124_v35 = vmax.f32 %v1710_v25, 0.0  ;;  %v1713_v36 = vadd.f32 %v4787_v44, %v1712_v32 }
 0x12a   :  { %v3722_v37 = vpack.c.bf16 %v2018_v27, %v2018_v27  ;;  %v2019_v38 = vmax.f32 %v1289_v28, 0.0  ;;  %v3830_v39 = vpack.c.bf16 %v2126_v30, %v2126_v30  ;;  %v2127_v40 = vmax.f32 %v1721_v31, 0.0 }
 0x12b   :  { %v3720_v41 = vpack.c.bf16 %v2016_v33, %v2016_v33  ;;  %v2017_v42 = vmax.f32 %v1281_v34, 0.0  ;;  %v3828_v43 = vpack.c.bf16 %v2124_v35, %v2124_v35  ;;  %v2125_v45 = vmax.f32 %v1713_v36, 0.0 }
 0x12c   :  { %3079 = vst.msk [vmem:[%s5856_s3 + $0x98] sm:$0xf] %vm3040_vm1, %v3722_v37  ;;  %v3723_v46 = vpack.c.bf16 %v2019_v38, %v2019_v38  ;;  %3187 = vst.msk [vmem:[%s5856_s3 + $0x248] sm:$0xf] %vm3040_vm1, %v3830_v39  ;;  %v3831_v47 = vpack.c.bf16 %v2127_v40, %v2127_v40 }
 0x12d   :  { %3077 = vst.msk [vmem:[%s5856_s3 + $0x90] sm:$0xf] %vm3040_vm1, %v3720_v41  ;;  %v3721_v48 = vpack.c.bf16 %v2017_v42, %v2017_v42  ;;  %3185 = vst.msk [vmem:[%s5856_s3 + $0x240] sm:$0xf] %vm3040_vm1, %v3828_v43  ;;  %v4050_v49 = vpop.f32.mrb[40].mxu0  ;;  %v3829_v50 = vpack.c.bf16 %v2125_v45, %v2125_v45  ;;  %v4158_v51 = vpop.f32.mrb[40].mxu1 }
 0x12e   :  { %3080 = vst.msk [vmem:[%s5856_s3 + $0x9c] sm:$0xf] %vm3040_vm1, %v3723_v46  ;;  %3188 = vst.msk [vmem:[%s5856_s3 + $0x24c] sm:$0xf] %vm3040_vm1, %v3831_v47  ;;  %v1302_v52 = vadd.f32 %v4050_v49, %v4787_v44  ;;  %v1293_v53 = vpop.f32.mrb[41].mxu0  ;;  %v1734_v54 = vadd.f32 %v4158_v51, %v4787_v44  ;;  %v1725_v55 = vpop.f32.mrb[41].mxu1 }
 0x12f   :  { %3078 = vst.msk [vmem:[%s5856_s3 + $0x94] sm:$0xf] %vm3040_vm1, %v3721_v48  ;;  %3186 = vst.msk [vmem:[%s5856_s3 + $0x244] sm:$0xf] %vm3040_vm1, %v3829_v50  ;;  %v1294_v56 = vadd.f32 %v4787_v44, %v1293_v53  ;;  %v4051_v57 = vpop.f32.mrb[42].mxu0  ;;  %v1726_v58 = vadd.f32 %v4787_v44, %v1725_v55  ;;  %v4159_v59 = vpop.f32.mrb[42].mxu1 }
 0x130   :  { %v2022_v60 = vmax.f32 %v1302_v52, 0.0  ;;  %v1305_v61 = vadd.f32 %v4051_v57, %v4787_v44  ;;  %v1296_v62 = vpop.f32.mrb[43].mxu0  ;;  %v2130_v63 = vmax.f32 %v1734_v54, 0.0  ;;  %v1737_v0 = vadd.f32 %v4159_v59, %v4787_v44  ;;  %v1728_v1 = vpop.f32.mrb[43].mxu1 }
 0x131   :  { %v2020_v2 = vmax.f32 %v1294_v56, 0.0  ;;  %v1297_v3 = vadd.f32 %v4787_v44, %v1296_v62  ;;  %v2128_v4 = vmax.f32 %v1726_v58, 0.0  ;;  %v1729_v5 = vadd.f32 %v4787_v44, %v1728_v1 }
 0x132   :  { %v3726_v6 = vpack.c.bf16 %v2022_v60, %v2022_v60  ;;  %v2023_v7 = vmax.f32 %v1305_v61, 0.0  ;;  %v3834_v8 = vpack.c.bf16 %v2130_v63, %v2130_v63  ;;  %v2131_v9 = vmax.f32 %v1737_v0, 0.0 }
 0x133   :  { %v3724_v10 = vpack.c.bf16 %v2020_v2, %v2020_v2  ;;  %v2021_v11 = vmax.f32 %v1297_v3, 0.0  ;;  %v3832_v12 = vpack.c.bf16 %v2128_v4, %v2128_v4  ;;  %v2129_v13 = vmax.f32 %v1729_v5, 0.0 }
 0x134   :  { %3083 = vst.msk [vmem:[%s5856_s3 + $0xa8] sm:$0xf] %vm3040_vm1, %v3726_v6  ;;  %v3727_v14 = vpack.c.bf16 %v2023_v7, %v2023_v7  ;;  %3191 = vst.msk [vmem:[%s5856_s3 + $0x258] sm:$0xf] %vm3040_vm1, %v3834_v8  ;;  %v3835_v15 = vpack.c.bf16 %v2131_v9, %v2131_v9 }
 0x135   :  { %3081 = vst.msk [vmem:[%s5856_s3 + $0xa0] sm:$0xf] %vm3040_vm1, %v3724_v10  ;;  %v3725_v16 = vpack.c.bf16 %v2021_v11, %v2021_v11  ;;  %3189 = vst.msk [vmem:[%s5856_s3 + $0x250] sm:$0xf] %vm3040_vm1, %v3832_v12  ;;  %v4054_v17 = vpop.f32.mrb[44].mxu0  ;;  %v3833_v18 = vpack.c.bf16 %v2129_v13, %v2129_v13  ;;  %v4162_v19 = vpop.f32.mrb[44].mxu1 }
 0x136   :  { %3084 = vst.msk [vmem:[%s5856_s3 + $0xac] sm:$0xf] %vm3040_vm1, %v3727_v14  ;;  %3192 = vst.msk [vmem:[%s5856_s3 + $0x25c] sm:$0xf] %vm3040_vm1, %v3835_v15  ;;  %v1318_v20 = vadd.f32 %v4054_v17, %v4787_v44  ;;  %v1309_v21 = vpop.f32.mrb[45].mxu0  ;;  %v1750_v22 = vadd.f32 %v4162_v19, %v4787_v44  ;;  %v1741_v23 = vpop.f32.mrb[45].mxu1 }
 0x137   :  { %3082 = vst.msk [vmem:[%s5856_s3 + $0xa4] sm:$0xf] %vm3040_vm1, %v3725_v16  ;;  %3190 = vst.msk [vmem:[%s5856_s3 + $0x254] sm:$0xf] %vm3040_vm1, %v3833_v18  ;;  %v1310_v24 = vadd.f32 %v4787_v44, %v1309_v21  ;;  %v4055_v25 = vpop.f32.mrb[46].mxu0  ;;  %v1742_v26 = vadd.f32 %v4787_v44, %v1741_v23  ;;  %v4163_v27 = vpop.f32.mrb[46].mxu1 }
 0x138   :  { %v2026_v28 = vmax.f32 %v1318_v20, 0.0  ;;  %v1321_v29 = vadd.f32 %v4055_v25, %v4787_v44  ;;  %v1312_v30 = vpop.f32.mrb[47].mxu0  ;;  %v2134_v31 = vmax.f32 %v1750_v22, 0.0  ;;  %v1753_v32 = vadd.f32 %v4163_v27, %v4787_v44  ;;  %v1744_v33 = vpop.f32.mrb[47].mxu1  ;;  %v5304_v20 = vld [vmem:[%s5855_s2] ss:$0 sm:$0xff] }
 0x139   :  { %v2024_v34 = vmax.f32 %v1310_v24, 0.0  ;;  %v1313_v35 = vadd.f32 %v4787_v44, %v1312_v30  ;;  %v2132_v36 = vmax.f32 %v1742_v26, 0.0  ;;  %v1745_v37 = vadd.f32 %v4787_v44, %v1744_v33 }
 0x13a   :  { %v3730_v38 = vpack.c.bf16 %v2026_v28, %v2026_v28  ;;  %v2027_v39 = vmax.f32 %v1321_v29, 0.0  ;;  %v3838_v40 = vpack.c.bf16 %v2134_v31, %v2134_v31  ;;  %v2135_v41 = vmax.f32 %v1753_v32, 0.0 }
 0x13b   :  { %v3728_v42 = vpack.c.bf16 %v2024_v34, %v2024_v34  ;;  %v2025_v43 = vmax.f32 %v1313_v35, 0.0  ;;  %v3836_v45 = vpack.c.bf16 %v2132_v36, %v2132_v36  ;;  %v2133_v46 = vmax.f32 %v1745_v37, 0.0 }
 0x13c   :  { %3087 = vst.msk [vmem:[%s5856_s3 + $0xb8] sm:$0xf] %vm3040_vm1, %v3730_v38  ;;  %v3731_v47 = vpack.c.bf16 %v2027_v39, %v2027_v39  ;;  %3195 = vst.msk [vmem:[%s5856_s3 + $0x268] sm:$0xf] %vm3040_vm1, %v3838_v40  ;;  %v3839_v48 = vpack.c.bf16 %v2135_v41, %v2135_v41 }
 0x13d   :  { %3085 = vst.msk [vmem:[%s5856_s3 + $0xb0] sm:$0xf] %vm3040_vm1, %v3728_v42  ;;  %v3729_v49 = vpack.c.bf16 %v2025_v43, %v2025_v43  ;;  %3193 = vst.msk [vmem:[%s5856_s3 + $0x260] sm:$0xf] %vm3040_vm1, %v3836_v45  ;;  %v4058_v50 = vpop.f32.mrb[48].mxu0  ;;  %v3837_v51 = vpack.c.bf16 %v2133_v46, %v2133_v46  ;;  %v4166_v52 = vpop.f32.mrb[48].mxu1 }
 0x13e   :  { %3088 = vst.msk [vmem:[%s5856_s3 + $0xbc] sm:$0xf] %vm3040_vm1, %v3731_v47  ;;  %3196 = vst.msk [vmem:[%s5856_s3 + $0x26c] sm:$0xf] %vm3040_vm1, %v3839_v48  ;;  %v1334_v53 = vadd.f32 %v4058_v50, %v4787_v44  ;;  %v1325_v54 = vpop.f32.mrb[49].mxu0  ;;  %v1766_v55 = vadd.f32 %v4166_v52, %v4787_v44  ;;  %v1757_v56 = vpop.f32.mrb[49].mxu1 }
 0x13f   :  { %3086 = vst.msk [vmem:[%s5856_s3 + $0xb4] sm:$0xf] %vm3040_vm1, %v3729_v49  ;;  %3194 = vst.msk [vmem:[%s5856_s3 + $0x264] sm:$0xf] %vm3040_vm1, %v3837_v51  ;;  %v1326_v57 = vadd.f32 %v4787_v44, %v1325_v54  ;;  %v4059_v58 = vpop.f32.mrb[50].mxu0  ;;  %v1758_v59 = vadd.f32 %v4787_v44, %v1757_v56  ;;  %v4167_v60 = vpop.f32.mrb[50].mxu1 }
 0x140   :  { %v2030_v61 = vmax.f32 %v1334_v53, 0.0  ;;  %v1337_v62 = vadd.f32 %v4059_v58, %v4787_v44  ;;  %v1328_v63 = vpop.f32.mrb[51].mxu0  ;;  %v2138_v0 = vmax.f32 %v1766_v55, 0.0  ;;  %v1769_v1 = vadd.f32 %v4167_v60, %v4787_v44  ;;  %v1760_v2 = vpop.f32.mrb[51].mxu1 }
 0x141   :  { %v2028_v3 = vmax.f32 %v1326_v57, 0.0  ;;  %v1329_v4 = vadd.f32 %v4787_v44, %v1328_v63  ;;  %v2136_v5 = vmax.f32 %v1758_v59, 0.0  ;;  %v1761_v6 = vadd.f32 %v4787_v44, %v1760_v2 }
 0x142   :  { %v3734_v7 = vpack.c.bf16 %v2030_v61, %v2030_v61  ;;  %v2031_v8 = vmax.f32 %v1337_v62, 0.0  ;;  %v3842_v9 = vpack.c.bf16 %v2138_v0, %v2138_v0  ;;  %v2139_v10 = vmax.f32 %v1769_v1, 0.0 }
 0x143   :  { %v3732_v11 = vpack.c.bf16 %v2028_v3, %v2028_v3  ;;  %v2029_v12 = vmax.f32 %v1329_v4, 0.0  ;;  %v3840_v13 = vpack.c.bf16 %v2136_v5, %v2136_v5  ;;  %v2137_v14 = vmax.f32 %v1761_v6, 0.0 }
 0x144   :  { %3091 = vst.msk [vmem:[%s5856_s3 + $0xc8] sm:$0xf] %vm3040_vm1, %v3734_v7  ;;  %v3735_v15 = vpack.c.bf16 %v2031_v8, %v2031_v8  ;;  %3199 = vst.msk [vmem:[%s5856_s3 + $0x278] sm:$0xf] %vm3040_vm1, %v3842_v9  ;;  %v3843_v44 = vpack.c.bf16 %v2139_v10, %v2139_v10 }
 0x145   :  { %3089 = vst.msk [vmem:[%s5856_s3 + $0xc0] sm:$0xf] %vm3040_vm1, %v3732_v11  ;;  %v3733_v16 = vpack.c.bf16 %v2029_v12, %v2029_v12  ;;  %3197 = vst.msk [vmem:[%s5856_s3 + $0x270] sm:$0xf] %vm3040_vm1, %v3840_v13  ;;  %v4062_v17 = vpop.f32.mrb[52].mxu0  ;;  %v3841_v18 = vpack.c.bf16 %v2137_v14, %v2137_v14  ;;  %v4170_v19 = vpop.f32.mrb[52].mxu1 }
 0x146   :  { %3092 = vst.msk [vmem:[%s5856_s3 + $0xcc] sm:$0xf] %vm3040_vm1, %v3735_v15  ;;  %3200 = vst.msk [vmem:[%s5856_s3 + $0x27c] sm:$0xf] %vm3040_vm1, %v3843_v44  ;;  %v1350_v21 = vadd.f32 %v5304_v20, %v4062_v17  ;;  %v1341_v22 = vpop.f32.mrb[53].mxu0  ;;  %v1782_v23 = vadd.f32 %v5304_v20, %v4170_v19  ;;  %v1773_v24 = vpop.f32.mrb[53].mxu1 }
 0x147   :  { %3090 = vst.msk [vmem:[%s5856_s3 + $0xc4] sm:$0xf] %vm3040_vm1, %v3733_v16  ;;  %3198 = vst.msk [vmem:[%s5856_s3 + $0x274] sm:$0xf] %vm3040_vm1, %v3841_v18  ;;  %v1342_v25 = vadd.f32 %v5304_v20, %v1341_v22  ;;  %v4063_v26 = vpop.f32.mrb[54].mxu0  ;;  %v1774_v27 = vadd.f32 %v5304_v20, %v1773_v24  ;;  %v4171_v28 = vpop.f32.mrb[54].mxu1 }
 0x148   :  { %v2034_v29 = vmax.f32 %v1350_v21, 0.0  ;;  %v1353_v30 = vadd.f32 %v5304_v20, %v4063_v26  ;;  %v1344_v31 = vpop.f32.mrb[55].mxu0  ;;  %v2142_v32 = vmax.f32 %v1782_v23, 0.0  ;;  %v1785_v33 = vadd.f32 %v5304_v20, %v4171_v28  ;;  %v1776_v34 = vpop.f32.mrb[55].mxu1 }
 0x149   :  { %v2032_v35 = vmax.f32 %v1342_v25, 0.0  ;;  %v1345_v36 = vadd.f32 %v5304_v20, %v1344_v31  ;;  %v2140_v37 = vmax.f32 %v1774_v27, 0.0  ;;  %v1777_v38 = vadd.f32 %v5304_v20, %v1776_v34 }
 0x14a   :  { %v3738_v39 = vpack.c.bf16 %v2034_v29, %v2034_v29  ;;  %v2035_v40 = vmax.f32 %v1353_v30, 0.0  ;;  %v3846_v41 = vpack.c.bf16 %v2142_v32, %v2142_v32  ;;  %v2143_v42 = vmax.f32 %v1785_v33, 0.0 }
 0x14b   :  { %v3736_v43 = vpack.c.bf16 %v2032_v35, %v2032_v35  ;;  %v2033_v45 = vmax.f32 %v1345_v36, 0.0  ;;  %v3844_v46 = vpack.c.bf16 %v2140_v37, %v2140_v37  ;;  %v2141_v47 = vmax.f32 %v1777_v38, 0.0 }
 0x14c   :  { %3095 = vst.msk [vmem:[%s5856_s3 + $0xd8] sm:$0xf] %vm3040_vm1, %v3738_v39  ;;  %v3739_v48 = vpack.c.bf16 %v2035_v40, %v2035_v40  ;;  %3203 = vst.msk [vmem:[%s5856_s3 + $0x288] sm:$0xf] %vm3040_vm1, %v3846_v41  ;;  %v3847_v49 = vpack.c.bf16 %v2143_v42, %v2143_v42 }
 0x14d   :  { %3093 = vst.msk [vmem:[%s5856_s3 + $0xd0] sm:$0xf] %vm3040_vm1, %v3736_v43  ;;  %v3737_v50 = vpack.c.bf16 %v2033_v45, %v2033_v45  ;;  %3201 = vst.msk [vmem:[%s5856_s3 + $0x280] sm:$0xf] %vm3040_vm1, %v3844_v46  ;;  %v4066_v51 = vpop.f32.mrb[56].mxu0  ;;  %v3845_v52 = vpack.c.bf16 %v2141_v47, %v2141_v47  ;;  %v4174_v53 = vpop.f32.mrb[56].mxu1 }
 0x14e   :  { %3096 = vst.msk [vmem:[%s5856_s3 + $0xdc] sm:$0xf] %vm3040_vm1, %v3739_v48  ;;  %3204 = vst.msk [vmem:[%s5856_s3 + $0x28c] sm:$0xf] %vm3040_vm1, %v3847_v49  ;;  %v1366_v54 = vadd.f32 %v5304_v20, %v4066_v51  ;;  %v1357_v55 = vpop.f32.mrb[57].mxu0  ;;  %v1798_v56 = vadd.f32 %v5304_v20, %v4174_v53  ;;  %v1789_v57 = vpop.f32.mrb[57].mxu1 }
 0x14f   :  { %3094 = vst.msk [vmem:[%s5856_s3 + $0xd4] sm:$0xf] %vm3040_vm1, %v3737_v50  ;;  %3202 = vst.msk [vmem:[%s5856_s3 + $0x284] sm:$0xf] %vm3040_vm1, %v3845_v52  ;;  %v1358_v58 = vadd.f32 %v5304_v20, %v1357_v55  ;;  %v4067_v59 = vpop.f32.mrb[58].mxu0  ;;  %v1790_v60 = vadd.f32 %v5304_v20, %v1789_v57  ;;  %v4175_v61 = vpop.f32.mrb[58].mxu1 }
 0x150   :  { %v2038_v62 = vmax.f32 %v1366_v54, 0.0  ;;  %v1369_v63 = vadd.f32 %v5304_v20, %v4067_v59  ;;  %v1360_v0 = vpop.f32.mrb[59].mxu0  ;;  %v2146_v1 = vmax.f32 %v1798_v56, 0.0  ;;  %v1801_v2 = vadd.f32 %v5304_v20, %v4175_v61  ;;  %v1792_v3 = vpop.f32.mrb[59].mxu1 }
 0x151   :  { %v2036_v4 = vmax.f32 %v1358_v58, 0.0  ;;  %v1361_v5 = vadd.f32 %v5304_v20, %v1360_v0  ;;  %v2144_v6 = vmax.f32 %v1790_v60, 0.0  ;;  %v1793_v7 = vadd.f32 %v5304_v20, %v1792_v3 }
 0x152   :  { %v3742_v8 = vpack.c.bf16 %v2038_v62, %v2038_v62  ;;  %v2039_v9 = vmax.f32 %v1369_v63, 0.0  ;;  %v3850_v10 = vpack.c.bf16 %v2146_v1, %v2146_v1  ;;  %v2147_v11 = vmax.f32 %v1801_v2, 0.0 }
 0x153   :  { %v3740_v12 = vpack.c.bf16 %v2036_v4, %v2036_v4  ;;  %v2037_v13 = vmax.f32 %v1361_v5, 0.0  ;;  %v3848_v14 = vpack.c.bf16 %v2144_v6, %v2144_v6  ;;  %v2145_v15 = vmax.f32 %v1793_v7, 0.0 }
 0x154   :  { %3099 = vst.msk [vmem:[%s5856_s3 + $0xe8] sm:$0xf] %vm3040_vm1, %v3742_v8  ;;  %v3743_v44 = vpack.c.bf16 %v2039_v9, %v2039_v9  ;;  %3207 = vst.msk [vmem:[%s5856_s3 + $0x298] sm:$0xf] %vm3040_vm1, %v3850_v10  ;;  %v3851_v16 = vpack.c.bf16 %v2147_v11, %v2147_v11 }
 0x155   :  { %3097 = vst.msk [vmem:[%s5856_s3 + $0xe0] sm:$0xf] %vm3040_vm1, %v3740_v12  ;;  %v3741_v17 = vpack.c.bf16 %v2037_v13, %v2037_v13  ;;  %3205 = vst.msk [vmem:[%s5856_s3 + $0x290] sm:$0xf] %vm3040_vm1, %v3848_v14  ;;  %v4070_v18 = vpop.f32.mrb[60].mxu0  ;;  %v3849_v19 = vpack.c.bf16 %v2145_v15, %v2145_v15  ;;  %v4178_v21 = vpop.f32.mrb[60].mxu1 }
 0x156   :  { %3100 = vst.msk [vmem:[%s5856_s3 + $0xec] sm:$0xf] %vm3040_vm1, %v3743_v44  ;;  %3208 = vst.msk [vmem:[%s5856_s3 + $0x29c] sm:$0xf] %vm3040_vm1, %v3851_v16  ;;  %v1382_v22 = vadd.f32 %v5304_v20, %v4070_v18  ;;  %v1373_v23 = vpop.f32.mrb[61].mxu0  ;;  %v1814_v24 = vadd.f32 %v5304_v20, %v4178_v21  ;;  %v1805_v25 = vpop.f32.mrb[61].mxu1 }
 0x157   :  { %3098 = vst.msk [vmem:[%s5856_s3 + $0xe4] sm:$0xf] %vm3040_vm1, %v3741_v17  ;;  %3206 = vst.msk [vmem:[%s5856_s3 + $0x294] sm:$0xf] %vm3040_vm1, %v3849_v19  ;;  %v1374_v26 = vadd.f32 %v5304_v20, %v1373_v23  ;;  %v4071_v27 = vpop.f32.mrb[62].mxu0  ;;  %v1806_v28 = vadd.f32 %v5304_v20, %v1805_v25  ;;  %v4179_v29 = vpop.f32.mrb[62].mxu1 }
 0x158   :  { %v2042_v30 = vmax.f32 %v1382_v22, 0.0  ;;  %v1385_v31 = vadd.f32 %v5304_v20, %v4071_v27  ;;  %v1376_v32 = vpop.f32.mrb[63].mxu0  ;;  %v2150_v33 = vmax.f32 %v1814_v24, 0.0  ;;  %v1817_v34 = vadd.f32 %v5304_v20, %v4179_v29  ;;  %v1808_v35 = vpop.f32.mrb[63].mxu1 }
 0x159   :  { %v2040_v36 = vmax.f32 %v1374_v26, 0.0  ;;  %v1377_v37 = vadd.f32 %v5304_v20, %v1376_v32  ;;  %v2148_v38 = vmax.f32 %v1806_v28, 0.0  ;;  %v1809_v39 = vadd.f32 %v5304_v20, %v1808_v35 }
 0x15a   :  { %v3746_v40 = vpack.c.bf16 %v2042_v30, %v2042_v30  ;;  %v2043_v41 = vmax.f32 %v1385_v31, 0.0  ;;  %v3854_v42 = vpack.c.bf16 %v2150_v33, %v2150_v33  ;;  %v2151_v43 = vmax.f32 %v1817_v34, 0.0 }
 0x15b   :  { %v3744_v45 = vpack.c.bf16 %v2040_v36, %v2040_v36  ;;  %v2041_v46 = vmax.f32 %v1377_v37, 0.0  ;;  %v3852_v47 = vpack.c.bf16 %v2148_v38, %v2148_v38  ;;  %v2149_v48 = vmax.f32 %v1809_v39, 0.0 }
 0x15c   :  { %3103 = vst.msk [vmem:[%s5856_s3 + $0xf8] sm:$0xf] %vm3040_vm1, %v3746_v40  ;;  %v3747_v49 = vpack.c.bf16 %v2043_v41, %v2043_v41  ;;  %3211 = vst.msk [vmem:[%s5856_s3 + $0x2a8] sm:$0xf] %vm3040_vm1, %v3854_v42  ;;  %v3855_v50 = vpack.c.bf16 %v2151_v43, %v2151_v43 }
 0x15d   :  { %3101 = vst.msk [vmem:[%s5856_s3 + $0xf0] sm:$0xf] %vm3040_vm1, %v3744_v45  ;;  %v3745_v51 = vpack.c.bf16 %v2041_v46, %v2041_v46  ;;  %3209 = vst.msk [vmem:[%s5856_s3 + $0x2a0] sm:$0xf] %vm3040_vm1, %v3852_v47  ;;  %v4074_v52 = vpop.f32.mrb[64].mxu0  ;;  %v3853_v53 = vpack.c.bf16 %v2149_v48, %v2149_v48  ;;  %v4182_v54 = vpop.f32.mrb[64].mxu1 }
 0x15e   :  { %3104 = vst.msk [vmem:[%s5856_s3 + $0xfc] sm:$0xf] %vm3040_vm1, %v3747_v49  ;;  %3212 = vst.msk [vmem:[%s5856_s3 + $0x2ac] sm:$0xf] %vm3040_vm1, %v3855_v50  ;;  %v1398_v55 = vadd.f32 %v5304_v20, %v4074_v52  ;;  %v1389_v56 = vpop.f32.mrb[65].mxu0  ;;  %v1830_v57 = vadd.f32 %v5304_v20, %v4182_v54  ;;  %v1821_v58 = vpop.f32.mrb[65].mxu1 }
 0x15f   :  { %3102 = vst.msk [vmem:[%s5856_s3 + $0xf4] sm:$0xf] %vm3040_vm1, %v3745_v51  ;;  %3210 = vst.msk [vmem:[%s5856_s3 + $0x2a4] sm:$0xf] %vm3040_vm1, %v3853_v53  ;;  %v1390_v59 = vadd.f32 %v5304_v20, %v1389_v56  ;;  %v4075_v60 = vpop.f32.mrb[66].mxu0  ;;  %v1822_v61 = vadd.f32 %v5304_v20, %v1821_v58  ;;  %v4183_v62 = vpop.f32.mrb[66].mxu1 }
 0x160   :  { %v2046_v63 = vmax.f32 %v1398_v55, 0.0  ;;  %v1401_v0 = vadd.f32 %v5304_v20, %v4075_v60  ;;  %v1392_v1 = vpop.f32.mrb[67].mxu0  ;;  %v2154_v2 = vmax.f32 %v1830_v57, 0.0  ;;  %v1833_v3 = vadd.f32 %v5304_v20, %v4183_v62  ;;  %v1824_v4 = vpop.f32.mrb[67].mxu1 }
 0x161   :  { %v2044_v5 = vmax.f32 %v1390_v59, 0.0  ;;  %v1393_v6 = vadd.f32 %v5304_v20, %v1392_v1  ;;  %v2152_v7 = vmax.f32 %v1822_v61, 0.0  ;;  %v1825_v8 = vadd.f32 %v5304_v20, %v1824_v4 }
 0x162   :  { %v3750_v9 = vpack.c.bf16 %v2046_v63, %v2046_v63  ;;  %v2047_v10 = vmax.f32 %v1401_v0, 0.0  ;;  %v3858_v11 = vpack.c.bf16 %v2154_v2, %v2154_v2  ;;  %v2155_v12 = vmax.f32 %v1833_v3, 0.0 }
 0x163   :  { %v3748_v13 = vpack.c.bf16 %v2044_v5, %v2044_v5  ;;  %v2045_v14 = vmax.f32 %v1393_v6, 0.0  ;;  %v3856_v15 = vpack.c.bf16 %v2152_v7, %v2152_v7  ;;  %v2153_v44 = vmax.f32 %v1825_v8, 0.0 }
 0x164   :  { %3107 = vst.msk [vmem:[%s5856_s3 + $0x108] sm:$0xf] %vm3040_vm1, %v3750_v9  ;;  %v3751_v16 = vpack.c.bf16 %v2047_v10, %v2047_v10  ;;  %3215 = vst.msk [vmem:[%s5856_s3 + $0x2b8] sm:$0xf] %vm3040_vm1, %v3858_v11  ;;  %v3859_v17 = vpack.c.bf16 %v2155_v12, %v2155_v12 }
 0x165   :  { %3105 = vst.msk [vmem:[%s5856_s3 + $0x100] sm:$0xf] %vm3040_vm1, %v3748_v13  ;;  %v3749_v18 = vpack.c.bf16 %v2045_v14, %v2045_v14  ;;  %3213 = vst.msk [vmem:[%s5856_s3 + $0x2b0] sm:$0xf] %vm3040_vm1, %v3856_v15  ;;  %v4078_v19 = vpop.f32.mrb[68].mxu0  ;;  %v3857_v21 = vpack.c.bf16 %v2153_v44, %v2153_v44  ;;  %v4186_v22 = vpop.f32.mrb[68].mxu1 }
 0x166   :  { %3108 = vst.msk [vmem:[%s5856_s3 + $0x10c] sm:$0xf] %vm3040_vm1, %v3751_v16  ;;  %3216 = vst.msk [vmem:[%s5856_s3 + $0x2bc] sm:$0xf] %vm3040_vm1, %v3859_v17  ;;  %v1414_v23 = vadd.f32 %v5304_v20, %v4078_v19  ;;  %v1405_v24 = vpop.f32.mrb[69].mxu0  ;;  %v1846_v25 = vadd.f32 %v5304_v20, %v4186_v22  ;;  %v1837_v26 = vpop.f32.mrb[69].mxu1 }
 0x167   :  { %3106 = vst.msk [vmem:[%s5856_s3 + $0x104] sm:$0xf] %vm3040_vm1, %v3749_v18  ;;  %3214 = vst.msk [vmem:[%s5856_s3 + $0x2b4] sm:$0xf] %vm3040_vm1, %v3857_v21  ;;  %v1406_v27 = vadd.f32 %v5304_v20, %v1405_v24  ;;  %v4079_v28 = vpop.f32.mrb[70].mxu0  ;;  %v1838_v29 = vadd.f32 %v5304_v20, %v1837_v26  ;;  %v4187_v30 = vpop.f32.mrb[70].mxu1 }
 0x168   :  { %v2050_v31 = vmax.f32 %v1414_v23, 0.0  ;;  %v1417_v32 = vadd.f32 %v5304_v20, %v4079_v28  ;;  %v1408_v33 = vpop.f32.mrb[71].mxu0  ;;  %v2158_v34 = vmax.f32 %v1846_v25, 0.0  ;;  %v1849_v35 = vadd.f32 %v5304_v20, %v4187_v30  ;;  %v1840_v36 = vpop.f32.mrb[71].mxu1 }
 0x169   :  { %v2048_v37 = vmax.f32 %v1406_v27, 0.0  ;;  %v1409_v38 = vadd.f32 %v5304_v20, %v1408_v33  ;;  %v2156_v39 = vmax.f32 %v1838_v29, 0.0  ;;  %v1841_v40 = vadd.f32 %v5304_v20, %v1840_v36 }
 0x16a   :  { %v3754_v41 = vpack.c.bf16 %v2050_v31, %v2050_v31  ;;  %v2051_v42 = vmax.f32 %v1417_v32, 0.0  ;;  %v3862_v43 = vpack.c.bf16 %v2158_v34, %v2158_v34  ;;  %v2159_v45 = vmax.f32 %v1849_v35, 0.0 }
 0x16b   :  { %v3752_v46 = vpack.c.bf16 %v2048_v37, %v2048_v37  ;;  %v2049_v47 = vmax.f32 %v1409_v38, 0.0  ;;  %v3860_v48 = vpack.c.bf16 %v2156_v39, %v2156_v39  ;;  %v2157_v49 = vmax.f32 %v1841_v40, 0.0 }
 0x16c   :  { %3111 = vst.msk [vmem:[%s5856_s3 + $0x118] sm:$0xf] %vm3040_vm1, %v3754_v41  ;;  %v3755_v50 = vpack.c.bf16 %v2051_v42, %v2051_v42  ;;  %3219 = vst.msk [vmem:[%s5856_s3 + $0x2c8] sm:$0xf] %vm3040_vm1, %v3862_v43  ;;  %v3863_v51 = vpack.c.bf16 %v2159_v45, %v2159_v45 }
 0x16d   :  { %3109 = vst.msk [vmem:[%s5856_s3 + $0x110] sm:$0xf] %vm3040_vm1, %v3752_v46  ;;  %v3753_v52 = vpack.c.bf16 %v2049_v47, %v2049_v47  ;;  %3217 = vst.msk [vmem:[%s5856_s3 + $0x2c0] sm:$0xf] %vm3040_vm1, %v3860_v48  ;;  %v4082_v53 = vpop.f32.mrb[72].mxu0  ;;  %v3861_v54 = vpack.c.bf16 %v2157_v49, %v2157_v49  ;;  %v4190_v55 = vpop.f32.mrb[72].mxu1 }
 0x16e   :  { %3112 = vst.msk [vmem:[%s5856_s3 + $0x11c] sm:$0xf] %vm3040_vm1, %v3755_v50  ;;  %3220 = vst.msk [vmem:[%s5856_s3 + $0x2cc] sm:$0xf] %vm3040_vm1, %v3863_v51  ;;  %v1430_v56 = vadd.f32 %v5304_v20, %v4082_v53  ;;  %v1421_v57 = vpop.f32.mrb[73].mxu0  ;;  %v1862_v58 = vadd.f32 %v5304_v20, %v4190_v55  ;;  %v1853_v59 = vpop.f32.mrb[73].mxu1 }
 0x16f   :  { %3110 = vst.msk [vmem:[%s5856_s3 + $0x114] sm:$0xf] %vm3040_vm1, %v3753_v52  ;;  %3218 = vst.msk [vmem:[%s5856_s3 + $0x2c4] sm:$0xf] %vm3040_vm1, %v3861_v54  ;;  %v1422_v60 = vadd.f32 %v5304_v20, %v1421_v57  ;;  %v4083_v61 = vpop.f32.mrb[74].mxu0  ;;  %v1854_v62 = vadd.f32 %v5304_v20, %v1853_v59  ;;  %v4191_v63 = vpop.f32.mrb[74].mxu1 }
 0x170   :  { %v2054_v0 = vmax.f32 %v1430_v56, 0.0  ;;  %v1433_v1 = vadd.f32 %v5304_v20, %v4083_v61  ;;  %v1424_v2 = vpop.f32.mrb[75].mxu0  ;;  %v2162_v3 = vmax.f32 %v1862_v58, 0.0  ;;  %v1865_v4 = vadd.f32 %v5304_v20, %v4191_v63  ;;  %v1856_v5 = vpop.f32.mrb[75].mxu1 }
 0x171   :  { %v2052_v6 = vmax.f32 %v1422_v60, 0.0  ;;  %v1425_v7 = vadd.f32 %v5304_v20, %v1424_v2  ;;  %v2160_v8 = vmax.f32 %v1854_v62, 0.0  ;;  %v1857_v9 = vadd.f32 %v5304_v20, %v1856_v5 }
 0x172   :  { %v3758_v10 = vpack.c.bf16 %v2054_v0, %v2054_v0  ;;  %v2055_v11 = vmax.f32 %v1433_v1, 0.0  ;;  %v3866_v12 = vpack.c.bf16 %v2162_v3, %v2162_v3  ;;  %v2163_v13 = vmax.f32 %v1865_v4, 0.0 }
 0x173   :  { %v3756_v14 = vpack.c.bf16 %v2052_v6, %v2052_v6  ;;  %v2053_v15 = vmax.f32 %v1425_v7, 0.0  ;;  %v3864_v44 = vpack.c.bf16 %v2160_v8, %v2160_v8  ;;  %v2161_v16 = vmax.f32 %v1857_v9, 0.0 }
 0x174   :  { %3115 = vst.msk [vmem:[%s5856_s3 + $0x128] sm:$0xf] %vm3040_vm1, %v3758_v10  ;;  %v3759_v17 = vpack.c.bf16 %v2055_v11, %v2055_v11  ;;  %3223 = vst.msk [vmem:[%s5856_s3 + $0x2d8] sm:$0xf] %vm3040_vm1, %v3866_v12  ;;  %v3867_v18 = vpack.c.bf16 %v2163_v13, %v2163_v13 }
 0x175   :  { %3113 = vst.msk [vmem:[%s5856_s3 + $0x120] sm:$0xf] %vm3040_vm1, %v3756_v14  ;;  %v3757_v19 = vpack.c.bf16 %v2053_v15, %v2053_v15  ;;  %3221 = vst.msk [vmem:[%s5856_s3 + $0x2d0] sm:$0xf] %vm3040_vm1, %v3864_v44  ;;  %v4086_v21 = vpop.f32.mrb[76].mxu0  ;;  %v3865_v22 = vpack.c.bf16 %v2161_v16, %v2161_v16  ;;  %v4194_v23 = vpop.f32.mrb[76].mxu1 }
 0x176   :  { %3116 = vst.msk [vmem:[%s5856_s3 + $0x12c] sm:$0xf] %vm3040_vm1, %v3759_v17  ;;  %3224 = vst.msk [vmem:[%s5856_s3 + $0x2dc] sm:$0xf] %vm3040_vm1, %v3867_v18  ;;  %v1446_v24 = vadd.f32 %v5304_v20, %v4086_v21  ;;  %v1437_v25 = vpop.f32.mrb[77].mxu0  ;;  %v1878_v26 = vadd.f32 %v5304_v20, %v4194_v23  ;;  %v1869_v27 = vpop.f32.mrb[77].mxu1 }
 0x177   :  { %3114 = vst.msk [vmem:[%s5856_s3 + $0x124] sm:$0xf] %vm3040_vm1, %v3757_v19  ;;  %3222 = vst.msk [vmem:[%s5856_s3 + $0x2d4] sm:$0xf] %vm3040_vm1, %v3865_v22  ;;  %v1438_v28 = vadd.f32 %v5304_v20, %v1437_v25  ;;  %v4087_v29 = vpop.f32.mrb[78].mxu0  ;;  %v1870_v30 = vadd.f32 %v5304_v20, %v1869_v27  ;;  %v4195_v31 = vpop.f32.mrb[78].mxu1 }
 0x178   :  { %v2058_v32 = vmax.f32 %v1446_v24, 0.0  ;;  %v1449_v33 = vadd.f32 %v5304_v20, %v4087_v29  ;;  %v1440_v34 = vpop.f32.mrb[79].mxu0  ;;  %v2166_v35 = vmax.f32 %v1878_v26, 0.0  ;;  %v1881_v36 = vadd.f32 %v5304_v20, %v4195_v31  ;;  %v1872_v37 = vpop.f32.mrb[79].mxu1 }
 0x179   :  { %v2056_v38 = vmax.f32 %v1438_v28, 0.0  ;;  %v1441_v39 = vadd.f32 %v5304_v20, %v1440_v34  ;;  %v2164_v40 = vmax.f32 %v1870_v30, 0.0  ;;  %v1873_v41 = vadd.f32 %v5304_v20, %v1872_v37 }
 0x17a   :  { %v3762_v42 = vpack.c.bf16 %v2058_v32, %v2058_v32  ;;  %v2059_v43 = vmax.f32 %v1449_v33, 0.0  ;;  %v3870_v45 = vpack.c.bf16 %v2166_v35, %v2166_v35  ;;  %v2167_v46 = vmax.f32 %v1881_v36, 0.0 }
 0x17b   :  { %v3760_v47 = vpack.c.bf16 %v2056_v38, %v2056_v38  ;;  %v2057_v48 = vmax.f32 %v1441_v39, 0.0  ;;  %v3868_v49 = vpack.c.bf16 %v2164_v40, %v2164_v40  ;;  %v2165_v50 = vmax.f32 %v1873_v41, 0.0 }
 0x17c   :  { %3119 = vst.msk [vmem:[%s5856_s3 + $0x138] sm:$0xf] %vm3040_vm1, %v3762_v42  ;;  %v3763_v51 = vpack.c.bf16 %v2059_v43, %v2059_v43  ;;  %3227 = vst.msk [vmem:[%s5856_s3 + $0x2e8] sm:$0xf] %vm3040_vm1, %v3870_v45  ;;  %v3871_v52 = vpack.c.bf16 %v2167_v46, %v2167_v46 }
 0x17d   :  { %3117 = vst.msk [vmem:[%s5856_s3 + $0x130] sm:$0xf] %vm3040_vm1, %v3760_v47  ;;  %v3761_v53 = vpack.c.bf16 %v2057_v48, %v2057_v48  ;;  %3225 = vst.msk [vmem:[%s5856_s3 + $0x2e0] sm:$0xf] %vm3040_vm1, %v3868_v49  ;;  %v4090_v54 = vpop.f32.mrb[80].mxu0  ;;  %v3869_v55 = vpack.c.bf16 %v2165_v50, %v2165_v50  ;;  %v4198_v56 = vpop.f32.mrb[80].mxu1 }
 0x17e   :  { %3120 = vst.msk [vmem:[%s5856_s3 + $0x13c] sm:$0xf] %vm3040_vm1, %v3763_v51  ;;  %3228 = vst.msk [vmem:[%s5856_s3 + $0x2ec] sm:$0xf] %vm3040_vm1, %v3871_v52  ;;  %v1462_v57 = vadd.f32 %v5304_v20, %v4090_v54  ;;  %v1453_v58 = vpop.f32.mrb[81].mxu0  ;;  %v1894_v59 = vadd.f32 %v5304_v20, %v4198_v56  ;;  %v1885_v60 = vpop.f32.mrb[81].mxu1 }
 0x17f   :  { %3118 = vst.msk [vmem:[%s5856_s3 + $0x134] sm:$0xf] %vm3040_vm1, %v3761_v53  ;;  %3226 = vst.msk [vmem:[%s5856_s3 + $0x2e4] sm:$0xf] %vm3040_vm1, %v3869_v55  ;;  %v1454_v61 = vadd.f32 %v5304_v20, %v1453_v58  ;;  %v4091_v62 = vpop.f32.mrb[82].mxu0  ;;  %v1886_v63 = vadd.f32 %v5304_v20, %v1885_v60  ;;  %v4199_v0 = vpop.f32.mrb[82].mxu1 }
 0x180   :  { %v2062_v1 = vmax.f32 %v1462_v57, 0.0  ;;  %v1465_v2 = vadd.f32 %v5304_v20, %v4091_v62  ;;  %v1456_v3 = vpop.f32.mrb[83].mxu0  ;;  %v2170_v4 = vmax.f32 %v1894_v59, 0.0  ;;  %v1897_v5 = vadd.f32 %v5304_v20, %v4199_v0  ;;  %v1888_v6 = vpop.f32.mrb[83].mxu1 }
 0x181   :  { %v2060_v7 = vmax.f32 %v1454_v61, 0.0  ;;  %v1457_v8 = vadd.f32 %v5304_v20, %v1456_v3  ;;  %v2168_v9 = vmax.f32 %v1886_v63, 0.0  ;;  %v1889_v10 = vadd.f32 %v5304_v20, %v1888_v6 }
 0x182   :  { %v3766_v11 = vpack.c.bf16 %v2062_v1, %v2062_v1  ;;  %v2063_v12 = vmax.f32 %v1465_v2, 0.0  ;;  %v3874_v13 = vpack.c.bf16 %v2170_v4, %v2170_v4  ;;  %v2171_v14 = vmax.f32 %v1897_v5, 0.0 }
 0x183   :  { %v3764_v15 = vpack.c.bf16 %v2060_v7, %v2060_v7  ;;  %v2061_v44 = vmax.f32 %v1457_v8, 0.0  ;;  %v3872_v16 = vpack.c.bf16 %v2168_v9, %v2168_v9  ;;  %v2169_v17 = vmax.f32 %v1889_v10, 0.0 }
 0x184   :  { %3123 = vst.msk [vmem:[%s5856_s3 + $0x148] sm:$0xf] %vm3040_vm1, %v3766_v11  ;;  %v3767_v18 = vpack.c.bf16 %v2063_v12, %v2063_v12  ;;  %3231 = vst.msk [vmem:[%s5856_s3 + $0x2f8] sm:$0xf] %vm3040_vm1, %v3874_v13  ;;  %v3875_v19 = vpack.c.bf16 %v2171_v14, %v2171_v14 }
 0x185   :  { %3121 = vst.msk [vmem:[%s5856_s3 + $0x140] sm:$0xf] %vm3040_vm1, %v3764_v15  ;;  %v3765_v21 = vpack.c.bf16 %v2061_v44, %v2061_v44  ;;  %3229 = vst.msk [vmem:[%s5856_s3 + $0x2f0] sm:$0xf] %vm3040_vm1, %v3872_v16  ;;  %v4094_v22 = vpop.f32.mrb[84].mxu0  ;;  %v3873_v23 = vpack.c.bf16 %v2169_v17, %v2169_v17  ;;  %v4202_v24 = vpop.f32.mrb[84].mxu1 }
 0x186   :  { %3124 = vst.msk [vmem:[%s5856_s3 + $0x14c] sm:$0xf] %vm3040_vm1, %v3767_v18  ;;  %3232 = vst.msk [vmem:[%s5856_s3 + $0x2fc] sm:$0xf] %vm3040_vm1, %v3875_v19  ;;  %v1478_v25 = vadd.f32 %v5304_v20, %v4094_v22  ;;  %v1469_v26 = vpop.f32.mrb[85].mxu0  ;;  %v1910_v27 = vadd.f32 %v5304_v20, %v4202_v24  ;;  %v1901_v28 = vpop.f32.mrb[85].mxu1 }
 0x187   :  { %3122 = vst.msk [vmem:[%s5856_s3 + $0x144] sm:$0xf] %vm3040_vm1, %v3765_v21  ;;  %3230 = vst.msk [vmem:[%s5856_s3 + $0x2f4] sm:$0xf] %vm3040_vm1, %v3873_v23  ;;  %v1470_v29 = vadd.f32 %v5304_v20, %v1469_v26  ;;  %v4095_v30 = vpop.f32.mrb[86].mxu0  ;;  %v1902_v31 = vadd.f32 %v5304_v20, %v1901_v28  ;;  %v4203_v32 = vpop.f32.mrb[86].mxu1 }
 0x188   :  { %v2066_v33 = vmax.f32 %v1478_v25, 0.0  ;;  %v1481_v34 = vadd.f32 %v5304_v20, %v4095_v30  ;;  %v1472_v35 = vpop.f32.mrb[87].mxu0  ;;  %v2174_v36 = vmax.f32 %v1910_v27, 0.0  ;;  %v1913_v37 = vadd.f32 %v5304_v20, %v4203_v32  ;;  %v1904_v38 = vpop.f32.mrb[87].mxu1 }
 0x189   :  { %v2064_v39 = vmax.f32 %v1470_v29, 0.0  ;;  %v1473_v40 = vadd.f32 %v5304_v20, %v1472_v35  ;;  %v2172_v41 = vmax.f32 %v1902_v31, 0.0  ;;  %v1905_v42 = vadd.f32 %v5304_v20, %v1904_v38 }
 0x18a   :  { %v3770_v43 = vpack.c.bf16 %v2066_v33, %v2066_v33  ;;  %v2067_v45 = vmax.f32 %v1481_v34, 0.0  ;;  %v3878_v46 = vpack.c.bf16 %v2174_v36, %v2174_v36  ;;  %v2175_v47 = vmax.f32 %v1913_v37, 0.0 }
 0x18b   :  { %v3768_v48 = vpack.c.bf16 %v2064_v39, %v2064_v39  ;;  %v2065_v49 = vmax.f32 %v1473_v40, 0.0  ;;  %v3876_v50 = vpack.c.bf16 %v2172_v41, %v2172_v41  ;;  %v2173_v51 = vmax.f32 %v1905_v42, 0.0 }
 0x18c   :  { %3127 = vst.msk [vmem:[%s5856_s3 + $0x158] sm:$0xf] %vm3040_vm1, %v3770_v43  ;;  %v3771_v52 = vpack.c.bf16 %v2067_v45, %v2067_v45  ;;  %3235 = vst.msk [vmem:[%s5856_s3 + $0x308] sm:$0xf] %vm3040_vm1, %v3878_v46  ;;  %v3879_v53 = vpack.c.bf16 %v2175_v47, %v2175_v47 }
 0x18d   :  { %3125 = vst.msk [vmem:[%s5856_s3 + $0x150] sm:$0xf] %vm3040_vm1, %v3768_v48  ;;  %v3769_v54 = vpack.c.bf16 %v2065_v49, %v2065_v49  ;;  %3233 = vst.msk [vmem:[%s5856_s3 + $0x300] sm:$0xf] %vm3040_vm1, %v3876_v50  ;;  %v4098_v55 = vpop.f32.mrb[88].mxu0  ;;  %v3877_v56 = vpack.c.bf16 %v2173_v51, %v2173_v51  ;;  %v4206_v57 = vpop.f32.mrb[88].mxu1 }
 0x18e   :  { %3128 = vst.msk [vmem:[%s5856_s3 + $0x15c] sm:$0xf] %vm3040_vm1, %v3771_v52  ;;  %3236 = vst.msk [vmem:[%s5856_s3 + $0x30c] sm:$0xf] %vm3040_vm1, %v3879_v53  ;;  %v1494_v58 = vadd.f32 %v5304_v20, %v4098_v55  ;;  %v1485_v59 = vpop.f32.mrb[89].mxu0  ;;  %v1926_v60 = vadd.f32 %v5304_v20, %v4206_v57  ;;  %v1917_v61 = vpop.f32.mrb[89].mxu1 }
 0x18f   :  { %3126 = vst.msk [vmem:[%s5856_s3 + $0x154] sm:$0xf] %vm3040_vm1, %v3769_v54  ;;  %3234 = vst.msk [vmem:[%s5856_s3 + $0x304] sm:$0xf] %vm3040_vm1, %v3877_v56  ;;  %v1486_v62 = vadd.f32 %v5304_v20, %v1485_v59  ;;  %v4099_v63 = vpop.f32.mrb[90].mxu0  ;;  %v1918_v0 = vadd.f32 %v5304_v20, %v1917_v61  ;;  %v4207_v1 = vpop.f32.mrb[90].mxu1 }
 0x190   :  { %v2070_v2 = vmax.f32 %v1494_v58, 0.0  ;;  %v1497_v3 = vadd.f32 %v5304_v20, %v4099_v63  ;;  %v1488_v4 = vpop.f32.mrb[91].mxu0  ;;  %v2178_v5 = vmax.f32 %v1926_v60, 0.0  ;;  %v1929_v6 = vadd.f32 %v5304_v20, %v4207_v1  ;;  %v1920_v7 = vpop.f32.mrb[91].mxu1 }
 0x191   :  { %v2068_v8 = vmax.f32 %v1486_v62, 0.0  ;;  %v1489_v9 = vadd.f32 %v5304_v20, %v1488_v4  ;;  %v2176_v10 = vmax.f32 %v1918_v0, 0.0  ;;  %v1921_v11 = vadd.f32 %v5304_v20, %v1920_v7 }
 0x192   :  { %v3774_v12 = vpack.c.bf16 %v2070_v2, %v2070_v2  ;;  %v2071_v13 = vmax.f32 %v1497_v3, 0.0  ;;  %v3882_v14 = vpack.c.bf16 %v2178_v5, %v2178_v5  ;;  %v2179_v15 = vmax.f32 %v1929_v6, 0.0 }
 0x193   :  { %v3772_v44 = vpack.c.bf16 %v2068_v8, %v2068_v8  ;;  %v2069_v16 = vmax.f32 %v1489_v9, 0.0  ;;  %v3880_v17 = vpack.c.bf16 %v2176_v10, %v2176_v10  ;;  %v2177_v18 = vmax.f32 %v1921_v11, 0.0 }
 0x194   :  { %3131 = vst.msk [vmem:[%s5856_s3 + $0x168] sm:$0xf] %vm3040_vm1, %v3774_v12  ;;  %v3775_v19 = vpack.c.bf16 %v2071_v13, %v2071_v13  ;;  %3239 = vst.msk [vmem:[%s5856_s3 + $0x318] sm:$0xf] %vm3040_vm1, %v3882_v14  ;;  %v3883_v21 = vpack.c.bf16 %v2179_v15, %v2179_v15 }
 0x195   :  { %3129 = vst.msk [vmem:[%s5856_s3 + $0x160] sm:$0xf] %vm3040_vm1, %v3772_v44  ;;  %v3773_v22 = vpack.c.bf16 %v2069_v16, %v2069_v16  ;;  %3237 = vst.msk [vmem:[%s5856_s3 + $0x310] sm:$0xf] %vm3040_vm1, %v3880_v17  ;;  %v4102_v23 = vpop.f32.mrb[92].mxu0  ;;  %v3881_v24 = vpack.c.bf16 %v2177_v18, %v2177_v18  ;;  %v4210_v25 = vpop.f32.mrb[92].mxu1 }
 0x196   :  { %3132 = vst.msk [vmem:[%s5856_s3 + $0x16c] sm:$0xf] %vm3040_vm1, %v3775_v19  ;;  %3240 = vst.msk [vmem:[%s5856_s3 + $0x31c] sm:$0xf] %vm3040_vm1, %v3883_v21  ;;  %v1510_v26 = vadd.f32 %v5304_v20, %v4102_v23  ;;  %v1501_v27 = vpop.f32.mrb[93].mxu0  ;;  %v1942_v28 = vadd.f32 %v5304_v20, %v4210_v25  ;;  %v1933_v29 = vpop.f32.mrb[93].mxu1 }
 0x197   :  { %3130 = vst.msk [vmem:[%s5856_s3 + $0x164] sm:$0xf] %vm3040_vm1, %v3773_v22  ;;  %3238 = vst.msk [vmem:[%s5856_s3 + $0x314] sm:$0xf] %vm3040_vm1, %v3881_v24  ;;  %v1502_v30 = vadd.f32 %v5304_v20, %v1501_v27  ;;  %v4103_v31 = vpop.f32.mrb[94].mxu0  ;;  %v1934_v32 = vadd.f32 %v5304_v20, %v1933_v29  ;;  %v4211_v33 = vpop.f32.mrb[94].mxu1 }
 0x198   :  { %v2074_v34 = vmax.f32 %v1510_v26, 0.0  ;;  %v1513_v35 = vadd.f32 %v5304_v20, %v4103_v31  ;;  %v1504_v36 = vpop.f32.mrb[95].mxu0  ;;  %v2182_v37 = vmax.f32 %v1942_v28, 0.0  ;;  %v1945_v38 = vadd.f32 %v5304_v20, %v4211_v33  ;;  %v1936_v39 = vpop.f32.mrb[95].mxu1 }
 0x199   :  { %v2072_v40 = vmax.f32 %v1502_v30, 0.0  ;;  %v1505_v41 = vadd.f32 %v5304_v20, %v1504_v36  ;;  %v2180_v42 = vmax.f32 %v1934_v32, 0.0  ;;  %v1937_v43 = vadd.f32 %v5304_v20, %v1936_v39 }
 0x19a   :  { %v3778_v45 = vpack.c.bf16 %v2074_v34, %v2074_v34  ;;  %v2075_v46 = vmax.f32 %v1513_v35, 0.0  ;;  %v3886_v47 = vpack.c.bf16 %v2182_v37, %v2182_v37  ;;  %v2183_v48 = vmax.f32 %v1945_v38, 0.0 }
 0x19b   :  { %v3776_v49 = vpack.c.bf16 %v2072_v40, %v2072_v40  ;;  %v2073_v50 = vmax.f32 %v1505_v41, 0.0  ;;  %v3884_v51 = vpack.c.bf16 %v2180_v42, %v2180_v42  ;;  %v2181_v52 = vmax.f32 %v1937_v43, 0.0 }
 0x19c   :  { %3135 = vst.msk [vmem:[%s5856_s3 + $0x178] sm:$0xf] %vm3040_vm1, %v3778_v45  ;;  %v3779_v53 = vpack.c.bf16 %v2075_v46, %v2075_v46  ;;  %3243 = vst.msk [vmem:[%s5856_s3 + $0x328] sm:$0xf] %vm3040_vm1, %v3886_v47  ;;  %v3887_v54 = vpack.c.bf16 %v2183_v48, %v2183_v48 }
 0x19d   :  { %3133 = vst.msk [vmem:[%s5856_s3 + $0x170] sm:$0xf] %vm3040_vm1, %v3776_v49  ;;  %v3777_v55 = vpack.c.bf16 %v2073_v50, %v2073_v50  ;;  %3241 = vst.msk [vmem:[%s5856_s3 + $0x320] sm:$0xf] %vm3040_vm1, %v3884_v51  ;;  %v4106_v56 = vpop.f32.mrb[96].mxu0  ;;  %v3885_v57 = vpack.c.bf16 %v2181_v52, %v2181_v52  ;;  %v4214_v58 = vpop.f32.mrb[96].mxu1 }
 0x19e   :  { %3136 = vst.msk [vmem:[%s5856_s3 + $0x17c] sm:$0xf] %vm3040_vm1, %v3779_v53  ;;  %3244 = vst.msk [vmem:[%s5856_s3 + $0x32c] sm:$0xf] %vm3040_vm1, %v3887_v54  ;;  %v1526_v59 = vadd.f32 %v5304_v20, %v4106_v56  ;;  %v1517_v60 = vpop.f32.mrb[97].mxu0  ;;  %v1958_v61 = vadd.f32 %v5304_v20, %v4214_v58  ;;  %v1949_v62 = vpop.f32.mrb[97].mxu1 }
 0x19f   :  { %3134 = vst.msk [vmem:[%s5856_s3 + $0x174] sm:$0xf] %vm3040_vm1, %v3777_v55  ;;  %3242 = vst.msk [vmem:[%s5856_s3 + $0x324] sm:$0xf] %vm3040_vm1, %v3885_v57  ;;  %v1518_v63 = vadd.f32 %v5304_v20, %v1517_v60  ;;  %v4107_v0 = vpop.f32.mrb[98].mxu0  ;;  %v1950_v1 = vadd.f32 %v5304_v20, %v1949_v62  ;;  %v4215_v2 = vpop.f32.mrb[98].mxu1 }
 0x1a0   :  { %v2078_v3 = vmax.f32 %v1526_v59, 0.0  ;;  %v1529_v4 = vadd.f32 %v5304_v20, %v4107_v0  ;;  %v1520_v5 = vpop.f32.mrb[99].mxu0  ;;  %v2186_v6 = vmax.f32 %v1958_v61, 0.0  ;;  %v1961_v7 = vadd.f32 %v5304_v20, %v4215_v2  ;;  %v1952_v8 = vpop.f32.mrb[99].mxu1  ;;  %v4333_v58 = vld [vmem:[%s5855_s2] ss:$0 sm:$0xff] }
 0x1a1   :  { %v2076_v9 = vmax.f32 %v1518_v63, 0.0  ;;  %v1521_v10 = vadd.f32 %v5304_v20, %v1520_v5  ;;  %v2184_v11 = vmax.f32 %v1950_v1, 0.0  ;;  %v1953_v12 = vadd.f32 %v5304_v20, %v1952_v8 }
 0x1a2   :  { %v3782_v13 = vpack.c.bf16 %v2078_v3, %v2078_v3  ;;  %v2079_v14 = vmax.f32 %v1529_v4, 0.0  ;;  %v3890_v15 = vpack.c.bf16 %v2186_v6, %v2186_v6  ;;  %v2187_v44 = vmax.f32 %v1961_v7, 0.0 }
 0x1a3   :  { %v3780_v16 = vpack.c.bf16 %v2076_v9, %v2076_v9  ;;  %v2077_v17 = vmax.f32 %v1521_v10, 0.0  ;;  %v3888_v18 = vpack.c.bf16 %v2184_v11, %v2184_v11  ;;  %v2185_v19 = vmax.f32 %v1953_v12, 0.0 }
 0x1a4   :  { %3139 = vst.msk [vmem:[%s5856_s3 + $0x188] sm:$0xf] %vm3040_vm1, %v3782_v13  ;;  %v3783_v21 = vpack.c.bf16 %v2079_v14, %v2079_v14  ;;  %3247 = vst.msk [vmem:[%s5856_s3 + $0x338] sm:$0xf] %vm3040_vm1, %v3890_v15  ;;  %v3891_v22 = vpack.c.bf16 %v2187_v44, %v2187_v44 }
 0x1a5   :  { %3137 = vst.msk [vmem:[%s5856_s3 + $0x180] sm:$0xf] %vm3040_vm1, %v3780_v16  ;;  %v3781_v23 = vpack.c.bf16 %v2077_v17, %v2077_v17  ;;  %3245 = vst.msk [vmem:[%s5856_s3 + $0x330] sm:$0xf] %vm3040_vm1, %v3888_v18  ;;  %v4110_v24 = vpop.f32.mrb[100].mxu0  ;;  %v3889_v25 = vpack.c.bf16 %v2185_v19, %v2185_v19  ;;  %v4218_v26 = vpop.f32.mrb[100].mxu1 }
 0x1a6   :  { %3140 = vst.msk [vmem:[%s5856_s3 + $0x18c] sm:$0xf] %vm3040_vm1, %v3783_v21  ;;  %3248 = vst.msk [vmem:[%s5856_s3 + $0x33c] sm:$0xf] %vm3040_vm1, %v3891_v22  ;;  %v1542_v27 = vadd.f32 %v5304_v20, %v4110_v24  ;;  %v1533_v28 = vpop.f32.mrb[101].mxu0  ;;  %v1974_v29 = vadd.f32 %v5304_v20, %v4218_v26  ;;  %v1965_v30 = vpop.f32.mrb[101].mxu1 }
 0x1a7   :  { %3138 = vst.msk [vmem:[%s5856_s3 + $0x184] sm:$0xf] %vm3040_vm1, %v3781_v23  ;;  %3246 = vst.msk [vmem:[%s5856_s3 + $0x334] sm:$0xf] %vm3040_vm1, %v3889_v25  ;;  %v1534_v31 = vadd.f32 %v5304_v20, %v1533_v28  ;;  %v4111_v32 = vpop.f32.mrb[102].mxu0  ;;  %v1966_v33 = vadd.f32 %v5304_v20, %v1965_v30  ;;  %v4219_v34 = vpop.f32.mrb[102].mxu1 }
 0x1a8   :  { %v2082_v35 = vmax.f32 %v1542_v27, 0.0  ;;  %v1545_v36 = vadd.f32 %v5304_v20, %v4111_v32  ;;  %v1536_v37 = vpop.f32.mrb[103].mxu0  ;;  %v2190_v38 = vmax.f32 %v1974_v29, 0.0  ;;  %v1977_v39 = vadd.f32 %v5304_v20, %v4219_v34  ;;  %v1968_v40 = vpop.f32.mrb[103].mxu1 }
 0x1a9   :  { %v2080_v41 = vmax.f32 %v1534_v31, 0.0  ;;  %v1537_v42 = vadd.f32 %v5304_v20, %v1536_v37  ;;  %v2188_v43 = vmax.f32 %v1966_v33, 0.0  ;;  %v1969_v45 = vadd.f32 %v5304_v20, %v1968_v40 }
 0x1aa   :  { %v3786_v46 = vpack.c.bf16 %v2082_v35, %v2082_v35  ;;  %v2083_v47 = vmax.f32 %v1545_v36, 0.0  ;;  %v3894_v48 = vpack.c.bf16 %v2190_v38, %v2190_v38  ;;  %v2191_v49 = vmax.f32 %v1977_v39, 0.0 }
 0x1ab   :  { %v3784_v50 = vpack.c.bf16 %v2080_v41, %v2080_v41  ;;  %v2081_v51 = vmax.f32 %v1537_v42, 0.0  ;;  %v3892_v52 = vpack.c.bf16 %v2188_v43, %v2188_v43  ;;  %v2189_v53 = vmax.f32 %v1969_v45, 0.0 }
 0x1ac   :  { %3143 = vst.msk [vmem:[%s5856_s3 + $0x198] sm:$0xf] %vm3040_vm1, %v3786_v46  ;;  %v3787_v54 = vpack.c.bf16 %v2083_v47, %v2083_v47  ;;  %3251 = vst.msk [vmem:[%s5856_s3 + $0x348] sm:$0xf] %vm3040_vm1, %v3894_v48  ;;  %v3895_v20 = vpack.c.bf16 %v2191_v49, %v2191_v49 }
 0x1ad   :  { %3141 = vst.msk [vmem:[%s5856_s3 + $0x190] sm:$0xf] %vm3040_vm1, %v3784_v50  ;;  %v3785_v55 = vpack.c.bf16 %v2081_v51, %v2081_v51  ;;  %3249 = vst.msk [vmem:[%s5856_s3 + $0x340] sm:$0xf] %vm3040_vm1, %v3892_v52  ;;  %v4114_v56 = vpop.f32.mrb[104].mxu0  ;;  %v3893_v57 = vpack.c.bf16 %v2189_v53, %v2189_v53 }
 0x1ae   :  { %3144 = vst.msk [vmem:[%s5856_s3 + $0x19c] sm:$0xf] %vm3040_vm1, %v3787_v54  ;;  %3252 = vst.msk [vmem:[%s5856_s3 + $0x34c] sm:$0xf] %vm3040_vm1, %v3895_v20  ;;  %v1558_v59 = vadd.f32 %v4333_v58, %v4114_v56  ;;  %v1549_v60 = vpop.f32.mrb[105].mxu0 }
 0x1af   :  { %3142 = vst.msk [vmem:[%s5856_s3 + $0x194] sm:$0xf] %vm3040_vm1, %v3785_v55  ;;  %3250 = vst.msk [vmem:[%s5856_s3 + $0x344] sm:$0xf] %vm3040_vm1, %v3893_v57  ;;  %v1550_v61 = vadd.f32 %v4333_v58, %v1549_v60  ;;  %v4115_v62 = vpop.f32.mrb[106].mxu0 }
 0x1b0   :  { %v2086_v63 = vmax.f32 %v1558_v59, 0.0  ;;  %v1561_v0 = vadd.f32 %v4333_v58, %v4115_v62  ;;  %v1552_v1 = vpop.f32.mrb[107].mxu0 }
 0x1b1   :  { %v2084_v2 = vmax.f32 %v1550_v61, 0.0  ;;  %v1553_v3 = vadd.f32 %v4333_v58, %v1552_v1 }
 0x1b2   :  { %v3790_v4 = vpack.c.bf16 %v2086_v63, %v2086_v63  ;;  %v2087_v5 = vmax.f32 %v1561_v0, 0.0 }
 0x1b3   :  { %v3788_v6 = vpack.c.bf16 %v2084_v2, %v2084_v2  ;;  %v2085_v7 = vmax.f32 %v1553_v3, 0.0 }
 0x1b4   :  { %3147 = vst.msk [vmem:[%s5856_s3 + $0x1a8] sm:$0xf] %vm3040_vm1, %v3790_v4  ;;  %v3791_v8 = vpack.c.bf16 %v2087_v5, %v2087_v5 }
 0x1b5   :  { %3145 = vst.msk [vmem:[%s5856_s3 + $0x1a0] sm:$0xf] %vm3040_vm1, %v3788_v6  ;;  %v3789_v9 = vpack.c.bf16 %v2085_v7, %v2085_v7 }
 0x1b6   :  { %3148 = vst.msk [vmem:[%s5856_s3 + $0x1ac] sm:$0xf] %vm3040_vm1, %v3791_v8 }
 0x1b7   :  { %3146 = vst.msk [vmem:[%s5856_s3 + $0x1a4] sm:$0xf] %vm3040_vm1, %v3789_v9 }

// kernel: qnetwork_forward.5
= control target key start
LH: loop header
LB: loop body
LE: loop exit
PB: predicated region body
PF: predicated region fallthrough
CT: control target
= control target key end

     0   :  { %vm2667_vm0 = vcmask 519168   ;;  %s5136_s1 = inlined_call_operand.vmem [shape: bf16[128,64], index: 1, kind: input, shape index: {}]   ;;  %s5137_s0 = inlined_call_operand.vmem [shape: bf16[1568,128], index: 0, kind: input, shape index: {}]   ;;  %s5138_s2 = inlined_call_operand.vmem [shape: f32[1,64], index: 2, kind: input, shape index: {}]   ;;  %s5139_s3 = inlined_call_operand.vmem [shape: bf16[1568,64], index: 3, kind: output, shape index: {}]  }
   0x1   :  { %v3701_v0 = vld [vmem:[%s5136_s1] sm:$0xff]   ;;  %v3702_v1 = vld [vmem:[%s5136_s1 + $0x8] sm:$0xff]   ;;  %v3703_v2 = vld [vmem:[%s5136_s1 + $0x10] sm:$0xff]  }
   0x2   :  { %3473 = vmatprep.subr.bf16.mxu0 %v3701_v0  ;;  %3685 = vmatprep.subr.bf16.mxu1 %v3701_v0  ;;  %v3704_v3 = vld [vmem:[%s5136_s1 + $0x18] sm:$0xff]   ;;  %v3709_v4 = vld [vmem:[%s5137_s0] sm:$0xff]   ;;  %v3711_v5 = vld [vmem:[%s5137_s0 + $0x190] sm:$0xff]  }
   0x3   :  { %3474 = vmatpush3.bf16.msra.mxu0 %v3701_v0  ;;  %3693 = vmatpush3.bf16.msra.mxu1 %v3701_v0  ;;  %v3705_v6 = vld [vmem:[%s5136_s1 + $0x20] sm:$0xff]   ;;  %v3706_v7 = vld [vmem:[%s5136_s1 + $0x28] sm:$0xff]   ;;  %v3707_v8 = vld [vmem:[%s5136_s1 + $0x30] sm:$0xff]  }
   0x4   :  { %3475 = vmatprep.subr.bf16.mxu0 %v3702_v1  ;;  %3686 = vmatprep.subr.bf16.mxu1 %v3702_v1  ;;  %v3708_v9 = vld [vmem:[%s5136_s1 + $0x38] sm:$0xff]   ;;  %v3710_v10 = vld [vmem:[%s5137_s0 + $0x8] sm:$0xff]   ;;  %v3713_v12 = vld [vmem:[%s5137_s0 + $0x10] sm:$0xff]  }
   0x5   :  { %3489 = vmatprep.mubr.bf16.mxu0 %v3709_v4  ;;  %3589 = vmatprep.mubr.bf16.mxu1 %v3711_v5  ;;  %v3712_v11 = vld [vmem:[%s5137_s0 + $0x198] sm:$0xff]   ;;  %v3715_v13 = vld [vmem:[%s5137_s0 + $0x1a0] sm:$0xff]   ;;  %v3716_v15 = vld [vmem:[%s5137_s0 + $0x1a8] sm:$0xff]  }
   0x6   :  { %v3714_v14 = vld [vmem:[%s5137_s0 + $0x18] sm:$0xff]   ;;  %v3717_v16 = vld [vmem:[%s5137_s0 + $0x20] sm:$0xff]   ;;  %v3719_v17 = vld [vmem:[%s5137_s0 + $0x1b0] sm:$0xff]  }
   0x7   :  { %3476 = vmatpush3.bf16.msra.mxu0 %v3702_v1  ;;  %3694 = vmatpush3.bf16.msra.mxu1 %v3702_v1  ;;  %v3718_v18 = vld [vmem:[%s5137_s0 + $0x28] sm:$0xff]   ;;  %v3720_v19 = vld [vmem:[%s5137_s0 + $0x1b8] sm:$0xff]   ;;  %v3721_v20 = vld [vmem:[%s5137_s0 + $0x30] sm:$0xff]  }
   0x8   :  { %3477 = vmatprep.subr.bf16.mxu0 %v3703_v2  ;;  %3687 = vmatprep.subr.bf16.mxu1 %v3703_v2  ;;  %v3723_v21 = vld [vmem:[%s5137_s0 + $0x1c0] sm:$0xff]   ;;  %v3722_v22 = vld [vmem:[%s5137_s0 + $0x38] sm:$0xff]   ;;  %v3724_v23 = vld [vmem:[%s5137_s0 + $0x1c8] sm:$0xff]  }
   0x9   :  { %v3725_v24 = vld [vmem:[%s5137_s0 + $0x40] sm:$0xff]   ;;  %v3727_v25 = vld [vmem:[%s5137_s0 + $0x1d0] sm:$0xff]   ;;  %v3726_v26 = vld [vmem:[%s5137_s0 + $0x48] sm:$0xff]  }
   0xa   :  { %v3728_v27 = vld [vmem:[%s5137_s0 + $0x1d8] sm:$0xff]   ;;  %v3729_v28 = vld [vmem:[%s5137_s0 + $0x50] sm:$0xff]   ;;  %v3731_v29 = vld [vmem:[%s5137_s0 + $0x1e0] sm:$0xff]  }
   0xb   :  { %3478 = vmatpush3.bf16.msra.mxu0 %v3703_v2  ;;  %3695 = vmatpush3.bf16.msra.mxu1 %v3703_v2  ;;  %v3730_v30 = vld [vmem:[%s5137_s0 + $0x58] sm:$0xff]   ;;  %v3732_v31 = vld [vmem:[%s5137_s0 + $0x1e8] sm:$0xff]   ;;  %v3733_v32 = vld [vmem:[%s5137_s0 + $0x60] sm:$0xff]  }
   0xc   :  { %3479 = vmatprep.subr.bf16.mxu0 %v3704_v3  ;;  %3688 = vmatprep.subr.bf16.mxu1 %v3704_v3  ;;  %v3735_v33 = vld [vmem:[%s5137_s0 + $0x1f0] sm:$0xff]   ;;  %v3734_v34 = vld [vmem:[%s5137_s0 + $0x68] sm:$0xff]   ;;  %v3736_v35 = vld [vmem:[%s5137_s0 + $0x1f8] sm:$0xff]  }
   0xd   :  { %v3737_v36 = vld [vmem:[%s5137_s0 + $0x70] sm:$0xff]   ;;  %v3739_v37 = vld [vmem:[%s5137_s0 + $0x200] sm:$0xff]   ;;  %v3738_v38 = vld [vmem:[%s5137_s0 + $0x78] sm:$0xff]  }
   0xe   :  { %v3740_v39 = vld [vmem:[%s5137_s0 + $0x208] sm:$0xff]   ;;  %v3741_v40 = vld [vmem:[%s5137_s0 + $0x80] sm:$0xff]   ;;  %v3743_v41 = vld [vmem:[%s5137_s0 + $0x210] sm:$0xff]  }
   0xf   :  { %3480 = vmatpush3.bf16.msra.mxu0 %v3704_v3  ;;  %3696 = vmatpush3.bf16.msra.mxu1 %v3704_v3  ;;  %v3742_v42 = vld [vmem:[%s5137_s0 + $0x88] sm:$0xff]   ;;  %v3744_v43 = vld [vmem:[%s5137_s0 + $0x218] sm:$0xff]   ;;  %v3745_v44 = vld [vmem:[%s5137_s0 + $0x90] sm:$0xff]  }
  0x10   :  { %3481 = vmatprep.subr.bf16.mxu0 %v3705_v6  ;;  %3689 = vmatprep.subr.bf16.mxu1 %v3705_v6  ;;  %v3747_v45 = vld [vmem:[%s5137_s0 + $0x220] sm:$0xff]   ;;  %v3746_v46 = vld [vmem:[%s5137_s0 + $0x98] sm:$0xff]   ;;  %v3748_v47 = vld [vmem:[%s5137_s0 + $0x228] sm:$0xff]  }
  0x11   :  { %v3749_v48 = vld [vmem:[%s5137_s0 + $0xa0] sm:$0xff]   ;;  %v3751_v49 = vld [vmem:[%s5137_s0 + $0x230] sm:$0xff]   ;;  %v3750_v50 = vld [vmem:[%s5137_s0 + $0xa8] sm:$0xff]  }
  0x12   :  { %v3752_v51 = vld [vmem:[%s5137_s0 + $0x238] sm:$0xff]   ;;  %v3753_v52 = vld [vmem:[%s5137_s0 + $0xb0] sm:$0xff]   ;;  %v3755_v53 = vld [vmem:[%s5137_s0 + $0x240] sm:$0xff]  }
  0x13   :  { %3482 = vmatpush3.bf16.msra.mxu0 %v3705_v6  ;;  %3697 = vmatpush3.bf16.msra.mxu1 %v3705_v6  ;;  %v3754_v54 = vld [vmem:[%s5137_s0 + $0xb8] sm:$0xff]   ;;  %v3756_v55 = vld [vmem:[%s5137_s0 + $0x248] sm:$0xff]   ;;  %v3757_v56 = vld [vmem:[%s5137_s0 + $0xc0] sm:$0xff]  }
  0x14   :  { %3483 = vmatprep.subr.bf16.mxu0 %v3706_v7  ;;  %3690 = vmatprep.subr.bf16.mxu1 %v3706_v7  ;;  %v3759_v57 = vld [vmem:[%s5137_s0 + $0x250] sm:$0xff]   ;;  %v3758_v58 = vld [vmem:[%s5137_s0 + $0xc8] sm:$0xff]   ;;  %v3760_v59 = vld [vmem:[%s5137_s0 + $0x258] sm:$0xff]  }
  0x15   :  { %v3761_v60 = vld [vmem:[%s5137_s0 + $0xd0] sm:$0xff]   ;;  %v3763_v61 = vld [vmem:[%s5137_s0 + $0x260] sm:$0xff]   ;;  %v3762_v62 = vld [vmem:[%s5137_s0 + $0xd8] sm:$0xff]  }
  0x16   :  { %v3764_v63 = vld [vmem:[%s5137_s0 + $0x268] sm:$0xff]   ;;  %v3765_v0 = vld [vmem:[%s5137_s0 + $0xe0] sm:$0xff]   ;;  %v3767_v1 = vld [vmem:[%s5137_s0 + $0x270] sm:$0xff]  }
  0x17   :  { %3484 = vmatpush3.bf16.msra.mxu0 %v3706_v7  ;;  %3698 = vmatpush3.bf16.msra.mxu1 %v3706_v7  ;;  %v3766_v2 = vld [vmem:[%s5137_s0 + $0xe8] sm:$0xff]   ;;  %v3768_v3 = vld [vmem:[%s5137_s0 + $0x278] sm:$0xff]   ;;  %v3769_v4 = vld [vmem:[%s5137_s0 + $0xf0] sm:$0xff]  }
  0x18   :  { %3485 = vmatprep.subr.bf16.mxu0 %v3707_v8  ;;  %3691 = vmatprep.subr.bf16.mxu1 %v3707_v8  ;;  %v3771_v5 = vld [vmem:[%s5137_s0 + $0x280] sm:$0xff]   ;;  %v3770_v6 = vld [vmem:[%s5137_s0 + $0xf8] sm:$0xff]   ;;  %v3772_v7 = vld [vmem:[%s5137_s0 + $0x288] sm:$0xff]  }
  0x1b   :  { %3486 = vmatpush3.bf16.msra.mxu0 %v3707_v8  ;;  %3699 = vmatpush3.bf16.msra.mxu1 %v3707_v8  ;;  %v3773_v8 = vld [vmem:[%s5137_s0 + $0x100] sm:$0xff]  }
  0x1c   :  { %3487 = vmatprep.subr.bf16.mxu0 %v3708_v9  ;;  %3692 = vmatprep.subr.bf16.mxu1 %v3708_v9 }
  0x1f   :  { %3488 = vmatpush3.bf16.msra.mxu0 %v3708_v9  ;;  %3700 = vmatpush3.bf16.msra.mxu1 %v3708_v9  ;;  %v3775_v9 = vld [vmem:[%s5137_s0 + $0x290] sm:$0xff]  }
  0x22   :  { %3490 = vmatmul.mubr.bf16.vlgmr.msra.gmra.mrb[0].mxu0 %v3710_v10  ;;  %3590 = vmatmul.mubr.bf16.vlgmr.msra.gmra.mrb[0].mxu1 %v3712_v11  ;;  %v3774_v10 = vld [vmem:[%s5137_s0 + $0x108] sm:$0xff]   ;;  %v3776_v11 = vld [vmem:[%s5137_s0 + $0x298] sm:$0xff]  }
  0x23   :  { %3493 = vmatprep.mubr.bf16.mxu0 %v3713_v12  ;;  %3593 = vmatprep.mubr.bf16.mxu1 %v3715_v13  ;;  %v3777_v12 = vld [vmem:[%s5137_s0 + $0x110] sm:$0xff]   ;;  %v3779_v13 = vld [vmem:[%s5137_s0 + $0x2a0] sm:$0xff]  }
  0x2a   :  { %3494 = vmatmul.mubr.bf16.gmra.mrb[4].mxu0 %v3714_v14  ;;  %3594 = vmatmul.mubr.bf16.gmra.mrb[4].mxu1 %v3716_v15  ;;  %v3778_v14 = vld [vmem:[%s5137_s0 + $0x118] sm:$0xff]   ;;  %v3780_v15 = vld [vmem:[%s5137_s0 + $0x2a8] sm:$0xff]  }
  0x2b   :  { %3497 = vmatprep.mubr.bf16.mxu0 %v3717_v16  ;;  %3597 = vmatprep.mubr.bf16.mxu1 %v3719_v17  ;;  %v3781_v16 = vld [vmem:[%s5137_s0 + $0x120] sm:$0xff]   ;;  %v3783_v17 = vld [vmem:[%s5137_s0 + $0x2b0] sm:$0xff]  }
  0x32   :  { %3498 = vmatmul.mubr.bf16.gmra.mrb[8].mxu0 %v3718_v18  ;;  %3598 = vmatmul.mubr.bf16.gmra.mrb[8].mxu1 %v3720_v19  ;;  %v3782_v18 = vld [vmem:[%s5137_s0 + $0x128] sm:$0xff]   ;;  %v3784_v19 = vld [vmem:[%s5137_s0 + $0x2b8] sm:$0xff]  }
  0x33   :  { %3501 = vmatprep.mubr.bf16.mxu0 %v3721_v20  ;;  %3601 = vmatprep.mubr.bf16.mxu1 %v3723_v21  ;;  %v3785_v20 = vld [vmem:[%s5137_s0 + $0x130] sm:$0xff]   ;;  %v3787_v21 = vld [vmem:[%s5137_s0 + $0x2c0] sm:$0xff]  }
  0x3a   :  { %3502 = vmatmul.mubr.bf16.gmra.mrb[12].mxu0 %v3722_v22  ;;  %3602 = vmatmul.mubr.bf16.gmra.mrb[12].mxu1 %v3724_v23  ;;  %v3786_v22 = vld [vmem:[%s5137_s0 + $0x138] sm:$0xff]   ;;  %v3788_v23 = vld [vmem:[%s5137_s0 + $0x2c8] sm:$0xff]  }
  0x3b   :  { %3505 = vmatprep.mubr.bf16.mxu0 %v3725_v24  ;;  %3605 = vmatprep.mubr.bf16.mxu1 %v3727_v25  ;;  %v3789_v24 = vld [vmem:[%s5137_s0 + $0x140] sm:$0xff]   ;;  %v3791_v25 = vld [vmem:[%s5137_s0 + $0x2d0] sm:$0xff]  }
  0x42   :  { %3506 = vmatmul.mubr.bf16.gmra.mrb[16].mxu0 %v3726_v26  ;;  %3606 = vmatmul.mubr.bf16.gmra.mrb[16].mxu1 %v3728_v27  ;;  %v3790_v26 = vld [vmem:[%s5137_s0 + $0x148] sm:$0xff]   ;;  %v3792_v27 = vld [vmem:[%s5137_s0 + $0x2d8] sm:$0xff]  }
  0x43   :  { %3509 = vmatprep.mubr.bf16.mxu0 %v3729_v28  ;;  %3609 = vmatprep.mubr.bf16.mxu1 %v3731_v29  ;;  %v3793_v28 = vld [vmem:[%s5137_s0 + $0x150] sm:$0xff]   ;;  %v3795_v29 = vld [vmem:[%s5137_s0 + $0x2e0] sm:$0xff]  }
  0x4a   :  { %3510 = vmatmul.mubr.bf16.gmra.mrb[20].mxu0 %v3730_v30  ;;  %3610 = vmatmul.mubr.bf16.gmra.mrb[20].mxu1 %v3732_v31  ;;  %v3794_v30 = vld [vmem:[%s5137_s0 + $0x158] sm:$0xff]   ;;  %v3796_v31 = vld [vmem:[%s5137_s0 + $0x2e8] sm:$0xff]  }
  0x4b   :  { %3513 = vmatprep.mubr.bf16.mxu0 %v3733_v32  ;;  %3613 = vmatprep.mubr.bf16.mxu1 %v3735_v33  ;;  %v3797_v32 = vld [vmem:[%s5137_s0 + $0x160] sm:$0xff]   ;;  %v3799_v33 = vld [vmem:[%s5137_s0 + $0x2f0] sm:$0xff]  }
  0x52   :  { %3514 = vmatmul.mubr.bf16.gmra.mrb[24].mxu0 %v3734_v34  ;;  %3614 = vmatmul.mubr.bf16.gmra.mrb[24].mxu1 %v3736_v35  ;;  %v3798_v34 = vld [vmem:[%s5137_s0 + $0x168] sm:$0xff]   ;;  %v3800_v35 = vld [vmem:[%s5137_s0 + $0x2f8] sm:$0xff]  }
  0x53   :  { %3517 = vmatprep.mubr.bf16.mxu0 %v3737_v36  ;;  %3617 = vmatprep.mubr.bf16.mxu1 %v3739_v37  ;;  %v3801_v36 = vld [vmem:[%s5137_s0 + $0x170] sm:$0xff]   ;;  %v3803_v37 = vld [vmem:[%s5137_s0 + $0x300] sm:$0xff]  }
  0x5a   :  { %3518 = vmatmul.mubr.bf16.gmra.mrb[28].mxu0 %v3738_v38  ;;  %3618 = vmatmul.mubr.bf16.gmra.mrb[28].mxu1 %v3740_v39  ;;  %v3802_v38 = vld [vmem:[%s5137_s0 + $0x178] sm:$0xff]   ;;  %v3804_v39 = vld [vmem:[%s5137_s0 + $0x308] sm:$0xff]  }
  0x5b   :  { %3521 = vmatprep.mubr.bf16.mxu0 %v3741_v40  ;;  %3621 = vmatprep.mubr.bf16.mxu1 %v3743_v41  ;;  %v3805_v40 = vld [vmem:[%s5137_s0 + $0x180] sm:$0xff]   ;;  %v3806_v41 = vld [vmem:[%s5137_s0 + $0x188] sm:$0xff]  }
  0x62   :  { %3522 = vmatmul.mubr.bf16.gmra.mrb[32].mxu0 %v3742_v42  ;;  %3622 = vmatmul.mubr.bf16.gmra.mrb[32].mxu1 %v3744_v43  ;;  %v4149_v42 = vld [vmem:[%s5138_s2] ss:$0 sm:$0xff] }
  0x63   :  { %3525 = vmatprep.mubr.bf16.mxu0 %v3745_v44  ;;  %3625 = vmatprep.mubr.bf16.mxu1 %v3747_v45 }
  0x6a   :  { %3526 = vmatmul.mubr.bf16.gmra.mrb[36].mxu0 %v3746_v46  ;;  %3626 = vmatmul.mubr.bf16.gmra.mrb[36].mxu1 %v3748_v47 }
  0x6b   :  { %3529 = vmatprep.mubr.bf16.mxu0 %v3749_v48  ;;  %3629 = vmatprep.mubr.bf16.mxu1 %v3751_v49 }
  0x72   :  { %3530 = vmatmul.mubr.bf16.gmra.mrb[40].mxu0 %v3750_v50  ;;  %3630 = vmatmul.mubr.bf16.gmra.mrb[40].mxu1 %v3752_v51 }
  0x73   :  { %3533 = vmatprep.mubr.bf16.mxu0 %v3753_v52  ;;  %3633 = vmatprep.mubr.bf16.mxu1 %v3755_v53 }
  0x7a   :  { %3534 = vmatmul.mubr.bf16.gmra.mrb[44].mxu0 %v3754_v54  ;;  %3634 = vmatmul.mubr.bf16.gmra.mrb[44].mxu1 %v3756_v55 }
  0x7b   :  { %3537 = vmatprep.mubr.bf16.mxu0 %v3757_v56  ;;  %3637 = vmatprep.mubr.bf16.mxu1 %v3759_v57 }
  0x82   :  { %3538 = vmatmul.mubr.bf16.gmra.mrb[48].mxu0 %v3758_v58  ;;  %3638 = vmatmul.mubr.bf16.gmra.mrb[48].mxu1 %v3760_v59 }
  0x83   :  { %3541 = vmatprep.mubr.bf16.mxu0 %v3761_v60  ;;  %3641 = vmatprep.mubr.bf16.mxu1 %v3763_v61 }
  0x8a   :  { %3542 = vmatmul.mubr.bf16.gmra.mrb[52].mxu0 %v3762_v62  ;;  %3642 = vmatmul.mubr.bf16.gmra.mrb[52].mxu1 %v3764_v63 }
  0x8b   :  { %3545 = vmatprep.mubr.bf16.mxu0 %v3765_v0  ;;  %3645 = vmatprep.mubr.bf16.mxu1 %v3767_v1 }
  0x92   :  { %3546 = vmatmul.mubr.bf16.gmra.mrb[56].mxu0 %v3766_v2  ;;  %3646 = vmatmul.mubr.bf16.gmra.mrb[56].mxu1 %v3768_v3 }
  0x93   :  { %3549 = vmatprep.mubr.bf16.mxu0 %v3769_v4  ;;  %3649 = vmatprep.mubr.bf16.mxu1 %v3771_v5 }
  0x9a   :  { %3550 = vmatmul.mubr.bf16.gmra.mrb[60].mxu0 %v3770_v6  ;;  %3650 = vmatmul.mubr.bf16.gmra.mrb[60].mxu1 %v3772_v7 }
  0x9b   :  { %3553 = vmatprep.mubr.bf16.mxu0 %v3773_v8  ;;  %3653 = vmatprep.mubr.bf16.mxu1 %v3775_v9 }
  0xa2   :  { %3554 = vmatmul.mubr.bf16.gmra.mrb[64].mxu0 %v3774_v10  ;;  %3654 = vmatmul.mubr.bf16.gmra.mrb[64].mxu1 %v3776_v11 }
  0xa3   :  { %3557 = vmatprep.mubr.bf16.mxu0 %v3777_v12  ;;  %3657 = vmatprep.mubr.bf16.mxu1 %v3779_v13 }
  0xaa   :  { %3558 = vmatmul.mubr.bf16.gmra.mrb[68].mxu0 %v3778_v14  ;;  %3658 = vmatmul.mubr.bf16.gmra.mrb[68].mxu1 %v3780_v15 }
  0xab   :  { %3561 = vmatprep.mubr.bf16.mxu0 %v3781_v16  ;;  %3661 = vmatprep.mubr.bf16.mxu1 %v3783_v17 }
  0xb2   :  { %3562 = vmatmul.mubr.bf16.gmra.mrb[72].mxu0 %v3782_v18  ;;  %3662 = vmatmul.mubr.bf16.gmra.mrb[72].mxu1 %v3784_v19 }
  0xb3   :  { %3565 = vmatprep.mubr.bf16.mxu0 %v3785_v20  ;;  %3665 = vmatprep.mubr.bf16.mxu1 %v3787_v21 }
  0xba   :  { %3566 = vmatmul.mubr.bf16.gmra.mrb[76].mxu0 %v3786_v22  ;;  %3666 = vmatmul.mubr.bf16.gmra.mrb[76].mxu1 %v3788_v23 }
  0xbb   :  { %3569 = vmatprep.mubr.bf16.mxu0 %v3789_v24  ;;  %3669 = vmatprep.mubr.bf16.mxu1 %v3791_v25 }
  0xc2   :  { %3570 = vmatmul.mubr.bf16.gmra.mrb[80].mxu0 %v3790_v26  ;;  %3670 = vmatmul.mubr.bf16.gmra.mrb[80].mxu1 %v3792_v27 }
  0xc3   :  { %3573 = vmatprep.mubr.bf16.mxu0 %v3793_v28  ;;  %3673 = vmatprep.mubr.bf16.mxu1 %v3795_v29 }
  0xca   :  { %3574 = vmatmul.mubr.bf16.gmra.mrb[84].mxu0 %v3794_v30  ;;  %3674 = vmatmul.mubr.bf16.gmra.mrb[84].mxu1 %v3796_v31 }
  0xcb   :  { %3577 = vmatprep.mubr.bf16.mxu0 %v3797_v32  ;;  %3677 = vmatprep.mubr.bf16.mxu1 %v3799_v33 }
  0xd2   :  { %3578 = vmatmul.mubr.bf16.gmra.mrb[88].mxu0 %v3798_v34  ;;  %3678 = vmatmul.mubr.bf16.gmra.mrb[88].mxu1 %v3800_v35 }
  0xd3   :  { %3581 = vmatprep.mubr.bf16.mxu0 %v3801_v36  ;;  %3681 = vmatprep.mubr.bf16.mxu1 %v3803_v37 }
  0xda   :  { %3582 = vmatmul.mubr.bf16.gmra.mrb[92].mxu0 %v3802_v38  ;;  %3682 = vmatmul.mubr.bf16.gmra.mrb[92].mxu1 %v3804_v39 }
  0xdb   :  { %3585 = vmatprep.mubr.bf16.mxu0 %v3805_v40 }
  0xe2   :  { %3586 = vmatmul.mubr.bf16.gmra.mrb[96].mxu0 %v3806_v41 }
  0xf5   :  { %v3491_v43 = vpop.f32.mrb[0].mxu0  ;;  %v3591_v44 = vpop.f32.mrb[0].mxu1 }
  0xf6   :  { %v913_v45 = vadd.f32 %v3491_v43, %v4149_v42  ;;  %v904_v46 = vpop.f32.mrb[1].mxu0  ;;  %v1313_v47 = vadd.f32 %v3591_v44, %v4149_v42  ;;  %v1304_v48 = vpop.f32.mrb[1].mxu1 }
  0xf7   :  { %v905_v49 = vadd.f32 %v4149_v42, %v904_v46  ;;  %v3492_v50 = vpop.f32.mrb[2].mxu0  ;;  %v1305_v51 = vadd.f32 %v4149_v42, %v1304_v48  ;;  %v3592_v52 = vpop.f32.mrb[2].mxu1 }
  0xf8   :  { %v1689_v53 = vmax.f32 %v913_v45, 0.0  ;;  %v916_v54 = vadd.f32 %v3492_v50, %v4149_v42  ;;  %v907_v55 = vpop.f32.mrb[3].mxu0  ;;  %v1789_v56 = vmax.f32 %v1313_v47, 0.0  ;;  %v1316_v57 = vadd.f32 %v3592_v52, %v4149_v42  ;;  %v1307_v58 = vpop.f32.mrb[3].mxu1 }
  0xf9   :  { %v1687_v59 = vmax.f32 %v905_v49, 0.0  ;;  %v908_v60 = vadd.f32 %v4149_v42, %v907_v55  ;;  %v1787_v61 = vmax.f32 %v1305_v51, 0.0  ;;  %v1308_v62 = vadd.f32 %v4149_v42, %v1307_v58 }
  0xfa   :  { %v3173_v63 = vpack.c.bf16 %v1689_v53, %v1689_v53  ;;  %v1690_v0 = vmax.f32 %v916_v54, 0.0  ;;  %v3273_v1 = vpack.c.bf16 %v1789_v56, %v1789_v56  ;;  %v1790_v2 = vmax.f32 %v1316_v57, 0.0 }
  0xfb   :  { %v3171_v3 = vpack.c.bf16 %v1687_v59, %v1687_v59  ;;  %v1688_v4 = vmax.f32 %v908_v60, 0.0  ;;  %v3271_v5 = vpack.c.bf16 %v1787_v61, %v1787_v61  ;;  %v1788_v6 = vmax.f32 %v1308_v62, 0.0 }
  0xfc   :  { %2670 = vst.msk [vmem:[%s5139_s3 + $0x8] sm:$0xf] %vm2667_vm0, %v3173_v63  ;;  %v3174_v7 = vpack.c.bf16 %v1690_v0, %v1690_v0  ;;  %2770 = vst.msk [vmem:[%s5139_s3 + $0x198] sm:$0xf] %vm2667_vm0, %v3273_v1  ;;  %v3274_v8 = vpack.c.bf16 %v1790_v2, %v1790_v2 }
  0xfd   :  { %2668 = vst.msk [vmem:[%s5139_s3] sm:$0xf] %vm2667_vm0, %v3171_v3  ;;  %v3172_v9 = vpack.c.bf16 %v1688_v4, %v1688_v4  ;;  %2768 = vst.msk [vmem:[%s5139_s3 + $0x190] sm:$0xf] %vm2667_vm0, %v3271_v5  ;;  %v3495_v10 = vpop.f32.mrb[4].mxu0  ;;  %v3272_v11 = vpack.c.bf16 %v1788_v6, %v1788_v6  ;;  %v3595_v12 = vpop.f32.mrb[4].mxu1 }
  0xfe   :  { %2671 = vst.msk [vmem:[%s5139_s3 + $0xc] sm:$0xf] %vm2667_vm0, %v3174_v7  ;;  %2771 = vst.msk [vmem:[%s5139_s3 + $0x19c] sm:$0xf] %vm2667_vm0, %v3274_v8  ;;  %v929_v13 = vadd.f32 %v3495_v10, %v4149_v42  ;;  %v920_v14 = vpop.f32.mrb[5].mxu0  ;;  %v1329_v15 = vadd.f32 %v3595_v12, %v4149_v42  ;;  %v1320_v16 = vpop.f32.mrb[5].mxu1 }
  0xff   :  { %2669 = vst.msk [vmem:[%s5139_s3 + $0x4] sm:$0xf] %vm2667_vm0, %v3172_v9  ;;  %2769 = vst.msk [vmem:[%s5139_s3 + $0x194] sm:$0xf] %vm2667_vm0, %v3272_v11  ;;  %v921_v17 = vadd.f32 %v4149_v42, %v920_v14  ;;  %v3496_v18 = vpop.f32.mrb[6].mxu0  ;;  %v1321_v19 = vadd.f32 %v4149_v42, %v1320_v16  ;;  %v3596_v20 = vpop.f32.mrb[6].mxu1 }
 0x100   :  { %v1693_v21 = vmax.f32 %v929_v13, 0.0  ;;  %v932_v22 = vadd.f32 %v3496_v18, %v4149_v42  ;;  %v923_v23 = vpop.f32.mrb[7].mxu0  ;;  %v1793_v24 = vmax.f32 %v1329_v15, 0.0  ;;  %v1332_v25 = vadd.f32 %v3596_v20, %v4149_v42  ;;  %v1323_v26 = vpop.f32.mrb[7].mxu1 }
 0x101   :  { %v1691_v27 = vmax.f32 %v921_v17, 0.0  ;;  %v924_v28 = vadd.f32 %v4149_v42, %v923_v23  ;;  %v1791_v29 = vmax.f32 %v1321_v19, 0.0  ;;  %v1324_v30 = vadd.f32 %v4149_v42, %v1323_v26 }
 0x102   :  { %v3177_v31 = vpack.c.bf16 %v1693_v21, %v1693_v21  ;;  %v1694_v32 = vmax.f32 %v932_v22, 0.0  ;;  %v3277_v33 = vpack.c.bf16 %v1793_v24, %v1793_v24  ;;  %v1794_v34 = vmax.f32 %v1332_v25, 0.0 }
 0x103   :  { %v3175_v35 = vpack.c.bf16 %v1691_v27, %v1691_v27  ;;  %v1692_v36 = vmax.f32 %v924_v28, 0.0  ;;  %v3275_v37 = vpack.c.bf16 %v1791_v29, %v1791_v29  ;;  %v1792_v38 = vmax.f32 %v1324_v30, 0.0 }
 0x104   :  { %2674 = vst.msk [vmem:[%s5139_s3 + $0x18] sm:$0xf] %vm2667_vm0, %v3177_v31  ;;  %v3178_v39 = vpack.c.bf16 %v1694_v32, %v1694_v32  ;;  %2774 = vst.msk [vmem:[%s5139_s3 + $0x1a8] sm:$0xf] %vm2667_vm0, %v3277_v33  ;;  %v3278_v40 = vpack.c.bf16 %v1794_v34, %v1794_v34 }
 0x105   :  { %2672 = vst.msk [vmem:[%s5139_s3 + $0x10] sm:$0xf] %vm2667_vm0, %v3175_v35  ;;  %v3176_v41 = vpack.c.bf16 %v1692_v36, %v1692_v36  ;;  %2772 = vst.msk [vmem:[%s5139_s3 + $0x1a0] sm:$0xf] %vm2667_vm0, %v3275_v37  ;;  %v3499_v43 = vpop.f32.mrb[8].mxu0  ;;  %v3276_v44 = vpack.c.bf16 %v1792_v38, %v1792_v38  ;;  %v3599_v45 = vpop.f32.mrb[8].mxu1 }
 0x106   :  { %2675 = vst.msk [vmem:[%s5139_s3 + $0x1c] sm:$0xf] %vm2667_vm0, %v3178_v39  ;;  %2775 = vst.msk [vmem:[%s5139_s3 + $0x1ac] sm:$0xf] %vm2667_vm0, %v3278_v40  ;;  %v945_v46 = vadd.f32 %v3499_v43, %v4149_v42  ;;  %v936_v47 = vpop.f32.mrb[9].mxu0  ;;  %v1345_v48 = vadd.f32 %v3599_v45, %v4149_v42  ;;  %v1336_v49 = vpop.f32.mrb[9].mxu1 }
 0x107   :  { %2673 = vst.msk [vmem:[%s5139_s3 + $0x14] sm:$0xf] %vm2667_vm0, %v3176_v41  ;;  %2773 = vst.msk [vmem:[%s5139_s3 + $0x1a4] sm:$0xf] %vm2667_vm0, %v3276_v44  ;;  %v937_v50 = vadd.f32 %v4149_v42, %v936_v47  ;;  %v3500_v51 = vpop.f32.mrb[10].mxu0  ;;  %v1337_v52 = vadd.f32 %v4149_v42, %v1336_v49  ;;  %v3600_v53 = vpop.f32.mrb[10].mxu1 }
 0x108   :  { %v1697_v54 = vmax.f32 %v945_v46, 0.0  ;;  %v948_v55 = vadd.f32 %v3500_v51, %v4149_v42  ;;  %v939_v56 = vpop.f32.mrb[11].mxu0  ;;  %v1797_v57 = vmax.f32 %v1345_v48, 0.0  ;;  %v1348_v58 = vadd.f32 %v3600_v53, %v4149_v42  ;;  %v1339_v59 = vpop.f32.mrb[11].mxu1 }
 0x109   :  { %v1695_v60 = vmax.f32 %v937_v50, 0.0  ;;  %v940_v61 = vadd.f32 %v4149_v42, %v939_v56  ;;  %v1795_v62 = vmax.f32 %v1337_v52, 0.0  ;;  %v1340_v63 = vadd.f32 %v4149_v42, %v1339_v59 }
 0x10a   :  { %v3181_v0 = vpack.c.bf16 %v1697_v54, %v1697_v54  ;;  %v1698_v1 = vmax.f32 %v948_v55, 0.0  ;;  %v3281_v2 = vpack.c.bf16 %v1797_v57, %v1797_v57  ;;  %v1798_v3 = vmax.f32 %v1348_v58, 0.0 }
 0x10b   :  { %v3179_v4 = vpack.c.bf16 %v1695_v60, %v1695_v60  ;;  %v1696_v5 = vmax.f32 %v940_v61, 0.0  ;;  %v3279_v6 = vpack.c.bf16 %v1795_v62, %v1795_v62  ;;  %v1796_v7 = vmax.f32 %v1340_v63, 0.0 }
 0x10c   :  { %2678 = vst.msk [vmem:[%s5139_s3 + $0x28] sm:$0xf] %vm2667_vm0, %v3181_v0  ;;  %v3182_v8 = vpack.c.bf16 %v1698_v1, %v1698_v1  ;;  %2778 = vst.msk [vmem:[%s5139_s3 + $0x1b8] sm:$0xf] %vm2667_vm0, %v3281_v2  ;;  %v3282_v9 = vpack.c.bf16 %v1798_v3, %v1798_v3 }
 0x10d   :  { %2676 = vst.msk [vmem:[%s5139_s3 + $0x20] sm:$0xf] %vm2667_vm0, %v3179_v4  ;;  %v3180_v10 = vpack.c.bf16 %v1696_v5, %v1696_v5  ;;  %2776 = vst.msk [vmem:[%s5139_s3 + $0x1b0] sm:$0xf] %vm2667_vm0, %v3279_v6  ;;  %v3503_v11 = vpop.f32.mrb[12].mxu0  ;;  %v3280_v12 = vpack.c.bf16 %v1796_v7, %v1796_v7  ;;  %v3603_v13 = vpop.f32.mrb[12].mxu1 }
 0x10e   :  { %2679 = vst.msk [vmem:[%s5139_s3 + $0x2c] sm:$0xf] %vm2667_vm0, %v3182_v8  ;;  %2779 = vst.msk [vmem:[%s5139_s3 + $0x1bc] sm:$0xf] %vm2667_vm0, %v3282_v9  ;;  %v961_v14 = vadd.f32 %v3503_v11, %v4149_v42  ;;  %v952_v15 = vpop.f32.mrb[13].mxu0  ;;  %v1361_v16 = vadd.f32 %v3603_v13, %v4149_v42  ;;  %v1352_v17 = vpop.f32.mrb[13].mxu1 }
 0x10f   :  { %2677 = vst.msk [vmem:[%s5139_s3 + $0x24] sm:$0xf] %vm2667_vm0, %v3180_v10  ;;  %2777 = vst.msk [vmem:[%s5139_s3 + $0x1b4] sm:$0xf] %vm2667_vm0, %v3280_v12  ;;  %v953_v18 = vadd.f32 %v4149_v42, %v952_v15  ;;  %v3504_v19 = vpop.f32.mrb[14].mxu0  ;;  %v1353_v20 = vadd.f32 %v4149_v42, %v1352_v17  ;;  %v3604_v21 = vpop.f32.mrb[14].mxu1 }
 0x110   :  { %v1701_v22 = vmax.f32 %v961_v14, 0.0  ;;  %v964_v23 = vadd.f32 %v3504_v19, %v4149_v42  ;;  %v955_v24 = vpop.f32.mrb[15].mxu0  ;;  %v1801_v25 = vmax.f32 %v1361_v16, 0.0  ;;  %v1364_v26 = vadd.f32 %v3604_v21, %v4149_v42  ;;  %v1355_v27 = vpop.f32.mrb[15].mxu1 }
 0x111   :  { %v1699_v28 = vmax.f32 %v953_v18, 0.0  ;;  %v956_v29 = vadd.f32 %v4149_v42, %v955_v24  ;;  %v1799_v30 = vmax.f32 %v1353_v20, 0.0  ;;  %v1356_v31 = vadd.f32 %v4149_v42, %v1355_v27 }
 0x112   :  { %v3185_v32 = vpack.c.bf16 %v1701_v22, %v1701_v22  ;;  %v1702_v33 = vmax.f32 %v964_v23, 0.0  ;;  %v3285_v34 = vpack.c.bf16 %v1801_v25, %v1801_v25  ;;  %v1802_v35 = vmax.f32 %v1364_v26, 0.0 }
 0x113   :  { %v3183_v36 = vpack.c.bf16 %v1699_v28, %v1699_v28  ;;  %v1700_v37 = vmax.f32 %v956_v29, 0.0  ;;  %v3283_v38 = vpack.c.bf16 %v1799_v30, %v1799_v30  ;;  %v1800_v39 = vmax.f32 %v1356_v31, 0.0 }
 0x114   :  { %2682 = vst.msk [vmem:[%s5139_s3 + $0x38] sm:$0xf] %vm2667_vm0, %v3185_v32  ;;  %v3186_v40 = vpack.c.bf16 %v1702_v33, %v1702_v33  ;;  %2782 = vst.msk [vmem:[%s5139_s3 + $0x1c8] sm:$0xf] %vm2667_vm0, %v3285_v34  ;;  %v3286_v41 = vpack.c.bf16 %v1802_v35, %v1802_v35 }
 0x115   :  { %2680 = vst.msk [vmem:[%s5139_s3 + $0x30] sm:$0xf] %vm2667_vm0, %v3183_v36  ;;  %v3184_v43 = vpack.c.bf16 %v1700_v37, %v1700_v37  ;;  %2780 = vst.msk [vmem:[%s5139_s3 + $0x1c0] sm:$0xf] %vm2667_vm0, %v3283_v38  ;;  %v3507_v44 = vpop.f32.mrb[16].mxu0  ;;  %v3284_v45 = vpack.c.bf16 %v1800_v39, %v1800_v39  ;;  %v3607_v46 = vpop.f32.mrb[16].mxu1 }
 0x116   :  { %2683 = vst.msk [vmem:[%s5139_s3 + $0x3c] sm:$0xf] %vm2667_vm0, %v3186_v40  ;;  %2783 = vst.msk [vmem:[%s5139_s3 + $0x1cc] sm:$0xf] %vm2667_vm0, %v3286_v41  ;;  %v977_v47 = vadd.f32 %v3507_v44, %v4149_v42  ;;  %v968_v48 = vpop.f32.mrb[17].mxu0  ;;  %v1377_v49 = vadd.f32 %v3607_v46, %v4149_v42  ;;  %v1368_v50 = vpop.f32.mrb[17].mxu1 }
 0x117   :  { %2681 = vst.msk [vmem:[%s5139_s3 + $0x34] sm:$0xf] %vm2667_vm0, %v3184_v43  ;;  %2781 = vst.msk [vmem:[%s5139_s3 + $0x1c4] sm:$0xf] %vm2667_vm0, %v3284_v45  ;;  %v969_v51 = vadd.f32 %v4149_v42, %v968_v48  ;;  %v3508_v52 = vpop.f32.mrb[18].mxu0  ;;  %v1369_v53 = vadd.f32 %v4149_v42, %v1368_v50  ;;  %v3608_v54 = vpop.f32.mrb[18].mxu1 }
 0x118   :  { %v1705_v55 = vmax.f32 %v977_v47, 0.0  ;;  %v980_v56 = vadd.f32 %v3508_v52, %v4149_v42  ;;  %v971_v57 = vpop.f32.mrb[19].mxu0  ;;  %v1805_v58 = vmax.f32 %v1377_v49, 0.0  ;;  %v1380_v59 = vadd.f32 %v3608_v54, %v4149_v42  ;;  %v1371_v60 = vpop.f32.mrb[19].mxu1 }
 0x119   :  { %v1703_v61 = vmax.f32 %v969_v51, 0.0  ;;  %v972_v62 = vadd.f32 %v4149_v42, %v971_v57  ;;  %v1803_v63 = vmax.f32 %v1369_v53, 0.0  ;;  %v1372_v0 = vadd.f32 %v4149_v42, %v1371_v60 }
 0x11a   :  { %v3189_v1 = vpack.c.bf16 %v1705_v55, %v1705_v55  ;;  %v1706_v2 = vmax.f32 %v980_v56, 0.0  ;;  %v3289_v3 = vpack.c.bf16 %v1805_v58, %v1805_v58  ;;  %v1806_v4 = vmax.f32 %v1380_v59, 0.0 }
 0x11b   :  { %v3187_v5 = vpack.c.bf16 %v1703_v61, %v1703_v61  ;;  %v1704_v6 = vmax.f32 %v972_v62, 0.0  ;;  %v3287_v7 = vpack.c.bf16 %v1803_v63, %v1803_v63  ;;  %v1804_v8 = vmax.f32 %v1372_v0, 0.0 }
 0x11c   :  { %2686 = vst.msk [vmem:[%s5139_s3 + $0x48] sm:$0xf] %vm2667_vm0, %v3189_v1  ;;  %v3190_v9 = vpack.c.bf16 %v1706_v2, %v1706_v2  ;;  %2786 = vst.msk [vmem:[%s5139_s3 + $0x1d8] sm:$0xf] %vm2667_vm0, %v3289_v3  ;;  %v3290_v10 = vpack.c.bf16 %v1806_v4, %v1806_v4 }
 0x11d   :  { %2684 = vst.msk [vmem:[%s5139_s3 + $0x40] sm:$0xf] %vm2667_vm0, %v3187_v5  ;;  %v3188_v11 = vpack.c.bf16 %v1704_v6, %v1704_v6  ;;  %2784 = vst.msk [vmem:[%s5139_s3 + $0x1d0] sm:$0xf] %vm2667_vm0, %v3287_v7  ;;  %v3511_v12 = vpop.f32.mrb[20].mxu0  ;;  %v3288_v13 = vpack.c.bf16 %v1804_v8, %v1804_v8  ;;  %v3611_v14 = vpop.f32.mrb[20].mxu1 }
 0x11e   :  { %2687 = vst.msk [vmem:[%s5139_s3 + $0x4c] sm:$0xf] %vm2667_vm0, %v3190_v9  ;;  %2787 = vst.msk [vmem:[%s5139_s3 + $0x1dc] sm:$0xf] %vm2667_vm0, %v3290_v10  ;;  %v993_v15 = vadd.f32 %v3511_v12, %v4149_v42  ;;  %v984_v16 = vpop.f32.mrb[21].mxu0  ;;  %v1393_v17 = vadd.f32 %v3611_v14, %v4149_v42  ;;  %v1384_v18 = vpop.f32.mrb[21].mxu1 }
 0x11f   :  { %2685 = vst.msk [vmem:[%s5139_s3 + $0x44] sm:$0xf] %vm2667_vm0, %v3188_v11  ;;  %2785 = vst.msk [vmem:[%s5139_s3 + $0x1d4] sm:$0xf] %vm2667_vm0, %v3288_v13  ;;  %v985_v19 = vadd.f32 %v4149_v42, %v984_v16  ;;  %v3512_v20 = vpop.f32.mrb[22].mxu0  ;;  %v1385_v21 = vadd.f32 %v4149_v42, %v1384_v18  ;;  %v3612_v22 = vpop.f32.mrb[22].mxu1 }
 0x120   :  { %v1709_v23 = vmax.f32 %v993_v15, 0.0  ;;  %v996_v24 = vadd.f32 %v3512_v20, %v4149_v42  ;;  %v987_v25 = vpop.f32.mrb[23].mxu0  ;;  %v1809_v26 = vmax.f32 %v1393_v17, 0.0  ;;  %v1396_v27 = vadd.f32 %v3612_v22, %v4149_v42  ;;  %v1387_v28 = vpop.f32.mrb[23].mxu1 }
 0x121   :  { %v1707_v29 = vmax.f32 %v985_v19, 0.0  ;;  %v988_v30 = vadd.f32 %v4149_v42, %v987_v25  ;;  %v1807_v31 = vmax.f32 %v1385_v21, 0.0  ;;  %v1388_v32 = vadd.f32 %v4149_v42, %v1387_v28 }
 0x122   :  { %v3193_v33 = vpack.c.bf16 %v1709_v23, %v1709_v23  ;;  %v1710_v34 = vmax.f32 %v996_v24, 0.0  ;;  %v3293_v35 = vpack.c.bf16 %v1809_v26, %v1809_v26  ;;  %v1810_v36 = vmax.f32 %v1396_v27, 0.0 }
 0x123   :  { %v3191_v37 = vpack.c.bf16 %v1707_v29, %v1707_v29  ;;  %v1708_v38 = vmax.f32 %v988_v30, 0.0  ;;  %v3291_v39 = vpack.c.bf16 %v1807_v31, %v1807_v31  ;;  %v1808_v40 = vmax.f32 %v1388_v32, 0.0 }
 0x124   :  { %2690 = vst.msk [vmem:[%s5139_s3 + $0x58] sm:$0xf] %vm2667_vm0, %v3193_v33  ;;  %v3194_v41 = vpack.c.bf16 %v1710_v34, %v1710_v34  ;;  %2790 = vst.msk [vmem:[%s5139_s3 + $0x1e8] sm:$0xf] %vm2667_vm0, %v3293_v35  ;;  %v3294_v43 = vpack.c.bf16 %v1810_v36, %v1810_v36 }
 0x125   :  { %2688 = vst.msk [vmem:[%s5139_s3 + $0x50] sm:$0xf] %vm2667_vm0, %v3191_v37  ;;  %v3192_v44 = vpack.c.bf16 %v1708_v38, %v1708_v38  ;;  %2788 = vst.msk [vmem:[%s5139_s3 + $0x1e0] sm:$0xf] %vm2667_vm0, %v3291_v39  ;;  %v3515_v45 = vpop.f32.mrb[24].mxu0  ;;  %v3292_v46 = vpack.c.bf16 %v1808_v40, %v1808_v40  ;;  %v3615_v47 = vpop.f32.mrb[24].mxu1 }
 0x126   :  { %2691 = vst.msk [vmem:[%s5139_s3 + $0x5c] sm:$0xf] %vm2667_vm0, %v3194_v41  ;;  %2791 = vst.msk [vmem:[%s5139_s3 + $0x1ec] sm:$0xf] %vm2667_vm0, %v3294_v43  ;;  %v1009_v48 = vadd.f32 %v3515_v45, %v4149_v42  ;;  %v1000_v49 = vpop.f32.mrb[25].mxu0  ;;  %v1409_v50 = vadd.f32 %v3615_v47, %v4149_v42  ;;  %v1400_v51 = vpop.f32.mrb[25].mxu1 }
 0x127   :  { %2689 = vst.msk [vmem:[%s5139_s3 + $0x54] sm:$0xf] %vm2667_vm0, %v3192_v44  ;;  %2789 = vst.msk [vmem:[%s5139_s3 + $0x1e4] sm:$0xf] %vm2667_vm0, %v3292_v46  ;;  %v1001_v52 = vadd.f32 %v4149_v42, %v1000_v49  ;;  %v3516_v53 = vpop.f32.mrb[26].mxu0  ;;  %v1401_v54 = vadd.f32 %v4149_v42, %v1400_v51  ;;  %v3616_v55 = vpop.f32.mrb[26].mxu1 }
 0x128   :  { %v1713_v56 = vmax.f32 %v1009_v48, 0.0  ;;  %v1012_v57 = vadd.f32 %v3516_v53, %v4149_v42  ;;  %v1003_v58 = vpop.f32.mrb[27].mxu0  ;;  %v1813_v59 = vmax.f32 %v1409_v50, 0.0  ;;  %v1412_v60 = vadd.f32 %v3616_v55, %v4149_v42  ;;  %v1403_v61 = vpop.f32.mrb[27].mxu1 }
 0x129   :  { %v1711_v62 = vmax.f32 %v1001_v52, 0.0  ;;  %v1004_v63 = vadd.f32 %v4149_v42, %v1003_v58  ;;  %v1811_v0 = vmax.f32 %v1401_v54, 0.0  ;;  %v1404_v1 = vadd.f32 %v4149_v42, %v1403_v61 }
 0x12a   :  { %v3197_v2 = vpack.c.bf16 %v1713_v56, %v1713_v56  ;;  %v1714_v3 = vmax.f32 %v1012_v57, 0.0  ;;  %v3297_v4 = vpack.c.bf16 %v1813_v59, %v1813_v59  ;;  %v1814_v5 = vmax.f32 %v1412_v60, 0.0 }
 0x12b   :  { %v3195_v6 = vpack.c.bf16 %v1711_v62, %v1711_v62  ;;  %v1712_v7 = vmax.f32 %v1004_v63, 0.0  ;;  %v3295_v8 = vpack.c.bf16 %v1811_v0, %v1811_v0  ;;  %v1812_v9 = vmax.f32 %v1404_v1, 0.0 }
 0x12c   :  { %2694 = vst.msk [vmem:[%s5139_s3 + $0x68] sm:$0xf] %vm2667_vm0, %v3197_v2  ;;  %v3198_v10 = vpack.c.bf16 %v1714_v3, %v1714_v3  ;;  %2794 = vst.msk [vmem:[%s5139_s3 + $0x1f8] sm:$0xf] %vm2667_vm0, %v3297_v4  ;;  %v3298_v11 = vpack.c.bf16 %v1814_v5, %v1814_v5 }
 0x12d   :  { %2692 = vst.msk [vmem:[%s5139_s3 + $0x60] sm:$0xf] %vm2667_vm0, %v3195_v6  ;;  %v3196_v12 = vpack.c.bf16 %v1712_v7, %v1712_v7  ;;  %2792 = vst.msk [vmem:[%s5139_s3 + $0x1f0] sm:$0xf] %vm2667_vm0, %v3295_v8  ;;  %v3519_v13 = vpop.f32.mrb[28].mxu0  ;;  %v3296_v14 = vpack.c.bf16 %v1812_v9, %v1812_v9  ;;  %v3619_v15 = vpop.f32.mrb[28].mxu1 }
 0x12e   :  { %2695 = vst.msk [vmem:[%s5139_s3 + $0x6c] sm:$0xf] %vm2667_vm0, %v3198_v10  ;;  %2795 = vst.msk [vmem:[%s5139_s3 + $0x1fc] sm:$0xf] %vm2667_vm0, %v3298_v11  ;;  %v1025_v16 = vadd.f32 %v3519_v13, %v4149_v42  ;;  %v1016_v17 = vpop.f32.mrb[29].mxu0  ;;  %v1425_v18 = vadd.f32 %v3619_v15, %v4149_v42  ;;  %v1416_v19 = vpop.f32.mrb[29].mxu1 }
 0x12f   :  { %2693 = vst.msk [vmem:[%s5139_s3 + $0x64] sm:$0xf] %vm2667_vm0, %v3196_v12  ;;  %2793 = vst.msk [vmem:[%s5139_s3 + $0x1f4] sm:$0xf] %vm2667_vm0, %v3296_v14  ;;  %v1017_v20 = vadd.f32 %v4149_v42, %v1016_v17  ;;  %v3520_v21 = vpop.f32.mrb[30].mxu0  ;;  %v1417_v22 = vadd.f32 %v4149_v42, %v1416_v19  ;;  %v3620_v23 = vpop.f32.mrb[30].mxu1 }
 0x130   :  { %v1717_v24 = vmax.f32 %v1025_v16, 0.0  ;;  %v1028_v25 = vadd.f32 %v3520_v21, %v4149_v42  ;;  %v1019_v26 = vpop.f32.mrb[31].mxu0  ;;  %v1817_v27 = vmax.f32 %v1425_v18, 0.0  ;;  %v1428_v28 = vadd.f32 %v3620_v23, %v4149_v42  ;;  %v1419_v29 = vpop.f32.mrb[31].mxu1 }
 0x131   :  { %v1715_v30 = vmax.f32 %v1017_v20, 0.0  ;;  %v1020_v31 = vadd.f32 %v4149_v42, %v1019_v26  ;;  %v1815_v32 = vmax.f32 %v1417_v22, 0.0  ;;  %v1420_v33 = vadd.f32 %v4149_v42, %v1419_v29 }
 0x132   :  { %v3201_v34 = vpack.c.bf16 %v1717_v24, %v1717_v24  ;;  %v1718_v35 = vmax.f32 %v1028_v25, 0.0  ;;  %v3301_v36 = vpack.c.bf16 %v1817_v27, %v1817_v27  ;;  %v1818_v37 = vmax.f32 %v1428_v28, 0.0 }
 0x133   :  { %v3199_v38 = vpack.c.bf16 %v1715_v30, %v1715_v30  ;;  %v1716_v39 = vmax.f32 %v1020_v31, 0.0  ;;  %v3299_v40 = vpack.c.bf16 %v1815_v32, %v1815_v32  ;;  %v1816_v41 = vmax.f32 %v1420_v33, 0.0 }
 0x134   :  { %2698 = vst.msk [vmem:[%s5139_s3 + $0x78] sm:$0xf] %vm2667_vm0, %v3201_v34  ;;  %v3202_v43 = vpack.c.bf16 %v1718_v35, %v1718_v35  ;;  %2798 = vst.msk [vmem:[%s5139_s3 + $0x208] sm:$0xf] %vm2667_vm0, %v3301_v36  ;;  %v3302_v44 = vpack.c.bf16 %v1818_v37, %v1818_v37 }
 0x135   :  { %2696 = vst.msk [vmem:[%s5139_s3 + $0x70] sm:$0xf] %vm2667_vm0, %v3199_v38  ;;  %v3200_v45 = vpack.c.bf16 %v1716_v39, %v1716_v39  ;;  %2796 = vst.msk [vmem:[%s5139_s3 + $0x200] sm:$0xf] %vm2667_vm0, %v3299_v40  ;;  %v3523_v46 = vpop.f32.mrb[32].mxu0  ;;  %v3300_v47 = vpack.c.bf16 %v1816_v41, %v1816_v41  ;;  %v3623_v48 = vpop.f32.mrb[32].mxu1 }
 0x136   :  { %2699 = vst.msk [vmem:[%s5139_s3 + $0x7c] sm:$0xf] %vm2667_vm0, %v3202_v43  ;;  %2799 = vst.msk [vmem:[%s5139_s3 + $0x20c] sm:$0xf] %vm2667_vm0, %v3302_v44  ;;  %v1041_v49 = vadd.f32 %v3523_v46, %v4149_v42  ;;  %v1032_v50 = vpop.f32.mrb[33].mxu0  ;;  %v1441_v51 = vadd.f32 %v3623_v48, %v4149_v42  ;;  %v1432_v52 = vpop.f32.mrb[33].mxu1 }
 0x137   :  { %2697 = vst.msk [vmem:[%s5139_s3 + $0x74] sm:$0xf] %vm2667_vm0, %v3200_v45  ;;  %2797 = vst.msk [vmem:[%s5139_s3 + $0x204] sm:$0xf] %vm2667_vm0, %v3300_v47  ;;  %v1033_v53 = vadd.f32 %v4149_v42, %v1032_v50  ;;  %v3524_v54 = vpop.f32.mrb[34].mxu0  ;;  %v1433_v55 = vadd.f32 %v4149_v42, %v1432_v52  ;;  %v3624_v56 = vpop.f32.mrb[34].mxu1 }
 0x138   :  { %v1721_v57 = vmax.f32 %v1041_v49, 0.0  ;;  %v1044_v58 = vadd.f32 %v3524_v54, %v4149_v42  ;;  %v1035_v59 = vpop.f32.mrb[35].mxu0  ;;  %v1821_v60 = vmax.f32 %v1441_v51, 0.0  ;;  %v1444_v61 = vadd.f32 %v3624_v56, %v4149_v42  ;;  %v1435_v62 = vpop.f32.mrb[35].mxu1 }
 0x139   :  { %v1719_v63 = vmax.f32 %v1033_v53, 0.0  ;;  %v1036_v0 = vadd.f32 %v4149_v42, %v1035_v59  ;;  %v1819_v1 = vmax.f32 %v1433_v55, 0.0  ;;  %v1436_v2 = vadd.f32 %v4149_v42, %v1435_v62 }
 0x13a   :  { %v3205_v3 = vpack.c.bf16 %v1721_v57, %v1721_v57  ;;  %v1722_v4 = vmax.f32 %v1044_v58, 0.0  ;;  %v3305_v5 = vpack.c.bf16 %v1821_v60, %v1821_v60  ;;  %v1822_v6 = vmax.f32 %v1444_v61, 0.0 }
 0x13b   :  { %v3203_v7 = vpack.c.bf16 %v1719_v63, %v1719_v63  ;;  %v1720_v8 = vmax.f32 %v1036_v0, 0.0  ;;  %v3303_v9 = vpack.c.bf16 %v1819_v1, %v1819_v1  ;;  %v1820_v10 = vmax.f32 %v1436_v2, 0.0 }
 0x13c   :  { %2702 = vst.msk [vmem:[%s5139_s3 + $0x88] sm:$0xf] %vm2667_vm0, %v3205_v3  ;;  %v3206_v11 = vpack.c.bf16 %v1722_v4, %v1722_v4  ;;  %2802 = vst.msk [vmem:[%s5139_s3 + $0x218] sm:$0xf] %vm2667_vm0, %v3305_v5  ;;  %v3306_v12 = vpack.c.bf16 %v1822_v6, %v1822_v6 }
 0x13d   :  { %2700 = vst.msk [vmem:[%s5139_s3 + $0x80] sm:$0xf] %vm2667_vm0, %v3203_v7  ;;  %v3204_v13 = vpack.c.bf16 %v1720_v8, %v1720_v8  ;;  %2800 = vst.msk [vmem:[%s5139_s3 + $0x210] sm:$0xf] %vm2667_vm0, %v3303_v9  ;;  %v3527_v14 = vpop.f32.mrb[36].mxu0  ;;  %v3304_v15 = vpack.c.bf16 %v1820_v10, %v1820_v10  ;;  %v3627_v16 = vpop.f32.mrb[36].mxu1 }
 0x13e   :  { %2703 = vst.msk [vmem:[%s5139_s3 + $0x8c] sm:$0xf] %vm2667_vm0, %v3206_v11  ;;  %2803 = vst.msk [vmem:[%s5139_s3 + $0x21c] sm:$0xf] %vm2667_vm0, %v3306_v12  ;;  %v1057_v17 = vadd.f32 %v3527_v14, %v4149_v42  ;;  %v1048_v18 = vpop.f32.mrb[37].mxu0  ;;  %v1457_v19 = vadd.f32 %v3627_v16, %v4149_v42  ;;  %v1448_v20 = vpop.f32.mrb[37].mxu1 }
 0x13f   :  { %2701 = vst.msk [vmem:[%s5139_s3 + $0x84] sm:$0xf] %vm2667_vm0, %v3204_v13  ;;  %2801 = vst.msk [vmem:[%s5139_s3 + $0x214] sm:$0xf] %vm2667_vm0, %v3304_v15  ;;  %v1049_v21 = vadd.f32 %v4149_v42, %v1048_v18  ;;  %v3528_v22 = vpop.f32.mrb[38].mxu0  ;;  %v1449_v23 = vadd.f32 %v4149_v42, %v1448_v20  ;;  %v3628_v24 = vpop.f32.mrb[38].mxu1 }
 0x140   :  { %v1725_v25 = vmax.f32 %v1057_v17, 0.0  ;;  %v1060_v26 = vadd.f32 %v3528_v22, %v4149_v42  ;;  %v1051_v27 = vpop.f32.mrb[39].mxu0  ;;  %v1825_v28 = vmax.f32 %v1457_v19, 0.0  ;;  %v1460_v29 = vadd.f32 %v3628_v24, %v4149_v42  ;;  %v1451_v30 = vpop.f32.mrb[39].mxu1 }
 0x141   :  { %v1723_v31 = vmax.f32 %v1049_v21, 0.0  ;;  %v1052_v32 = vadd.f32 %v4149_v42, %v1051_v27  ;;  %v1823_v33 = vmax.f32 %v1449_v23, 0.0  ;;  %v1452_v34 = vadd.f32 %v4149_v42, %v1451_v30 }
 0x142   :  { %v3209_v35 = vpack.c.bf16 %v1725_v25, %v1725_v25  ;;  %v1726_v36 = vmax.f32 %v1060_v26, 0.0  ;;  %v3309_v37 = vpack.c.bf16 %v1825_v28, %v1825_v28  ;;  %v1826_v38 = vmax.f32 %v1460_v29, 0.0 }
 0x143   :  { %v3207_v39 = vpack.c.bf16 %v1723_v31, %v1723_v31  ;;  %v1724_v40 = vmax.f32 %v1052_v32, 0.0  ;;  %v3307_v41 = vpack.c.bf16 %v1823_v33, %v1823_v33  ;;  %v1824_v43 = vmax.f32 %v1452_v34, 0.0 }
 0x144   :  { %2706 = vst.msk [vmem:[%s5139_s3 + $0x98] sm:$0xf] %vm2667_vm0, %v3209_v35  ;;  %v3210_v44 = vpack.c.bf16 %v1726_v36, %v1726_v36  ;;  %2806 = vst.msk [vmem:[%s5139_s3 + $0x228] sm:$0xf] %vm2667_vm0, %v3309_v37  ;;  %v3310_v45 = vpack.c.bf16 %v1826_v38, %v1826_v38 }
 0x145   :  { %2704 = vst.msk [vmem:[%s5139_s3 + $0x90] sm:$0xf] %vm2667_vm0, %v3207_v39  ;;  %v3208_v46 = vpack.c.bf16 %v1724_v40, %v1724_v40  ;;  %2804 = vst.msk [vmem:[%s5139_s3 + $0x220] sm:$0xf] %vm2667_vm0, %v3307_v41  ;;  %v3531_v47 = vpop.f32.mrb[40].mxu0  ;;  %v3308_v48 = vpack.c.bf16 %v1824_v43, %v1824_v43  ;;  %v3631_v49 = vpop.f32.mrb[40].mxu1 }
 0x146   :  { %2707 = vst.msk [vmem:[%s5139_s3 + $0x9c] sm:$0xf] %vm2667_vm0, %v3210_v44  ;;  %2807 = vst.msk [vmem:[%s5139_s3 + $0x22c] sm:$0xf] %vm2667_vm0, %v3310_v45  ;;  %v1073_v50 = vadd.f32 %v3531_v47, %v4149_v42  ;;  %v1064_v51 = vpop.f32.mrb[41].mxu0  ;;  %v1473_v52 = vadd.f32 %v3631_v49, %v4149_v42  ;;  %v1464_v53 = vpop.f32.mrb[41].mxu1 }
 0x147   :  { %2705 = vst.msk [vmem:[%s5139_s3 + $0x94] sm:$0xf] %vm2667_vm0, %v3208_v46  ;;  %2805 = vst.msk [vmem:[%s5139_s3 + $0x224] sm:$0xf] %vm2667_vm0, %v3308_v48  ;;  %v1065_v54 = vadd.f32 %v4149_v42, %v1064_v51  ;;  %v3532_v55 = vpop.f32.mrb[42].mxu0  ;;  %v1465_v56 = vadd.f32 %v4149_v42, %v1464_v53  ;;  %v3632_v57 = vpop.f32.mrb[42].mxu1 }
 0x148   :  { %v1729_v58 = vmax.f32 %v1073_v50, 0.0  ;;  %v1076_v59 = vadd.f32 %v3532_v55, %v4149_v42  ;;  %v1067_v60 = vpop.f32.mrb[43].mxu0  ;;  %v1829_v61 = vmax.f32 %v1473_v52, 0.0  ;;  %v1476_v62 = vadd.f32 %v3632_v57, %v4149_v42  ;;  %v1467_v63 = vpop.f32.mrb[43].mxu1 }
 0x149   :  { %v1727_v0 = vmax.f32 %v1065_v54, 0.0  ;;  %v1068_v1 = vadd.f32 %v4149_v42, %v1067_v60  ;;  %v1827_v2 = vmax.f32 %v1465_v56, 0.0  ;;  %v1468_v3 = vadd.f32 %v4149_v42, %v1467_v63 }
 0x14a   :  { %v3213_v4 = vpack.c.bf16 %v1729_v58, %v1729_v58  ;;  %v1730_v5 = vmax.f32 %v1076_v59, 0.0  ;;  %v3313_v6 = vpack.c.bf16 %v1829_v61, %v1829_v61  ;;  %v1830_v7 = vmax.f32 %v1476_v62, 0.0 }
 0x14b   :  { %v3211_v8 = vpack.c.bf16 %v1727_v0, %v1727_v0  ;;  %v1728_v9 = vmax.f32 %v1068_v1, 0.0  ;;  %v3311_v10 = vpack.c.bf16 %v1827_v2, %v1827_v2  ;;  %v1828_v11 = vmax.f32 %v1468_v3, 0.0 }
 0x14c   :  { %2710 = vst.msk [vmem:[%s5139_s3 + $0xa8] sm:$0xf] %vm2667_vm0, %v3213_v4  ;;  %v3214_v12 = vpack.c.bf16 %v1730_v5, %v1730_v5  ;;  %2810 = vst.msk [vmem:[%s5139_s3 + $0x238] sm:$0xf] %vm2667_vm0, %v3313_v6  ;;  %v3314_v13 = vpack.c.bf16 %v1830_v7, %v1830_v7 }
 0x14d   :  { %2708 = vst.msk [vmem:[%s5139_s3 + $0xa0] sm:$0xf] %vm2667_vm0, %v3211_v8  ;;  %v3212_v14 = vpack.c.bf16 %v1728_v9, %v1728_v9  ;;  %2808 = vst.msk [vmem:[%s5139_s3 + $0x230] sm:$0xf] %vm2667_vm0, %v3311_v10  ;;  %v3535_v15 = vpop.f32.mrb[44].mxu0  ;;  %v3312_v16 = vpack.c.bf16 %v1828_v11, %v1828_v11  ;;  %v3635_v17 = vpop.f32.mrb[44].mxu1 }
 0x14e   :  { %2711 = vst.msk [vmem:[%s5139_s3 + $0xac] sm:$0xf] %vm2667_vm0, %v3214_v12  ;;  %2811 = vst.msk [vmem:[%s5139_s3 + $0x23c] sm:$0xf] %vm2667_vm0, %v3314_v13  ;;  %v1089_v18 = vadd.f32 %v3535_v15, %v4149_v42  ;;  %v1080_v19 = vpop.f32.mrb[45].mxu0  ;;  %v1489_v20 = vadd.f32 %v3635_v17, %v4149_v42  ;;  %v1480_v21 = vpop.f32.mrb[45].mxu1 }
 0x14f   :  { %2709 = vst.msk [vmem:[%s5139_s3 + $0xa4] sm:$0xf] %vm2667_vm0, %v3212_v14  ;;  %2809 = vst.msk [vmem:[%s5139_s3 + $0x234] sm:$0xf] %vm2667_vm0, %v3312_v16  ;;  %v1081_v22 = vadd.f32 %v4149_v42, %v1080_v19  ;;  %v3536_v23 = vpop.f32.mrb[46].mxu0  ;;  %v1481_v24 = vadd.f32 %v4149_v42, %v1480_v21  ;;  %v3636_v25 = vpop.f32.mrb[46].mxu1 }
 0x150   :  { %v1733_v26 = vmax.f32 %v1089_v18, 0.0  ;;  %v1092_v27 = vadd.f32 %v3536_v23, %v4149_v42  ;;  %v1083_v28 = vpop.f32.mrb[47].mxu0  ;;  %v1833_v29 = vmax.f32 %v1489_v20, 0.0  ;;  %v1492_v30 = vadd.f32 %v3636_v25, %v4149_v42  ;;  %v1483_v31 = vpop.f32.mrb[47].mxu1  ;;  %v4666_v18 = vld [vmem:[%s5138_s2] ss:$0 sm:$0xff] }
 0x151   :  { %v1731_v32 = vmax.f32 %v1081_v22, 0.0  ;;  %v1084_v33 = vadd.f32 %v4149_v42, %v1083_v28  ;;  %v1831_v34 = vmax.f32 %v1481_v24, 0.0  ;;  %v1484_v35 = vadd.f32 %v4149_v42, %v1483_v31 }
 0x152   :  { %v3217_v36 = vpack.c.bf16 %v1733_v26, %v1733_v26  ;;  %v1734_v37 = vmax.f32 %v1092_v27, 0.0  ;;  %v3317_v38 = vpack.c.bf16 %v1833_v29, %v1833_v29  ;;  %v1834_v39 = vmax.f32 %v1492_v30, 0.0 }
 0x153   :  { %v3215_v40 = vpack.c.bf16 %v1731_v32, %v1731_v32  ;;  %v1732_v41 = vmax.f32 %v1084_v33, 0.0  ;;  %v3315_v43 = vpack.c.bf16 %v1831_v34, %v1831_v34  ;;  %v1832_v44 = vmax.f32 %v1484_v35, 0.0 }
 0x154   :  { %2714 = vst.msk [vmem:[%s5139_s3 + $0xb8] sm:$0xf] %vm2667_vm0, %v3217_v36  ;;  %v3218_v45 = vpack.c.bf16 %v1734_v37, %v1734_v37  ;;  %2814 = vst.msk [vmem:[%s5139_s3 + $0x248] sm:$0xf] %vm2667_vm0, %v3317_v38  ;;  %v3318_v46 = vpack.c.bf16 %v1834_v39, %v1834_v39 }
 0x155   :  { %2712 = vst.msk [vmem:[%s5139_s3 + $0xb0] sm:$0xf] %vm2667_vm0, %v3215_v40  ;;  %v3216_v47 = vpack.c.bf16 %v1732_v41, %v1732_v41  ;;  %2812 = vst.msk [vmem:[%s5139_s3 + $0x240] sm:$0xf] %vm2667_vm0, %v3315_v43  ;;  %v3539_v48 = vpop.f32.mrb[48].mxu0  ;;  %v3316_v49 = vpack.c.bf16 %v1832_v44, %v1832_v44  ;;  %v3639_v50 = vpop.f32.mrb[48].mxu1 }
 0x156   :  { %2715 = vst.msk [vmem:[%s5139_s3 + $0xbc] sm:$0xf] %vm2667_vm0, %v3218_v45  ;;  %2815 = vst.msk [vmem:[%s5139_s3 + $0x24c] sm:$0xf] %vm2667_vm0, %v3318_v46  ;;  %v1105_v51 = vadd.f32 %v3539_v48, %v4149_v42  ;;  %v1096_v52 = vpop.f32.mrb[49].mxu0  ;;  %v1505_v53 = vadd.f32 %v3639_v50, %v4149_v42  ;;  %v1496_v54 = vpop.f32.mrb[49].mxu1 }
 0x157   :  { %2713 = vst.msk [vmem:[%s5139_s3 + $0xb4] sm:$0xf] %vm2667_vm0, %v3216_v47  ;;  %2813 = vst.msk [vmem:[%s5139_s3 + $0x244] sm:$0xf] %vm2667_vm0, %v3316_v49  ;;  %v1097_v55 = vadd.f32 %v4149_v42, %v1096_v52  ;;  %v3540_v56 = vpop.f32.mrb[50].mxu0  ;;  %v1497_v57 = vadd.f32 %v4149_v42, %v1496_v54  ;;  %v3640_v58 = vpop.f32.mrb[50].mxu1 }
 0x158   :  { %v1737_v59 = vmax.f32 %v1105_v51, 0.0  ;;  %v1108_v60 = vadd.f32 %v3540_v56, %v4149_v42  ;;  %v1099_v61 = vpop.f32.mrb[51].mxu0  ;;  %v1837_v62 = vmax.f32 %v1505_v53, 0.0  ;;  %v1508_v63 = vadd.f32 %v3640_v58, %v4149_v42  ;;  %v1499_v0 = vpop.f32.mrb[51].mxu1 }
 0x159   :  { %v1735_v1 = vmax.f32 %v1097_v55, 0.0  ;;  %v1100_v2 = vadd.f32 %v4149_v42, %v1099_v61  ;;  %v1835_v3 = vmax.f32 %v1497_v57, 0.0  ;;  %v1500_v4 = vadd.f32 %v4149_v42, %v1499_v0 }
 0x15a   :  { %v3221_v5 = vpack.c.bf16 %v1737_v59, %v1737_v59  ;;  %v1738_v6 = vmax.f32 %v1108_v60, 0.0  ;;  %v3321_v7 = vpack.c.bf16 %v1837_v62, %v1837_v62  ;;  %v1838_v8 = vmax.f32 %v1508_v63, 0.0 }
 0x15b   :  { %v3219_v9 = vpack.c.bf16 %v1735_v1, %v1735_v1  ;;  %v1736_v10 = vmax.f32 %v1100_v2, 0.0  ;;  %v3319_v11 = vpack.c.bf16 %v1835_v3, %v1835_v3  ;;  %v1836_v12 = vmax.f32 %v1500_v4, 0.0 }
 0x15c   :  { %2718 = vst.msk [vmem:[%s5139_s3 + $0xc8] sm:$0xf] %vm2667_vm0, %v3221_v5  ;;  %v3222_v13 = vpack.c.bf16 %v1738_v6, %v1738_v6  ;;  %2818 = vst.msk [vmem:[%s5139_s3 + $0x258] sm:$0xf] %vm2667_vm0, %v3321_v7  ;;  %v3322_v42 = vpack.c.bf16 %v1838_v8, %v1838_v8 }
 0x15d   :  { %2716 = vst.msk [vmem:[%s5139_s3 + $0xc0] sm:$0xf] %vm2667_vm0, %v3219_v9  ;;  %v3220_v14 = vpack.c.bf16 %v1736_v10, %v1736_v10  ;;  %2816 = vst.msk [vmem:[%s5139_s3 + $0x250] sm:$0xf] %vm2667_vm0, %v3319_v11  ;;  %v3543_v15 = vpop.f32.mrb[52].mxu0  ;;  %v3320_v16 = vpack.c.bf16 %v1836_v12, %v1836_v12  ;;  %v3643_v17 = vpop.f32.mrb[52].mxu1 }
 0x15e   :  { %2719 = vst.msk [vmem:[%s5139_s3 + $0xcc] sm:$0xf] %vm2667_vm0, %v3222_v13  ;;  %2819 = vst.msk [vmem:[%s5139_s3 + $0x25c] sm:$0xf] %vm2667_vm0, %v3322_v42  ;;  %v1121_v19 = vadd.f32 %v4666_v18, %v3543_v15  ;;  %v1112_v20 = vpop.f32.mrb[53].mxu0  ;;  %v1521_v21 = vadd.f32 %v4666_v18, %v3643_v17  ;;  %v1512_v22 = vpop.f32.mrb[53].mxu1 }
 0x15f   :  { %2717 = vst.msk [vmem:[%s5139_s3 + $0xc4] sm:$0xf] %vm2667_vm0, %v3220_v14  ;;  %2817 = vst.msk [vmem:[%s5139_s3 + $0x254] sm:$0xf] %vm2667_vm0, %v3320_v16  ;;  %v1113_v23 = vadd.f32 %v4666_v18, %v1112_v20  ;;  %v3544_v24 = vpop.f32.mrb[54].mxu0  ;;  %v1513_v25 = vadd.f32 %v4666_v18, %v1512_v22  ;;  %v3644_v26 = vpop.f32.mrb[54].mxu1 }
 0x160   :  { %v1741_v27 = vmax.f32 %v1121_v19, 0.0  ;;  %v1124_v28 = vadd.f32 %v4666_v18, %v3544_v24  ;;  %v1115_v29 = vpop.f32.mrb[55].mxu0  ;;  %v1841_v30 = vmax.f32 %v1521_v21, 0.0  ;;  %v1524_v31 = vadd.f32 %v4666_v18, %v3644_v26  ;;  %v1515_v32 = vpop.f32.mrb[55].mxu1 }
 0x161   :  { %v1739_v33 = vmax.f32 %v1113_v23, 0.0  ;;  %v1116_v34 = vadd.f32 %v4666_v18, %v1115_v29  ;;  %v1839_v35 = vmax.f32 %v1513_v25, 0.0  ;;  %v1516_v36 = vadd.f32 %v4666_v18, %v1515_v32 }
 0x162   :  { %v3225_v37 = vpack.c.bf16 %v1741_v27, %v1741_v27  ;;  %v1742_v38 = vmax.f32 %v1124_v28, 0.0  ;;  %v3325_v39 = vpack.c.bf16 %v1841_v30, %v1841_v30  ;;  %v1842_v40 = vmax.f32 %v1524_v31, 0.0 }
 0x163   :  { %v3223_v41 = vpack.c.bf16 %v1739_v33, %v1739_v33  ;;  %v1740_v43 = vmax.f32 %v1116_v34, 0.0  ;;  %v3323_v44 = vpack.c.bf16 %v1839_v35, %v1839_v35  ;;  %v1840_v45 = vmax.f32 %v1516_v36, 0.0 }
 0x164   :  { %2722 = vst.msk [vmem:[%s5139_s3 + $0xd8] sm:$0xf] %vm2667_vm0, %v3225_v37  ;;  %v3226_v46 = vpack.c.bf16 %v1742_v38, %v1742_v38  ;;  %2822 = vst.msk [vmem:[%s5139_s3 + $0x268] sm:$0xf] %vm2667_vm0, %v3325_v39  ;;  %v3326_v47 = vpack.c.bf16 %v1842_v40, %v1842_v40 }
 0x165   :  { %2720 = vst.msk [vmem:[%s5139_s3 + $0xd0] sm:$0xf] %vm2667_vm0, %v3223_v41  ;;  %v3224_v48 = vpack.c.bf16 %v1740_v43, %v1740_v43  ;;  %2820 = vst.msk [vmem:[%s5139_s3 + $0x260] sm:$0xf] %vm2667_vm0, %v3323_v44  ;;  %v3547_v49 = vpop.f32.mrb[56].mxu0  ;;  %v3324_v50 = vpack.c.bf16 %v1840_v45, %v1840_v45  ;;  %v3647_v51 = vpop.f32.mrb[56].mxu1 }
 0x166   :  { %2723 = vst.msk [vmem:[%s5139_s3 + $0xdc] sm:$0xf] %vm2667_vm0, %v3226_v46  ;;  %2823 = vst.msk [vmem:[%s5139_s3 + $0x26c] sm:$0xf] %vm2667_vm0, %v3326_v47  ;;  %v1137_v52 = vadd.f32 %v4666_v18, %v3547_v49  ;;  %v1128_v53 = vpop.f32.mrb[57].mxu0  ;;  %v1537_v54 = vadd.f32 %v4666_v18, %v3647_v51  ;;  %v1528_v55 = vpop.f32.mrb[57].mxu1 }
 0x167   :  { %2721 = vst.msk [vmem:[%s5139_s3 + $0xd4] sm:$0xf] %vm2667_vm0, %v3224_v48  ;;  %2821 = vst.msk [vmem:[%s5139_s3 + $0x264] sm:$0xf] %vm2667_vm0, %v3324_v50  ;;  %v1129_v56 = vadd.f32 %v4666_v18, %v1128_v53  ;;  %v3548_v57 = vpop.f32.mrb[58].mxu0  ;;  %v1529_v58 = vadd.f32 %v4666_v18, %v1528_v55  ;;  %v3648_v59 = vpop.f32.mrb[58].mxu1 }
 0x168   :  { %v1745_v60 = vmax.f32 %v1137_v52, 0.0  ;;  %v1140_v61 = vadd.f32 %v4666_v18, %v3548_v57  ;;  %v1131_v62 = vpop.f32.mrb[59].mxu0  ;;  %v1845_v63 = vmax.f32 %v1537_v54, 0.0  ;;  %v1540_v0 = vadd.f32 %v4666_v18, %v3648_v59  ;;  %v1531_v1 = vpop.f32.mrb[59].mxu1 }
 0x169   :  { %v1743_v2 = vmax.f32 %v1129_v56, 0.0  ;;  %v1132_v3 = vadd.f32 %v4666_v18, %v1131_v62  ;;  %v1843_v4 = vmax.f32 %v1529_v58, 0.0  ;;  %v1532_v5 = vadd.f32 %v4666_v18, %v1531_v1 }
 0x16a   :  { %v3229_v6 = vpack.c.bf16 %v1745_v60, %v1745_v60  ;;  %v1746_v7 = vmax.f32 %v1140_v61, 0.0  ;;  %v3329_v8 = vpack.c.bf16 %v1845_v63, %v1845_v63  ;;  %v1846_v9 = vmax.f32 %v1540_v0, 0.0 }
 0x16b   :  { %v3227_v10 = vpack.c.bf16 %v1743_v2, %v1743_v2  ;;  %v1744_v11 = vmax.f32 %v1132_v3, 0.0  ;;  %v3327_v12 = vpack.c.bf16 %v1843_v4, %v1843_v4  ;;  %v1844_v13 = vmax.f32 %v1532_v5, 0.0 }
 0x16c   :  { %2726 = vst.msk [vmem:[%s5139_s3 + $0xe8] sm:$0xf] %vm2667_vm0, %v3229_v6  ;;  %v3230_v42 = vpack.c.bf16 %v1746_v7, %v1746_v7  ;;  %2826 = vst.msk [vmem:[%s5139_s3 + $0x278] sm:$0xf] %vm2667_vm0, %v3329_v8  ;;  %v3330_v14 = vpack.c.bf16 %v1846_v9, %v1846_v9 }
 0x16d   :  { %2724 = vst.msk [vmem:[%s5139_s3 + $0xe0] sm:$0xf] %vm2667_vm0, %v3227_v10  ;;  %v3228_v15 = vpack.c.bf16 %v1744_v11, %v1744_v11  ;;  %2824 = vst.msk [vmem:[%s5139_s3 + $0x270] sm:$0xf] %vm2667_vm0, %v3327_v12  ;;  %v3551_v16 = vpop.f32.mrb[60].mxu0  ;;  %v3328_v17 = vpack.c.bf16 %v1844_v13, %v1844_v13  ;;  %v3651_v19 = vpop.f32.mrb[60].mxu1 }
 0x16e   :  { %2727 = vst.msk [vmem:[%s5139_s3 + $0xec] sm:$0xf] %vm2667_vm0, %v3230_v42  ;;  %2827 = vst.msk [vmem:[%s5139_s3 + $0x27c] sm:$0xf] %vm2667_vm0, %v3330_v14  ;;  %v1153_v20 = vadd.f32 %v4666_v18, %v3551_v16  ;;  %v1144_v21 = vpop.f32.mrb[61].mxu0  ;;  %v1553_v22 = vadd.f32 %v4666_v18, %v3651_v19  ;;  %v1544_v23 = vpop.f32.mrb[61].mxu1 }
 0x16f   :  { %2725 = vst.msk [vmem:[%s5139_s3 + $0xe4] sm:$0xf] %vm2667_vm0, %v3228_v15  ;;  %2825 = vst.msk [vmem:[%s5139_s3 + $0x274] sm:$0xf] %vm2667_vm0, %v3328_v17  ;;  %v1145_v24 = vadd.f32 %v4666_v18, %v1144_v21  ;;  %v3552_v25 = vpop.f32.mrb[62].mxu0  ;;  %v1545_v26 = vadd.f32 %v4666_v18, %v1544_v23  ;;  %v3652_v27 = vpop.f32.mrb[62].mxu1 }
 0x170   :  { %v1749_v28 = vmax.f32 %v1153_v20, 0.0  ;;  %v1156_v29 = vadd.f32 %v4666_v18, %v3552_v25  ;;  %v1147_v30 = vpop.f32.mrb[63].mxu0  ;;  %v1849_v31 = vmax.f32 %v1553_v22, 0.0  ;;  %v1556_v32 = vadd.f32 %v4666_v18, %v3652_v27  ;;  %v1547_v33 = vpop.f32.mrb[63].mxu1 }
 0x171   :  { %v1747_v34 = vmax.f32 %v1145_v24, 0.0  ;;  %v1148_v35 = vadd.f32 %v4666_v18, %v1147_v30  ;;  %v1847_v36 = vmax.f32 %v1545_v26, 0.0  ;;  %v1548_v37 = vadd.f32 %v4666_v18, %v1547_v33 }
 0x172   :  { %v3233_v38 = vpack.c.bf16 %v1749_v28, %v1749_v28  ;;  %v1750_v39 = vmax.f32 %v1156_v29, 0.0  ;;  %v3333_v40 = vpack.c.bf16 %v1849_v31, %v1849_v31  ;;  %v1850_v41 = vmax.f32 %v1556_v32, 0.0 }
 0x173   :  { %v3231_v43 = vpack.c.bf16 %v1747_v34, %v1747_v34  ;;  %v1748_v44 = vmax.f32 %v1148_v35, 0.0  ;;  %v3331_v45 = vpack.c.bf16 %v1847_v36, %v1847_v36  ;;  %v1848_v46 = vmax.f32 %v1548_v37, 0.0 }
 0x174   :  { %2730 = vst.msk [vmem:[%s5139_s3 + $0xf8] sm:$0xf] %vm2667_vm0, %v3233_v38  ;;  %v3234_v47 = vpack.c.bf16 %v1750_v39, %v1750_v39  ;;  %2830 = vst.msk [vmem:[%s5139_s3 + $0x288] sm:$0xf] %vm2667_vm0, %v3333_v40  ;;  %v3334_v48 = vpack.c.bf16 %v1850_v41, %v1850_v41 }
 0x175   :  { %2728 = vst.msk [vmem:[%s5139_s3 + $0xf0] sm:$0xf] %vm2667_vm0, %v3231_v43  ;;  %v3232_v49 = vpack.c.bf16 %v1748_v44, %v1748_v44  ;;  %2828 = vst.msk [vmem:[%s5139_s3 + $0x280] sm:$0xf] %vm2667_vm0, %v3331_v45  ;;  %v3555_v50 = vpop.f32.mrb[64].mxu0  ;;  %v3332_v51 = vpack.c.bf16 %v1848_v46, %v1848_v46  ;;  %v3655_v52 = vpop.f32.mrb[64].mxu1 }
 0x176   :  { %2731 = vst.msk [vmem:[%s5139_s3 + $0xfc] sm:$0xf] %vm2667_vm0, %v3234_v47  ;;  %2831 = vst.msk [vmem:[%s5139_s3 + $0x28c] sm:$0xf] %vm2667_vm0, %v3334_v48  ;;  %v1169_v53 = vadd.f32 %v4666_v18, %v3555_v50  ;;  %v1160_v54 = vpop.f32.mrb[65].mxu0  ;;  %v1569_v55 = vadd.f32 %v4666_v18, %v3655_v52  ;;  %v1560_v56 = vpop.f32.mrb[65].mxu1 }
 0x177   :  { %2729 = vst.msk [vmem:[%s5139_s3 + $0xf4] sm:$0xf] %vm2667_vm0, %v3232_v49  ;;  %2829 = vst.msk [vmem:[%s5139_s3 + $0x284] sm:$0xf] %vm2667_vm0, %v3332_v51  ;;  %v1161_v57 = vadd.f32 %v4666_v18, %v1160_v54  ;;  %v3556_v58 = vpop.f32.mrb[66].mxu0  ;;  %v1561_v59 = vadd.f32 %v4666_v18, %v1560_v56  ;;  %v3656_v60 = vpop.f32.mrb[66].mxu1 }
 0x178   :  { %v1753_v61 = vmax.f32 %v1169_v53, 0.0  ;;  %v1172_v62 = vadd.f32 %v4666_v18, %v3556_v58  ;;  %v1163_v63 = vpop.f32.mrb[67].mxu0  ;;  %v1853_v0 = vmax.f32 %v1569_v55, 0.0  ;;  %v1572_v1 = vadd.f32 %v4666_v18, %v3656_v60  ;;  %v1563_v2 = vpop.f32.mrb[67].mxu1 }
 0x179   :  { %v1751_v3 = vmax.f32 %v1161_v57, 0.0  ;;  %v1164_v4 = vadd.f32 %v4666_v18, %v1163_v63  ;;  %v1851_v5 = vmax.f32 %v1561_v59, 0.0  ;;  %v1564_v6 = vadd.f32 %v4666_v18, %v1563_v2 }
 0x17a   :  { %v3237_v7 = vpack.c.bf16 %v1753_v61, %v1753_v61  ;;  %v1754_v8 = vmax.f32 %v1172_v62, 0.0  ;;  %v3337_v9 = vpack.c.bf16 %v1853_v0, %v1853_v0  ;;  %v1854_v10 = vmax.f32 %v1572_v1, 0.0 }
 0x17b   :  { %v3235_v11 = vpack.c.bf16 %v1751_v3, %v1751_v3  ;;  %v1752_v12 = vmax.f32 %v1164_v4, 0.0  ;;  %v3335_v13 = vpack.c.bf16 %v1851_v5, %v1851_v5  ;;  %v1852_v42 = vmax.f32 %v1564_v6, 0.0 }
 0x17c   :  { %2734 = vst.msk [vmem:[%s5139_s3 + $0x108] sm:$0xf] %vm2667_vm0, %v3237_v7  ;;  %v3238_v14 = vpack.c.bf16 %v1754_v8, %v1754_v8  ;;  %2834 = vst.msk [vmem:[%s5139_s3 + $0x298] sm:$0xf] %vm2667_vm0, %v3337_v9  ;;  %v3338_v15 = vpack.c.bf16 %v1854_v10, %v1854_v10 }
 0x17d   :  { %2732 = vst.msk [vmem:[%s5139_s3 + $0x100] sm:$0xf] %vm2667_vm0, %v3235_v11  ;;  %v3236_v16 = vpack.c.bf16 %v1752_v12, %v1752_v12  ;;  %2832 = vst.msk [vmem:[%s5139_s3 + $0x290] sm:$0xf] %vm2667_vm0, %v3335_v13  ;;  %v3559_v17 = vpop.f32.mrb[68].mxu0  ;;  %v3336_v19 = vpack.c.bf16 %v1852_v42, %v1852_v42  ;;  %v3659_v20 = vpop.f32.mrb[68].mxu1 }
 0x17e   :  { %2735 = vst.msk [vmem:[%s5139_s3 + $0x10c] sm:$0xf] %vm2667_vm0, %v3238_v14  ;;  %2835 = vst.msk [vmem:[%s5139_s3 + $0x29c] sm:$0xf] %vm2667_vm0, %v3338_v15  ;;  %v1185_v21 = vadd.f32 %v4666_v18, %v3559_v17  ;;  %v1176_v22 = vpop.f32.mrb[69].mxu0  ;;  %v1585_v23 = vadd.f32 %v4666_v18, %v3659_v20  ;;  %v1576_v24 = vpop.f32.mrb[69].mxu1 }
 0x17f   :  { %2733 = vst.msk [vmem:[%s5139_s3 + $0x104] sm:$0xf] %vm2667_vm0, %v3236_v16  ;;  %2833 = vst.msk [vmem:[%s5139_s3 + $0x294] sm:$0xf] %vm2667_vm0, %v3336_v19  ;;  %v1177_v25 = vadd.f32 %v4666_v18, %v1176_v22  ;;  %v3560_v26 = vpop.f32.mrb[70].mxu0  ;;  %v1577_v27 = vadd.f32 %v4666_v18, %v1576_v24  ;;  %v3660_v28 = vpop.f32.mrb[70].mxu1 }
 0x180   :  { %v1757_v29 = vmax.f32 %v1185_v21, 0.0  ;;  %v1188_v30 = vadd.f32 %v4666_v18, %v3560_v26  ;;  %v1179_v31 = vpop.f32.mrb[71].mxu0  ;;  %v1857_v32 = vmax.f32 %v1585_v23, 0.0  ;;  %v1588_v33 = vadd.f32 %v4666_v18, %v3660_v28  ;;  %v1579_v34 = vpop.f32.mrb[71].mxu1 }
 0x181   :  { %v1755_v35 = vmax.f32 %v1177_v25, 0.0  ;;  %v1180_v36 = vadd.f32 %v4666_v18, %v1179_v31  ;;  %v1855_v37 = vmax.f32 %v1577_v27, 0.0  ;;  %v1580_v38 = vadd.f32 %v4666_v18, %v1579_v34 }
 0x182   :  { %v3241_v39 = vpack.c.bf16 %v1757_v29, %v1757_v29  ;;  %v1758_v40 = vmax.f32 %v1188_v30, 0.0  ;;  %v3341_v41 = vpack.c.bf16 %v1857_v32, %v1857_v32  ;;  %v1858_v43 = vmax.f32 %v1588_v33, 0.0 }
 0x183   :  { %v3239_v44 = vpack.c.bf16 %v1755_v35, %v1755_v35  ;;  %v1756_v45 = vmax.f32 %v1180_v36, 0.0  ;;  %v3339_v46 = vpack.c.bf16 %v1855_v37, %v1855_v37  ;;  %v1856_v47 = vmax.f32 %v1580_v38, 0.0 }
 0x184   :  { %2738 = vst.msk [vmem:[%s5139_s3 + $0x118] sm:$0xf] %vm2667_vm0, %v3241_v39  ;;  %v3242_v48 = vpack.c.bf16 %v1758_v40, %v1758_v40  ;;  %2838 = vst.msk [vmem:[%s5139_s3 + $0x2a8] sm:$0xf] %vm2667_vm0, %v3341_v41  ;;  %v3342_v49 = vpack.c.bf16 %v1858_v43, %v1858_v43 }
 0x185   :  { %2736 = vst.msk [vmem:[%s5139_s3 + $0x110] sm:$0xf] %vm2667_vm0, %v3239_v44  ;;  %v3240_v50 = vpack.c.bf16 %v1756_v45, %v1756_v45  ;;  %2836 = vst.msk [vmem:[%s5139_s3 + $0x2a0] sm:$0xf] %vm2667_vm0, %v3339_v46  ;;  %v3563_v51 = vpop.f32.mrb[72].mxu0  ;;  %v3340_v52 = vpack.c.bf16 %v1856_v47, %v1856_v47  ;;  %v3663_v53 = vpop.f32.mrb[72].mxu1 }
 0x186   :  { %2739 = vst.msk [vmem:[%s5139_s3 + $0x11c] sm:$0xf] %vm2667_vm0, %v3242_v48  ;;  %2839 = vst.msk [vmem:[%s5139_s3 + $0x2ac] sm:$0xf] %vm2667_vm0, %v3342_v49  ;;  %v1201_v54 = vadd.f32 %v4666_v18, %v3563_v51  ;;  %v1192_v55 = vpop.f32.mrb[73].mxu0  ;;  %v1601_v56 = vadd.f32 %v4666_v18, %v3663_v53  ;;  %v1592_v57 = vpop.f32.mrb[73].mxu1 }
 0x187   :  { %2737 = vst.msk [vmem:[%s5139_s3 + $0x114] sm:$0xf] %vm2667_vm0, %v3240_v50  ;;  %2837 = vst.msk [vmem:[%s5139_s3 + $0x2a4] sm:$0xf] %vm2667_vm0, %v3340_v52  ;;  %v1193_v58 = vadd.f32 %v4666_v18, %v1192_v55  ;;  %v3564_v59 = vpop.f32.mrb[74].mxu0  ;;  %v1593_v60 = vadd.f32 %v4666_v18, %v1592_v57  ;;  %v3664_v61 = vpop.f32.mrb[74].mxu1 }
 0x188   :  { %v1761_v62 = vmax.f32 %v1201_v54, 0.0  ;;  %v1204_v63 = vadd.f32 %v4666_v18, %v3564_v59  ;;  %v1195_v0 = vpop.f32.mrb[75].mxu0  ;;  %v1861_v1 = vmax.f32 %v1601_v56, 0.0  ;;  %v1604_v2 = vadd.f32 %v4666_v18, %v3664_v61  ;;  %v1595_v3 = vpop.f32.mrb[75].mxu1 }
 0x189   :  { %v1759_v4 = vmax.f32 %v1193_v58, 0.0  ;;  %v1196_v5 = vadd.f32 %v4666_v18, %v1195_v0  ;;  %v1859_v6 = vmax.f32 %v1593_v60, 0.0  ;;  %v1596_v7 = vadd.f32 %v4666_v18, %v1595_v3 }
 0x18a   :  { %v3245_v8 = vpack.c.bf16 %v1761_v62, %v1761_v62  ;;  %v1762_v9 = vmax.f32 %v1204_v63, 0.0  ;;  %v3345_v10 = vpack.c.bf16 %v1861_v1, %v1861_v1  ;;  %v1862_v11 = vmax.f32 %v1604_v2, 0.0 }
 0x18b   :  { %v3243_v12 = vpack.c.bf16 %v1759_v4, %v1759_v4  ;;  %v1760_v13 = vmax.f32 %v1196_v5, 0.0  ;;  %v3343_v42 = vpack.c.bf16 %v1859_v6, %v1859_v6  ;;  %v1860_v14 = vmax.f32 %v1596_v7, 0.0 }
 0x18c   :  { %2742 = vst.msk [vmem:[%s5139_s3 + $0x128] sm:$0xf] %vm2667_vm0, %v3245_v8  ;;  %v3246_v15 = vpack.c.bf16 %v1762_v9, %v1762_v9  ;;  %2842 = vst.msk [vmem:[%s5139_s3 + $0x2b8] sm:$0xf] %vm2667_vm0, %v3345_v10  ;;  %v3346_v16 = vpack.c.bf16 %v1862_v11, %v1862_v11 }
 0x18d   :  { %2740 = vst.msk [vmem:[%s5139_s3 + $0x120] sm:$0xf] %vm2667_vm0, %v3243_v12  ;;  %v3244_v17 = vpack.c.bf16 %v1760_v13, %v1760_v13  ;;  %2840 = vst.msk [vmem:[%s5139_s3 + $0x2b0] sm:$0xf] %vm2667_vm0, %v3343_v42  ;;  %v3567_v19 = vpop.f32.mrb[76].mxu0  ;;  %v3344_v20 = vpack.c.bf16 %v1860_v14, %v1860_v14  ;;  %v3667_v21 = vpop.f32.mrb[76].mxu1 }
 0x18e   :  { %2743 = vst.msk [vmem:[%s5139_s3 + $0x12c] sm:$0xf] %vm2667_vm0, %v3246_v15  ;;  %2843 = vst.msk [vmem:[%s5139_s3 + $0x2bc] sm:$0xf] %vm2667_vm0, %v3346_v16  ;;  %v1217_v22 = vadd.f32 %v4666_v18, %v3567_v19  ;;  %v1208_v23 = vpop.f32.mrb[77].mxu0  ;;  %v1617_v24 = vadd.f32 %v4666_v18, %v3667_v21  ;;  %v1608_v25 = vpop.f32.mrb[77].mxu1 }
 0x18f   :  { %2741 = vst.msk [vmem:[%s5139_s3 + $0x124] sm:$0xf] %vm2667_vm0, %v3244_v17  ;;  %2841 = vst.msk [vmem:[%s5139_s3 + $0x2b4] sm:$0xf] %vm2667_vm0, %v3344_v20  ;;  %v1209_v26 = vadd.f32 %v4666_v18, %v1208_v23  ;;  %v3568_v27 = vpop.f32.mrb[78].mxu0  ;;  %v1609_v28 = vadd.f32 %v4666_v18, %v1608_v25  ;;  %v3668_v29 = vpop.f32.mrb[78].mxu1 }
 0x190   :  { %v1765_v30 = vmax.f32 %v1217_v22, 0.0  ;;  %v1220_v31 = vadd.f32 %v4666_v18, %v3568_v27  ;;  %v1211_v32 = vpop.f32.mrb[79].mxu0  ;;  %v1865_v33 = vmax.f32 %v1617_v24, 0.0  ;;  %v1620_v34 = vadd.f32 %v4666_v18, %v3668_v29  ;;  %v1611_v35 = vpop.f32.mrb[79].mxu1 }
 0x191   :  { %v1763_v36 = vmax.f32 %v1209_v26, 0.0  ;;  %v1212_v37 = vadd.f32 %v4666_v18, %v1211_v32  ;;  %v1863_v38 = vmax.f32 %v1609_v28, 0.0  ;;  %v1612_v39 = vadd.f32 %v4666_v18, %v1611_v35 }
 0x192   :  { %v3249_v40 = vpack.c.bf16 %v1765_v30, %v1765_v30  ;;  %v1766_v41 = vmax.f32 %v1220_v31, 0.0  ;;  %v3349_v43 = vpack.c.bf16 %v1865_v33, %v1865_v33  ;;  %v1866_v44 = vmax.f32 %v1620_v34, 0.0 }
 0x193   :  { %v3247_v45 = vpack.c.bf16 %v1763_v36, %v1763_v36  ;;  %v1764_v46 = vmax.f32 %v1212_v37, 0.0  ;;  %v3347_v47 = vpack.c.bf16 %v1863_v38, %v1863_v38  ;;  %v1864_v48 = vmax.f32 %v1612_v39, 0.0 }
 0x194   :  { %2746 = vst.msk [vmem:[%s5139_s3 + $0x138] sm:$0xf] %vm2667_vm0, %v3249_v40  ;;  %v3250_v49 = vpack.c.bf16 %v1766_v41, %v1766_v41  ;;  %2846 = vst.msk [vmem:[%s5139_s3 + $0x2c8] sm:$0xf] %vm2667_vm0, %v3349_v43  ;;  %v3350_v50 = vpack.c.bf16 %v1866_v44, %v1866_v44 }
 0x195   :  { %2744 = vst.msk [vmem:[%s5139_s3 + $0x130] sm:$0xf] %vm2667_vm0, %v3247_v45  ;;  %v3248_v51 = vpack.c.bf16 %v1764_v46, %v1764_v46  ;;  %2844 = vst.msk [vmem:[%s5139_s3 + $0x2c0] sm:$0xf] %vm2667_vm0, %v3347_v47  ;;  %v3571_v52 = vpop.f32.mrb[80].mxu0  ;;  %v3348_v53 = vpack.c.bf16 %v1864_v48, %v1864_v48  ;;  %v3671_v54 = vpop.f32.mrb[80].mxu1 }
 0x196   :  { %2747 = vst.msk [vmem:[%s5139_s3 + $0x13c] sm:$0xf] %vm2667_vm0, %v3250_v49  ;;  %2847 = vst.msk [vmem:[%s5139_s3 + $0x2cc] sm:$0xf] %vm2667_vm0, %v3350_v50  ;;  %v1233_v55 = vadd.f32 %v4666_v18, %v3571_v52  ;;  %v1224_v56 = vpop.f32.mrb[81].mxu0  ;;  %v1633_v57 = vadd.f32 %v4666_v18, %v3671_v54  ;;  %v1624_v58 = vpop.f32.mrb[81].mxu1 }
 0x197   :  { %2745 = vst.msk [vmem:[%s5139_s3 + $0x134] sm:$0xf] %vm2667_vm0, %v3248_v51  ;;  %2845 = vst.msk [vmem:[%s5139_s3 + $0x2c4] sm:$0xf] %vm2667_vm0, %v3348_v53  ;;  %v1225_v59 = vadd.f32 %v4666_v18, %v1224_v56  ;;  %v3572_v60 = vpop.f32.mrb[82].mxu0  ;;  %v1625_v61 = vadd.f32 %v4666_v18, %v1624_v58  ;;  %v3672_v62 = vpop.f32.mrb[82].mxu1 }
 0x198   :  { %v1769_v63 = vmax.f32 %v1233_v55, 0.0  ;;  %v1236_v0 = vadd.f32 %v4666_v18, %v3572_v60  ;;  %v1227_v1 = vpop.f32.mrb[83].mxu0  ;;  %v1869_v2 = vmax.f32 %v1633_v57, 0.0  ;;  %v1636_v3 = vadd.f32 %v4666_v18, %v3672_v62  ;;  %v1627_v4 = vpop.f32.mrb[83].mxu1 }
 0x199   :  { %v1767_v5 = vmax.f32 %v1225_v59, 0.0  ;;  %v1228_v6 = vadd.f32 %v4666_v18, %v1227_v1  ;;  %v1867_v7 = vmax.f32 %v1625_v61, 0.0  ;;  %v1628_v8 = vadd.f32 %v4666_v18, %v1627_v4 }
 0x19a   :  { %v3253_v9 = vpack.c.bf16 %v1769_v63, %v1769_v63  ;;  %v1770_v10 = vmax.f32 %v1236_v0, 0.0  ;;  %v3353_v11 = vpack.c.bf16 %v1869_v2, %v1869_v2  ;;  %v1870_v12 = vmax.f32 %v1636_v3, 0.0 }
 0x19b   :  { %v3251_v13 = vpack.c.bf16 %v1767_v5, %v1767_v5  ;;  %v1768_v42 = vmax.f32 %v1228_v6, 0.0  ;;  %v3351_v14 = vpack.c.bf16 %v1867_v7, %v1867_v7  ;;  %v1868_v15 = vmax.f32 %v1628_v8, 0.0 }
 0x19c   :  { %2750 = vst.msk [vmem:[%s5139_s3 + $0x148] sm:$0xf] %vm2667_vm0, %v3253_v9  ;;  %v3254_v16 = vpack.c.bf16 %v1770_v10, %v1770_v10  ;;  %2850 = vst.msk [vmem:[%s5139_s3 + $0x2d8] sm:$0xf] %vm2667_vm0, %v3353_v11  ;;  %v3354_v17 = vpack.c.bf16 %v1870_v12, %v1870_v12 }
 0x19d   :  { %2748 = vst.msk [vmem:[%s5139_s3 + $0x140] sm:$0xf] %vm2667_vm0, %v3251_v13  ;;  %v3252_v19 = vpack.c.bf16 %v1768_v42, %v1768_v42  ;;  %2848 = vst.msk [vmem:[%s5139_s3 + $0x2d0] sm:$0xf] %vm2667_vm0, %v3351_v14  ;;  %v3575_v20 = vpop.f32.mrb[84].mxu0  ;;  %v3352_v21 = vpack.c.bf16 %v1868_v15, %v1868_v15  ;;  %v3675_v22 = vpop.f32.mrb[84].mxu1 }
 0x19e   :  { %2751 = vst.msk [vmem:[%s5139_s3 + $0x14c] sm:$0xf] %vm2667_vm0, %v3254_v16  ;;  %2851 = vst.msk [vmem:[%s5139_s3 + $0x2dc] sm:$0xf] %vm2667_vm0, %v3354_v17  ;;  %v1249_v23 = vadd.f32 %v4666_v18, %v3575_v20  ;;  %v1240_v24 = vpop.f32.mrb[85].mxu0  ;;  %v1649_v25 = vadd.f32 %v4666_v18, %v3675_v22  ;;  %v1640_v26 = vpop.f32.mrb[85].mxu1 }
 0x19f   :  { %2749 = vst.msk [vmem:[%s5139_s3 + $0x144] sm:$0xf] %vm2667_vm0, %v3252_v19  ;;  %2849 = vst.msk [vmem:[%s5139_s3 + $0x2d4] sm:$0xf] %vm2667_vm0, %v3352_v21  ;;  %v1241_v27 = vadd.f32 %v4666_v18, %v1240_v24  ;;  %v3576_v28 = vpop.f32.mrb[86].mxu0  ;;  %v1641_v29 = vadd.f32 %v4666_v18, %v1640_v26  ;;  %v3676_v30 = vpop.f32.mrb[86].mxu1 }
 0x1a0   :  { %v1773_v31 = vmax.f32 %v1249_v23, 0.0  ;;  %v1252_v32 = vadd.f32 %v4666_v18, %v3576_v28  ;;  %v1243_v33 = vpop.f32.mrb[87].mxu0  ;;  %v1873_v34 = vmax.f32 %v1649_v25, 0.0  ;;  %v1652_v35 = vadd.f32 %v4666_v18, %v3676_v30  ;;  %v1643_v36 = vpop.f32.mrb[87].mxu1 }
 0x1a1   :  { %v1771_v37 = vmax.f32 %v1241_v27, 0.0  ;;  %v1244_v38 = vadd.f32 %v4666_v18, %v1243_v33  ;;  %v1871_v39 = vmax.f32 %v1641_v29, 0.0  ;;  %v1644_v40 = vadd.f32 %v4666_v18, %v1643_v36 }
 0x1a2   :  { %v3257_v41 = vpack.c.bf16 %v1773_v31, %v1773_v31  ;;  %v1774_v43 = vmax.f32 %v1252_v32, 0.0  ;;  %v3357_v44 = vpack.c.bf16 %v1873_v34, %v1873_v34  ;;  %v1874_v45 = vmax.f32 %v1652_v35, 0.0 }
 0x1a3   :  { %v3255_v46 = vpack.c.bf16 %v1771_v37, %v1771_v37  ;;  %v1772_v47 = vmax.f32 %v1244_v38, 0.0  ;;  %v3355_v48 = vpack.c.bf16 %v1871_v39, %v1871_v39  ;;  %v1872_v49 = vmax.f32 %v1644_v40, 0.0 }
 0x1a4   :  { %2754 = vst.msk [vmem:[%s5139_s3 + $0x158] sm:$0xf] %vm2667_vm0, %v3257_v41  ;;  %v3258_v50 = vpack.c.bf16 %v1774_v43, %v1774_v43  ;;  %2854 = vst.msk [vmem:[%s5139_s3 + $0x2e8] sm:$0xf] %vm2667_vm0, %v3357_v44  ;;  %v3358_v51 = vpack.c.bf16 %v1874_v45, %v1874_v45 }
 0x1a5   :  { %2752 = vst.msk [vmem:[%s5139_s3 + $0x150] sm:$0xf] %vm2667_vm0, %v3255_v46  ;;  %v3256_v52 = vpack.c.bf16 %v1772_v47, %v1772_v47  ;;  %2852 = vst.msk [vmem:[%s5139_s3 + $0x2e0] sm:$0xf] %vm2667_vm0, %v3355_v48  ;;  %v3579_v53 = vpop.f32.mrb[88].mxu0  ;;  %v3356_v54 = vpack.c.bf16 %v1872_v49, %v1872_v49  ;;  %v3679_v55 = vpop.f32.mrb[88].mxu1 }
 0x1a6   :  { %2755 = vst.msk [vmem:[%s5139_s3 + $0x15c] sm:$0xf] %vm2667_vm0, %v3258_v50  ;;  %2855 = vst.msk [vmem:[%s5139_s3 + $0x2ec] sm:$0xf] %vm2667_vm0, %v3358_v51  ;;  %v1265_v56 = vadd.f32 %v4666_v18, %v3579_v53  ;;  %v1256_v57 = vpop.f32.mrb[89].mxu0  ;;  %v1665_v58 = vadd.f32 %v4666_v18, %v3679_v55  ;;  %v1656_v59 = vpop.f32.mrb[89].mxu1 }
 0x1a7   :  { %2753 = vst.msk [vmem:[%s5139_s3 + $0x154] sm:$0xf] %vm2667_vm0, %v3256_v52  ;;  %2853 = vst.msk [vmem:[%s5139_s3 + $0x2e4] sm:$0xf] %vm2667_vm0, %v3356_v54  ;;  %v1257_v60 = vadd.f32 %v4666_v18, %v1256_v57  ;;  %v3580_v61 = vpop.f32.mrb[90].mxu0  ;;  %v1657_v62 = vadd.f32 %v4666_v18, %v1656_v59  ;;  %v3680_v63 = vpop.f32.mrb[90].mxu1 }
 0x1a8   :  { %v1777_v0 = vmax.f32 %v1265_v56, 0.0  ;;  %v1268_v1 = vadd.f32 %v4666_v18, %v3580_v61  ;;  %v1259_v2 = vpop.f32.mrb[91].mxu0  ;;  %v1877_v3 = vmax.f32 %v1665_v58, 0.0  ;;  %v1668_v4 = vadd.f32 %v4666_v18, %v3680_v63  ;;  %v1659_v5 = vpop.f32.mrb[91].mxu1 }
 0x1a9   :  { %v1775_v6 = vmax.f32 %v1257_v60, 0.0  ;;  %v1260_v7 = vadd.f32 %v4666_v18, %v1259_v2  ;;  %v1875_v8 = vmax.f32 %v1657_v62, 0.0  ;;  %v1660_v9 = vadd.f32 %v4666_v18, %v1659_v5 }
 0x1aa   :  { %v3261_v10 = vpack.c.bf16 %v1777_v0, %v1777_v0  ;;  %v1778_v11 = vmax.f32 %v1268_v1, 0.0  ;;  %v3361_v12 = vpack.c.bf16 %v1877_v3, %v1877_v3  ;;  %v1878_v13 = vmax.f32 %v1668_v4, 0.0 }
 0x1ab   :  { %v3259_v42 = vpack.c.bf16 %v1775_v6, %v1775_v6  ;;  %v1776_v14 = vmax.f32 %v1260_v7, 0.0  ;;  %v3359_v15 = vpack.c.bf16 %v1875_v8, %v1875_v8  ;;  %v1876_v16 = vmax.f32 %v1660_v9, 0.0 }
 0x1ac   :  { %2758 = vst.msk [vmem:[%s5139_s3 + $0x168] sm:$0xf] %vm2667_vm0, %v3261_v10  ;;  %v3262_v17 = vpack.c.bf16 %v1778_v11, %v1778_v11  ;;  %2858 = vst.msk [vmem:[%s5139_s3 + $0x2f8] sm:$0xf] %vm2667_vm0, %v3361_v12  ;;  %v3362_v19 = vpack.c.bf16 %v1878_v13, %v1878_v13 }
 0x1ad   :  { %2756 = vst.msk [vmem:[%s5139_s3 + $0x160] sm:$0xf] %vm2667_vm0, %v3259_v42  ;;  %v3260_v20 = vpack.c.bf16 %v1776_v14, %v1776_v14  ;;  %2856 = vst.msk [vmem:[%s5139_s3 + $0x2f0] sm:$0xf] %vm2667_vm0, %v3359_v15  ;;  %v3583_v21 = vpop.f32.mrb[92].mxu0  ;;  %v3360_v22 = vpack.c.bf16 %v1876_v16, %v1876_v16  ;;  %v3683_v23 = vpop.f32.mrb[92].mxu1 }
 0x1ae   :  { %2759 = vst.msk [vmem:[%s5139_s3 + $0x16c] sm:$0xf] %vm2667_vm0, %v3262_v17  ;;  %2859 = vst.msk [vmem:[%s5139_s3 + $0x2fc] sm:$0xf] %vm2667_vm0, %v3362_v19  ;;  %v1281_v24 = vadd.f32 %v4666_v18, %v3583_v21  ;;  %v1272_v25 = vpop.f32.mrb[93].mxu0  ;;  %v1681_v26 = vadd.f32 %v4666_v18, %v3683_v23  ;;  %v1672_v27 = vpop.f32.mrb[93].mxu1 }
 0x1af   :  { %2757 = vst.msk [vmem:[%s5139_s3 + $0x164] sm:$0xf] %vm2667_vm0, %v3260_v20  ;;  %2857 = vst.msk [vmem:[%s5139_s3 + $0x2f4] sm:$0xf] %vm2667_vm0, %v3360_v22  ;;  %v1273_v28 = vadd.f32 %v4666_v18, %v1272_v25  ;;  %v3584_v29 = vpop.f32.mrb[94].mxu0  ;;  %v1673_v30 = vadd.f32 %v4666_v18, %v1672_v27  ;;  %v3684_v31 = vpop.f32.mrb[94].mxu1 }
 0x1b0   :  { %v1781_v32 = vmax.f32 %v1281_v24, 0.0  ;;  %v1284_v33 = vadd.f32 %v4666_v18, %v3584_v29  ;;  %v1275_v34 = vpop.f32.mrb[95].mxu0  ;;  %v1881_v35 = vmax.f32 %v1681_v26, 0.0  ;;  %v1684_v36 = vadd.f32 %v4666_v18, %v3684_v31  ;;  %v1675_v37 = vpop.f32.mrb[95].mxu1 }
 0x1b1   :  { %v1779_v38 = vmax.f32 %v1273_v28, 0.0  ;;  %v1276_v39 = vadd.f32 %v4666_v18, %v1275_v34  ;;  %v1879_v40 = vmax.f32 %v1673_v30, 0.0  ;;  %v1676_v41 = vadd.f32 %v4666_v18, %v1675_v37 }
 0x1b2   :  { %v3265_v43 = vpack.c.bf16 %v1781_v32, %v1781_v32  ;;  %v1782_v44 = vmax.f32 %v1284_v33, 0.0  ;;  %v3365_v45 = vpack.c.bf16 %v1881_v35, %v1881_v35  ;;  %v1882_v46 = vmax.f32 %v1684_v36, 0.0 }
 0x1b3   :  { %v3263_v47 = vpack.c.bf16 %v1779_v38, %v1779_v38  ;;  %v1780_v48 = vmax.f32 %v1276_v39, 0.0  ;;  %v3363_v49 = vpack.c.bf16 %v1879_v40, %v1879_v40  ;;  %v1880_v50 = vmax.f32 %v1676_v41, 0.0 }
 0x1b4   :  { %2762 = vst.msk [vmem:[%s5139_s3 + $0x178] sm:$0xf] %vm2667_vm0, %v3265_v43  ;;  %v3266_v51 = vpack.c.bf16 %v1782_v44, %v1782_v44  ;;  %2862 = vst.msk [vmem:[%s5139_s3 + $0x308] sm:$0xf] %vm2667_vm0, %v3365_v45  ;;  %v3366_v52 = vpack.c.bf16 %v1882_v46, %v1882_v46 }
 0x1b5   :  { %2760 = vst.msk [vmem:[%s5139_s3 + $0x170] sm:$0xf] %vm2667_vm0, %v3263_v47  ;;  %v3264_v53 = vpack.c.bf16 %v1780_v48, %v1780_v48  ;;  %2860 = vst.msk [vmem:[%s5139_s3 + $0x300] sm:$0xf] %vm2667_vm0, %v3363_v49  ;;  %v3587_v54 = vpop.f32.mrb[96].mxu0  ;;  %v3364_v55 = vpack.c.bf16 %v1880_v50, %v1880_v50 }
 0x1b6   :  { %2763 = vst.msk [vmem:[%s5139_s3 + $0x17c] sm:$0xf] %vm2667_vm0, %v3266_v51  ;;  %2863 = vst.msk [vmem:[%s5139_s3 + $0x30c] sm:$0xf] %vm2667_vm0, %v3366_v52  ;;  %v1297_v56 = vadd.f32 %v4666_v18, %v3587_v54  ;;  %v1288_v57 = vpop.f32.mrb[97].mxu0 }
 0x1b7   :  { %2761 = vst.msk [vmem:[%s5139_s3 + $0x174] sm:$0xf] %vm2667_vm0, %v3264_v53  ;;  %2861 = vst.msk [vmem:[%s5139_s3 + $0x304] sm:$0xf] %vm2667_vm0, %v3364_v55  ;;  %v1289_v58 = vadd.f32 %v4666_v18, %v1288_v57  ;;  %v3588_v59 = vpop.f32.mrb[98].mxu0 }
 0x1b8   :  { %v1785_v60 = vmax.f32 %v1297_v56, 0.0  ;;  %v1300_v61 = vadd.f32 %v4666_v18, %v3588_v59  ;;  %v1291_v62 = vpop.f32.mrb[99].mxu0 }
 0x1b9   :  { %v1783_v63 = vmax.f32 %v1289_v58, 0.0  ;;  %v1292_v0 = vadd.f32 %v4666_v18, %v1291_v62 }
 0x1ba   :  { %v3269_v1 = vpack.c.bf16 %v1785_v60, %v1785_v60  ;;  %v1786_v2 = vmax.f32 %v1300_v61, 0.0 }
 0x1bb   :  { %v3267_v3 = vpack.c.bf16 %v1783_v63, %v1783_v63  ;;  %v1784_v4 = vmax.f32 %v1292_v0, 0.0 }
 0x1bc   :  { %2766 = vst.msk [vmem:[%s5139_s3 + $0x188] sm:$0xf] %vm2667_vm0, %v3269_v1  ;;  %v3270_v5 = vpack.c.bf16 %v1786_v2, %v1786_v2 }
 0x1bd   :  { %2764 = vst.msk [vmem:[%s5139_s3 + $0x180] sm:$0xf] %vm2667_vm0, %v3267_v3  ;;  %v3268_v6 = vpack.c.bf16 %v1784_v4, %v1784_v4 }
 0x1be   :  { %2767 = vst.msk [vmem:[%s5139_s3 + $0x18c] sm:$0xf] %vm2667_vm0, %v3270_v5 }
 0x1bf   :  { %2765 = vst.msk [vmem:[%s5139_s3 + $0x184] sm:$0xf] %vm2667_vm0, %v3268_v6 }

// kernel: qnetwork_forward.6
= control target key start
LH: loop header
LB: loop body
LE: loop exit
PB: predicated region body
PF: predicated region fallthrough
CT: control target
= control target key end

     0   :  { %v4578_v0 = vmov 0   ;;  %s5696_s1 = inlined_call_operand.vmem [shape: bf16[256,128], index: 1, kind: input, shape index: {}]   ;;  %s5697_s0 = inlined_call_operand.vmem [shape: bf16[1472,256], index: 0, kind: input, shape index: {}]   ;;  %s5698_s2 = inlined_call_operand.vmem [shape: f32[1,128], index: 2, kind: input, shape index: {}]   ;;  %s5699_s3 = inlined_call_operand.vmem [shape: bf16[1472,128], index: 3, kind: output, shape index: {}]  }
   0x1   :  { %1254 = vmatprep.subr.bf16.mxu0 %v4578_v0  ;;  %4251 = vmatprep.subr.bf16.mxu1 %v4578_v0  ;;  %v4284_v1 = vld [vmem:[%s5696_s1] sm:$0xff]   ;;  %v4285_v2 = vld [vmem:[%s5696_s1 + $0x8] sm:$0xff]   ;;  %v4286_v3 = vld [vmem:[%s5696_s1 + $0x10] sm:$0xff]  }
   0x2   :  { %1255 = vmatpush1.bf16.msra.mxu0 %v4284_v1  ;;  %4267 = vmatpush1.bf16.msra.mxu1 %v4284_v1  ;;  %v4287_v4 = vld [vmem:[%s5696_s1 + $0x18] sm:$0xff]   ;;  %v4288_v5 = vld [vmem:[%s5696_s1 + $0x20] sm:$0xff]   ;;  %v4289_v7 = vld [vmem:[%s5696_s1 + $0x28] sm:$0xff]  }
   0x3   :  { %1256 = vmatprep.subr.bf16.mxu0 %v4578_v0  ;;  %4252 = vmatprep.subr.bf16.mxu1 %v4578_v0  ;;  %v4302_v6 = vld [vmem:[%s5697_s0 + $0x4] ss:$8 sps:$4 sm:$0xff]   ;;  %v4290_v9 = vld [vmem:[%s5696_s1 + $0x30] sm:$0xff]   ;;  %v4291_v10 = vld [vmem:[%s5696_s1 + $0x38] sm:$0xff]  }
   0x4   :  { %v4305_v8 = vld [vmem:[%s5697_s0 + $0x2e4] ss:$8 sps:$4 sm:$0xff]   ;;  %1286 = vmatprep.mubr.bf16.mxu0 %v4302_v6  ;;  %v4294_v13 = vld [vmem:[%s5696_s1 + $0x50] sm:$0xff]   ;;  %v4295_v14 = vld [vmem:[%s5696_s1 + $0x58] sm:$0xff]  }
   0x5   :  { %1654 = vmatprep.mubr.bf16.mxu1 %v4305_v8  ;;  %v4292_v11 = vld [vmem:[%s5696_s1 + $0x40] sm:$0xff]   ;;  %v4293_v12 = vld [vmem:[%s5696_s1 + $0x48] sm:$0xff]   ;;  %v4298_v17 = vld [vmem:[%s5696_s1 + $0x70] sm:$0xff]  }
   0x6   :  { %1257 = vmatpush1.bf16.msra.mxu0 %v4285_v2  ;;  %4268 = vmatpush1.bf16.msra.mxu1 %v4285_v2  ;;  %v4296_v15 = vld [vmem:[%s5696_s1 + $0x60] sm:$0xff]   ;;  %v4297_v16 = vld [vmem:[%s5696_s1 + $0x68] sm:$0xff]   ;;  %v4299_v18 = vld [vmem:[%s5696_s1 + $0x78] sm:$0xff]  }
   0x7   :  { %1258 = vmatprep.subr.bf16.mxu0 %v4578_v0  ;;  %4253 = vmatprep.subr.bf16.mxu1 %v4578_v0  ;;  %v4300_v19 = vld [vmem:[%s5697_s0] ss:$8 sps:$4 sm:$0xff]   ;;  %v4306_v21 = vld [vmem:[%s5697_s0 + $0x14] ss:$8 sps:$4 sm:$0xff]   ;;  %v4310_v23 = vld [vmem:[%s5697_s0 + $0x10] ss:$8 sps:$4 sm:$0xff]  }
   0x8   :  { %v4303_v20 = vld [vmem:[%s5697_s0 + $0x2e0] ss:$8 sps:$4 sm:$0xff]   ;;  %v4308_v22 = vld [vmem:[%s5697_s0 + $0x2f4] ss:$8 sps:$4 sm:$0xff]   ;;  %v4311_v24 = vld [vmem:[%s5697_s0 + $0x2f0] ss:$8 sps:$4 sm:$0xff]  }
   0x9   :  { %v4312_v25 = vld [vmem:[%s5697_s0 + $0x24] ss:$8 sps:$4 sm:$0xff]   ;;  %v4316_v27 = vld [vmem:[%s5697_s0 + $0x20] ss:$8 sps:$4 sm:$0xff]   ;;  %v4318_v29 = vld [vmem:[%s5697_s0 + $0x34] ss:$8 sps:$4 sm:$0xff]  }
   0xa   :  { %1259 = vmatpush1.bf16.msra.mxu0 %v4286_v3  ;;  %4269 = vmatpush1.bf16.msra.mxu1 %v4286_v3  ;;  %v4314_v26 = vld [vmem:[%s5697_s0 + $0x304] ss:$8 sps:$4 sm:$0xff]   ;;  %v4317_v28 = vld [vmem:[%s5697_s0 + $0x300] ss:$8 sps:$4 sm:$0xff]   ;;  %v4320_v30 = vld [vmem:[%s5697_s0 + $0x314] ss:$8 sps:$4 sm:$0xff]  }
   0xb   :  { %1260 = vmatprep.subr.bf16.mxu0 %v4578_v0  ;;  %4254 = vmatprep.subr.bf16.mxu1 %v4578_v0  ;;  %v4322_v31 = vld [vmem:[%s5697_s0 + $0x30] ss:$8 sps:$4 sm:$0xff]   ;;  %v4324_v33 = vld [vmem:[%s5697_s0 + $0x44] ss:$8 sps:$4 sm:$0xff]   ;;  %v4328_v35 = vld [vmem:[%s5697_s0 + $0x40] ss:$8 sps:$4 sm:$0xff]  }
   0xc   :  { %v4323_v32 = vld [vmem:[%s5697_s0 + $0x310] ss:$8 sps:$4 sm:$0xff]   ;;  %v4326_v34 = vld [vmem:[%s5697_s0 + $0x324] ss:$8 sps:$4 sm:$0xff]   ;;  %v4329_v36 = vld [vmem:[%s5697_s0 + $0x320] ss:$8 sps:$4 sm:$0xff]  }
   0xd   :  { %v4330_v37 = vld [vmem:[%s5697_s0 + $0x54] ss:$8 sps:$4 sm:$0xff]   ;;  %v4334_v39 = vld [vmem:[%s5697_s0 + $0x50] ss:$8 sps:$4 sm:$0xff]   ;;  %v4336_v41 = vld [vmem:[%s5697_s0 + $0x64] ss:$8 sps:$4 sm:$0xff]  }
   0xe   :  { %1261 = vmatpush1.bf16.msra.mxu0 %v4287_v4  ;;  %4270 = vmatpush1.bf16.msra.mxu1 %v4287_v4  ;;  %v4332_v38 = vld [vmem:[%s5697_s0 + $0x334] ss:$8 sps:$4 sm:$0xff]   ;;  %v4335_v40 = vld [vmem:[%s5697_s0 + $0x330] ss:$8 sps:$4 sm:$0xff]   ;;  %v4338_v42 = vld [vmem:[%s5697_s0 + $0x344] ss:$8 sps:$4 sm:$0xff]  }
   0xf   :  { %1262 = vmatprep.subr.bf16.mxu0 %v4578_v0  ;;  %4255 = vmatprep.subr.bf16.mxu1 %v4578_v0  ;;  %v4340_v43 = vld [vmem:[%s5697_s0 + $0x60] ss:$8 sps:$4 sm:$0xff]   ;;  %v4342_v45 = vld [vmem:[%s5697_s0 + $0x74] ss:$8 sps:$4 sm:$0xff]   ;;  %v4346_v47 = vld [vmem:[%s5697_s0 + $0x70] ss:$8 sps:$4 sm:$0xff]  }
  0x10   :  { %v4341_v44 = vld [vmem:[%s5697_s0 + $0x340] ss:$8 sps:$4 sm:$0xff]   ;;  %v4344_v46 = vld [vmem:[%s5697_s0 + $0x354] ss:$8 sps:$4 sm:$0xff]   ;;  %v4347_v48 = vld [vmem:[%s5697_s0 + $0x350] ss:$8 sps:$4 sm:$0xff]  }
  0x11   :  { %v4348_v49 = vld [vmem:[%s5697_s0 + $0x84] ss:$8 sps:$4 sm:$0xff]   ;;  %v4352_v51 = vld [vmem:[%s5697_s0 + $0x80] ss:$8 sps:$4 sm:$0xff]   ;;  %v4354_v53 = vld [vmem:[%s5697_s0 + $0x94] ss:$8 sps:$4 sm:$0xff]  }
  0x12   :  { %1263 = vmatpush1.bf16.msra.mxu0 %v4288_v5  ;;  %4271 = vmatpush1.bf16.msra.mxu1 %v4288_v5  ;;  %v4350_v50 = vld [vmem:[%s5697_s0 + $0x364] ss:$8 sps:$4 sm:$0xff]   ;;  %v4353_v52 = vld [vmem:[%s5697_s0 + $0x360] ss:$8 sps:$4 sm:$0xff]   ;;  %v4356_v54 = vld [vmem:[%s5697_s0 + $0x374] ss:$8 sps:$4 sm:$0xff]  }
  0x13   :  { %1264 = vmatprep.subr.bf16.mxu0 %v4578_v0  ;;  %4256 = vmatprep.subr.bf16.mxu1 %v4578_v0  ;;  %v4358_v55 = vld [vmem:[%s5697_s0 + $0x90] ss:$8 sps:$4 sm:$0xff]   ;;  %v4360_v57 = vld [vmem:[%s5697_s0 + $0xa4] ss:$8 sps:$4 sm:$0xff]   ;;  %v4364_v59 = vld [vmem:[%s5697_s0 + $0xa0] ss:$8 sps:$4 sm:$0xff]  }
  0x14   :  { %v4359_v56 = vld [vmem:[%s5697_s0 + $0x370] ss:$8 sps:$4 sm:$0xff]   ;;  %v4362_v58 = vld [vmem:[%s5697_s0 + $0x384] ss:$8 sps:$4 sm:$0xff]   ;;  %v4365_v60 = vld [vmem:[%s5697_s0 + $0x380] ss:$8 sps:$4 sm:$0xff]  }
  0x15   :  { %v4366_v61 = vld [vmem:[%s5697_s0 + $0xb4] ss:$8 sps:$4 sm:$0xff]   ;;  %v4370_v63 = vld [vmem:[%s5697_s0 + $0xb0] ss:$8 sps:$4 sm:$0xff]   ;;  %v4372_v1 = vld [vmem:[%s5697_s0 + $0xc4] ss:$8 sps:$4 sm:$0xff]  }
  0x16   :  { %1265 = vmatpush1.bf16.msra.mxu0 %v4289_v7  ;;  %4272 = vmatpush1.bf16.msra.mxu1 %v4289_v7  ;;  %v4368_v62 = vld [vmem:[%s5697_s0 + $0x394] ss:$8 sps:$4 sm:$0xff]   ;;  %v4374_v2 = vld [vmem:[%s5697_s0 + $0x3a4] ss:$8 sps:$4 sm:$0xff]   ;;  %v4376_v3 = vld [vmem:[%s5697_s0 + $0xc0] ss:$8 sps:$4 sm:$0xff]  }
  0x17   :  { %1266 = vmatprep.subr.bf16.mxu0 %v4578_v0  ;;  %4257 = vmatprep.subr.bf16.mxu1 %v4578_v0  ;;  %v4377_v4 = vld [vmem:[%s5697_s0 + $0x3a0] ss:$8 sps:$4 sm:$0xff]   ;;  %v4378_v5 = vld [vmem:[%s5697_s0 + $0xd4] ss:$8 sps:$4 sm:$0xff]   ;;  %v4382_v7 = vld [vmem:[%s5697_s0 + $0xd0] ss:$8 sps:$4 sm:$0xff]  }
  0x18   :  { %v4380_v6 = vld [vmem:[%s5697_s0 + $0x3b4] ss:$8 sps:$4 sm:$0xff]   ;;  %v4383_v8 = vld [vmem:[%s5697_s0 + $0x3b0] ss:$8 sps:$4 sm:$0xff]  }
  0x1a   :  { %1267 = vmatpush1.bf16.msra.mxu0 %v4290_v9  ;;  %4273 = vmatpush1.bf16.msra.mxu1 %v4290_v9  ;;  %v4384_v9 = vld [vmem:[%s5697_s0 + $0xe4] ss:$8 sps:$4 sm:$0xff]  }
  0x1b   :  { %1268 = vmatprep.subr.bf16.mxu0 %v4578_v0  ;;  %4258 = vmatprep.subr.bf16.mxu1 %v4578_v0 }
  0x1e   :  { %1269 = vmatpush1.bf16.msra.mxu0 %v4291_v10  ;;  %4274 = vmatpush1.bf16.msra.mxu1 %v4291_v10  ;;  %v4386_v10 = vld [vmem:[%s5697_s0 + $0x3c4] ss:$8 sps:$4 sm:$0xff]  }
  0x1f   :  { %1270 = vmatprep.subr.bf16.mxu0 %v4578_v0  ;;  %4259 = vmatprep.subr.bf16.mxu1 %v4578_v0 }
  0x22   :  { %1271 = vmatpush1.bf16.msra.mxu0 %v4292_v11  ;;  %4275 = vmatpush1.bf16.msra.mxu1 %v4292_v11  ;;  %v4388_v11 = vld [vmem:[%s5697_s0 + $0xe0] ss:$8 sps:$4 sm:$0xff]  }
  0x23   :  { %1272 = vmatprep.subr.bf16.mxu0 %v4578_v0  ;;  %4260 = vmatprep.subr.bf16.mxu1 %v4578_v0 }
  0x26   :  { %1273 = vmatpush1.bf16.msra.mxu0 %v4293_v12  ;;  %4276 = vmatpush1.bf16.msra.mxu1 %v4293_v12  ;;  %v4389_v12 = vld [vmem:[%s5697_s0 + $0x3c0] ss:$8 sps:$4 sm:$0xff]  }
  0x27   :  { %1274 = vmatprep.subr.bf16.mxu0 %v4578_v0  ;;  %4261 = vmatprep.subr.bf16.mxu1 %v4578_v0 }
  0x2a   :  { %1275 = vmatpush1.bf16.msra.mxu0 %v4294_v13  ;;  %4277 = vmatpush1.bf16.msra.mxu1 %v4294_v13  ;;  %v4390_v13 = vld [vmem:[%s5697_s0 + $0xf4] ss:$8 sps:$4 sm:$0xff]  }
  0x2b   :  { %1276 = vmatprep.subr.bf16.mxu0 %v4578_v0  ;;  %4262 = vmatprep.subr.bf16.mxu1 %v4578_v0 }
  0x2e   :  { %1277 = vmatpush1.bf16.msra.mxu0 %v4295_v14  ;;  %4278 = vmatpush1.bf16.msra.mxu1 %v4295_v14  ;;  %v4392_v14 = vld [vmem:[%s5697_s0 + $0x3d4] ss:$8 sps:$4 sm:$0xff]  }
  0x2f   :  { %1278 = vmatprep.subr.bf16.mxu0 %v4578_v0  ;;  %4263 = vmatprep.subr.bf16.mxu1 %v4578_v0 }
  0x32   :  { %1279 = vmatpush1.bf16.msra.mxu0 %v4296_v15  ;;  %4279 = vmatpush1.bf16.msra.mxu1 %v4296_v15  ;;  %v4394_v15 = vld [vmem:[%s5697_s0 + $0xf0] ss:$8 sps:$4 sm:$0xff]  }
  0x33   :  { %1280 = vmatprep.subr.bf16.mxu0 %v4578_v0  ;;  %4264 = vmatprep.subr.bf16.mxu1 %v4578_v0 }
  0x36   :  { %1281 = vmatpush1.bf16.msra.mxu0 %v4297_v16  ;;  %4280 = vmatpush1.bf16.msra.mxu1 %v4297_v16  ;;  %v4395_v16 = vld [vmem:[%s5697_s0 + $0x3d0] ss:$8 sps:$4 sm:$0xff]  }
  0x37   :  { %1282 = vmatprep.subr.bf16.mxu0 %v4578_v0  ;;  %4265 = vmatprep.subr.bf16.mxu1 %v4578_v0 }
  0x3a   :  { %1283 = vmatpush1.bf16.msra.mxu0 %v4298_v17  ;;  %4281 = vmatpush1.bf16.msra.mxu1 %v4298_v17  ;;  %v4396_v17 = vld [vmem:[%s5697_s0 + $0x104] ss:$8 sps:$4 sm:$0xff]  }
  0x3b   :  { %1284 = vmatprep.subr.bf16.mxu0 %v4578_v0  ;;  %4266 = vmatprep.subr.bf16.mxu1 %v4578_v0  ;;  %v4371_v0 = vld [vmem:[%s5697_s0 + $0x390] ss:$8 sps:$4 sm:$0xff]  }
  0x3e   :  { %1285 = vmatpush1.bf16.msra.mxu0 %v4299_v18  ;;  %4282 = vmatpush1.bf16.msra.mxu1 %v4299_v18  ;;  %v4398_v18 = vld [vmem:[%s5697_s0 + $0x3e4] ss:$8 sps:$4 sm:$0xff]  }
  0x41   :  { %1287 = vmatmul.mubr.bf16.vlgmr.msra.gmra.mrb[0].mxu0 %v4300_v19  ;;  %1655 = vmatmul.mubr.bf16.vlgmr.msra.gmra.mrb[0].mxu1 %v4303_v20  ;;  %v4400_v19 = vld [vmem:[%s5697_s0 + $0x100] ss:$8 sps:$4 sm:$0xff]  }
  0x42   :  { %1294 = vmatprep.mubr.bf16.mxu0 %v4306_v21  ;;  %1662 = vmatprep.mubr.bf16.mxu1 %v4308_v22  ;;  %v4401_v20 = vld [vmem:[%s5697_s0 + $0x3e0] ss:$8 sps:$4 sm:$0xff]   ;;  %v4402_v21 = vld [vmem:[%s5697_s0 + $0x114] ss:$8 sps:$4 sm:$0xff]  }
  0x43   :  { %v4404_v22 = vld [vmem:[%s5697_s0 + $0x3f4] ss:$8 sps:$4 sm:$0xff]  }
  0x49   :  { %1295 = vmatmul.mubr.bf16.gmra.mrb[4].mxu0 %v4310_v23  ;;  %1663 = vmatmul.mubr.bf16.gmra.mrb[4].mxu1 %v4311_v24  ;;  %v4406_v23 = vld [vmem:[%s5697_s0 + $0x110] ss:$8 sps:$4 sm:$0xff]  }
  0x4a   :  { %1302 = vmatprep.mubr.bf16.mxu0 %v4312_v25  ;;  %1670 = vmatprep.mubr.bf16.mxu1 %v4314_v26  ;;  %v4407_v24 = vld [vmem:[%s5697_s0 + $0x3f0] ss:$8 sps:$4 sm:$0xff]   ;;  %v4408_v25 = vld [vmem:[%s5697_s0 + $0x124] ss:$8 sps:$4 sm:$0xff]  }
  0x4b   :  { %v4410_v26 = vld [vmem:[%s5697_s0 + $0x404] ss:$8 sps:$4 sm:$0xff]  }
  0x51   :  { %1303 = vmatmul.mubr.bf16.gmra.mrb[8].mxu0 %v4316_v27  ;;  %1671 = vmatmul.mubr.bf16.gmra.mrb[8].mxu1 %v4317_v28  ;;  %v4412_v27 = vld [vmem:[%s5697_s0 + $0x120] ss:$8 sps:$4 sm:$0xff]  }
  0x52   :  { %1310 = vmatprep.mubr.bf16.mxu0 %v4318_v29  ;;  %1678 = vmatprep.mubr.bf16.mxu1 %v4320_v30  ;;  %v4413_v28 = vld [vmem:[%s5697_s0 + $0x400] ss:$8 sps:$4 sm:$0xff]   ;;  %v4414_v29 = vld [vmem:[%s5697_s0 + $0x134] ss:$8 sps:$4 sm:$0xff]  }
  0x53   :  { %v4416_v30 = vld [vmem:[%s5697_s0 + $0x414] ss:$8 sps:$4 sm:$0xff]  }
  0x59   :  { %1311 = vmatmul.mubr.bf16.gmra.mrb[12].mxu0 %v4322_v31  ;;  %1679 = vmatmul.mubr.bf16.gmra.mrb[12].mxu1 %v4323_v32  ;;  %v4418_v31 = vld [vmem:[%s5697_s0 + $0x130] ss:$8 sps:$4 sm:$0xff]  }
  0x5a   :  { %1318 = vmatprep.mubr.bf16.mxu0 %v4324_v33  ;;  %1686 = vmatprep.mubr.bf16.mxu1 %v4326_v34  ;;  %v4419_v32 = vld [vmem:[%s5697_s0 + $0x410] ss:$8 sps:$4 sm:$0xff]   ;;  %v4420_v33 = vld [vmem:[%s5697_s0 + $0x144] ss:$8 sps:$4 sm:$0xff]  }
  0x5b   :  { %v4422_v34 = vld [vmem:[%s5697_s0 + $0x424] ss:$8 sps:$4 sm:$0xff]  }
  0x61   :  { %1319 = vmatmul.mubr.bf16.gmra.mrb[16].mxu0 %v4328_v35  ;;  %1687 = vmatmul.mubr.bf16.gmra.mrb[16].mxu1 %v4329_v36  ;;  %v4424_v35 = vld [vmem:[%s5697_s0 + $0x140] ss:$8 sps:$4 sm:$0xff]  }
  0x62   :  { %1326 = vmatprep.mubr.bf16.mxu0 %v4330_v37  ;;  %1694 = vmatprep.mubr.bf16.mxu1 %v4332_v38  ;;  %v4425_v36 = vld [vmem:[%s5697_s0 + $0x420] ss:$8 sps:$4 sm:$0xff]   ;;  %v4426_v37 = vld [vmem:[%s5697_s0 + $0x154] ss:$8 sps:$4 sm:$0xff]  }
  0x63   :  { %v4428_v38 = vld [vmem:[%s5697_s0 + $0x434] ss:$8 sps:$4 sm:$0xff]  }
  0x69   :  { %1327 = vmatmul.mubr.bf16.gmra.mrb[20].mxu0 %v4334_v39  ;;  %1695 = vmatmul.mubr.bf16.gmra.mrb[20].mxu1 %v4335_v40  ;;  %v4430_v39 = vld [vmem:[%s5697_s0 + $0x150] ss:$8 sps:$4 sm:$0xff]  }
  0x6a   :  { %1334 = vmatprep.mubr.bf16.mxu0 %v4336_v41  ;;  %1702 = vmatprep.mubr.bf16.mxu1 %v4338_v42  ;;  %v4431_v40 = vld [vmem:[%s5697_s0 + $0x430] ss:$8 sps:$4 sm:$0xff]   ;;  %v4432_v41 = vld [vmem:[%s5697_s0 + $0x164] ss:$8 sps:$4 sm:$0xff]  }
  0x6b   :  { %v4434_v42 = vld [vmem:[%s5697_s0 + $0x444] ss:$8 sps:$4 sm:$0xff]  }
  0x71   :  { %1335 = vmatmul.mubr.bf16.gmra.mrb[24].mxu0 %v4340_v43  ;;  %1703 = vmatmul.mubr.bf16.gmra.mrb[24].mxu1 %v4341_v44  ;;  %v4436_v43 = vld [vmem:[%s5697_s0 + $0x160] ss:$8 sps:$4 sm:$0xff]  }
  0x72   :  { %1342 = vmatprep.mubr.bf16.mxu0 %v4342_v45  ;;  %1710 = vmatprep.mubr.bf16.mxu1 %v4344_v46  ;;  %v4437_v44 = vld [vmem:[%s5697_s0 + $0x440] ss:$8 sps:$4 sm:$0xff]   ;;  %v4438_v45 = vld [vmem:[%s5697_s0 + $0x174] ss:$8 sps:$4 sm:$0xff]  }
  0x73   :  { %v4440_v46 = vld [vmem:[%s5697_s0 + $0x454] ss:$8 sps:$4 sm:$0xff]  }
  0x79   :  { %1343 = vmatmul.mubr.bf16.gmra.mrb[28].mxu0 %v4346_v47  ;;  %1711 = vmatmul.mubr.bf16.gmra.mrb[28].mxu1 %v4347_v48  ;;  %v4442_v47 = vld [vmem:[%s5697_s0 + $0x170] ss:$8 sps:$4 sm:$0xff]  }
  0x7a   :  { %1350 = vmatprep.mubr.bf16.mxu0 %v4348_v49  ;;  %1718 = vmatprep.mubr.bf16.mxu1 %v4350_v50  ;;  %v4443_v48 = vld [vmem:[%s5697_s0 + $0x450] ss:$8 sps:$4 sm:$0xff]   ;;  %v4444_v49 = vld [vmem:[%s5697_s0 + $0x184] ss:$8 sps:$4 sm:$0xff]  }
  0x7b   :  { %v4446_v50 = vld [vmem:[%s5697_s0 + $0x464] ss:$8 sps:$4 sm:$0xff]  }
  0x81   :  { %1351 = vmatmul.mubr.bf16.gmra.mrb[32].mxu0 %v4352_v51  ;;  %1719 = vmatmul.mubr.bf16.gmra.mrb[32].mxu1 %v4353_v52  ;;  %v4448_v51 = vld [vmem:[%s5697_s0 + $0x180] ss:$8 sps:$4 sm:$0xff]  }
  0x82   :  { %1358 = vmatprep.mubr.bf16.mxu0 %v4354_v53  ;;  %1726 = vmatprep.mubr.bf16.mxu1 %v4356_v54  ;;  %v4449_v52 = vld [vmem:[%s5697_s0 + $0x460] ss:$8 sps:$4 sm:$0xff]   ;;  %v4450_v53 = vld [vmem:[%s5697_s0 + $0x194] ss:$8 sps:$4 sm:$0xff]  }
  0x83   :  { %v4452_v54 = vld [vmem:[%s5697_s0 + $0x474] ss:$8 sps:$4 sm:$0xff]  }
  0x89   :  { %1359 = vmatmul.mubr.bf16.gmra.mrb[36].mxu0 %v4358_v55  ;;  %1727 = vmatmul.mubr.bf16.gmra.mrb[36].mxu1 %v4359_v56  ;;  %v4454_v55 = vld [vmem:[%s5697_s0 + $0x190] ss:$8 sps:$4 sm:$0xff]  }
  0x8a   :  { %1366 = vmatprep.mubr.bf16.mxu0 %v4360_v57  ;;  %1734 = vmatprep.mubr.bf16.mxu1 %v4362_v58  ;;  %v4455_v56 = vld [vmem:[%s5697_s0 + $0x470] ss:$8 sps:$4 sm:$0xff]   ;;  %v4456_v57 = vld [vmem:[%s5697_s0 + $0x1a4] ss:$8 sps:$4 sm:$0xff]  }
  0x8b   :  { %v4458_v58 = vld [vmem:[%s5697_s0 + $0x484] ss:$8 sps:$4 sm:$0xff]  }
  0x91   :  { %1367 = vmatmul.mubr.bf16.gmra.mrb[40].mxu0 %v4364_v59  ;;  %1735 = vmatmul.mubr.bf16.gmra.mrb[40].mxu1 %v4365_v60  ;;  %v4460_v59 = vld [vmem:[%s5697_s0 + $0x1a0] ss:$8 sps:$4 sm:$0xff]  }
  0x92   :  { %1374 = vmatprep.mubr.bf16.mxu0 %v4366_v61  ;;  %1742 = vmatprep.mubr.bf16.mxu1 %v4368_v62  ;;  %v4461_v60 = vld [vmem:[%s5697_s0 + $0x480] ss:$8 sps:$4 sm:$0xff]   ;;  %v4462_v61 = vld [vmem:[%s5697_s0 + $0x1b4] ss:$8 sps:$4 sm:$0xff]  }
  0x93   :  { %v4464_v62 = vld [vmem:[%s5697_s0 + $0x494] ss:$8 sps:$4 sm:$0xff]  }
  0x99   :  { %1375 = vmatmul.mubr.bf16.gmra.mrb[44].mxu0 %v4370_v63  ;;  %1743 = vmatmul.mubr.bf16.gmra.mrb[44].mxu1 %v4371_v0  ;;  %v5012_v63 = vld [vmem:[%s5698_s2] ss:$0 sm:$0xff] }
  0x9a   :  { %1382 = vmatprep.mubr.bf16.mxu0 %v4372_v1  ;;  %1750 = vmatprep.mubr.bf16.mxu1 %v4374_v2 }
  0xa1   :  { %1383 = vmatmul.mubr.bf16.gmra.mrb[48].mxu0 %v4376_v3  ;;  %1751 = vmatmul.mubr.bf16.gmra.mrb[48].mxu1 %v4377_v4 }
  0xa2   :  { %1390 = vmatprep.mubr.bf16.mxu0 %v4378_v5  ;;  %1758 = vmatprep.mubr.bf16.mxu1 %v4380_v6  ;;  %v4466_v6 = vld [vmem:[%s5697_s0 + $0x1b0] ss:$8 sps:$4 sm:$0xff]  }
  0xa9   :  { %1391 = vmatmul.mubr.bf16.gmra.mrb[52].mxu0 %v4382_v7  ;;  %1759 = vmatmul.mubr.bf16.gmra.mrb[52].mxu1 %v4383_v8  ;;  %v4467_v7 = vld [vmem:[%s5697_s0 + $0x490] ss:$8 sps:$4 sm:$0xff]  }
  0xaa   :  { %1398 = vmatprep.mubr.bf16.mxu0 %v4384_v9  ;;  %1766 = vmatprep.mubr.bf16.mxu1 %v4386_v10  ;;  %v4468_v10 = vld [vmem:[%s5697_s0 + $0x1c4] ss:$8 sps:$4 sm:$0xff]  }
  0xb1   :  { %1399 = vmatmul.mubr.bf16.gmra.mrb[56].mxu0 %v4388_v11  ;;  %1767 = vmatmul.mubr.bf16.gmra.mrb[56].mxu1 %v4389_v12  ;;  %v4470_v11 = vld [vmem:[%s5697_s0 + $0x4a4] ss:$8 sps:$4 sm:$0xff]  }
  0xb2   :  { %1406 = vmatprep.mubr.bf16.mxu0 %v4390_v13  ;;  %1774 = vmatprep.mubr.bf16.mxu1 %v4392_v14 }
  0xb9   :  { %1407 = vmatmul.mubr.bf16.gmra.mrb[60].mxu0 %v4394_v15  ;;  %1775 = vmatmul.mubr.bf16.gmra.mrb[60].mxu1 %v4395_v16 }
  0xba   :  { %1414 = vmatprep.mubr.bf16.mxu0 %v4396_v17  ;;  %1782 = vmatprep.mubr.bf16.mxu1 %v4398_v18 }
  0xc1   :  { %1415 = vmatmul.mubr.bf16.gmra.mrb[64].mxu0 %v4400_v19  ;;  %1783 = vmatmul.mubr.bf16.gmra.mrb[64].mxu1 %v4401_v20 }
  0xc2   :  { %1422 = vmatprep.mubr.bf16.mxu0 %v4402_v21  ;;  %1790 = vmatprep.mubr.bf16.mxu1 %v4404_v22 }
  0xc9   :  { %1423 = vmatmul.mubr.bf16.gmra.mrb[68].mxu0 %v4406_v23  ;;  %1791 = vmatmul.mubr.bf16.gmra.mrb[68].mxu1 %v4407_v24 }
  0xca   :  { %1430 = vmatprep.mubr.bf16.mxu0 %v4408_v25  ;;  %1798 = vmatprep.mubr.bf16.mxu1 %v4410_v26 }
  0xd1   :  { %1431 = vmatmul.mubr.bf16.gmra.mrb[72].mxu0 %v4412_v27  ;;  %1799 = vmatmul.mubr.bf16.gmra.mrb[72].mxu1 %v4413_v28  ;;  %v4472_v28 = vld [vmem:[%s5697_s0 + $0x1c0] ss:$8 sps:$4 sm:$0xff]  }
  0xd2   :  { %1438 = vmatprep.mubr.bf16.mxu0 %v4414_v29  ;;  %1806 = vmatprep.mubr.bf16.mxu1 %v4416_v30  ;;  %v4473_v29 = vld [vmem:[%s5697_s0 + $0x4a0] ss:$8 sps:$4 sm:$0xff]  }
  0xd9   :  { %1439 = vmatmul.mubr.bf16.gmra.mrb[76].mxu0 %v4418_v31  ;;  %1807 = vmatmul.mubr.bf16.gmra.mrb[76].mxu1 %v4419_v32  ;;  %v4474_v32 = vld [vmem:[%s5697_s0 + $0x1d4] ss:$8 sps:$4 sm:$0xff]  }
  0xda   :  { %1446 = vmatprep.mubr.bf16.mxu0 %v4420_v33  ;;  %1814 = vmatprep.mubr.bf16.mxu1 %v4422_v34  ;;  %v4476_v33 = vld [vmem:[%s5697_s0 + $0x4b4] ss:$8 sps:$4 sm:$0xff]  }
  0xe1   :  { %1447 = vmatmul.mubr.bf16.gmra.mrb[80].mxu0 %v4424_v35  ;;  %1815 = vmatmul.mubr.bf16.gmra.mrb[80].mxu1 %v4425_v36 }
  0xe2   :  { %1454 = vmatprep.mubr.bf16.mxu0 %v4426_v37  ;;  %1822 = vmatprep.mubr.bf16.mxu1 %v4428_v38 }
  0xe9   :  { %1455 = vmatmul.mubr.bf16.gmra.mrb[84].mxu0 %v4430_v39  ;;  %1823 = vmatmul.mubr.bf16.gmra.mrb[84].mxu1 %v4431_v40 }
  0xea   :  { %1462 = vmatprep.mubr.bf16.mxu0 %v4432_v41  ;;  %1830 = vmatprep.mubr.bf16.mxu1 %v4434_v42 }
  0xf1   :  { %1463 = vmatmul.mubr.bf16.gmra.mrb[88].mxu0 %v4436_v43  ;;  %1831 = vmatmul.mubr.bf16.gmra.mrb[88].mxu1 %v4437_v44 }
  0xf2   :  { %1470 = vmatprep.mubr.bf16.mxu0 %v4438_v45  ;;  %1838 = vmatprep.mubr.bf16.mxu1 %v4440_v46 }
  0xf9   :  { %1471 = vmatmul.mubr.bf16.gmra.mrb[92].mxu0 %v4442_v47  ;;  %1839 = vmatmul.mubr.bf16.gmra.mrb[92].mxu1 %v4443_v48 }
  0xfa   :  { %1478 = vmatprep.mubr.bf16.mxu0 %v4444_v49  ;;  %1846 = vmatprep.mubr.bf16.mxu1 %v4446_v50  ;;  %v4478_v50 = vld [vmem:[%s5697_s0 + $0x1d0] ss:$8 sps:$4 sm:$0xff]  }
 0x101   :  { %1479 = vmatmul.mubr.bf16.gmra.mrb[96].mxu0 %v4448_v51  ;;  %1847 = vmatmul.mubr.bf16.gmra.mrb[96].mxu1 %v4449_v52  ;;  %v4479_v51 = vld [vmem:[%s5697_s0 + $0x4b0] ss:$8 sps:$4 sm:$0xff]  }
 0x102   :  { %1486 = vmatprep.mubr.bf16.mxu0 %v4450_v53  ;;  %1854 = vmatprep.mubr.bf16.mxu1 %v4452_v54  ;;  %v4480_v54 = vld [vmem:[%s5697_s0 + $0x1e4] ss:$8 sps:$4 sm:$0xff]  }
 0x109   :  { %1487 = vmatmul.mubr.bf16.gmra.mrb[100].mxu0 %v4454_v55  ;;  %1855 = vmatmul.mubr.bf16.gmra.mrb[100].mxu1 %v4455_v56  ;;  %v4482_v55 = vld [vmem:[%s5697_s0 + $0x4c4] ss:$8 sps:$4 sm:$0xff]  }
 0x10a   :  { %1494 = vmatprep.mubr.bf16.mxu0 %v4456_v57  ;;  %1862 = vmatprep.mubr.bf16.mxu1 %v4458_v58 }
 0x111   :  { %1495 = vmatmul.mubr.bf16.gmra.mrb[104].mxu0 %v4460_v59  ;;  %1863 = vmatmul.mubr.bf16.gmra.mrb[104].mxu1 %v4461_v60 }
 0x112   :  { %1502 = vmatprep.mubr.bf16.mxu0 %v4462_v61  ;;  %1870 = vmatprep.mubr.bf16.mxu1 %v4464_v62 }
 0x114   :  { %v1288_v0 = vpop.f32.mrb[0].mxu0  ;;  %v1656_v1 = vpop.f32.mrb[0].mxu1 }
 0x115   :  { %v1289_v2 = vadd.f32 %v5012_v63, %v1288_v0  ;;  %v1657_v3 = vadd.f32 %v5012_v63, %v1656_v1  ;;  %v1290_v4 = vpop.f32.mrb[1].mxu0  ;;  %v1658_v5 = vpop.f32.mrb[1].mxu1 }
 0x116   :  { %v1291_v8 = vpop.f32.mrb[2].mxu0  ;;  %v1659_v9 = vpop.f32.mrb[2].mxu1 }
 0x117   :  { %v1292_v12 = vadd.f32 %v5012_v63, %v1291_v8  ;;  %v1660_v13 = vadd.f32 %v5012_v63, %v1659_v9  ;;  %v1293_v14 = vpop.f32.mrb[3].mxu0  ;;  %v1661_v15 = vpop.f32.mrb[3].mxu1  ;;  %v2023_v16 = vmax.f32 %v1289_v2, 0.0  ;;  %v2115_v17 = vmax.f32 %v1657_v3, 0.0  ;;  %v4484_v9 = vld [vmem:[%s5697_s0 + $0x1e0] ss:$8 sps:$4 sm:$0xff]  }
 0x118   :  { %v4488_v14 = vld [vmem:[%s5697_s0 + $0x4d4] ss:$8 sps:$4 sm:$0xff]  }
 0x119   :  { %v2024_v18 = vmax.f32 %v1292_v12, 0.0  ;;  %v2116_v19 = vmax.f32 %v1660_v13, 0.0  ;;  %1503 = vmatmul.mubr.bf16.gmra.mrb[108].mxu0 %v4466_v6  ;;  %1871 = vmatmul.mubr.bf16.gmra.mrb[108].mxu1 %v4467_v7  ;;  %v4486_v13 = vld [vmem:[%s5697_s0 + $0x1f4] ss:$8 sps:$4 sm:$0xff]  }
 0x11a   :  { %1510 = vmatprep.mubr.bf16.mxu0 %v4468_v10  ;;  %1878 = vmatprep.mubr.bf16.mxu1 %v4470_v11  ;;  %v4485_v10 = vld [vmem:[%s5697_s0 + $0x4c0] ss:$8 sps:$4 sm:$0xff]  }
 0x11b   :  { %v3703_v20 = vpack.c.bf16 %v2024_v18, %v2023_v16  ;;  %v3933_v21 = vpack.c.bf16 %v2116_v19, %v2115_v17 }
 0x11c   :  { %v1296_v22 = vpop.f32.mrb[4].mxu0  ;;  %v1664_v23 = vpop.f32.mrb[4].mxu1 }
 0x11d   :  { %3704 = vst [vmem:[%s5699_s3] sm:$0xff] %v3703_v20   ;;  %4205 = vst [vmem:[%s5699_s3 + $0x170] sm:$0xff] %v3933_v21   ;;  %v1297_v24 = vadd.f32 %v5012_v63, %v1296_v22  ;;  %v1665_v25 = vadd.f32 %v5012_v63, %v1664_v23  ;;  %v1298_v26 = vpop.f32.mrb[5].mxu0  ;;  %v1666_v27 = vpop.f32.mrb[5].mxu1 }
 0x11e   :  { %v1299_v30 = vpop.f32.mrb[6].mxu0  ;;  %v1667_v31 = vpop.f32.mrb[6].mxu1 }
 0x11f   :  { %v1300_v34 = vadd.f32 %v5012_v63, %v1299_v30  ;;  %v1668_v35 = vadd.f32 %v5012_v63, %v1667_v31  ;;  %v1301_v36 = vpop.f32.mrb[7].mxu0  ;;  %v1669_v37 = vpop.f32.mrb[7].mxu1  ;;  %v2025_v38 = vmax.f32 %v1297_v24, 0.0  ;;  %v2117_v39 = vmax.f32 %v1665_v25, 0.0  ;;  %v4490_v31 = vld [vmem:[%s5697_s0 + $0x1f0] ss:$8 sps:$4 sm:$0xff]  }
 0x120   :  { %v4494_v36 = vld [vmem:[%s5697_s0 + $0x4e4] ss:$8 sps:$4 sm:$0xff]  }
 0x121   :  { %v2026_v40 = vmax.f32 %v1300_v34, 0.0  ;;  %v2118_v41 = vmax.f32 %v1668_v35, 0.0  ;;  %1511 = vmatmul.mubr.bf16.gmra.mrb[112].mxu0 %v4472_v28  ;;  %1879 = vmatmul.mubr.bf16.gmra.mrb[112].mxu1 %v4473_v29  ;;  %v4492_v35 = vld [vmem:[%s5697_s0 + $0x204] ss:$8 sps:$4 sm:$0xff]  }
 0x122   :  { %1518 = vmatprep.mubr.bf16.mxu0 %v4474_v32  ;;  %1886 = vmatprep.mubr.bf16.mxu1 %v4476_v33  ;;  %v4491_v32 = vld [vmem:[%s5697_s0 + $0x4d0] ss:$8 sps:$4 sm:$0xff]  }
 0x123   :  { %v3708_v42 = vpack.c.bf16 %v2026_v40, %v2025_v38  ;;  %v3938_v43 = vpack.c.bf16 %v2118_v41, %v2117_v39 }
 0x124   :  { %v1304_v44 = vpop.f32.mrb[8].mxu0  ;;  %v1672_v45 = vpop.f32.mrb[8].mxu1 }
 0x125   :  { %4160 = vst [vmem:[%s5699_s3 + $0x8] sm:$0xff] %v3708_v42   ;;  %4206 = vst [vmem:[%s5699_s3 + $0x178] sm:$0xff] %v3938_v43   ;;  %v1305_v46 = vadd.f32 %v5012_v63, %v1304_v44  ;;  %v1673_v47 = vadd.f32 %v5012_v63, %v1672_v45  ;;  %v1306_v48 = vpop.f32.mrb[9].mxu0  ;;  %v1674_v49 = vpop.f32.mrb[9].mxu1 }
 0x126   :  { %v1307_v52 = vpop.f32.mrb[10].mxu0  ;;  %v1675_v53 = vpop.f32.mrb[10].mxu1 }
 0x127   :  { %v1308_v56 = vadd.f32 %v5012_v63, %v1307_v52  ;;  %v1676_v57 = vadd.f32 %v5012_v63, %v1675_v53  ;;  %v1309_v58 = vpop.f32.mrb[11].mxu0  ;;  %v1677_v59 = vpop.f32.mrb[11].mxu1  ;;  %v2027_v60 = vmax.f32 %v1305_v46, 0.0  ;;  %v2119_v61 = vmax.f32 %v1673_v47, 0.0  ;;  %v4496_v53 = vld [vmem:[%s5697_s0 + $0x200] ss:$8 sps:$4 sm:$0xff]  }
 0x128   :  { %v4500_v58 = vld [vmem:[%s5697_s0 + $0x4f4] ss:$8 sps:$4 sm:$0xff]  }
 0x129   :  { %v2028_v62 = vmax.f32 %v1308_v56, 0.0  ;;  %v2120_v0 = vmax.f32 %v1676_v57, 0.0  ;;  %1519 = vmatmul.mubr.bf16.gmra.mrb[116].mxu0 %v4478_v50  ;;  %1887 = vmatmul.mubr.bf16.gmra.mrb[116].mxu1 %v4479_v51  ;;  %v4498_v57 = vld [vmem:[%s5697_s0 + $0x214] ss:$8 sps:$4 sm:$0xff]  }
 0x12a   :  { %1526 = vmatprep.mubr.bf16.mxu0 %v4480_v54  ;;  %1894 = vmatprep.mubr.bf16.mxu1 %v4482_v55  ;;  %v4497_v54 = vld [vmem:[%s5697_s0 + $0x4e0] ss:$8 sps:$4 sm:$0xff]  }
 0x12b   :  { %v3713_v1 = vpack.c.bf16 %v2028_v62, %v2027_v60  ;;  %v3943_v2 = vpack.c.bf16 %v2120_v0, %v2119_v61 }
 0x12c   :  { %v1312_v3 = vpop.f32.mrb[12].mxu0  ;;  %v1680_v4 = vpop.f32.mrb[12].mxu1 }
 0x12d   :  { %4161 = vst [vmem:[%s5699_s3 + $0x10] sm:$0xff] %v3713_v1   ;;  %4207 = vst [vmem:[%s5699_s3 + $0x180] sm:$0xff] %v3943_v2   ;;  %v1313_v5 = vadd.f32 %v5012_v63, %v1312_v3  ;;  %v1681_v6 = vadd.f32 %v5012_v63, %v1680_v4  ;;  %v1314_v7 = vpop.f32.mrb[13].mxu0  ;;  %v1682_v8 = vpop.f32.mrb[13].mxu1 }
 0x12e   :  { %v1315_v11 = vpop.f32.mrb[14].mxu0  ;;  %v1683_v12 = vpop.f32.mrb[14].mxu1 }
 0x12f   :  { %v1316_v15 = vadd.f32 %v5012_v63, %v1315_v11  ;;  %v1684_v16 = vadd.f32 %v5012_v63, %v1683_v12  ;;  %v1317_v17 = vpop.f32.mrb[15].mxu0  ;;  %v1685_v18 = vpop.f32.mrb[15].mxu1  ;;  %v2029_v19 = vmax.f32 %v1313_v5, 0.0  ;;  %v2121_v20 = vmax.f32 %v1681_v6, 0.0  ;;  %v4502_v12 = vld [vmem:[%s5697_s0 + $0x210] ss:$8 sps:$4 sm:$0xff]  }
 0x130   :  { %v4506_v17 = vld [vmem:[%s5697_s0 + $0x504] ss:$8 sps:$4 sm:$0xff]  }
 0x131   :  { %v2030_v21 = vmax.f32 %v1316_v15, 0.0  ;;  %v2122_v22 = vmax.f32 %v1684_v16, 0.0  ;;  %1527 = vmatmul.mubr.bf16.gmra.mrb[120].mxu0 %v4484_v9  ;;  %1895 = vmatmul.mubr.bf16.gmra.mrb[120].mxu1 %v4485_v10  ;;  %v4504_v16 = vld [vmem:[%s5697_s0 + $0x224] ss:$8 sps:$4 sm:$0xff]  }
 0x132   :  { %1534 = vmatprep.mubr.bf16.mxu0 %v4486_v13  ;;  %1902 = vmatprep.mubr.bf16.mxu1 %v4488_v14  ;;  %v4503_v13 = vld [vmem:[%s5697_s0 + $0x4f0] ss:$8 sps:$4 sm:$0xff]  }
 0x133   :  { %v3718_v23 = vpack.c.bf16 %v2030_v21, %v2029_v19  ;;  %v3948_v24 = vpack.c.bf16 %v2122_v22, %v2121_v20 }
 0x134   :  { %v1320_v25 = vpop.f32.mrb[16].mxu0  ;;  %v1688_v26 = vpop.f32.mrb[16].mxu1 }
 0x135   :  { %4162 = vst [vmem:[%s5699_s3 + $0x18] sm:$0xff] %v3718_v23   ;;  %4208 = vst [vmem:[%s5699_s3 + $0x188] sm:$0xff] %v3948_v24   ;;  %v1321_v27 = vadd.f32 %v5012_v63, %v1320_v25  ;;  %v1689_v28 = vadd.f32 %v5012_v63, %v1688_v26  ;;  %v1322_v29 = vpop.f32.mrb[17].mxu0  ;;  %v1690_v30 = vpop.f32.mrb[17].mxu1 }
 0x136   :  { %v1323_v33 = vpop.f32.mrb[18].mxu0  ;;  %v1691_v34 = vpop.f32.mrb[18].mxu1 }
 0x137   :  { %v1324_v37 = vadd.f32 %v5012_v63, %v1323_v33  ;;  %v1692_v38 = vadd.f32 %v5012_v63, %v1691_v34  ;;  %v1325_v39 = vpop.f32.mrb[19].mxu0  ;;  %v1693_v40 = vpop.f32.mrb[19].mxu1  ;;  %v2031_v41 = vmax.f32 %v1321_v27, 0.0  ;;  %v2123_v42 = vmax.f32 %v1689_v28, 0.0  ;;  %v4508_v34 = vld [vmem:[%s5697_s0 + $0x220] ss:$8 sps:$4 sm:$0xff]  }
 0x138   :  { %v4512_v39 = vld [vmem:[%s5697_s0 + $0x514] ss:$8 sps:$4 sm:$0xff]  }
 0x139   :  { %v2032_v43 = vmax.f32 %v1324_v37, 0.0  ;;  %v2124_v44 = vmax.f32 %v1692_v38, 0.0  ;;  %1535 = vmatmul.mubr.bf16.gmra.mrb[124].mxu0 %v4490_v31  ;;  %1903 = vmatmul.mubr.bf16.gmra.mrb[124].mxu1 %v4491_v32  ;;  %v4510_v38 = vld [vmem:[%s5697_s0 + $0x234] ss:$8 sps:$4 sm:$0xff]  }
 0x13a   :  { %1542 = vmatprep.mubr.bf16.mxu0 %v4492_v35  ;;  %1910 = vmatprep.mubr.bf16.mxu1 %v4494_v36  ;;  %v4509_v35 = vld [vmem:[%s5697_s0 + $0x500] ss:$8 sps:$4 sm:$0xff]  }
 0x13b   :  { %v3723_v45 = vpack.c.bf16 %v2032_v43, %v2031_v41  ;;  %v3953_v46 = vpack.c.bf16 %v2124_v44, %v2123_v42 }
 0x13c   :  { %v1328_v47 = vpop.f32.mrb[20].mxu0  ;;  %v1696_v48 = vpop.f32.mrb[20].mxu1 }
 0x13d   :  { %4163 = vst [vmem:[%s5699_s3 + $0x20] sm:$0xff] %v3723_v45   ;;  %4209 = vst [vmem:[%s5699_s3 + $0x190] sm:$0xff] %v3953_v46   ;;  %v1329_v49 = vadd.f32 %v5012_v63, %v1328_v47  ;;  %v1697_v50 = vadd.f32 %v5012_v63, %v1696_v48  ;;  %v1330_v51 = vpop.f32.mrb[21].mxu0  ;;  %v1698_v52 = vpop.f32.mrb[21].mxu1 }
 0x13e   :  { %v1331_v55 = vpop.f32.mrb[22].mxu0  ;;  %v1699_v56 = vpop.f32.mrb[22].mxu1 }
 0x13f   :  { %v1332_v59 = vadd.f32 %v5012_v63, %v1331_v55  ;;  %v1700_v60 = vadd.f32 %v5012_v63, %v1699_v56  ;;  %v1333_v61 = vpop.f32.mrb[23].mxu0  ;;  %v1701_v62 = vpop.f32.mrb[23].mxu1  ;;  %v2033_v0 = vmax.f32 %v1329_v49, 0.0  ;;  %v2125_v1 = vmax.f32 %v1697_v50, 0.0  ;;  %v4514_v56 = vld [vmem:[%s5697_s0 + $0x230] ss:$8 sps:$4 sm:$0xff]  }
 0x140   :  { %v4518_v61 = vld [vmem:[%s5697_s0 + $0x524] ss:$8 sps:$4 sm:$0xff]  }
 0x141   :  { %v2034_v2 = vmax.f32 %v1332_v59, 0.0  ;;  %v2126_v3 = vmax.f32 %v1700_v60, 0.0  ;;  %1543 = vmatmul.mubr.bf16.gmra.mrb[128].mxu0 %v4496_v53  ;;  %1911 = vmatmul.mubr.bf16.gmra.mrb[128].mxu1 %v4497_v54  ;;  %v4516_v60 = vld [vmem:[%s5697_s0 + $0x244] ss:$8 sps:$4 sm:$0xff]  }
 0x142   :  { %1550 = vmatprep.mubr.bf16.mxu0 %v4498_v57  ;;  %1918 = vmatprep.mubr.bf16.mxu1 %v4500_v58  ;;  %v4515_v57 = vld [vmem:[%s5697_s0 + $0x510] ss:$8 sps:$4 sm:$0xff]  }
 0x143   :  { %v3728_v4 = vpack.c.bf16 %v2034_v2, %v2033_v0  ;;  %v3958_v5 = vpack.c.bf16 %v2126_v3, %v2125_v1 }
 0x144   :  { %v1336_v6 = vpop.f32.mrb[24].mxu0  ;;  %v1704_v7 = vpop.f32.mrb[24].mxu1 }
 0x145   :  { %4164 = vst [vmem:[%s5699_s3 + $0x28] sm:$0xff] %v3728_v4   ;;  %4210 = vst [vmem:[%s5699_s3 + $0x198] sm:$0xff] %v3958_v5   ;;  %v1337_v8 = vadd.f32 %v5012_v63, %v1336_v6  ;;  %v1705_v9 = vadd.f32 %v5012_v63, %v1704_v7  ;;  %v1338_v10 = vpop.f32.mrb[25].mxu0  ;;  %v1706_v11 = vpop.f32.mrb[25].mxu1 }
 0x146   :  { %v1339_v14 = vpop.f32.mrb[26].mxu0  ;;  %v1707_v15 = vpop.f32.mrb[26].mxu1 }
 0x147   :  { %v1340_v18 = vadd.f32 %v5012_v63, %v1339_v14  ;;  %v1708_v19 = vadd.f32 %v5012_v63, %v1707_v15  ;;  %v1341_v20 = vpop.f32.mrb[27].mxu0  ;;  %v1709_v21 = vpop.f32.mrb[27].mxu1  ;;  %v2035_v22 = vmax.f32 %v1337_v8, 0.0  ;;  %v2127_v23 = vmax.f32 %v1705_v9, 0.0  ;;  %v4520_v15 = vld [vmem:[%s5697_s0 + $0x240] ss:$8 sps:$4 sm:$0xff]  }
 0x148   :  { %v4524_v20 = vld [vmem:[%s5697_s0 + $0x534] ss:$8 sps:$4 sm:$0xff]  }
 0x149   :  { %v2036_v24 = vmax.f32 %v1340_v18, 0.0  ;;  %v2128_v25 = vmax.f32 %v1708_v19, 0.0  ;;  %1551 = vmatmul.mubr.bf16.gmra.mrb[132].mxu0 %v4502_v12  ;;  %1919 = vmatmul.mubr.bf16.gmra.mrb[132].mxu1 %v4503_v13  ;;  %v4522_v19 = vld [vmem:[%s5697_s0 + $0x254] ss:$8 sps:$4 sm:$0xff]  }
 0x14a   :  { %1558 = vmatprep.mubr.bf16.mxu0 %v4504_v16  ;;  %1926 = vmatprep.mubr.bf16.mxu1 %v4506_v17  ;;  %v4521_v16 = vld [vmem:[%s5697_s0 + $0x520] ss:$8 sps:$4 sm:$0xff]  }
 0x14b   :  { %v3733_v26 = vpack.c.bf16 %v2036_v24, %v2035_v22  ;;  %v3963_v27 = vpack.c.bf16 %v2128_v25, %v2127_v23 }
 0x14c   :  { %v1344_v28 = vpop.f32.mrb[28].mxu0  ;;  %v1712_v29 = vpop.f32.mrb[28].mxu1 }
 0x14d   :  { %4165 = vst [vmem:[%s5699_s3 + $0x30] sm:$0xff] %v3733_v26   ;;  %4211 = vst [vmem:[%s5699_s3 + $0x1a0] sm:$0xff] %v3963_v27   ;;  %v1345_v30 = vadd.f32 %v5012_v63, %v1344_v28  ;;  %v1713_v31 = vadd.f32 %v5012_v63, %v1712_v29  ;;  %v1346_v32 = vpop.f32.mrb[29].mxu0  ;;  %v1714_v33 = vpop.f32.mrb[29].mxu1 }
 0x14e   :  { %v1347_v36 = vpop.f32.mrb[30].mxu0  ;;  %v1715_v37 = vpop.f32.mrb[30].mxu1 }
 0x14f   :  { %v1348_v40 = vadd.f32 %v5012_v63, %v1347_v36  ;;  %v1716_v41 = vadd.f32 %v5012_v63, %v1715_v37  ;;  %v1349_v42 = vpop.f32.mrb[31].mxu0  ;;  %v1717_v43 = vpop.f32.mrb[31].mxu1  ;;  %v2037_v44 = vmax.f32 %v1345_v30, 0.0  ;;  %v2129_v45 = vmax.f32 %v1713_v31, 0.0  ;;  %v4526_v37 = vld [vmem:[%s5697_s0 + $0x250] ss:$8 sps:$4 sm:$0xff]  }
 0x150   :  { %v4530_v42 = vld [vmem:[%s5697_s0 + $0x544] ss:$8 sps:$4 sm:$0xff]  }
 0x151   :  { %v2038_v46 = vmax.f32 %v1348_v40, 0.0  ;;  %v2130_v47 = vmax.f32 %v1716_v41, 0.0  ;;  %1559 = vmatmul.mubr.bf16.gmra.mrb[136].mxu0 %v4508_v34  ;;  %1927 = vmatmul.mubr.bf16.gmra.mrb[136].mxu1 %v4509_v35  ;;  %v4528_v41 = vld [vmem:[%s5697_s0 + $0x264] ss:$8 sps:$4 sm:$0xff]  }
 0x152   :  { %1566 = vmatprep.mubr.bf16.mxu0 %v4510_v38  ;;  %1934 = vmatprep.mubr.bf16.mxu1 %v4512_v39  ;;  %v4527_v38 = vld [vmem:[%s5697_s0 + $0x530] ss:$8 sps:$4 sm:$0xff]  }
 0x153   :  { %v3738_v48 = vpack.c.bf16 %v2038_v46, %v2037_v44  ;;  %v3968_v49 = vpack.c.bf16 %v2130_v47, %v2129_v45 }
 0x154   :  { %v1352_v50 = vpop.f32.mrb[32].mxu0  ;;  %v1720_v51 = vpop.f32.mrb[32].mxu1 }
 0x155   :  { %4166 = vst [vmem:[%s5699_s3 + $0x38] sm:$0xff] %v3738_v48   ;;  %4212 = vst [vmem:[%s5699_s3 + $0x1a8] sm:$0xff] %v3968_v49   ;;  %v1353_v52 = vadd.f32 %v5012_v63, %v1352_v50  ;;  %v1721_v53 = vadd.f32 %v5012_v63, %v1720_v51  ;;  %v1354_v54 = vpop.f32.mrb[33].mxu0  ;;  %v1722_v55 = vpop.f32.mrb[33].mxu1 }
 0x156   :  { %v1355_v58 = vpop.f32.mrb[34].mxu0  ;;  %v1723_v59 = vpop.f32.mrb[34].mxu1 }
 0x157   :  { %v1356_v62 = vadd.f32 %v5012_v63, %v1355_v58  ;;  %v1724_v0 = vadd.f32 %v5012_v63, %v1723_v59  ;;  %v1357_v1 = vpop.f32.mrb[35].mxu0  ;;  %v1725_v2 = vpop.f32.mrb[35].mxu1  ;;  %v2039_v3 = vmax.f32 %v1353_v52, 0.0  ;;  %v2131_v4 = vmax.f32 %v1721_v53, 0.0  ;;  %v4532_v59 = vld [vmem:[%s5697_s0 + $0x260] ss:$8 sps:$4 sm:$0xff]  }
 0x158   :  { %v4536_v1 = vld [vmem:[%s5697_s0 + $0x554] ss:$8 sps:$4 sm:$0xff]  }
 0x159   :  { %v2040_v5 = vmax.f32 %v1356_v62, 0.0  ;;  %v2132_v6 = vmax.f32 %v1724_v0, 0.0  ;;  %1567 = vmatmul.mubr.bf16.gmra.mrb[140].mxu0 %v4514_v56  ;;  %1935 = vmatmul.mubr.bf16.gmra.mrb[140].mxu1 %v4515_v57  ;;  %v4534_v0 = vld [vmem:[%s5697_s0 + $0x274] ss:$8 sps:$4 sm:$0xff]  }
 0x15a   :  { %1574 = vmatprep.mubr.bf16.mxu0 %v4516_v60  ;;  %1942 = vmatprep.mubr.bf16.mxu1 %v4518_v61  ;;  %v4533_v60 = vld [vmem:[%s5697_s0 + $0x540] ss:$8 sps:$4 sm:$0xff]  }
 0x15b   :  { %v3743_v7 = vpack.c.bf16 %v2040_v5, %v2039_v3  ;;  %v3973_v8 = vpack.c.bf16 %v2132_v6, %v2131_v4 }
 0x15c   :  { %v1360_v9 = vpop.f32.mrb[36].mxu0  ;;  %v1728_v10 = vpop.f32.mrb[36].mxu1 }
 0x15d   :  { %4167 = vst [vmem:[%s5699_s3 + $0x40] sm:$0xff] %v3743_v7   ;;  %4213 = vst [vmem:[%s5699_s3 + $0x1b0] sm:$0xff] %v3973_v8   ;;  %v1361_v11 = vadd.f32 %v5012_v63, %v1360_v9  ;;  %v1729_v12 = vadd.f32 %v5012_v63, %v1728_v10  ;;  %v1362_v13 = vpop.f32.mrb[37].mxu0  ;;  %v1730_v14 = vpop.f32.mrb[37].mxu1 }
 0x15e   :  { %v1363_v17 = vpop.f32.mrb[38].mxu0  ;;  %v1731_v18 = vpop.f32.mrb[38].mxu1 }
 0x15f   :  { %v1364_v21 = vadd.f32 %v5012_v63, %v1363_v17  ;;  %v1732_v22 = vadd.f32 %v5012_v63, %v1731_v18  ;;  %v1365_v23 = vpop.f32.mrb[39].mxu0  ;;  %v1733_v24 = vpop.f32.mrb[39].mxu1  ;;  %v2041_v25 = vmax.f32 %v1361_v11, 0.0  ;;  %v2133_v26 = vmax.f32 %v1729_v12, 0.0  ;;  %v4538_v18 = vld [vmem:[%s5697_s0 + $0x270] ss:$8 sps:$4 sm:$0xff]  }
 0x160   :  { %v4542_v23 = vld [vmem:[%s5697_s0 + $0x564] ss:$8 sps:$4 sm:$0xff]  }
 0x161   :  { %v2042_v27 = vmax.f32 %v1364_v21, 0.0  ;;  %v2134_v28 = vmax.f32 %v1732_v22, 0.0  ;;  %1575 = vmatmul.mubr.bf16.gmra.mrb[144].mxu0 %v4520_v15  ;;  %1943 = vmatmul.mubr.bf16.gmra.mrb[144].mxu1 %v4521_v16  ;;  %v4540_v22 = vld [vmem:[%s5697_s0 + $0x284] ss:$8 sps:$4 sm:$0xff]  }
 0x162   :  { %1582 = vmatprep.mubr.bf16.mxu0 %v4522_v19  ;;  %1950 = vmatprep.mubr.bf16.mxu1 %v4524_v20  ;;  %v4539_v19 = vld [vmem:[%s5697_s0 + $0x550] ss:$8 sps:$4 sm:$0xff]  }
 0x163   :  { %v3748_v29 = vpack.c.bf16 %v2042_v27, %v2041_v25  ;;  %v3978_v30 = vpack.c.bf16 %v2134_v28, %v2133_v26 }
 0x164   :  { %v1368_v31 = vpop.f32.mrb[40].mxu0  ;;  %v1736_v32 = vpop.f32.mrb[40].mxu1 }
 0x165   :  { %4168 = vst [vmem:[%s5699_s3 + $0x48] sm:$0xff] %v3748_v29   ;;  %4214 = vst [vmem:[%s5699_s3 + $0x1b8] sm:$0xff] %v3978_v30   ;;  %v1369_v33 = vadd.f32 %v5012_v63, %v1368_v31  ;;  %v1737_v34 = vadd.f32 %v5012_v63, %v1736_v32  ;;  %v1370_v35 = vpop.f32.mrb[41].mxu0  ;;  %v1738_v36 = vpop.f32.mrb[41].mxu1 }
 0x166   :  { %v1371_v39 = vpop.f32.mrb[42].mxu0  ;;  %v1739_v40 = vpop.f32.mrb[42].mxu1 }
 0x167   :  { %v1372_v43 = vadd.f32 %v5012_v63, %v1371_v39  ;;  %v1740_v44 = vadd.f32 %v5012_v63, %v1739_v40  ;;  %v1373_v45 = vpop.f32.mrb[43].mxu0  ;;  %v1741_v46 = vpop.f32.mrb[43].mxu1  ;;  %v2043_v47 = vmax.f32 %v1369_v33, 0.0  ;;  %v2135_v48 = vmax.f32 %v1737_v34, 0.0  ;;  %v4544_v40 = vld [vmem:[%s5697_s0 + $0x280] ss:$8 sps:$4 sm:$0xff]  }
 0x168   :  { %v4548_v45 = vld [vmem:[%s5697_s0 + $0x574] ss:$8 sps:$4 sm:$0xff]  }
 0x169   :  { %v2044_v49 = vmax.f32 %v1372_v43, 0.0  ;;  %v2136_v50 = vmax.f32 %v1740_v44, 0.0  ;;  %1583 = vmatmul.mubr.bf16.gmra.mrb[148].mxu0 %v4526_v37  ;;  %1951 = vmatmul.mubr.bf16.gmra.mrb[148].mxu1 %v4527_v38  ;;  %v4546_v44 = vld [vmem:[%s5697_s0 + $0x294] ss:$8 sps:$4 sm:$0xff]  }
 0x16a   :  { %1590 = vmatprep.mubr.bf16.mxu0 %v4528_v41  ;;  %1958 = vmatprep.mubr.bf16.mxu1 %v4530_v42  ;;  %v4545_v41 = vld [vmem:[%s5697_s0 + $0x560] ss:$8 sps:$4 sm:$0xff]  }
 0x16b   :  { %v3753_v51 = vpack.c.bf16 %v2044_v49, %v2043_v47  ;;  %v3983_v52 = vpack.c.bf16 %v2136_v50, %v2135_v48 }
 0x16c   :  { %v1376_v53 = vpop.f32.mrb[44].mxu0  ;;  %v1744_v54 = vpop.f32.mrb[44].mxu1 }
 0x16d   :  { %4169 = vst [vmem:[%s5699_s3 + $0x50] sm:$0xff] %v3753_v51   ;;  %4215 = vst [vmem:[%s5699_s3 + $0x1c0] sm:$0xff] %v3983_v52   ;;  %v1377_v55 = vadd.f32 %v5012_v63, %v1376_v53  ;;  %v1745_v56 = vadd.f32 %v5012_v63, %v1744_v54  ;;  %v1378_v57 = vpop.f32.mrb[45].mxu0  ;;  %v1746_v58 = vpop.f32.mrb[45].mxu1 }
 0x16e   :  { %v1379_v61 = vpop.f32.mrb[46].mxu0  ;;  %v1747_v62 = vpop.f32.mrb[46].mxu1 }
 0x16f   :  { %v1380_v2 = vadd.f32 %v5012_v63, %v1379_v61  ;;  %v1748_v3 = vadd.f32 %v5012_v63, %v1747_v62  ;;  %v1381_v4 = vpop.f32.mrb[47].mxu0  ;;  %v1749_v5 = vpop.f32.mrb[47].mxu1  ;;  %v2045_v6 = vmax.f32 %v1377_v55, 0.0  ;;  %v2137_v7 = vmax.f32 %v1745_v56, 0.0  ;;  %v4550_v62 = vld [vmem:[%s5697_s0 + $0x290] ss:$8 sps:$4 sm:$0xff]  }
 0x170   :  { %v4554_v4 = vld [vmem:[%s5697_s0 + $0x584] ss:$8 sps:$4 sm:$0xff]  }
 0x171   :  { %v2046_v8 = vmax.f32 %v1380_v2, 0.0  ;;  %v2138_v9 = vmax.f32 %v1748_v3, 0.0  ;;  %1591 = vmatmul.mubr.bf16.gmra.mrb[152].mxu0 %v4532_v59  ;;  %1959 = vmatmul.mubr.bf16.gmra.mrb[152].mxu1 %v4533_v60  ;;  %v4552_v3 = vld [vmem:[%s5697_s0 + $0x2a4] ss:$8 sps:$4 sm:$0xff]  }
 0x172   :  { %1598 = vmatprep.mubr.bf16.mxu0 %v4534_v0  ;;  %1966 = vmatprep.mubr.bf16.mxu1 %v4536_v1  ;;  %v4551_v0 = vld [vmem:[%s5697_s0 + $0x570] ss:$8 sps:$4 sm:$0xff]  }
 0x173   :  { %v3758_v10 = vpack.c.bf16 %v2046_v8, %v2045_v6  ;;  %v3988_v11 = vpack.c.bf16 %v2138_v9, %v2137_v7 }
 0x174   :  { %v1384_v12 = vpop.f32.mrb[48].mxu0  ;;  %v1752_v13 = vpop.f32.mrb[48].mxu1 }
 0x175   :  { %4170 = vst [vmem:[%s5699_s3 + $0x58] sm:$0xff] %v3758_v10   ;;  %4216 = vst [vmem:[%s5699_s3 + $0x1c8] sm:$0xff] %v3988_v11   ;;  %v1385_v14 = vadd.f32 %v5012_v63, %v1384_v12  ;;  %v1753_v15 = vadd.f32 %v5012_v63, %v1752_v13  ;;  %v1386_v16 = vpop.f32.mrb[49].mxu0  ;;  %v1754_v17 = vpop.f32.mrb[49].mxu1 }
 0x176   :  { %v1387_v20 = vpop.f32.mrb[50].mxu0  ;;  %v1755_v21 = vpop.f32.mrb[50].mxu1 }
 0x177   :  { %v1388_v24 = vadd.f32 %v5012_v63, %v1387_v20  ;;  %v1756_v25 = vadd.f32 %v5012_v63, %v1755_v21  ;;  %v1389_v26 = vpop.f32.mrb[51].mxu0  ;;  %v1757_v27 = vpop.f32.mrb[51].mxu1  ;;  %v2047_v28 = vmax.f32 %v1385_v14, 0.0  ;;  %v2139_v29 = vmax.f32 %v1753_v15, 0.0  ;;  %v4556_v21 = vld [vmem:[%s5697_s0 + $0x2a0] ss:$8 sps:$4 sm:$0xff]  }
 0x178   :  { %v4560_v26 = vld [vmem:[%s5697_s0 + $0x594] ss:$8 sps:$4 sm:$0xff]  }
 0x179   :  { %v2048_v30 = vmax.f32 %v1388_v24, 0.0  ;;  %v2140_v31 = vmax.f32 %v1756_v25, 0.0  ;;  %1599 = vmatmul.mubr.bf16.gmra.mrb[156].mxu0 %v4538_v18  ;;  %1967 = vmatmul.mubr.bf16.gmra.mrb[156].mxu1 %v4539_v19  ;;  %v4558_v25 = vld [vmem:[%s5697_s0 + $0x2b4] ss:$8 sps:$4 sm:$0xff]  }
 0x17a   :  { %1606 = vmatprep.mubr.bf16.mxu0 %v4540_v22  ;;  %1974 = vmatprep.mubr.bf16.mxu1 %v4542_v23  ;;  %v4557_v22 = vld [vmem:[%s5697_s0 + $0x580] ss:$8 sps:$4 sm:$0xff]  }
 0x17b   :  { %v3763_v32 = vpack.c.bf16 %v2048_v30, %v2047_v28  ;;  %v3993_v33 = vpack.c.bf16 %v2140_v31, %v2139_v29 }
 0x17c   :  { %v1392_v34 = vpop.f32.mrb[52].mxu0  ;;  %v1760_v35 = vpop.f32.mrb[52].mxu1 }
 0x17d   :  { %4171 = vst [vmem:[%s5699_s3 + $0x60] sm:$0xff] %v3763_v32   ;;  %4217 = vst [vmem:[%s5699_s3 + $0x1d0] sm:$0xff] %v3993_v33   ;;  %v1393_v36 = vadd.f32 %v5012_v63, %v1392_v34  ;;  %v1761_v37 = vadd.f32 %v5012_v63, %v1760_v35  ;;  %v1394_v38 = vpop.f32.mrb[53].mxu0  ;;  %v1762_v39 = vpop.f32.mrb[53].mxu1 }
 0x17e   :  { %v1395_v42 = vpop.f32.mrb[54].mxu0  ;;  %v1763_v43 = vpop.f32.mrb[54].mxu1 }
 0x17f   :  { %v1396_v46 = vadd.f32 %v5012_v63, %v1395_v42  ;;  %v1764_v47 = vadd.f32 %v5012_v63, %v1763_v43  ;;  %v1397_v48 = vpop.f32.mrb[55].mxu0  ;;  %v1765_v49 = vpop.f32.mrb[55].mxu1  ;;  %v2049_v50 = vmax.f32 %v1393_v36, 0.0  ;;  %v2141_v51 = vmax.f32 %v1761_v37, 0.0  ;;  %v4562_v43 = vld [vmem:[%s5697_s0 + $0x2b0] ss:$8 sps:$4 sm:$0xff]  }
 0x180   :  { %v4566_v48 = vld [vmem:[%s5697_s0 + $0x5a4] ss:$8 sps:$4 sm:$0xff]  }
 0x181   :  { %v2050_v52 = vmax.f32 %v1396_v46, 0.0  ;;  %v2142_v53 = vmax.f32 %v1764_v47, 0.0  ;;  %1607 = vmatmul.mubr.bf16.gmra.mrb[160].mxu0 %v4544_v40  ;;  %1975 = vmatmul.mubr.bf16.gmra.mrb[160].mxu1 %v4545_v41  ;;  %v4564_v47 = vld [vmem:[%s5697_s0 + $0x2c4] ss:$8 sps:$4 sm:$0xff]  }
 0x182   :  { %1614 = vmatprep.mubr.bf16.mxu0 %v4546_v44  ;;  %1982 = vmatprep.mubr.bf16.mxu1 %v4548_v45  ;;  %v4563_v44 = vld [vmem:[%s5697_s0 + $0x590] ss:$8 sps:$4 sm:$0xff]  }
 0x183   :  { %v3768_v54 = vpack.c.bf16 %v2050_v52, %v2049_v50  ;;  %v3998_v55 = vpack.c.bf16 %v2142_v53, %v2141_v51 }
 0x184   :  { %v1400_v56 = vpop.f32.mrb[56].mxu0  ;;  %v1768_v57 = vpop.f32.mrb[56].mxu1 }
 0x185   :  { %4172 = vst [vmem:[%s5699_s3 + $0x68] sm:$0xff] %v3768_v54   ;;  %4218 = vst [vmem:[%s5699_s3 + $0x1d8] sm:$0xff] %v3998_v55   ;;  %v1401_v58 = vadd.f32 %v5012_v63, %v1400_v56  ;;  %v1769_v59 = vadd.f32 %v5012_v63, %v1768_v57  ;;  %v1402_v60 = vpop.f32.mrb[57].mxu0  ;;  %v1770_v61 = vpop.f32.mrb[57].mxu1 }
 0x186   :  { %v1403_v1 = vpop.f32.mrb[58].mxu0  ;;  %v1771_v2 = vpop.f32.mrb[58].mxu1 }
 0x187   :  { %v1404_v5 = vadd.f32 %v5012_v63, %v1403_v1  ;;  %v1772_v6 = vadd.f32 %v5012_v63, %v1771_v2  ;;  %v1405_v7 = vpop.f32.mrb[59].mxu0  ;;  %v1773_v8 = vpop.f32.mrb[59].mxu1  ;;  %v2051_v9 = vmax.f32 %v1401_v58, 0.0  ;;  %v2143_v10 = vmax.f32 %v1769_v59, 0.0  ;;  %v4568_v2 = vld [vmem:[%s5697_s0 + $0x2c0] ss:$8 sps:$4 sm:$0xff]  }
 0x188   :  { %v4572_v7 = vld [vmem:[%s5697_s0 + $0x5b4] ss:$8 sps:$4 sm:$0xff]  }
 0x189   :  { %v2052_v11 = vmax.f32 %v1404_v5, 0.0  ;;  %v2144_v12 = vmax.f32 %v1772_v6, 0.0  ;;  %1615 = vmatmul.mubr.bf16.gmra.mrb[164].mxu0 %v4550_v62  ;;  %1983 = vmatmul.mubr.bf16.gmra.mrb[164].mxu1 %v4551_v0  ;;  %v4570_v6 = vld [vmem:[%s5697_s0 + $0x2d4] ss:$8 sps:$4 sm:$0xff]  }
 0x18a   :  { %1622 = vmatprep.mubr.bf16.mxu0 %v4552_v3  ;;  %1990 = vmatprep.mubr.bf16.mxu1 %v4554_v4  ;;  %v4569_v3 = vld [vmem:[%s5697_s0 + $0x5a0] ss:$8 sps:$4 sm:$0xff]  }
 0x18b   :  { %v3773_v13 = vpack.c.bf16 %v2052_v11, %v2051_v9  ;;  %v4003_v14 = vpack.c.bf16 %v2144_v12, %v2143_v10 }
 0x18c   :  { %v1408_v15 = vpop.f32.mrb[60].mxu0  ;;  %v1776_v16 = vpop.f32.mrb[60].mxu1 }
 0x18d   :  { %4173 = vst [vmem:[%s5699_s3 + $0x70] sm:$0xff] %v3773_v13   ;;  %4219 = vst [vmem:[%s5699_s3 + $0x1e0] sm:$0xff] %v4003_v14   ;;  %v1409_v17 = vadd.f32 %v5012_v63, %v1408_v15  ;;  %v1777_v18 = vadd.f32 %v5012_v63, %v1776_v16  ;;  %v1410_v19 = vpop.f32.mrb[61].mxu0  ;;  %v1778_v20 = vpop.f32.mrb[61].mxu1 }
 0x18e   :  { %v1411_v23 = vpop.f32.mrb[62].mxu0  ;;  %v1779_v24 = vpop.f32.mrb[62].mxu1 }
 0x18f   :  { %v1412_v27 = vadd.f32 %v5012_v63, %v1411_v23  ;;  %v1780_v28 = vadd.f32 %v5012_v63, %v1779_v24  ;;  %v1413_v29 = vpop.f32.mrb[63].mxu0  ;;  %v1781_v30 = vpop.f32.mrb[63].mxu1  ;;  %v2053_v31 = vmax.f32 %v1409_v17, 0.0  ;;  %v2145_v32 = vmax.f32 %v1777_v18, 0.0  ;;  %v4574_v24 = vld [vmem:[%s5697_s0 + $0x2d0] ss:$8 sps:$4 sm:$0xff]  }
 0x191   :  { %v2054_v33 = vmax.f32 %v1412_v27, 0.0  ;;  %v2146_v34 = vmax.f32 %v1780_v28, 0.0  ;;  %1623 = vmatmul.mubr.bf16.gmra.mrb[168].mxu0 %v4556_v21  ;;  %1991 = vmatmul.mubr.bf16.gmra.mrb[168].mxu1 %v4557_v22  ;;  %v5421_v28 = vld [vmem:[%s5698_s2] ss:$0 sm:$0xff] }
 0x192   :  { %1630 = vmatprep.mubr.bf16.mxu0 %v4558_v25  ;;  %1998 = vmatprep.mubr.bf16.mxu1 %v4560_v26  ;;  %v4575_v25 = vld [vmem:[%s5697_s0 + $0x5b0] ss:$8 sps:$4 sm:$0xff]  }
 0x193   :  { %v3778_v35 = vpack.c.bf16 %v2054_v33, %v2053_v31  ;;  %v4008_v36 = vpack.c.bf16 %v2146_v34, %v2145_v32 }
 0x194   :  { %v1416_v37 = vpop.f32.mrb[64].mxu0  ;;  %v1784_v38 = vpop.f32.mrb[64].mxu1 }
 0x195   :  { %4174 = vst [vmem:[%s5699_s3 + $0x78] sm:$0xff] %v3778_v35   ;;  %4220 = vst [vmem:[%s5699_s3 + $0x1e8] sm:$0xff] %v4008_v36   ;;  %v1417_v39 = vadd.f32 %v5012_v63, %v1416_v37  ;;  %v1785_v40 = vadd.f32 %v5012_v63, %v1784_v38  ;;  %v1418_v41 = vpop.f32.mrb[65].mxu0  ;;  %v1786_v42 = vpop.f32.mrb[65].mxu1 }
 0x196   :  { %v1419_v45 = vpop.f32.mrb[66].mxu0  ;;  %v1787_v46 = vpop.f32.mrb[66].mxu1 }
 0x197   :  { %v1420_v49 = vadd.f32 %v5012_v63, %v1419_v45  ;;  %v1788_v50 = vadd.f32 %v5012_v63, %v1787_v46  ;;  %v1421_v51 = vpop.f32.mrb[67].mxu0  ;;  %v1789_v52 = vpop.f32.mrb[67].mxu1  ;;  %v2055_v53 = vmax.f32 %v1417_v39, 0.0  ;;  %v2147_v54 = vmax.f32 %v1785_v40, 0.0 }
 0x199   :  { %v2056_v55 = vmax.f32 %v1420_v49, 0.0  ;;  %v2148_v56 = vmax.f32 %v1788_v50, 0.0  ;;  %1631 = vmatmul.mubr.bf16.gmra.mrb[172].mxu0 %v4562_v43  ;;  %1999 = vmatmul.mubr.bf16.gmra.mrb[172].mxu1 %v4563_v44 }
 0x19a   :  { %1638 = vmatprep.mubr.bf16.mxu0 %v4564_v47  ;;  %2006 = vmatprep.mubr.bf16.mxu1 %v4566_v48 }
 0x19b   :  { %v3783_v57 = vpack.c.bf16 %v2056_v55, %v2055_v53  ;;  %v4013_v58 = vpack.c.bf16 %v2148_v56, %v2147_v54 }
 0x19c   :  { %v1424_v59 = vpop.f32.mrb[68].mxu0  ;;  %v1792_v60 = vpop.f32.mrb[68].mxu1 }
 0x19d   :  { %4175 = vst [vmem:[%s5699_s3 + $0x80] sm:$0xff] %v3783_v57   ;;  %4221 = vst [vmem:[%s5699_s3 + $0x1f0] sm:$0xff] %v4013_v58   ;;  %v1425_v61 = vadd.f32 %v5012_v63, %v1424_v59  ;;  %v1793_v62 = vadd.f32 %v5012_v63, %v1792_v60  ;;  %v1426_v0 = vpop.f32.mrb[69].mxu0  ;;  %v1794_v1 = vpop.f32.mrb[69].mxu1 }
 0x19e   :  { %v1427_v4 = vpop.f32.mrb[70].mxu0  ;;  %v1795_v5 = vpop.f32.mrb[70].mxu1 }
 0x19f   :  { %v1428_v8 = vadd.f32 %v5012_v63, %v1427_v4  ;;  %v1796_v9 = vadd.f32 %v5012_v63, %v1795_v5  ;;  %v1429_v10 = vpop.f32.mrb[71].mxu0  ;;  %v1797_v11 = vpop.f32.mrb[71].mxu1  ;;  %v2057_v12 = vmax.f32 %v1425_v61, 0.0  ;;  %v2149_v13 = vmax.f32 %v1793_v62, 0.0 }
 0x1a1   :  { %v2058_v14 = vmax.f32 %v1428_v8, 0.0  ;;  %v2150_v15 = vmax.f32 %v1796_v9, 0.0  ;;  %1639 = vmatmul.mubr.bf16.gmra.mrb[176].mxu0 %v4568_v2  ;;  %2007 = vmatmul.mubr.bf16.gmra.mrb[176].mxu1 %v4569_v3 }
 0x1a2   :  { %1646 = vmatprep.mubr.bf16.mxu0 %v4570_v6  ;;  %2014 = vmatprep.mubr.bf16.mxu1 %v4572_v7 }
 0x1a3   :  { %v3788_v16 = vpack.c.bf16 %v2058_v14, %v2057_v12  ;;  %v4018_v17 = vpack.c.bf16 %v2150_v15, %v2149_v13 }
 0x1a4   :  { %v1432_v18 = vpop.f32.mrb[72].mxu0  ;;  %v1800_v19 = vpop.f32.mrb[72].mxu1 }
 0x1a5   :  { %4176 = vst [vmem:[%s5699_s3 + $0x88] sm:$0xff] %v3788_v16   ;;  %4222 = vst [vmem:[%s5699_s3 + $0x1f8] sm:$0xff] %v4018_v17   ;;  %v1433_v20 = vadd.f32 %v5012_v63, %v1432_v18  ;;  %v1801_v21 = vadd.f32 %v5012_v63, %v1800_v19  ;;  %v1434_v22 = vpop.f32.mrb[73].mxu0  ;;  %v1802_v23 = vpop.f32.mrb[73].mxu1 }
 0x1a6   :  { %v1435_v26 = vpop.f32.mrb[74].mxu0  ;;  %v1803_v27 = vpop.f32.mrb[74].mxu1 }
 0x1a7   :  { %v1436_v29 = vadd.f32 %v5421_v28, %v1435_v26  ;;  %v1804_v63 = vadd.f32 %v5421_v28, %v1803_v27  ;;  %v1437_v30 = vpop.f32.mrb[75].mxu0  ;;  %v1805_v31 = vpop.f32.mrb[75].mxu1  ;;  %v2059_v32 = vmax.f32 %v1433_v20, 0.0  ;;  %v2151_v33 = vmax.f32 %v1801_v21, 0.0 }
 0x1a9   :  { %v2060_v34 = vmax.f32 %v1436_v29, 0.0  ;;  %v2152_v35 = vmax.f32 %v1804_v63, 0.0  ;;  %1647 = vmatmul.mubr.bf16.gmra.mrb[180].mxu0 %v4574_v24  ;;  %2015 = vmatmul.mubr.bf16.gmra.mrb[180].mxu1 %v4575_v25 }
 0x1ab   :  { %v3793_v36 = vpack.c.bf16 %v2060_v34, %v2059_v32  ;;  %v4023_v37 = vpack.c.bf16 %v2152_v35, %v2151_v33 }
 0x1ac   :  { %v1440_v38 = vpop.f32.mrb[76].mxu0  ;;  %v1808_v39 = vpop.f32.mrb[76].mxu1 }
 0x1ad   :  { %4177 = vst [vmem:[%s5699_s3 + $0x90] sm:$0xff] %v3793_v36   ;;  %4223 = vst [vmem:[%s5699_s3 + $0x200] sm:$0xff] %v4023_v37   ;;  %v1441_v40 = vadd.f32 %v5421_v28, %v1440_v38  ;;  %v1809_v41 = vadd.f32 %v5421_v28, %v1808_v39  ;;  %v1442_v42 = vpop.f32.mrb[77].mxu0  ;;  %v1810_v43 = vpop.f32.mrb[77].mxu1 }
 0x1ae   :  { %v1443_v44 = vpop.f32.mrb[78].mxu0  ;;  %v1811_v45 = vpop.f32.mrb[78].mxu1 }
 0x1af   :  { %v1444_v46 = vadd.f32 %v5421_v28, %v1443_v44  ;;  %v1812_v47 = vadd.f32 %v5421_v28, %v1811_v45  ;;  %v1445_v48 = vpop.f32.mrb[79].mxu0  ;;  %v1813_v49 = vpop.f32.mrb[79].mxu1  ;;  %v2061_v50 = vmax.f32 %v1441_v40, 0.0  ;;  %v2153_v51 = vmax.f32 %v1809_v41, 0.0 }
 0x1b1   :  { %v2062_v52 = vmax.f32 %v1444_v46, 0.0  ;;  %v2154_v53 = vmax.f32 %v1812_v47, 0.0 }
 0x1b3   :  { %v3798_v54 = vpack.c.bf16 %v2062_v52, %v2061_v50  ;;  %v4028_v55 = vpack.c.bf16 %v2154_v53, %v2153_v51 }
 0x1b4   :  { %v1448_v56 = vpop.f32.mrb[80].mxu0  ;;  %v1816_v57 = vpop.f32.mrb[80].mxu1 }
 0x1b5   :  { %4178 = vst [vmem:[%s5699_s3 + $0x98] sm:$0xff] %v3798_v54   ;;  %4224 = vst [vmem:[%s5699_s3 + $0x208] sm:$0xff] %v4028_v55   ;;  %v1449_v58 = vadd.f32 %v5421_v28, %v1448_v56  ;;  %v1817_v59 = vadd.f32 %v5421_v28, %v1816_v57  ;;  %v1450_v60 = vpop.f32.mrb[81].mxu0  ;;  %v1818_v61 = vpop.f32.mrb[81].mxu1 }
 0x1b6   :  { %v1451_v62 = vpop.f32.mrb[82].mxu0  ;;  %v1819_v0 = vpop.f32.mrb[82].mxu1 }
 0x1b7   :  { %v1452_v1 = vadd.f32 %v5421_v28, %v1451_v62  ;;  %v1820_v2 = vadd.f32 %v5421_v28, %v1819_v0  ;;  %v1453_v3 = vpop.f32.mrb[83].mxu0  ;;  %v1821_v4 = vpop.f32.mrb[83].mxu1  ;;  %v2063_v5 = vmax.f32 %v1449_v58, 0.0  ;;  %v2155_v6 = vmax.f32 %v1817_v59, 0.0 }
 0x1b9   :  { %v2064_v7 = vmax.f32 %v1452_v1, 0.0  ;;  %v2156_v8 = vmax.f32 %v1820_v2, 0.0 }
 0x1bb   :  { %v3803_v9 = vpack.c.bf16 %v2064_v7, %v2063_v5  ;;  %v4033_v10 = vpack.c.bf16 %v2156_v8, %v2155_v6 }
 0x1bc   :  { %v1456_v11 = vpop.f32.mrb[84].mxu0  ;;  %v1824_v12 = vpop.f32.mrb[84].mxu1 }
 0x1bd   :  { %4179 = vst [vmem:[%s5699_s3 + $0xa0] sm:$0xff] %v3803_v9   ;;  %4225 = vst [vmem:[%s5699_s3 + $0x210] sm:$0xff] %v4033_v10   ;;  %v1457_v13 = vadd.f32 %v5421_v28, %v1456_v11  ;;  %v1825_v14 = vadd.f32 %v5421_v28, %v1824_v12  ;;  %v1458_v15 = vpop.f32.mrb[85].mxu0  ;;  %v1826_v16 = vpop.f32.mrb[85].mxu1 }
 0x1be   :  { %v1459_v17 = vpop.f32.mrb[86].mxu0  ;;  %v1827_v18 = vpop.f32.mrb[86].mxu1 }
 0x1bf   :  { %v1460_v19 = vadd.f32 %v5421_v28, %v1459_v17  ;;  %v1828_v20 = vadd.f32 %v5421_v28, %v1827_v18  ;;  %v1461_v21 = vpop.f32.mrb[87].mxu0  ;;  %v1829_v22 = vpop.f32.mrb[87].mxu1  ;;  %v2065_v23 = vmax.f32 %v1457_v13, 0.0  ;;  %v2157_v24 = vmax.f32 %v1825_v14, 0.0 }
 0x1c1   :  { %v2066_v25 = vmax.f32 %v1460_v19, 0.0  ;;  %v2158_v26 = vmax.f32 %v1828_v20, 0.0 }
 0x1c3   :  { %v3808_v27 = vpack.c.bf16 %v2066_v25, %v2065_v23  ;;  %v4038_v29 = vpack.c.bf16 %v2158_v26, %v2157_v24 }
 0x1c4   :  { %v1464_v63 = vpop.f32.mrb[88].mxu0  ;;  %v1832_v30 = vpop.f32.mrb[88].mxu1 }
 0x1c5   :  { %4180 = vst [vmem:[%s5699_s3 + $0xa8] sm:$0xff] %v3808_v27   ;;  %4226 = vst [vmem:[%s5699_s3 + $0x218] sm:$0xff] %v4038_v29   ;;  %v1465_v31 = vadd.f32 %v5421_v28, %v1464_v63  ;;  %v1833_v32 = vadd.f32 %v5421_v28, %v1832_v30  ;;  %v1466_v33 = vpop.f32.mrb[89].mxu0  ;;  %v1834_v34 = vpop.f32.mrb[89].mxu1 }
 0x1c6   :  { %v1467_v35 = vpop.f32.mrb[90].mxu0  ;;  %v1835_v36 = vpop.f32.mrb[90].mxu1 }
 0x1c7   :  { %v1468_v37 = vadd.f32 %v5421_v28, %v1467_v35  ;;  %v1836_v38 = vadd.f32 %v5421_v28, %v1835_v36  ;;  %v1469_v39 = vpop.f32.mrb[91].mxu0  ;;  %v1837_v40 = vpop.f32.mrb[91].mxu1  ;;  %v2067_v41 = vmax.f32 %v1465_v31, 0.0  ;;  %v2159_v42 = vmax.f32 %v1833_v32, 0.0 }
 0x1c9   :  { %v2068_v43 = vmax.f32 %v1468_v37, 0.0  ;;  %v2160_v44 = vmax.f32 %v1836_v38, 0.0 }
 0x1cb   :  { %v3813_v45 = vpack.c.bf16 %v2068_v43, %v2067_v41  ;;  %v4043_v46 = vpack.c.bf16 %v2160_v44, %v2159_v42 }
 0x1cc   :  { %v1472_v47 = vpop.f32.mrb[92].mxu0  ;;  %v1840_v48 = vpop.f32.mrb[92].mxu1 }
 0x1cd   :  { %4181 = vst [vmem:[%s5699_s3 + $0xb0] sm:$0xff] %v3813_v45   ;;  %4227 = vst [vmem:[%s5699_s3 + $0x220] sm:$0xff] %v4043_v46   ;;  %v1473_v49 = vadd.f32 %v5421_v28, %v1472_v47  ;;  %v1841_v50 = vadd.f32 %v5421_v28, %v1840_v48  ;;  %v1474_v51 = vpop.f32.mrb[93].mxu0  ;;  %v1842_v52 = vpop.f32.mrb[93].mxu1 }
 0x1ce   :  { %v1475_v53 = vpop.f32.mrb[94].mxu0  ;;  %v1843_v54 = vpop.f32.mrb[94].mxu1 }
 0x1cf   :  { %v1476_v55 = vadd.f32 %v5421_v28, %v1475_v53  ;;  %v1844_v56 = vadd.f32 %v5421_v28, %v1843_v54  ;;  %v1477_v57 = vpop.f32.mrb[95].mxu0  ;;  %v1845_v58 = vpop.f32.mrb[95].mxu1  ;;  %v2069_v59 = vmax.f32 %v1473_v49, 0.0  ;;  %v2161_v60 = vmax.f32 %v1841_v50, 0.0 }
 0x1d1   :  { %v2070_v61 = vmax.f32 %v1476_v55, 0.0  ;;  %v2162_v62 = vmax.f32 %v1844_v56, 0.0 }
 0x1d3   :  { %v3818_v0 = vpack.c.bf16 %v2070_v61, %v2069_v59  ;;  %v4048_v1 = vpack.c.bf16 %v2162_v62, %v2161_v60 }
 0x1d4   :  { %v1480_v2 = vpop.f32.mrb[96].mxu0  ;;  %v1848_v3 = vpop.f32.mrb[96].mxu1 }
 0x1d5   :  { %4182 = vst [vmem:[%s5699_s3 + $0xb8] sm:$0xff] %v3818_v0   ;;  %4228 = vst [vmem:[%s5699_s3 + $0x228] sm:$0xff] %v4048_v1   ;;  %v1481_v4 = vadd.f32 %v5421_v28, %v1480_v2  ;;  %v1849_v5 = vadd.f32 %v5421_v28, %v1848_v3  ;;  %v1482_v6 = vpop.f32.mrb[97].mxu0  ;;  %v1850_v7 = vpop.f32.mrb[97].mxu1 }
 0x1d6   :  { %v1483_v8 = vpop.f32.mrb[98].mxu0  ;;  %v1851_v9 = vpop.f32.mrb[98].mxu1 }
 0x1d7   :  { %v1484_v10 = vadd.f32 %v5421_v28, %v1483_v8  ;;  %v1852_v11 = vadd.f32 %v5421_v28, %v1851_v9  ;;  %v1485_v12 = vpop.f32.mrb[99].mxu0  ;;  %v1853_v13 = vpop.f32.mrb[99].mxu1  ;;  %v2071_v14 = vmax.f32 %v1481_v4, 0.0  ;;  %v2163_v15 = vmax.f32 %v1849_v5, 0.0 }
 0x1d9   :  { %v2072_v16 = vmax.f32 %v1484_v10, 0.0  ;;  %v2164_v17 = vmax.f32 %v1852_v11, 0.0 }
 0x1db   :  { %v3823_v18 = vpack.c.bf16 %v2072_v16, %v2071_v14  ;;  %v4053_v19 = vpack.c.bf16 %v2164_v17, %v2163_v15 }
 0x1dc   :  { %v1488_v20 = vpop.f32.mrb[100].mxu0  ;;  %v1856_v21 = vpop.f32.mrb[100].mxu1 }
 0x1dd   :  { %4183 = vst [vmem:[%s5699_s3 + $0xc0] sm:$0xff] %v3823_v18   ;;  %4229 = vst [vmem:[%s5699_s3 + $0x230] sm:$0xff] %v4053_v19   ;;  %v1489_v22 = vadd.f32 %v5421_v28, %v1488_v20  ;;  %v1857_v23 = vadd.f32 %v5421_v28, %v1856_v21  ;;  %v1490_v24 = vpop.f32.mrb[101].mxu0  ;;  %v1858_v25 = vpop.f32.mrb[101].mxu1 }
 0x1de   :  { %v1491_v26 = vpop.f32.mrb[102].mxu0  ;;  %v1859_v27 = vpop.f32.mrb[102].mxu1 }
 0x1df   :  { %v1492_v29 = vadd.f32 %v5421_v28, %v1491_v26  ;;  %v1860_v63 = vadd.f32 %v5421_v28, %v1859_v27  ;;  %v1493_v30 = vpop.f32.mrb[103].mxu0  ;;  %v1861_v31 = vpop.f32.mrb[103].mxu1  ;;  %v2073_v32 = vmax.f32 %v1489_v22, 0.0  ;;  %v2165_v33 = vmax.f32 %v1857_v23, 0.0 }
 0x1e1   :  { %v2074_v34 = vmax.f32 %v1492_v29, 0.0  ;;  %v2166_v35 = vmax.f32 %v1860_v63, 0.0 }
 0x1e3   :  { %v3828_v36 = vpack.c.bf16 %v2074_v34, %v2073_v32  ;;  %v4058_v37 = vpack.c.bf16 %v2166_v35, %v2165_v33 }
 0x1e4   :  { %v1496_v38 = vpop.f32.mrb[104].mxu0  ;;  %v1864_v39 = vpop.f32.mrb[104].mxu1 }
 0x1e5   :  { %4184 = vst [vmem:[%s5699_s3 + $0xc8] sm:$0xff] %v3828_v36   ;;  %4230 = vst [vmem:[%s5699_s3 + $0x238] sm:$0xff] %v4058_v37   ;;  %v1497_v40 = vadd.f32 %v5421_v28, %v1496_v38  ;;  %v1865_v41 = vadd.f32 %v5421_v28, %v1864_v39  ;;  %v1498_v42 = vpop.f32.mrb[105].mxu0  ;;  %v1866_v43 = vpop.f32.mrb[105].mxu1 }
 0x1e6   :  { %v1499_v44 = vpop.f32.mrb[106].mxu0  ;;  %v1867_v45 = vpop.f32.mrb[106].mxu1 }
 0x1e7   :  { %v1500_v46 = vadd.f32 %v5421_v28, %v1499_v44  ;;  %v1868_v47 = vadd.f32 %v5421_v28, %v1867_v45  ;;  %v1501_v48 = vpop.f32.mrb[107].mxu0  ;;  %v1869_v49 = vpop.f32.mrb[107].mxu1  ;;  %v2075_v50 = vmax.f32 %v1497_v40, 0.0  ;;  %v2167_v51 = vmax.f32 %v1865_v41, 0.0 }
 0x1e9   :  { %v2076_v52 = vmax.f32 %v1500_v46, 0.0  ;;  %v2168_v53 = vmax.f32 %v1868_v47, 0.0 }
 0x1eb   :  { %v3833_v54 = vpack.c.bf16 %v2076_v52, %v2075_v50  ;;  %v4063_v55 = vpack.c.bf16 %v2168_v53, %v2167_v51 }
 0x1ec   :  { %v1504_v56 = vpop.f32.mrb[108].mxu0  ;;  %v1872_v57 = vpop.f32.mrb[108].mxu1 }
 0x1ed   :  { %4185 = vst [vmem:[%s5699_s3 + $0xd0] sm:$0xff] %v3833_v54   ;;  %4231 = vst [vmem:[%s5699_s3 + $0x240] sm:$0xff] %v4063_v55   ;;  %v1505_v58 = vadd.f32 %v5421_v28, %v1504_v56  ;;  %v1873_v59 = vadd.f32 %v5421_v28, %v1872_v57  ;;  %v1506_v60 = vpop.f32.mrb[109].mxu0  ;;  %v1874_v61 = vpop.f32.mrb[109].mxu1 }
 0x1ee   :  { %v1507_v62 = vpop.f32.mrb[110].mxu0  ;;  %v1875_v0 = vpop.f32.mrb[110].mxu1 }
 0x1ef   :  { %v1508_v1 = vadd.f32 %v5421_v28, %v1507_v62  ;;  %v1876_v2 = vadd.f32 %v5421_v28, %v1875_v0  ;;  %v1509_v3 = vpop.f32.mrb[111].mxu0  ;;  %v1877_v4 = vpop.f32.mrb[111].mxu1  ;;  %v2077_v5 = vmax.f32 %v1505_v58, 0.0  ;;  %v2169_v6 = vmax.f32 %v1873_v59, 0.0 }
 0x1f1   :  { %v2078_v7 = vmax.f32 %v1508_v1, 0.0  ;;  %v2170_v8 = vmax.f32 %v1876_v2, 0.0 }
 0x1f3   :  { %v3838_v9 = vpack.c.bf16 %v2078_v7, %v2077_v5  ;;  %v4068_v10 = vpack.c.bf16 %v2170_v8, %v2169_v6 }
 0x1f4   :  { %v1512_v11 = vpop.f32.mrb[112].mxu0  ;;  %v1880_v12 = vpop.f32.mrb[112].mxu1 }
 0x1f5   :  { %4186 = vst [vmem:[%s5699_s3 + $0xd8] sm:$0xff] %v3838_v9   ;;  %4232 = vst [vmem:[%s5699_s3 + $0x248] sm:$0xff] %v4068_v10   ;;  %v1513_v13 = vadd.f32 %v5421_v28, %v1512_v11  ;;  %v1881_v14 = vadd.f32 %v5421_v28, %v1880_v12  ;;  %v1514_v15 = vpop.f32.mrb[113].mxu0  ;;  %v1882_v16 = vpop.f32.mrb[113].mxu1 }
 0x1f6   :  { %v1515_v17 = vpop.f32.mrb[114].mxu0  ;;  %v1883_v18 = vpop.f32.mrb[114].mxu1 }
 0x1f7   :  { %v1516_v19 = vadd.f32 %v5421_v28, %v1515_v17  ;;  %v1884_v20 = vadd.f32 %v5421_v28, %v1883_v18  ;;  %v1517_v21 = vpop.f32.mrb[115].mxu0  ;;  %v1885_v22 = vpop.f32.mrb[115].mxu1  ;;  %v2079_v23 = vmax.f32 %v1513_v13, 0.0  ;;  %v2171_v24 = vmax.f32 %v1881_v14, 0.0 }
 0x1f9   :  { %v2080_v25 = vmax.f32 %v1516_v19, 0.0  ;;  %v2172_v26 = vmax.f32 %v1884_v20, 0.0 }
 0x1fb   :  { %v3843_v27 = vpack.c.bf16 %v2080_v25, %v2079_v23  ;;  %v4073_v29 = vpack.c.bf16 %v2172_v26, %v2171_v24 }
 0x1fc   :  { %v1520_v63 = vpop.f32.mrb[116].mxu0  ;;  %v1888_v30 = vpop.f32.mrb[116].mxu1 }
 0x1fd   :  { %4187 = vst [vmem:[%s5699_s3 + $0xe0] sm:$0xff] %v3843_v27   ;;  %4233 = vst [vmem:[%s5699_s3 + $0x250] sm:$0xff] %v4073_v29   ;;  %v1521_v31 = vadd.f32 %v5421_v28, %v1520_v63  ;;  %v1889_v32 = vadd.f32 %v5421_v28, %v1888_v30  ;;  %v1522_v33 = vpop.f32.mrb[117].mxu0  ;;  %v1890_v34 = vpop.f32.mrb[117].mxu1 }
 0x1fe   :  { %v1523_v35 = vpop.f32.mrb[118].mxu0  ;;  %v1891_v36 = vpop.f32.mrb[118].mxu1 }
 0x1ff   :  { %v1524_v37 = vadd.f32 %v5421_v28, %v1523_v35  ;;  %v1892_v38 = vadd.f32 %v5421_v28, %v1891_v36  ;;  %v1525_v39 = vpop.f32.mrb[119].mxu0  ;;  %v1893_v40 = vpop.f32.mrb[119].mxu1  ;;  %v2081_v41 = vmax.f32 %v1521_v31, 0.0  ;;  %v2173_v42 = vmax.f32 %v1889_v32, 0.0 }
 0x201   :  { %v2082_v43 = vmax.f32 %v1524_v37, 0.0  ;;  %v2174_v44 = vmax.f32 %v1892_v38, 0.0 }
 0x203   :  { %v3848_v45 = vpack.c.bf16 %v2082_v43, %v2081_v41  ;;  %v4078_v46 = vpack.c.bf16 %v2174_v44, %v2173_v42 }
 0x204   :  { %v1528_v47 = vpop.f32.mrb[120].mxu0  ;;  %v1896_v48 = vpop.f32.mrb[120].mxu1 }
 0x205   :  { %4188 = vst [vmem:[%s5699_s3 + $0xe8] sm:$0xff] %v3848_v45   ;;  %4234 = vst [vmem:[%s5699_s3 + $0x258] sm:$0xff] %v4078_v46   ;;  %v1529_v49 = vadd.f32 %v5421_v28, %v1528_v47  ;;  %v1897_v50 = vadd.f32 %v5421_v28, %v1896_v48  ;;  %v1530_v51 = vpop.f32.mrb[121].mxu0  ;;  %v1898_v52 = vpop.f32.mrb[121].mxu1 }
 0x206   :  { %v1531_v53 = vpop.f32.mrb[122].mxu0  ;;  %v1899_v54 = vpop.f32.mrb[122].mxu1 }
 0x207   :  { %v1532_v55 = vadd.f32 %v5421_v28, %v1531_v53  ;;  %v1900_v56 = vadd.f32 %v5421_v28, %v1899_v54  ;;  %v1533_v57 = vpop.f32.mrb[123].mxu0  ;;  %v1901_v58 = vpop.f32.mrb[123].mxu1  ;;  %v2083_v59 = vmax.f32 %v1529_v49, 0.0  ;;  %v2175_v60 = vmax.f32 %v1897_v50, 0.0 }
 0x209   :  { %v2084_v61 = vmax.f32 %v1532_v55, 0.0  ;;  %v2176_v62 = vmax.f32 %v1900_v56, 0.0 }
 0x20b   :  { %v3853_v0 = vpack.c.bf16 %v2084_v61, %v2083_v59  ;;  %v4083_v1 = vpack.c.bf16 %v2176_v62, %v2175_v60 }
 0x20c   :  { %v1536_v2 = vpop.f32.mrb[124].mxu0  ;;  %v1904_v3 = vpop.f32.mrb[124].mxu1 }
 0x20d   :  { %4189 = vst [vmem:[%s5699_s3 + $0xf0] sm:$0xff] %v3853_v0   ;;  %4235 = vst [vmem:[%s5699_s3 + $0x260] sm:$0xff] %v4083_v1   ;;  %v1537_v4 = vadd.f32 %v5421_v28, %v1536_v2  ;;  %v1905_v5 = vadd.f32 %v5421_v28, %v1904_v3  ;;  %v1538_v6 = vpop.f32.mrb[125].mxu0  ;;  %v1906_v7 = vpop.f32.mrb[125].mxu1 }
 0x20e   :  { %v1539_v8 = vpop.f32.mrb[126].mxu0  ;;  %v1907_v9 = vpop.f32.mrb[126].mxu1 }
 0x20f   :  { %v1540_v10 = vadd.f32 %v5421_v28, %v1539_v8  ;;  %v1908_v11 = vadd.f32 %v5421_v28, %v1907_v9  ;;  %v1541_v12 = vpop.f32.mrb[127].mxu0  ;;  %v1909_v13 = vpop.f32.mrb[127].mxu1  ;;  %v2085_v14 = vmax.f32 %v1537_v4, 0.0  ;;  %v2177_v15 = vmax.f32 %v1905_v5, 0.0 }
 0x211   :  { %v2086_v16 = vmax.f32 %v1540_v10, 0.0  ;;  %v2178_v17 = vmax.f32 %v1908_v11, 0.0 }
 0x213   :  { %v3858_v18 = vpack.c.bf16 %v2086_v16, %v2085_v14  ;;  %v4088_v19 = vpack.c.bf16 %v2178_v17, %v2177_v15 }
 0x214   :  { %v1544_v20 = vpop.f32.mrb[128].mxu0  ;;  %v1912_v21 = vpop.f32.mrb[128].mxu1 }
 0x215   :  { %4190 = vst [vmem:[%s5699_s3 + $0xf8] sm:$0xff] %v3858_v18   ;;  %4236 = vst [vmem:[%s5699_s3 + $0x268] sm:$0xff] %v4088_v19   ;;  %v1545_v22 = vadd.f32 %v5421_v28, %v1544_v20  ;;  %v1913_v23 = vadd.f32 %v5421_v28, %v1912_v21  ;;  %v1546_v24 = vpop.f32.mrb[129].mxu0  ;;  %v1914_v25 = vpop.f32.mrb[129].mxu1 }
 0x216   :  { %v1547_v26 = vpop.f32.mrb[130].mxu0  ;;  %v1915_v27 = vpop.f32.mrb[130].mxu1 }
 0x217   :  { %v1548_v29 = vadd.f32 %v5421_v28, %v1547_v26  ;;  %v1916_v63 = vadd.f32 %v5421_v28, %v1915_v27  ;;  %v1549_v30 = vpop.f32.mrb[131].mxu0  ;;  %v1917_v31 = vpop.f32.mrb[131].mxu1  ;;  %v2087_v32 = vmax.f32 %v1545_v22, 0.0  ;;  %v2179_v33 = vmax.f32 %v1913_v23, 0.0 }
 0x219   :  { %v2088_v34 = vmax.f32 %v1548_v29, 0.0  ;;  %v2180_v35 = vmax.f32 %v1916_v63, 0.0 }
 0x21b   :  { %v3863_v36 = vpack.c.bf16 %v2088_v34, %v2087_v32  ;;  %v4093_v37 = vpack.c.bf16 %v2180_v35, %v2179_v33 }
 0x21c   :  { %v1552_v38 = vpop.f32.mrb[132].mxu0  ;;  %v1920_v39 = vpop.f32.mrb[132].mxu1 }
 0x21d   :  { %4191 = vst [vmem:[%s5699_s3 + $0x100] sm:$0xff] %v3863_v36   ;;  %4237 = vst [vmem:[%s5699_s3 + $0x270] sm:$0xff] %v4093_v37   ;;  %v1553_v40 = vadd.f32 %v5421_v28, %v1552_v38  ;;  %v1921_v41 = vadd.f32 %v5421_v28, %v1920_v39  ;;  %v1554_v42 = vpop.f32.mrb[133].mxu0  ;;  %v1922_v43 = vpop.f32.mrb[133].mxu1 }
 0x21e   :  { %v1555_v44 = vpop.f32.mrb[134].mxu0  ;;  %v1923_v45 = vpop.f32.mrb[134].mxu1 }
 0x21f   :  { %v1556_v46 = vadd.f32 %v5421_v28, %v1555_v44  ;;  %v1924_v47 = vadd.f32 %v5421_v28, %v1923_v45  ;;  %v1557_v48 = vpop.f32.mrb[135].mxu0  ;;  %v1925_v49 = vpop.f32.mrb[135].mxu1  ;;  %v2089_v50 = vmax.f32 %v1553_v40, 0.0  ;;  %v2181_v51 = vmax.f32 %v1921_v41, 0.0 }
 0x221   :  { %v2090_v52 = vmax.f32 %v1556_v46, 0.0  ;;  %v2182_v53 = vmax.f32 %v1924_v47, 0.0 }
 0x223   :  { %v3868_v54 = vpack.c.bf16 %v2090_v52, %v2089_v50  ;;  %v4098_v55 = vpack.c.bf16 %v2182_v53, %v2181_v51 }
 0x224   :  { %v1560_v56 = vpop.f32.mrb[136].mxu0  ;;  %v1928_v57 = vpop.f32.mrb[136].mxu1 }
 0x225   :  { %4192 = vst [vmem:[%s5699_s3 + $0x108] sm:$0xff] %v3868_v54   ;;  %4238 = vst [vmem:[%s5699_s3 + $0x278] sm:$0xff] %v4098_v55   ;;  %v1561_v58 = vadd.f32 %v5421_v28, %v1560_v56  ;;  %v1929_v59 = vadd.f32 %v5421_v28, %v1928_v57  ;;  %v1562_v60 = vpop.f32.mrb[137].mxu0  ;;  %v1930_v61 = vpop.f32.mrb[137].mxu1 }
 0x226   :  { %v1563_v62 = vpop.f32.mrb[138].mxu0  ;;  %v1931_v0 = vpop.f32.mrb[138].mxu1 }
 0x227   :  { %v1564_v1 = vadd.f32 %v5421_v28, %v1563_v62  ;;  %v1932_v2 = vadd.f32 %v5421_v28, %v1931_v0  ;;  %v1565_v3 = vpop.f32.mrb[139].mxu0  ;;  %v1933_v4 = vpop.f32.mrb[139].mxu1  ;;  %v2091_v5 = vmax.f32 %v1561_v58, 0.0  ;;  %v2183_v6 = vmax.f32 %v1929_v59, 0.0 }
 0x229   :  { %v2092_v7 = vmax.f32 %v1564_v1, 0.0  ;;  %v2184_v8 = vmax.f32 %v1932_v2, 0.0 }
 0x22b   :  { %v3873_v9 = vpack.c.bf16 %v2092_v7, %v2091_v5  ;;  %v4103_v10 = vpack.c.bf16 %v2184_v8, %v2183_v6 }
 0x22c   :  { %v1568_v11 = vpop.f32.mrb[140].mxu0  ;;  %v1936_v12 = vpop.f32.mrb[140].mxu1 }
 0x22d   :  { %4193 = vst [vmem:[%s5699_s3 + $0x110] sm:$0xff] %v3873_v9   ;;  %4239 = vst [vmem:[%s5699_s3 + $0x280] sm:$0xff] %v4103_v10   ;;  %v1569_v13 = vadd.f32 %v5421_v28, %v1568_v11  ;;  %v1937_v14 = vadd.f32 %v5421_v28, %v1936_v12  ;;  %v1570_v15 = vpop.f32.mrb[141].mxu0  ;;  %v1938_v16 = vpop.f32.mrb[141].mxu1 }
 0x22e   :  { %v1571_v17 = vpop.f32.mrb[142].mxu0  ;;  %v1939_v18 = vpop.f32.mrb[142].mxu1 }
 0x22f   :  { %v1572_v19 = vadd.f32 %v5421_v28, %v1571_v17  ;;  %v1940_v20 = vadd.f32 %v5421_v28, %v1939_v18  ;;  %v1573_v21 = vpop.f32.mrb[143].mxu0  ;;  %v1941_v22 = vpop.f32.mrb[143].mxu1  ;;  %v2093_v23 = vmax.f32 %v1569_v13, 0.0  ;;  %v2185_v24 = vmax.f32 %v1937_v14, 0.0 }
 0x231   :  { %v2094_v25 = vmax.f32 %v1572_v19, 0.0  ;;  %v2186_v26 = vmax.f32 %v1940_v20, 0.0 }
 0x233   :  { %v3878_v27 = vpack.c.bf16 %v2094_v25, %v2093_v23  ;;  %v4108_v29 = vpack.c.bf16 %v2186_v26, %v2185_v24 }
 0x234   :  { %v1576_v63 = vpop.f32.mrb[144].mxu0  ;;  %v1944_v30 = vpop.f32.mrb[144].mxu1 }
 0x235   :  { %4194 = vst [vmem:[%s5699_s3 + $0x118] sm:$0xff] %v3878_v27   ;;  %4240 = vst [vmem:[%s5699_s3 + $0x288] sm:$0xff] %v4108_v29   ;;  %v1577_v31 = vadd.f32 %v5421_v28, %v1576_v63  ;;  %v1945_v32 = vadd.f32 %v5421_v28, %v1944_v30  ;;  %v1578_v33 = vpop.f32.mrb[145].mxu0  ;;  %v1946_v34 = vpop.f32.mrb[145].mxu1 }
 0x236   :  { %v1579_v35 = vpop.f32.mrb[146].mxu0  ;;  %v1947_v36 = vpop.f32.mrb[146].mxu1 }
 0x237   :  { %v1580_v37 = vadd.f32 %v5421_v28, %v1579_v35  ;;  %v1948_v38 = vadd.f32 %v5421_v28, %v1947_v36  ;;  %v1581_v39 = vpop.f32.mrb[147].mxu0  ;;  %v1949_v40 = vpop.f32.mrb[147].mxu1  ;;  %v2095_v41 = vmax.f32 %v1577_v31, 0.0  ;;  %v2187_v42 = vmax.f32 %v1945_v32, 0.0 }
 0x239   :  { %v2096_v43 = vmax.f32 %v1580_v37, 0.0  ;;  %v2188_v44 = vmax.f32 %v1948_v38, 0.0 }
 0x23b   :  { %v3883_v45 = vpack.c.bf16 %v2096_v43, %v2095_v41  ;;  %v4113_v46 = vpack.c.bf16 %v2188_v44, %v2187_v42 }
 0x23c   :  { %v1584_v47 = vpop.f32.mrb[148].mxu0  ;;  %v1952_v48 = vpop.f32.mrb[148].mxu1 }
 0x23d   :  { %4195 = vst [vmem:[%s5699_s3 + $0x120] sm:$0xff] %v3883_v45   ;;  %4241 = vst [vmem:[%s5699_s3 + $0x290] sm:$0xff] %v4113_v46   ;;  %v1585_v49 = vadd.f32 %v5421_v28, %v1584_v47  ;;  %v1953_v50 = vadd.f32 %v5421_v28, %v1952_v48  ;;  %v1586_v51 = vpop.f32.mrb[149].mxu0  ;;  %v1954_v52 = vpop.f32.mrb[149].mxu1 }
 0x23e   :  { %v1587_v53 = vpop.f32.mrb[150].mxu0  ;;  %v1955_v54 = vpop.f32.mrb[150].mxu1 }
 0x23f   :  { %v1588_v55 = vadd.f32 %v5421_v28, %v1587_v53  ;;  %v1956_v56 = vadd.f32 %v5421_v28, %v1955_v54  ;;  %v1589_v57 = vpop.f32.mrb[151].mxu0  ;;  %v1957_v58 = vpop.f32.mrb[151].mxu1  ;;  %v2097_v59 = vmax.f32 %v1585_v49, 0.0  ;;  %v2189_v60 = vmax.f32 %v1953_v50, 0.0 }
 0x241   :  { %v2098_v61 = vmax.f32 %v1588_v55, 0.0  ;;  %v2190_v62 = vmax.f32 %v1956_v56, 0.0 }
 0x243   :  { %v3888_v0 = vpack.c.bf16 %v2098_v61, %v2097_v59  ;;  %v4118_v1 = vpack.c.bf16 %v2190_v62, %v2189_v60 }
 0x244   :  { %v1592_v2 = vpop.f32.mrb[152].mxu0  ;;  %v1960_v3 = vpop.f32.mrb[152].mxu1 }
 0x245   :  { %4196 = vst [vmem:[%s5699_s3 + $0x128] sm:$0xff] %v3888_v0   ;;  %4242 = vst [vmem:[%s5699_s3 + $0x298] sm:$0xff] %v4118_v1   ;;  %v1593_v4 = vadd.f32 %v5421_v28, %v1592_v2  ;;  %v1961_v5 = vadd.f32 %v5421_v28, %v1960_v3  ;;  %v1594_v6 = vpop.f32.mrb[153].mxu0  ;;  %v1962_v7 = vpop.f32.mrb[153].mxu1 }
 0x246   :  { %v1595_v8 = vpop.f32.mrb[154].mxu0  ;;  %v1963_v9 = vpop.f32.mrb[154].mxu1 }
 0x247   :  { %v1596_v10 = vadd.f32 %v5421_v28, %v1595_v8  ;;  %v1964_v11 = vadd.f32 %v5421_v28, %v1963_v9  ;;  %v1597_v12 = vpop.f32.mrb[155].mxu0  ;;  %v1965_v13 = vpop.f32.mrb[155].mxu1  ;;  %v2099_v14 = vmax.f32 %v1593_v4, 0.0  ;;  %v2191_v15 = vmax.f32 %v1961_v5, 0.0 }
 0x249   :  { %v2100_v16 = vmax.f32 %v1596_v10, 0.0  ;;  %v2192_v17 = vmax.f32 %v1964_v11, 0.0 }
 0x24b   :  { %v3893_v18 = vpack.c.bf16 %v2100_v16, %v2099_v14  ;;  %v4123_v19 = vpack.c.bf16 %v2192_v17, %v2191_v15 }
 0x24c   :  { %v1600_v20 = vpop.f32.mrb[156].mxu0  ;;  %v1968_v21 = vpop.f32.mrb[156].mxu1 }
 0x24d   :  { %4197 = vst [vmem:[%s5699_s3 + $0x130] sm:$0xff] %v3893_v18   ;;  %4243 = vst [vmem:[%s5699_s3 + $0x2a0] sm:$0xff] %v4123_v19   ;;  %v1601_v22 = vadd.f32 %v5421_v28, %v1600_v20  ;;  %v1969_v23 = vadd.f32 %v5421_v28, %v1968_v21  ;;  %v1602_v24 = vpop.f32.mrb[157].mxu0  ;;  %v1970_v25 = vpop.f32.mrb[157].mxu1 }
 0x24e   :  { %v1603_v26 = vpop.f32.mrb[158].mxu0  ;;  %v1971_v27 = vpop.f32.mrb[158].mxu1 }
 0x24f   :  { %v1604_v29 = vadd.f32 %v5421_v28, %v1603_v26  ;;  %v1972_v63 = vadd.f32 %v5421_v28, %v1971_v27  ;;  %v1605_v30 = vpop.f32.mrb[159].mxu0  ;;  %v1973_v31 = vpop.f32.mrb[159].mxu1  ;;  %v2101_v32 = vmax.f32 %v1601_v22, 0.0  ;;  %v2193_v33 = vmax.f32 %v1969_v23, 0.0 }
 0x251   :  { %v2102_v34 = vmax.f32 %v1604_v29, 0.0  ;;  %v2194_v35 = vmax.f32 %v1972_v63, 0.0 }
 0x253   :  { %v3898_v36 = vpack.c.bf16 %v2102_v34, %v2101_v32  ;;  %v4128_v37 = vpack.c.bf16 %v2194_v35, %v2193_v33 }
 0x254   :  { %v1608_v38 = vpop.f32.mrb[160].mxu0  ;;  %v1976_v39 = vpop.f32.mrb[160].mxu1 }
 0x255   :  { %4198 = vst [vmem:[%s5699_s3 + $0x138] sm:$0xff] %v3898_v36   ;;  %4244 = vst [vmem:[%s5699_s3 + $0x2a8] sm:$0xff] %v4128_v37   ;;  %v1609_v40 = vadd.f32 %v5421_v28, %v1608_v38  ;;  %v1977_v41 = vadd.f32 %v5421_v28, %v1976_v39  ;;  %v1610_v42 = vpop.f32.mrb[161].mxu0  ;;  %v1978_v43 = vpop.f32.mrb[161].mxu1 }
 0x256   :  { %v1611_v44 = vpop.f32.mrb[162].mxu0  ;;  %v1979_v45 = vpop.f32.mrb[162].mxu1 }
 0x257   :  { %v1612_v46 = vadd.f32 %v5421_v28, %v1611_v44  ;;  %v1980_v47 = vadd.f32 %v5421_v28, %v1979_v45  ;;  %v1613_v48 = vpop.f32.mrb[163].mxu0  ;;  %v1981_v49 = vpop.f32.mrb[163].mxu1  ;;  %v2103_v50 = vmax.f32 %v1609_v40, 0.0  ;;  %v2195_v51 = vmax.f32 %v1977_v41, 0.0 }
 0x259   :  { %v2104_v52 = vmax.f32 %v1612_v46, 0.0  ;;  %v2196_v53 = vmax.f32 %v1980_v47, 0.0 }
 0x25b   :  { %v3903_v54 = vpack.c.bf16 %v2104_v52, %v2103_v50  ;;  %v4133_v55 = vpack.c.bf16 %v2196_v53, %v2195_v51 }
 0x25c   :  { %v1616_v56 = vpop.f32.mrb[164].mxu0  ;;  %v1984_v57 = vpop.f32.mrb[164].mxu1 }
 0x25d   :  { %4199 = vst [vmem:[%s5699_s3 + $0x140] sm:$0xff] %v3903_v54   ;;  %4245 = vst [vmem:[%s5699_s3 + $0x2b0] sm:$0xff] %v4133_v55   ;;  %v1617_v58 = vadd.f32 %v5421_v28, %v1616_v56  ;;  %v1985_v59 = vadd.f32 %v5421_v28, %v1984_v57  ;;  %v1618_v60 = vpop.f32.mrb[165].mxu0  ;;  %v1986_v61 = vpop.f32.mrb[165].mxu1 }
 0x25e   :  { %v1619_v62 = vpop.f32.mrb[166].mxu0  ;;  %v1987_v0 = vpop.f32.mrb[166].mxu1 }
 0x25f   :  { %v1620_v1 = vadd.f32 %v5421_v28, %v1619_v62  ;;  %v1988_v2 = vadd.f32 %v5421_v28, %v1987_v0  ;;  %v1621_v3 = vpop.f32.mrb[167].mxu0  ;;  %v1989_v4 = vpop.f32.mrb[167].mxu1  ;;  %v2105_v5 = vmax.f32 %v1617_v58, 0.0  ;;  %v2197_v6 = vmax.f32 %v1985_v59, 0.0 }
 0x261   :  { %v2106_v7 = vmax.f32 %v1620_v1, 0.0  ;;  %v2198_v8 = vmax.f32 %v1988_v2, 0.0 }
 0x263   :  { %v3908_v9 = vpack.c.bf16 %v2106_v7, %v2105_v5  ;;  %v4138_v10 = vpack.c.bf16 %v2198_v8, %v2197_v6 }
 0x264   :  { %v1624_v11 = vpop.f32.mrb[168].mxu0  ;;  %v1992_v12 = vpop.f32.mrb[168].mxu1 }
 0x265   :  { %4200 = vst [vmem:[%s5699_s3 + $0x148] sm:$0xff] %v3908_v9   ;;  %4246 = vst [vmem:[%s5699_s3 + $0x2b8] sm:$0xff] %v4138_v10   ;;  %v1625_v13 = vadd.f32 %v5421_v28, %v1624_v11  ;;  %v1993_v14 = vadd.f32 %v5421_v28, %v1992_v12  ;;  %v1626_v15 = vpop.f32.mrb[169].mxu0  ;;  %v1994_v16 = vpop.f32.mrb[169].mxu1 }
 0x266   :  { %v1627_v17 = vpop.f32.mrb[170].mxu0  ;;  %v1995_v18 = vpop.f32.mrb[170].mxu1 }
 0x267   :  { %v1628_v19 = vadd.f32 %v5421_v28, %v1627_v17  ;;  %v1996_v20 = vadd.f32 %v5421_v28, %v1995_v18  ;;  %v1629_v21 = vpop.f32.mrb[171].mxu0  ;;  %v1997_v22 = vpop.f32.mrb[171].mxu1  ;;  %v2107_v23 = vmax.f32 %v1625_v13, 0.0  ;;  %v2199_v24 = vmax.f32 %v1993_v14, 0.0 }
 0x269   :  { %v2108_v25 = vmax.f32 %v1628_v19, 0.0  ;;  %v2200_v26 = vmax.f32 %v1996_v20, 0.0 }
 0x26b   :  { %v3913_v27 = vpack.c.bf16 %v2108_v25, %v2107_v23  ;;  %v4143_v29 = vpack.c.bf16 %v2200_v26, %v2199_v24 }
 0x26c   :  { %v1632_v63 = vpop.f32.mrb[172].mxu0  ;;  %v2000_v30 = vpop.f32.mrb[172].mxu1 }
 0x26d   :  { %4201 = vst [vmem:[%s5699_s3 + $0x150] sm:$0xff] %v3913_v27   ;;  %4247 = vst [vmem:[%s5699_s3 + $0x2c0] sm:$0xff] %v4143_v29   ;;  %v1633_v31 = vadd.f32 %v5421_v28, %v1632_v63  ;;  %v2001_v32 = vadd.f32 %v5421_v28, %v2000_v30  ;;  %v1634_v33 = vpop.f32.mrb[173].mxu0  ;;  %v2002_v34 = vpop.f32.mrb[173].mxu1 }
 0x26e   :  { %v1635_v35 = vpop.f32.mrb[174].mxu0  ;;  %v2003_v36 = vpop.f32.mrb[174].mxu1 }
 0x26f   :  { %v1636_v37 = vadd.f32 %v5421_v28, %v1635_v35  ;;  %v2004_v38 = vadd.f32 %v5421_v28, %v2003_v36  ;;  %v1637_v39 = vpop.f32.mrb[175].mxu0  ;;  %v2005_v40 = vpop.f32.mrb[175].mxu1  ;;  %v2109_v41 = vmax.f32 %v1633_v31, 0.0  ;;  %v2201_v42 = vmax.f32 %v2001_v32, 0.0  ;;  %v4577_v28 = vld [vmem:[%s5698_s2] ss:$0 sm:$0xff] }
 0x271   :  { %v2110_v43 = vmax.f32 %v1636_v37, 0.0  ;;  %v2202_v44 = vmax.f32 %v2004_v38, 0.0 }
 0x273   :  { %v3918_v45 = vpack.c.bf16 %v2110_v43, %v2109_v41  ;;  %v4148_v46 = vpack.c.bf16 %v2202_v44, %v2201_v42 }
 0x274   :  { %v1640_v47 = vpop.f32.mrb[176].mxu0  ;;  %v2008_v48 = vpop.f32.mrb[176].mxu1 }
 0x275   :  { %4202 = vst [vmem:[%s5699_s3 + $0x158] sm:$0xff] %v3918_v45   ;;  %4248 = vst [vmem:[%s5699_s3 + $0x2c8] sm:$0xff] %v4148_v46   ;;  %v1641_v49 = vadd.f32 %v4577_v28, %v1640_v47  ;;  %v2009_v50 = vadd.f32 %v4577_v28, %v2008_v48  ;;  %v1642_v51 = vpop.f32.mrb[177].mxu0  ;;  %v2010_v52 = vpop.f32.mrb[177].mxu1 }
 0x276   :  { %v1643_v53 = vpop.f32.mrb[178].mxu0  ;;  %v2011_v54 = vpop.f32.mrb[178].mxu1 }
 0x277   :  { %v1644_v55 = vadd.f32 %v4577_v28, %v1643_v53  ;;  %v2012_v56 = vadd.f32 %v4577_v28, %v2011_v54  ;;  %v1645_v57 = vpop.f32.mrb[179].mxu0  ;;  %v2013_v58 = vpop.f32.mrb[179].mxu1  ;;  %v2111_v59 = vmax.f32 %v1641_v49, 0.0  ;;  %v2203_v60 = vmax.f32 %v2009_v50, 0.0 }
 0x279   :  { %v2112_v61 = vmax.f32 %v1644_v55, 0.0  ;;  %v2204_v62 = vmax.f32 %v2012_v56, 0.0 }
 0x27b   :  { %v3923_v0 = vpack.c.bf16 %v2112_v61, %v2111_v59  ;;  %v4153_v1 = vpack.c.bf16 %v2204_v62, %v2203_v60 }
 0x27c   :  { %v1648_v2 = vpop.f32.mrb[180].mxu0  ;;  %v2016_v3 = vpop.f32.mrb[180].mxu1 }
 0x27d   :  { %4203 = vst [vmem:[%s5699_s3 + $0x160] sm:$0xff] %v3923_v0   ;;  %4249 = vst [vmem:[%s5699_s3 + $0x2d0] sm:$0xff] %v4153_v1   ;;  %v1649_v4 = vadd.f32 %v4577_v28, %v1648_v2  ;;  %v2017_v5 = vadd.f32 %v4577_v28, %v2016_v3  ;;  %v1650_v6 = vpop.f32.mrb[181].mxu0  ;;  %v2018_v7 = vpop.f32.mrb[181].mxu1 }
 0x27e   :  { %v1651_v8 = vpop.f32.mrb[182].mxu0  ;;  %v2019_v9 = vpop.f32.mrb[182].mxu1 }
 0x27f   :  { %v1652_v10 = vadd.f32 %v4577_v28, %v1651_v8  ;;  %v2020_v11 = vadd.f32 %v4577_v28, %v2019_v9  ;;  %v1653_v12 = vpop.f32.mrb[183].mxu0  ;;  %v2021_v13 = vpop.f32.mrb[183].mxu1  ;;  %v2113_v14 = vmax.f32 %v1649_v4, 0.0  ;;  %v2205_v15 = vmax.f32 %v2017_v5, 0.0 }
 0x281   :  { %v2114_v16 = vmax.f32 %v1652_v10, 0.0  ;;  %v2206_v17 = vmax.f32 %v2020_v11, 0.0 }
 0x283   :  { %v3928_v18 = vpack.c.bf16 %v2114_v16, %v2113_v14  ;;  %v4158_v19 = vpack.c.bf16 %v2206_v17, %v2205_v15 }
 0x285   :  { %4204 = vst [vmem:[%s5699_s3 + $0x168] sm:$0xff] %v3928_v18   ;;  %4250 = vst [vmem:[%s5699_s3 + $0x2d8] sm:$0xff] %v4158_v19  }

// kernel: qnetwork_forward.7
= control target key start
LH: loop header
LB: loop body
LE: loop exit
PB: predicated region body
PF: predicated region fallthrough
CT: control target
= control target key end

     0   :  { %s17201_s0 = inlined_call_operand.vmem [shape: bf16[2,93696], index: 0, kind: input, shape index: {}]   ;;  %s17202_s1 = inlined_call_operand.vmem [shape: bf16[93696,128], index: 1, kind: input, shape index: {}]   ;;  %s17203_s2 = inlined_call_operand.vmem [shape: f32[1,128], index: 2, kind: input, shape index: {}]   ;;  %s17204_s3 = inlined_call_operand.vmem [shape: bf16[128,32], index: 3, kind: input, shape index: {}]   ;;  %s17205_s4 = inlined_call_operand.vmem [shape: f32[1,32], index: 4, kind: input, shape index: {}]   ;;  %s17206_s5 = inlined_call_operand.vmem [shape: bf16[128,32], index: 5, kind: input, shape index: {}]   ;;  %s17207_s6 = inlined_call_operand.vmem [shape: f32[1,32], index: 6, kind: input, shape index: {}]   ;;  %s17208_s7 = inlined_call_operand.vmem [shape: bf16[32,4], index: 7, kind: input, shape index: {}]   ;;  %s17209_s8 = inlined_call_operand.vmem [shape: f32[1,4], index: 8, kind: input, shape index: {}]   ;;  %s17210_s9 = inlined_call_operand.vmem [shape: bf16[32,1], index: 9, kind: input, shape index: {}]   ;;  %s17211_s10 = inlined_call_operand.<no memory space> [shape: f32[1,1], index: 10, kind: input, shape index: {}]   ;;  %s17212_s11 = inlined_call_operand.hbm [shape: f32[2,4], index: 11, kind: output, shape index: {}]  }
   0x1   :  { %v16_v0 = vstv %s17211_s10 }
   0x2   :  { %17 = vst [vmem:[#allocation3] sm:$0x1] %v16_v0 }
   0x3   :  { %18 = vsyncpa [#allocation5], 0  ;;  %s15820_s19 = smov 0  }
   0x4 LB: > { %s15826_s20 = sadd.s32 4294967295, %s15748_s19   ;;  %p12068_p0 = scmp.ge.s32.totalorder %s15748_s19, 1  ;;  %s15748_s19 = sphi %s15820_s19, %s24_s19  }
   0x5   : > { %p346_p1 = scmp.lt.s32.totalorder %s15748_s19, 7 }
   0x7   : > { %p347_p2 = pnand %p12068_p0, %p346_p1 }
   0x8   : > { %s385_s10 = smul.u32 (!%p347_p2), 122, %s15826_s20  ;;  %p12070_p5 = scmp.ne.s32.totalorder (!%p347_p2), %s15826_s20, 0 }
   0x9   : > { %350 = sbr.rel (%p347_p2) target bundleno = 2179 (0x883), region = 64 }
   0xa   : > { %s390_s21 = smul.u32 (!%p347_p2), 1952, %s15826_s20  ;;  %p386_p3 = scmp.lt.s32.totalorder (!%p347_p2), %s385_s10, 731 }
   0xc   : > { %p391_p4 = scmp.lt.s32.totalorder (!%p347_p2), %s390_s21, 11711 }
  0x10   : > { %s17214_s10 = smov (!%p386_p3, %s385_s10), 731  ;;  %s17216_s21 = smov (!%p391_p4, %s390_s21), 11711 }
  0x11   : > { %s15835_s24 = scalar_lea.vmem %s17201_s0, %s17214_s10  ;;  %s12069_s25 = sshll.u32 %s17216_s21, 2  ;;  %v15750_v1 = vmov (!%p12070_p5), 0.0  }
  0x12   : > { %s15840_s28 = scalar_lea.vmem %s17202_s1, %s12069_s25  ;;  %400 = sbr.rel (%p12070_p5) target bundleno = 25 (0x19), region = 68  ;;  %401 = vst [vmem:[#allocation2] sm:$0x3] (!%p12070_p5), %v15750_v1 }
  0x19 PF: > { %v14715_v2 = vld [vmem:[%s15840_s28 + $0x40] sm:$0xff]   ;;  %v14719_v6 = vld [vmem:[%s15840_s28 + $0x48] sm:$0xff]   ;;  %v14723_v10 = vld [vmem:[%s15840_s28 + $0x50] sm:$0xff]   ;;  %v2391_v31 = vlaneseq  ;;  %v15751_v37 = vmov 1966171168   ;;  %p13048_p6 = scmp.ne.s32.totalorder %s15826_s20, 5 }
  0x1a   : > { %v14716_v3 = vld [vmem:[%s15840_s28 + $0xc0] sm:$0xff]   ;;  %13156 = vmatprep.subr.bf16.mxu0 %v14715_v2  ;;  %v14720_v7 = vld [vmem:[%s15840_s28 + $0xc8] sm:$0xff]   ;;  %v14724_v11 = vld [vmem:[%s15840_s28 + $0xd0] sm:$0xff]   ;;  %v2389_v38 = vunpack.c.l.s4 %v15751_v37  ;;  %vm15753_vm0 = vmmov (!%p13048_p6), 0   ;;  %vm11813_vm1 = vcmask (!%p13048_p6), 261120   ;;  %vm11975_vm2 = vcmask (!%p13048_p6), 25600  }
  0x1b   : > { %v14717_v4 = vld [vmem:[%s15840_s28] sm:$0xff]   ;;  %13178 = vmatprep.subr.bf16.mxu1 %v14716_v3  ;;  %v14721_v8 = vld [vmem:[%s15840_s28 + $0x8] sm:$0xff]   ;;  %v14725_v12 = vld [vmem:[%s15840_s28 + $0x10] sm:$0xff]   ;;  %v2392_v35 = vshrl.u32 %v2391_v31, 7 }
  0x1c   : > { %v14718_v5 = vld [vmem:[%s15840_s28 + $0x80] sm:$0xff]   ;;  %13157 = vmatpush3.bf16.msra.mxu0 %v14717_v4  ;;  %v14722_v9 = vld [vmem:[%s15840_s28 + $0x88] sm:$0xff]   ;;  %v14726_v13 = vld [vmem:[%s15840_s28 + $0x90] sm:$0xff]   ;;  %v2390_v41 = vunpack.c.0.s8 %v2389_v38 }
  0x1d   : > { %13179 = vmatpush3.bf16.msra.mxu1 %v14718_v5  ;;  %13158 = vmatprep.subr.bf16.mxu0 %v14719_v6  ;;  %v14727_v14 = vld [vmem:[%s15840_s28 + $0x58] sm:$0xff]   ;;  %v14731_v18 = vld [vmem:[%s15840_s28 + $0x60] sm:$0xff]   ;;  %v14735_v22 = vld [vmem:[%s15840_s28 + $0x68] sm:$0xff]  }
  0x1e   : > { %13180 = vmatprep.subr.bf16.mxu1 %v14720_v7  ;;  %v14728_v15 = vld [vmem:[%s15840_s28 + $0xd8] sm:$0xff]   ;;  %v14732_v19 = vld [vmem:[%s15840_s28 + $0xe0] sm:$0xff]   ;;  %v14736_v23 = vld [vmem:[%s15840_s28 + $0xe8] sm:$0xff]   ;;  %v15878_v43 = vsub.s32 %v2390_v41, %v2392_v35 }
  0x1f   : > { %v14729_v16 = vld [vmem:[%s15840_s28 + $0x18] sm:$0xff]   ;;  %v14733_v20 = vld [vmem:[%s15840_s28 + $0x20] sm:$0xff]   ;;  %v14737_v24 = vld [vmem:[%s15840_s28 + $0x28] sm:$0xff]  }
  0x20   : > { %13159 = vmatpush3.bf16.msra.mxu0 %v14721_v8  ;;  %v14730_v17 = vld [vmem:[%s15840_s28 + $0x98] sm:$0xff]   ;;  %v14734_v21 = vld [vmem:[%s15840_s28 + $0xa0] sm:$0xff]   ;;  %v14738_v25 = vld [vmem:[%s15840_s28 + $0xa8] sm:$0xff]  }
  0x21   : > { %13181 = vmatpush3.bf16.msra.mxu1 %v14722_v9  ;;  %13160 = vmatprep.subr.bf16.mxu0 %v14723_v10  ;;  %v14739_v26 = vld [vmem:[%s15840_s28 + $0x70] sm:$0xff]   ;;  %v14743_v30 = vld [vmem:[%s15840_s28 + $0x78] sm:$0xff]   ;;  %v14748_v36 = vld [vmem:[%s15840_s28 + $0x140] sm:$0xff]  }
  0x22   : > { %13182 = vmatprep.subr.bf16.mxu1 %v14724_v11  ;;  %v14740_v27 = vld [vmem:[%s15840_s28 + $0xf0] sm:$0xff]   ;;  %v14744_v32 = vld [vmem:[%s15840_s28 + $0xf8] sm:$0xff]   ;;  %v403_v39 = vld [vmem:[%s15835_s24] sm:$0xff] }
  0x23   : > { %v14741_v28 = vld [vmem:[%s15840_s28 + $0x30] sm:$0xff]   ;;  %v14745_v33 = vld [vmem:[%s15840_s28 + $0x38] sm:$0xff]   ;;  %v2387_v40 = vcombine.high %v403_v39, %v403_v39  ;;  %v14750_v42 = vld [vmem:[%s15840_s28 + $0x1c0] sm:$0xff]   ;;  %v2394_v44 = vrot.slane %v403_v39, %v15878_v43 }
  0x24   : > { %13161 = vmatpush3.bf16.msra.mxu0 %v14725_v12  ;;  %v14742_v29 = vld [vmem:[%s15840_s28 + $0xb0] sm:$0xff]   ;;  %v14746_v34 = vld [vmem:[%s15840_s28 + $0xb8] sm:$0xff]   ;;  %v14749_v49 = vld [vmem:[%s15840_s28 + $0x100] sm:$0xff]  }
  0x25   : > { %13183 = vmatpush3.bf16.msra.mxu1 %v14726_v13  ;;  %13162 = vmatprep.subr.bf16.mxu0 %v14727_v14  ;;  %v15882_v45 = vrot.slane %v2387_v40, %v15878_v43  ;;  %v2402_v46 = vcombine.high %v2394_v44, %v2394_v44  ;;  %v2410_v47 = vrot.slane %v2394_v44, %v15878_v43  ;;  %v14751_v51 = vld [vmem:[%s15840_s28 + $0x180] sm:$0xff]   ;;  %v14752_v54 = vld [vmem:[%s15840_s28 + $0x148] sm:$0xff]   ;;  %v14756_v60 = vld [vmem:[%s15840_s28 + $0x150] sm:$0xff]  }
  0x26   : > { %13184 = vmatprep.subr.bf16.mxu1 %v14728_v15  ;;  %v14753_v56 = vld [vmem:[%s15840_s28 + $0x108] sm:$0xff]   ;;  %v14757_v61 = vld [vmem:[%s15840_s28 + $0x110] sm:$0xff]   ;;  %v14760_v0 = vld [vmem:[%s15840_s28 + $0x158] sm:$0xff]  }
  0x27   : > { %v2403_v48 = vcombine.high %v15882_v45, %v15882_v45  ;;  %v2424_v50 = vrot.slane %v2402_v46, %v15878_v43  ;;  %v2432_v53 = vcombine.high %v2410_v47, %v2410_v47  ;;  %v14754_v57 = vld [vmem:[%s15840_s28 + $0x1c8] sm:$0xff]   ;;  %v14758_v62 = vld [vmem:[%s15840_s28 + $0x1d0] sm:$0xff]   ;;  %v14761_v1 = vld [vmem:[%s15840_s28 + $0x118] sm:$0xff]  }
  0x28   : > { %13163 = vmatpush3.bf16.msra.mxu0 %v14729_v16  ;;  %v14755_v59 = vld [vmem:[%s15840_s28 + $0x188] sm:$0xff]   ;;  %v14759_v63 = vld [vmem:[%s15840_s28 + $0x190] sm:$0xff]   ;;  %v14762_v2 = vld [vmem:[%s15840_s28 + $0x1d8] sm:$0xff]  }
  0x29   : > { %13185 = vmatpush3.bf16.msra.mxu1 %v14730_v17  ;;  %13164 = vmatprep.subr.bf16.mxu0 %v14731_v18  ;;  %v2431_v52 = vrot.slane %v2403_v48, %v15878_v43  ;;  %v2434_v55 = vcombine.high %v2424_v50, %v2424_v50  ;;  %v14763_v3 = vld [vmem:[%s15840_s28 + $0x198] sm:$0xff]   ;;  %v14764_v4 = vld [vmem:[%s15840_s28 + $0x160] sm:$0xff]   ;;  %v14768_v8 = vld [vmem:[%s15840_s28 + $0x168] sm:$0xff]  }
  0x2a   : > { %13186 = vmatprep.subr.bf16.mxu1 %v14732_v19  ;;  %9154 = vmatprep.mubr.bf16.mxu0 %v2424_v50  ;;  %v14765_v5 = vld [vmem:[%s15840_s28 + $0x120] sm:$0xff]   ;;  %v14769_v9 = vld [vmem:[%s15840_s28 + $0x128] sm:$0xff]   ;;  %v14772_v12 = vld [vmem:[%s15840_s28 + $0x170] sm:$0xff]  }
  0x2b   : > { %v2435_v58 = vcombine.high %v2431_v52, %v2431_v52  ;;  %9194 = vmatprep.mubr.bf16.mxu1 %v2434_v55  ;;  %v14766_v6 = vld [vmem:[%s15840_s28 + $0x1e0] sm:$0xff]   ;;  %v14770_v10 = vld [vmem:[%s15840_s28 + $0x1e8] sm:$0xff]   ;;  %v14773_v13 = vld [vmem:[%s15840_s28 + $0x130] sm:$0xff]  }
  0x2c   : > { %13165 = vmatpush3.bf16.msra.mxu0 %v14733_v20  ;;  %v14767_v7 = vld [vmem:[%s15840_s28 + $0x1a0] sm:$0xff]   ;;  %v14771_v11 = vld [vmem:[%s15840_s28 + $0x1a8] sm:$0xff]   ;;  %v14774_v14 = vld [vmem:[%s15840_s28 + $0x1f0] sm:$0xff]   ;;  %v2417_v20 = vrot.slane %v15882_v45, %v15878_v43 }
  0x2d   : > { %13187 = vmatpush3.bf16.msra.mxu1 %v14734_v21  ;;  %13166 = vmatprep.subr.bf16.mxu0 %v14735_v22  ;;  %v14775_v15 = vld [vmem:[%s15840_s28 + $0x1b0] sm:$0xff]   ;;  %v14776_v16 = vld [vmem:[%s15840_s28 + $0x178] sm:$0xff]   ;;  %v14780_v21 = vld [vmem:[%s15840_s28 + $0x240] sm:$0xff]  }
  0x2e   : > { %13188 = vmatprep.subr.bf16.mxu1 %v14736_v23  ;;  %v14777_v17 = vld [vmem:[%s15840_s28 + $0x138] sm:$0xff]   ;;  %v14781_v22 = vld [vmem:[%s15840_s28 + $0x200] sm:$0xff]   ;;  %v14789_v31 = vld [vmem:[%s15840_s28 + $0x210] sm:$0xff]  }
  0x2f   : > { %v14778_v18 = vld [vmem:[%s15840_s28 + $0x1f8] sm:$0xff]   ;;  %v14782_v23 = vld [vmem:[%s15840_s28 + $0x2c0] sm:$0xff]   ;;  %v14801_v44 = vld [vmem:[%s15840_s28 + $0x228] sm:$0xff]  }
  0x30   : > { %13167 = vmatpush3.bf16.msra.mxu0 %v14737_v24  ;;  %v14779_v19 = vld [vmem:[%s15840_s28 + $0x1b8] sm:$0xff]   ;;  %v14783_v24 = vld [vmem:[%s15840_s28 + $0x280] sm:$0xff]   ;;  %v14802_v45 = vld [vmem:[%s15840_s28 + $0x2e8] sm:$0xff]  }
  0x31   : > { %13189 = vmatpush3.bf16.msra.mxu1 %v14738_v25  ;;  %13168 = vmatprep.subr.bf16.mxu0 %v14739_v26  ;;  %v2433_v25 = vcombine.high %v2417_v20, %v2417_v20  ;;  %v14784_v26 = vld [vmem:[%s15840_s28 + $0x248] sm:$0xff]   ;;  %v14793_v35 = vld [vmem:[%s15840_s28 + $0x218] sm:$0xff]   ;;  %v14796_v38 = vld [vmem:[%s15840_s28 + $0x260] sm:$0xff]  }
  0x32   : > { %13190 = vmatprep.subr.bf16.mxu1 %v14740_v27  ;;  %v14785_v27 = vld [vmem:[%s15840_s28 + $0x208] sm:$0xff]   ;;  %v14795_v37 = vld [vmem:[%s15840_s28 + $0x298] sm:$0xff]   ;;  %v14797_v39 = vld [vmem:[%s15840_s28 + $0x220] sm:$0xff]  }
  0x33   : > { %v14798_v40 = vld [vmem:[%s15840_s28 + $0x2e0] sm:$0xff]   ;;  %v14803_v46 = vld [vmem:[%s15840_s28 + $0x2a8] sm:$0xff]   ;;  %v14804_v48 = vld [vmem:[%s15840_s28 + $0x270] sm:$0xff]  }
  0x34   : > { %13169 = vmatpush3.bf16.msra.mxu0 %v14741_v28  ;;  %v14786_v28 = vld [vmem:[%s15840_s28 + $0x2c8] sm:$0xff]   ;;  %v14799_v41 = vld [vmem:[%s15840_s28 + $0x2a0] sm:$0xff]   ;;  %v14807_v55 = vld [vmem:[%s15840_s28 + $0x2b0] sm:$0xff]  }
  0x35   : > { %13191 = vmatpush3.bf16.msra.mxu1 %v14742_v29  ;;  %13170 = vmatprep.subr.bf16.mxu0 %v14743_v30  ;;  %v14787_v29 = vld [vmem:[%s15840_s28 + $0x288] sm:$0xff]   ;;  %v14788_v30 = vld [vmem:[%s15840_s28 + $0x250] sm:$0xff]  }
  0x36   : > { %13192 = vmatprep.subr.bf16.mxu1 %v14744_v32  ;;  %v14790_v32 = vld [vmem:[%s15840_s28 + $0x2d0] sm:$0xff]  }
  0x38   : > { %13171 = vmatpush3.bf16.msra.mxu0 %v14745_v33  ;;  %v14791_v33 = vld [vmem:[%s15840_s28 + $0x290] sm:$0xff]  }
  0x39   : > { %13193 = vmatpush3.bf16.msra.mxu1 %v14746_v34  ;;  %13200 = vmatprep.subr.bf16.mxu0 %v14748_v36  ;;  %v14792_v34 = vld [vmem:[%s15840_s28 + $0x258] sm:$0xff]  }
  0x3a   : > { %13222 = vmatprep.subr.bf16.mxu1 %v14750_v42  ;;  %v14794_v36 = vld [vmem:[%s15840_s28 + $0x2d8] sm:$0xff]   ;;  %v14800_v42 = vld [vmem:[%s15840_s28 + $0x268] sm:$0xff]  }
  0x3b   : > { %9155 = vmatmul.mubr.bf16.vlgmr.msra.gmra.mrb[0].mxu0 %v2410_v47  ;;  %v404_v47 = vld [vmem:[%s15835_s24 + $0x8] sm:$0xff] }
  0x3c   : > { %13201 = vmatpush3.bf16.msra.mxu0 %v14749_v49  ;;  %9195 = vmatmul.mubr.bf16.vlgmr.msra.gmra.mrb[0].mxu1 %v2432_v53  ;;  %v2443_v49 = vrot.slane %v404_v47, %v15878_v43  ;;  %v2436_v50 = vcombine.high %v404_v47, %v404_v47  ;;  %v14854_v47 = vld [vmem:[%s15840_s28 + $0x410] sm:$0xff]  }
  0x3d   : > { %13202 = vmatprep.subr.bf16.mxu0 %v14752_v54  ;;  %13223 = vmatpush3.bf16.msra.mxu1 %v14751_v51  ;;  %v14805_v51 = vld [vmem:[%s15840_s28 + $0x230] sm:$0xff]  }
  0x3e   : > { %9234 = vmatprep.mubr.bf16.mxu0 %v2431_v52  ;;  %13224 = vmatprep.subr.bf16.mxu1 %v14754_v57  ;;  %v14806_v52 = vld [vmem:[%s15840_s28 + $0x2f0] sm:$0xff]   ;;  %v2451_v53 = vcombine.high %v2443_v49, %v2443_v49  ;;  %v15951_v54 = vrot.slane %v2436_v50, %v15878_v43  ;;  %v14857_v50 = vld [vmem:[%s15840_s28 + $0x458] sm:$0xff]  }
  0x3f   : > { %9274 = vmatprep.mubr.bf16.mxu1 %v2435_v58  ;;  %v14809_v58 = vld [vmem:[%s15840_s28 + $0x238] sm:$0xff]  }
  0x40   : > { %13203 = vmatpush3.bf16.msra.mxu0 %v14753_v56  ;;  %v14808_v56 = vld [vmem:[%s15840_s28 + $0x278] sm:$0xff]   ;;  %v2473_v57 = vrot.slane %v2451_v53, %v15878_v43 }
  0x41   : > { %13204 = vmatprep.subr.bf16.mxu0 %v14756_v60  ;;  %13225 = vmatpush3.bf16.msra.mxu1 %v14755_v59  ;;  %v2452_v59 = vcombine.high %v15951_v54, %v15951_v54  ;;  %v14810_v60 = vld [vmem:[%s15840_s28 + $0x2f8] sm:$0xff]  }
  0x42   : > { %13226 = vmatprep.subr.bf16.mxu1 %v14758_v62  ;;  %v14811_v62 = vld [vmem:[%s15840_s28 + $0x2b8] sm:$0xff]  }
  0x43   : > { %v14860_v53 = vld [vmem:[%s15840_s28 + $0x498] sm:$0xff]  }
  0x44   : > { %13205 = vmatpush3.bf16.msra.mxu0 %v14757_v61  ;;  %v2483_v61 = vcombine.high %v2473_v57, %v2473_v57 }
  0x45   : > { %13206 = vmatprep.subr.bf16.mxu0 %v14760_v0  ;;  %13227 = vmatpush3.bf16.msra.mxu1 %v14759_v63  ;;  %v2459_v63 = vrot.slane %v2443_v49, %v15878_v43  ;;  %v14812_v0 = vld [vmem:[%s15840_s28 + $0x340] sm:$0xff]   ;;  %v14856_v49 = vld [vmem:[%s15840_s28 + $0x490] sm:$0xff]  }
  0x46   : > { %13228 = vmatprep.subr.bf16.mxu1 %v14762_v2  ;;  %v2480_v2 = vrot.slane %v2452_v59, %v15878_v43  ;;  %v14866_v59 = vld [vmem:[%s15840_s28 + $0x428] sm:$0xff]  }
  0x48   : > { %13207 = vmatpush3.bf16.msra.mxu0 %v14761_v1  ;;  %v14813_v1 = vld [vmem:[%s15840_s28 + $0x300] sm:$0xff]  }
  0x49   : > { %13208 = vmatprep.subr.bf16.mxu0 %v14764_v4  ;;  %13229 = vmatpush3.bf16.msra.mxu1 %v14763_v3  ;;  %v14814_v3 = vld [vmem:[%s15840_s28 + $0x3c0] sm:$0xff]  }
  0x4a   : > { %13230 = vmatprep.subr.bf16.mxu1 %v14766_v6  ;;  %v14815_v4 = vld [vmem:[%s15840_s28 + $0x380] sm:$0xff]   ;;  %v14816_v6 = vld [vmem:[%s15840_s28 + $0x348] sm:$0xff]  }
  0x4c   : > { %13209 = vmatpush3.bf16.msra.mxu0 %v14765_v5  ;;  %v2481_v5 = vcombine.high %v2459_v63, %v2459_v63 }
  0x4d   : > { %13210 = vmatprep.subr.bf16.mxu0 %v14768_v8  ;;  %13231 = vmatpush3.bf16.msra.mxu1 %v14767_v7  ;;  %v14817_v7 = vld [vmem:[%s15840_s28 + $0x308] sm:$0xff]   ;;  %v2484_v8 = vcombine.high %v2480_v2, %v2480_v2 }
  0x4e   : > { %13232 = vmatprep.subr.bf16.mxu1 %v14770_v10  ;;  %v14819_v10 = vld [vmem:[%s15840_s28 + $0x388] sm:$0xff]  }
  0x50   : > { %13211 = vmatpush3.bf16.msra.mxu0 %v14769_v9  ;;  %v14818_v9 = vld [vmem:[%s15840_s28 + $0x3c8] sm:$0xff]  }
  0x51   : > { %13212 = vmatprep.subr.bf16.mxu0 %v14772_v12  ;;  %13233 = vmatpush3.bf16.msra.mxu1 %v14771_v11  ;;  %v14820_v11 = vld [vmem:[%s15840_s28 + $0x350] sm:$0xff]  }
  0x52   : > { %13234 = vmatprep.subr.bf16.mxu1 %v14774_v14  ;;  %v14821_v12 = vld [vmem:[%s15840_s28 + $0x310] sm:$0xff]  }
  0x53   : > { %v14823_v14 = vld [vmem:[%s15840_s28 + $0x390] sm:$0xff]  }
  0x54   : > { %13213 = vmatpush3.bf16.msra.mxu0 %v14773_v13  ;;  %v14822_v13 = vld [vmem:[%s15840_s28 + $0x3d0] sm:$0xff]  }
  0x55   : > { %13214 = vmatprep.subr.bf16.mxu0 %v14776_v16  ;;  %13235 = vmatpush3.bf16.msra.mxu1 %v14775_v15  ;;  %v14824_v15 = vld [vmem:[%s15840_s28 + $0x358] sm:$0xff]  }
  0x56   : > { %13236 = vmatprep.subr.bf16.mxu1 %v14778_v18  ;;  %v14825_v16 = vld [vmem:[%s15840_s28 + $0x318] sm:$0xff]  }
  0x57   : > { %v14827_v18 = vld [vmem:[%s15840_s28 + $0x398] sm:$0xff]  }
  0x58   : > { %13215 = vmatpush3.bf16.msra.mxu0 %v14777_v17  ;;  %v14826_v17 = vld [vmem:[%s15840_s28 + $0x3d8] sm:$0xff]  }
  0x59   : > { %13244 = vmatprep.subr.bf16.mxu0 %v14780_v21  ;;  %13237 = vmatpush3.bf16.msra.mxu1 %v14779_v19  ;;  %v14828_v19 = vld [vmem:[%s15840_s28 + $0x360] sm:$0xff]  }
  0x5a   : > { %13266 = vmatprep.subr.bf16.mxu1 %v14782_v23  ;;  %v14830_v21 = vld [vmem:[%s15840_s28 + $0x3e0] sm:$0xff]   ;;  %v14832_v23 = vld [vmem:[%s15840_s28 + $0x368] sm:$0xff]  }
  0x5b   : > { %9235 = vmatmul.mubr.bf16.vlgmr.msra.gmra.mrb[4].mxu0 %v2417_v20  ;;  %v14829_v20 = vld [vmem:[%s15840_s28 + $0x320] sm:$0xff]  }
  0x5c   : > { %13245 = vmatpush3.bf16.msra.mxu0 %v14781_v22  ;;  %9275 = vmatmul.mubr.bf16.vlgmr.msra.gmra.mrb[4].mxu1 %v2433_v25  ;;  %v14831_v22 = vld [vmem:[%s15840_s28 + $0x3a0] sm:$0xff]   ;;  %v14834_v25 = vld [vmem:[%s15840_s28 + $0x3e8] sm:$0xff]  }
  0x5d   : > { %13246 = vmatprep.subr.bf16.mxu0 %v14784_v26  ;;  %13267 = vmatpush3.bf16.msra.mxu1 %v14783_v24  ;;  %v14833_v24 = vld [vmem:[%s15840_s28 + $0x328] sm:$0xff]  }
  0x5e   : > { %13268 = vmatprep.subr.bf16.mxu1 %v14786_v28  ;;  %9314 = vmatprep.mubr.bf16.mxu0 %v2473_v57  ;;  %v14835_v26 = vld [vmem:[%s15840_s28 + $0x3a8] sm:$0xff]   ;;  %v14837_v28 = vld [vmem:[%s15840_s28 + $0x330] sm:$0xff]   ;;  %v14864_v57 = vld [vmem:[%s15840_s28 + $0x4a0] sm:$0xff]  }
  0x5f   : > { %9354 = vmatprep.mubr.bf16.mxu1 %v2483_v61  ;;  %v14868_v61 = vld [vmem:[%s15840_s28 + $0x4a8] sm:$0xff]  }
  0x60   : > { %13247 = vmatpush3.bf16.msra.mxu0 %v14785_v27  ;;  %v14836_v27 = vld [vmem:[%s15840_s28 + $0x370] sm:$0xff]  }
  0x61   : > { %13248 = vmatprep.subr.bf16.mxu0 %v14788_v30  ;;  %13269 = vmatpush3.bf16.msra.mxu1 %v14787_v29  ;;  %v14838_v29 = vld [vmem:[%s15840_s28 + $0x3f0] sm:$0xff]  }
  0x62   : > { %13270 = vmatprep.subr.bf16.mxu1 %v14790_v32  ;;  %v14839_v30 = vld [vmem:[%s15840_s28 + $0x3b0] sm:$0xff]   ;;  %v14841_v32 = vld [vmem:[%s15840_s28 + $0x338] sm:$0xff]  }
  0x64   : > { %13249 = vmatpush3.bf16.msra.mxu0 %v14789_v31  ;;  %v14840_v31 = vld [vmem:[%s15840_s28 + $0x378] sm:$0xff]  }
  0x65   : > { %13250 = vmatprep.subr.bf16.mxu0 %v14792_v34  ;;  %13271 = vmatpush3.bf16.msra.mxu1 %v14791_v33  ;;  %v14842_v33 = vld [vmem:[%s15840_s28 + $0x3f8] sm:$0xff]  }
  0x66   : > { %13272 = vmatprep.subr.bf16.mxu1 %v14794_v36  ;;  %v14844_v34 = vld [vmem:[%s15840_s28 + $0x3b8] sm:$0xff]   ;;  %v14845_v36 = vld [vmem:[%s15840_s28 + $0x440] sm:$0xff]  }
  0x68   : > { %13251 = vmatpush3.bf16.msra.mxu0 %v14793_v35  ;;  %v2466_v35 = vrot.slane %v15951_v54, %v15878_v43  ;;  %v14861_v54 = vld [vmem:[%s15840_s28 + $0x460] sm:$0xff]  }
  0x69   : > { %13252 = vmatprep.subr.bf16.mxu0 %v14796_v38  ;;  %13273 = vmatpush3.bf16.msra.mxu1 %v14795_v37  ;;  %v14846_v37 = vld [vmem:[%s15840_s28 + $0x400] sm:$0xff]  }
  0x6a   : > { %13274 = vmatprep.subr.bf16.mxu1 %v14798_v40  ;;  %v14847_v38 = vld [vmem:[%s15840_s28 + $0x4c0] sm:$0xff]   ;;  %v2482_v40 = vcombine.high %v2466_v35, %v2466_v35 }
  0x6c   : > { %13253 = vmatpush3.bf16.msra.mxu0 %v14797_v39  ;;  %v14848_v39 = vld [vmem:[%s15840_s28 + $0x480] sm:$0xff]  }
  0x6d   : > { %13254 = vmatprep.subr.bf16.mxu0 %v14800_v42  ;;  %13275 = vmatpush3.bf16.msra.mxu1 %v14799_v41  ;;  %v14849_v41 = vld [vmem:[%s15840_s28 + $0x448] sm:$0xff]  }
  0x6e   : > { %13276 = vmatprep.subr.bf16.mxu1 %v14802_v45  ;;  %v14850_v42 = vld [vmem:[%s15840_s28 + $0x408] sm:$0xff]  }
  0x6f   : > { %v14852_v45 = vld [vmem:[%s15840_s28 + $0x488] sm:$0xff]  }
  0x70   : > { %13255 = vmatpush3.bf16.msra.mxu0 %v14801_v44  ;;  %v14851_v44 = vld [vmem:[%s15840_s28 + $0x4c8] sm:$0xff]  }
  0x71   : > { %13256 = vmatprep.subr.bf16.mxu0 %v14804_v48  ;;  %13277 = vmatpush3.bf16.msra.mxu1 %v14803_v46  ;;  %v14853_v46 = vld [vmem:[%s15840_s28 + $0x450] sm:$0xff]  }
  0x72   : > { %13278 = vmatprep.subr.bf16.mxu1 %v14806_v52  ;;  %v14855_v48 = vld [vmem:[%s15840_s28 + $0x4d0] sm:$0xff]   ;;  %v14859_v52 = vld [vmem:[%s15840_s28 + $0x4d8] sm:$0xff]  }
  0x74   : > { %13257 = vmatpush3.bf16.msra.mxu0 %v14805_v51  ;;  %v14858_v51 = vld [vmem:[%s15840_s28 + $0x418] sm:$0xff]  }
  0x75   : > { %13258 = vmatprep.subr.bf16.mxu0 %v14808_v56  ;;  %13279 = vmatpush3.bf16.msra.mxu1 %v14807_v55  ;;  %v14862_v55 = vld [vmem:[%s15840_s28 + $0x420] sm:$0xff]  }
  0x76   : > { %13280 = vmatprep.subr.bf16.mxu1 %v14810_v60  ;;  %v14863_v56 = vld [vmem:[%s15840_s28 + $0x4e0] sm:$0xff]   ;;  %v14867_v60 = vld [vmem:[%s15840_s28 + $0x4e8] sm:$0xff]  }
  0x78   : > { %13259 = vmatpush3.bf16.msra.mxu0 %v14809_v58  ;;  %v14865_v58 = vld [vmem:[%s15840_s28 + $0x468] sm:$0xff]  }
  0x79   : > { %13288 = vmatprep.subr.bf16.mxu0 %v14812_v0  ;;  %13281 = vmatpush3.bf16.msra.mxu1 %v14811_v62  ;;  %v405_v62 = vld [vmem:[%s15835_s24 + $0x10] sm:$0xff] }
  0x7a   : > { %13310 = vmatprep.subr.bf16.mxu1 %v14814_v3  ;;  %v2492_v0 = vrot.slane %v405_v62, %v15878_v43  ;;  %v14871_v3 = vld [vmem:[%s15840_s28 + $0x4f0] sm:$0xff]  }
  0x7b   : > { %9315 = vmatmul.mubr.bf16.vlgmr.msra.gmra.mrb[8].mxu0 %v2459_v63  ;;  %v14869_v63 = vld [vmem:[%s15840_s28 + $0x470] sm:$0xff]  }
  0x7c   : > { %13289 = vmatpush3.bf16.msra.mxu0 %v14813_v1  ;;  %9394 = vmatprep.mubr.bf16.mxu0 %v2480_v2  ;;  %v2485_v1 = vcombine.high %v405_v62, %v405_v62  ;;  %v14870_v2 = vld [vmem:[%s15840_s28 + $0x430] sm:$0xff]  }
  0x7d   : > { %9355 = vmatmul.mubr.bf16.vlgmr.msra.gmra.mrb[8].mxu1 %v2481_v5  ;;  %13290 = vmatprep.subr.bf16.mxu0 %v14816_v6  ;;  %v14872_v6 = vld [vmem:[%s15840_s28 + $0x4b0] sm:$0xff]  }
  0x7e   : > { %13311 = vmatpush3.bf16.msra.mxu1 %v14815_v4  ;;  %9434 = vmatprep.mubr.bf16.mxu1 %v2484_v8  ;;  %v2500_v4 = vcombine.high %v2492_v0, %v2492_v0  ;;  %v16027_v5 = vrot.slane %v2485_v1, %v15878_v43  ;;  %v14919_v62 = vld [vmem:[%s15840_s28 + $0x610] sm:$0xff]   ;;  %v14922_v1 = vld [vmem:[%s15840_s28 + $0x658] sm:$0xff]  }
  0x7f   : > { %13312 = vmatprep.subr.bf16.mxu1 %v14818_v9  ;;  %v14874_v9 = vld [vmem:[%s15840_s28 + $0x438] sm:$0xff]  }
  0x80   : > { %13291 = vmatpush3.bf16.msra.mxu0 %v14817_v7  ;;  %v14873_v7 = vld [vmem:[%s15840_s28 + $0x478] sm:$0xff]   ;;  %v2522_v8 = vrot.slane %v2500_v4, %v15878_v43 }
  0x81   : > { %13292 = vmatprep.subr.bf16.mxu0 %v14820_v11  ;;  %v14875_v11 = vld [vmem:[%s15840_s28 + $0x4f8] sm:$0xff]  }
  0x82   : > { %13313 = vmatpush3.bf16.msra.mxu1 %v14819_v10  ;;  %v2501_v10 = vcombine.high %v16027_v5, %v16027_v5  ;;  %v14925_v4 = vld [vmem:[%s15840_s28 + $0x698] sm:$0xff]  }
  0x83   : > { %13314 = vmatprep.subr.bf16.mxu1 %v14822_v13  ;;  %v14876_v13 = vld [vmem:[%s15840_s28 + $0x4b8] sm:$0xff]  }
  0x84   : > { %13293 = vmatpush3.bf16.msra.mxu0 %v14821_v12  ;;  %v2532_v12 = vcombine.high %v2522_v8, %v2522_v8 }
  0x85   : > { %13294 = vmatprep.subr.bf16.mxu0 %v14824_v15  ;;  %v14877_v15 = vld [vmem:[%s15840_s28 + $0x540] sm:$0xff]  }
  0x86   : > { %13315 = vmatpush3.bf16.msra.mxu1 %v14823_v14  ;;  %v2508_v14 = vrot.slane %v2492_v0, %v15878_v43  ;;  %v14921_v0 = vld [vmem:[%s15840_s28 + $0x690] sm:$0xff]  }
  0x87   : > { %13316 = vmatprep.subr.bf16.mxu1 %v14826_v17  ;;  %v2529_v17 = vrot.slane %v2501_v10, %v15878_v43  ;;  %v14931_v10 = vld [vmem:[%s15840_s28 + $0x628] sm:$0xff]  }
  0x88   : > { %13295 = vmatpush3.bf16.msra.mxu0 %v14825_v16  ;;  %v14878_v16 = vld [vmem:[%s15840_s28 + $0x500] sm:$0xff]  }
  0x89   : > { %13296 = vmatprep.subr.bf16.mxu0 %v14828_v19  ;;  %v14880_v19 = vld [vmem:[%s15840_s28 + $0x580] sm:$0xff]  }
  0x8a   : > { %13317 = vmatpush3.bf16.msra.mxu1 %v14827_v18  ;;  %v14879_v18 = vld [vmem:[%s15840_s28 + $0x5c0] sm:$0xff]  }
  0x8b   : > { %13318 = vmatprep.subr.bf16.mxu1 %v14830_v21  ;;  %v14881_v21 = vld [vmem:[%s15840_s28 + $0x548] sm:$0xff]  }
  0x8c   : > { %13297 = vmatpush3.bf16.msra.mxu0 %v14829_v20  ;;  %v2530_v20 = vcombine.high %v2508_v14, %v2508_v14 }
  0x8d   : > { %13298 = vmatprep.subr.bf16.mxu0 %v14832_v23  ;;  %v2533_v23 = vcombine.high %v2529_v17, %v2529_v17 }
  0x8e   : > { %13319 = vmatpush3.bf16.msra.mxu1 %v14831_v22  ;;  %v14882_v22 = vld [vmem:[%s15840_s28 + $0x508] sm:$0xff]  }
  0x8f   : > { %13320 = vmatprep.subr.bf16.mxu1 %v14834_v25  ;;  %v14884_v25 = vld [vmem:[%s15840_s28 + $0x588] sm:$0xff]  }
  0x90   : > { %13299 = vmatpush3.bf16.msra.mxu0 %v14833_v24  ;;  %v14883_v24 = vld [vmem:[%s15840_s28 + $0x5c8] sm:$0xff]  }
  0x91   : > { %13300 = vmatprep.subr.bf16.mxu0 %v14836_v27  ;;  %v14886_v27 = vld [vmem:[%s15840_s28 + $0x510] sm:$0xff]  }
  0x92   : > { %13321 = vmatpush3.bf16.msra.mxu1 %v14835_v26  ;;  %v14885_v26 = vld [vmem:[%s15840_s28 + $0x550] sm:$0xff]  }
  0x93   : > { %13322 = vmatprep.subr.bf16.mxu1 %v14838_v29  ;;  %v14888_v29 = vld [vmem:[%s15840_s28 + $0x590] sm:$0xff]  }
  0x94   : > { %13301 = vmatpush3.bf16.msra.mxu0 %v14837_v28  ;;  %v14887_v28 = vld [vmem:[%s15840_s28 + $0x5d0] sm:$0xff]  }
  0x95   : > { %13302 = vmatprep.subr.bf16.mxu0 %v14840_v31  ;;  %v14890_v31 = vld [vmem:[%s15840_s28 + $0x518] sm:$0xff]  }
  0x96   : > { %13323 = vmatpush3.bf16.msra.mxu1 %v14839_v30  ;;  %v14889_v30 = vld [vmem:[%s15840_s28 + $0x558] sm:$0xff]  }
  0x97   : > { %13324 = vmatprep.subr.bf16.mxu1 %v14842_v33  ;;  %v14892_v33 = vld [vmem:[%s15840_s28 + $0x598] sm:$0xff]  }
  0x98   : > { %13303 = vmatpush3.bf16.msra.mxu0 %v14841_v32  ;;  %v14891_v32 = vld [vmem:[%s15840_s28 + $0x5d8] sm:$0xff]  }
  0x99   : > { %13332 = vmatprep.subr.bf16.mxu0 %v14845_v36  ;;  %v14895_v36 = vld [vmem:[%s15840_s28 + $0x5e0] sm:$0xff]  }
  0x9a   : > { %13325 = vmatpush3.bf16.msra.mxu1 %v14844_v34  ;;  %v14893_v34 = vld [vmem:[%s15840_s28 + $0x560] sm:$0xff]  }
  0x9b   : > { %9395 = vmatmul.mubr.bf16.vlgmr.msra.gmra.mrb[12].mxu0 %v2466_v35  ;;  %13354 = vmatprep.subr.bf16.mxu1 %v14847_v38  ;;  %v14894_v35 = vld [vmem:[%s15840_s28 + $0x520] sm:$0xff]   ;;  %v14897_v38 = vld [vmem:[%s15840_s28 + $0x568] sm:$0xff]  }
  0x9c   : > { %13333 = vmatpush3.bf16.msra.mxu0 %v14846_v37  ;;  %9474 = vmatprep.mubr.bf16.mxu0 %v2522_v8  ;;  %v14896_v37 = vld [vmem:[%s15840_s28 + $0x5a0] sm:$0xff]  }
  0x9d   : > { %9435 = vmatmul.mubr.bf16.vlgmr.msra.gmra.mrb[12].mxu1 %v2482_v40  ;;  %13334 = vmatprep.subr.bf16.mxu0 %v14849_v41  ;;  %v14899_v40 = vld [vmem:[%s15840_s28 + $0x5e8] sm:$0xff]   ;;  %v14929_v8 = vld [vmem:[%s15840_s28 + $0x6a0] sm:$0xff]  }
  0x9e   : > { %13355 = vmatpush3.bf16.msra.mxu1 %v14848_v39  ;;  %9514 = vmatprep.mubr.bf16.mxu1 %v2532_v12  ;;  %v14898_v39 = vld [vmem:[%s15840_s28 + $0x528] sm:$0xff]  }
  0x9f   : > { %13356 = vmatprep.subr.bf16.mxu1 %v14851_v44  ;;  %v14900_v41 = vld [vmem:[%s15840_s28 + $0x5a8] sm:$0xff]   ;;  %v14902_v44 = vld [vmem:[%s15840_s28 + $0x530] sm:$0xff]  }
  0xa0   : > { %13335 = vmatpush3.bf16.msra.mxu0 %v14850_v42  ;;  %v14901_v42 = vld [vmem:[%s15840_s28 + $0x570] sm:$0xff]   ;;  %v14933_v12 = vld [vmem:[%s15840_s28 + $0x6a8] sm:$0xff]  }
  0xa1   : > { %13336 = vmatprep.subr.bf16.mxu0 %v14853_v46  ;;  %v14904_v46 = vld [vmem:[%s15840_s28 + $0x5b0] sm:$0xff]  }
  0xa2   : > { %13357 = vmatpush3.bf16.msra.mxu1 %v14852_v45  ;;  %v14903_v45 = vld [vmem:[%s15840_s28 + $0x5f0] sm:$0xff]  }
  0xa3   : > { %13358 = vmatprep.subr.bf16.mxu1 %v14855_v48  ;;  %v14906_v48 = vld [vmem:[%s15840_s28 + $0x538] sm:$0xff]  }
  0xa4   : > { %13337 = vmatpush3.bf16.msra.mxu0 %v14854_v47  ;;  %v14905_v47 = vld [vmem:[%s15840_s28 + $0x578] sm:$0xff]  }
  0xa5   : > { %13338 = vmatprep.subr.bf16.mxu0 %v14857_v50  ;;  %v14909_v50 = vld [vmem:[%s15840_s28 + $0x5b8] sm:$0xff]  }
  0xa6   : > { %13359 = vmatpush3.bf16.msra.mxu1 %v14856_v49  ;;  %v14907_v49 = vld [vmem:[%s15840_s28 + $0x5f8] sm:$0xff]  }
  0xa7   : > { %13360 = vmatprep.subr.bf16.mxu1 %v14859_v52  ;;  %v14910_v52 = vld [vmem:[%s15840_s28 + $0x640] sm:$0xff]  }
  0xa8   : > { %13339 = vmatpush3.bf16.msra.mxu0 %v14858_v51  ;;  %v2515_v51 = vrot.slane %v16027_v5, %v15878_v43  ;;  %v14926_v5 = vld [vmem:[%s15840_s28 + $0x660] sm:$0xff]  }
  0xa9   : > { %13340 = vmatprep.subr.bf16.mxu0 %v14861_v54  ;;  %v14912_v54 = vld [vmem:[%s15840_s28 + $0x6c0] sm:$0xff]  }
  0xaa   : > { %13361 = vmatpush3.bf16.msra.mxu1 %v14860_v53  ;;  %v14911_v53 = vld [vmem:[%s15840_s28 + $0x600] sm:$0xff]  }
  0xab   : > { %13362 = vmatprep.subr.bf16.mxu1 %v14863_v56  ;;  %v2531_v56 = vcombine.high %v2515_v51, %v2515_v51 }
  0xac   : > { %13341 = vmatpush3.bf16.msra.mxu0 %v14862_v55  ;;  %v14913_v55 = vld [vmem:[%s15840_s28 + $0x680] sm:$0xff]  }
  0xad   : > { %13342 = vmatprep.subr.bf16.mxu0 %v14865_v58  ;;  %v14915_v58 = vld [vmem:[%s15840_s28 + $0x608] sm:$0xff]  }
  0xae   : > { %13363 = vmatpush3.bf16.msra.mxu1 %v14864_v57  ;;  %v14914_v57 = vld [vmem:[%s15840_s28 + $0x648] sm:$0xff]  }
  0xaf   : > { %13364 = vmatprep.subr.bf16.mxu1 %v14867_v60  ;;  %v14917_v60 = vld [vmem:[%s15840_s28 + $0x688] sm:$0xff]  }
  0xb0   : > { %13343 = vmatpush3.bf16.msra.mxu0 %v14866_v59  ;;  %v14916_v59 = vld [vmem:[%s15840_s28 + $0x6c8] sm:$0xff]  }
  0xb1   : > { %13344 = vmatprep.subr.bf16.mxu0 %v14869_v63  ;;  %v14920_v63 = vld [vmem:[%s15840_s28 + $0x6d0] sm:$0xff]  }
  0xb2   : > { %13365 = vmatpush3.bf16.msra.mxu1 %v14868_v61  ;;  %v14918_v61 = vld [vmem:[%s15840_s28 + $0x650] sm:$0xff]  }
  0xb3   : > { %13366 = vmatprep.subr.bf16.mxu1 %v14871_v3  ;;  %v14924_v3 = vld [vmem:[%s15840_s28 + $0x6d8] sm:$0xff]  }
  0xb4   : > { %13345 = vmatpush3.bf16.msra.mxu0 %v14870_v2  ;;  %v14923_v2 = vld [vmem:[%s15840_s28 + $0x618] sm:$0xff]  }
  0xb5   : > { %13346 = vmatprep.subr.bf16.mxu0 %v14873_v7  ;;  %v14928_v7 = vld [vmem:[%s15840_s28 + $0x6e0] sm:$0xff]  }
  0xb6   : > { %13367 = vmatpush3.bf16.msra.mxu1 %v14872_v6  ;;  %v14927_v6 = vld [vmem:[%s15840_s28 + $0x620] sm:$0xff]  }
  0xb7   : > { %13368 = vmatprep.subr.bf16.mxu1 %v14875_v11  ;;  %v14932_v11 = vld [vmem:[%s15840_s28 + $0x6e8] sm:$0xff]  }
  0xb8   : > { %13347 = vmatpush3.bf16.msra.mxu0 %v14874_v9  ;;  %v14930_v9 = vld [vmem:[%s15840_s28 + $0x668] sm:$0xff]  }
  0xb9   : > { %13376 = vmatprep.subr.bf16.mxu0 %v14877_v15  ;;  %v14935_v15 = vld [vmem:[%s15840_s28 + $0x630] sm:$0xff]  }
  0xba   : > { %13369 = vmatpush3.bf16.msra.mxu1 %v14876_v13  ;;  %v14934_v13 = vld [vmem:[%s15840_s28 + $0x670] sm:$0xff]  }
  0xbb   : > { %9475 = vmatmul.mubr.bf16.vlgmr.msra.gmra.mrb[16].mxu0 %v2508_v14  ;;  %13398 = vmatprep.subr.bf16.mxu1 %v14879_v18  ;;  %v406_v14 = vld [vmem:[%s15835_s24 + $0x18] sm:$0xff]  ;;  %v14936_v18 = vld [vmem:[%s15840_s28 + $0x6f0] sm:$0xff]  }
  0xbc   : > { %13377 = vmatpush3.bf16.msra.mxu0 %v14878_v16  ;;  %9554 = vmatprep.mubr.bf16.mxu0 %v2529_v17  ;;  %v2541_v16 = vrot.slane %v406_v14, %v15878_v43  ;;  %v2534_v17 = vcombine.high %v406_v14, %v406_v14  ;;  %v14975_v14 = vld [vmem:[%s15840_s28 + $0x840] sm:$0xff]  }
  0xbd   : > { %9515 = vmatmul.mubr.bf16.vlgmr.msra.gmra.mrb[16].mxu1 %v2530_v20  ;;  %13378 = vmatprep.subr.bf16.mxu0 %v14881_v21 }
  0xbe   : > { %13399 = vmatpush3.bf16.msra.mxu1 %v14880_v19  ;;  %9594 = vmatprep.mubr.bf16.mxu1 %v2533_v23  ;;  %v14937_v19 = vld [vmem:[%s15840_s28 + $0x6b0] sm:$0xff]   ;;  %v2549_v20 = vcombine.high %v2541_v16, %v2541_v16  ;;  %v16104_v21 = vrot.slane %v2534_v17, %v15878_v43  ;;  %v14939_v23 = vld [vmem:[%s15840_s28 + $0x638] sm:$0xff]   ;;  %v14978_v17 = vld [vmem:[%s15840_s28 + $0x880] sm:$0xff]  }
  0xbf   : > { %13400 = vmatprep.subr.bf16.mxu1 %v14883_v24 }
  0xc0   : > { %13379 = vmatpush3.bf16.msra.mxu0 %v14882_v22  ;;  %v14938_v22 = vld [vmem:[%s15840_s28 + $0x678] sm:$0xff]   ;;  %v2571_v24 = vrot.slane %v2549_v20, %v15878_v43  ;;  %v14980_v20 = vld [vmem:[%s15840_s28 + $0x808] sm:$0xff]  }
  0xc1   : > { %13380 = vmatprep.subr.bf16.mxu0 %v14885_v26  ;;  %v14940_v26 = vld [vmem:[%s15840_s28 + $0x6f8] sm:$0xff]  }
  0xc2   : > { %13401 = vmatpush3.bf16.msra.mxu1 %v14884_v25  ;;  %v2550_v25 = vcombine.high %v16104_v21, %v16104_v21 }
  0xc3   : > { %13402 = vmatprep.subr.bf16.mxu1 %v14887_v28  ;;  %v2581_v28 = vcombine.high %v2571_v24, %v2571_v24 }
  0xc4   : > { %13381 = vmatpush3.bf16.msra.mxu0 %v14886_v27  ;;  %v14941_v27 = vld [vmem:[%s15840_s28 + $0x6b8] sm:$0xff]  }
  0xc5   : > { %13382 = vmatprep.subr.bf16.mxu0 %v14889_v30  ;;  %v14942_v30 = vld [vmem:[%s15840_s28 + $0x740] sm:$0xff]  }
  0xc6   : > { %13403 = vmatpush3.bf16.msra.mxu1 %v14888_v29  ;;  %v2557_v29 = vrot.slane %v2541_v16, %v15878_v43  ;;  %v14977_v16 = vld [vmem:[%s15840_s28 + $0x8c0] sm:$0xff]  }
  0xc7   : > { %13404 = vmatprep.subr.bf16.mxu1 %v14891_v32  ;;  %v2578_v32 = vrot.slane %v2550_v25, %v15878_v43  ;;  %v14985_v25 = vld [vmem:[%s15840_s28 + $0x8d0] sm:$0xff]  }
  0xc8   : > { %13383 = vmatpush3.bf16.msra.mxu0 %v14890_v31  ;;  %v14943_v31 = vld [vmem:[%s15840_s28 + $0x700] sm:$0xff]  }
  0xc9   : > { %13384 = vmatprep.subr.bf16.mxu0 %v14893_v34  ;;  %v14945_v34 = vld [vmem:[%s15840_s28 + $0x780] sm:$0xff]  }
  0xca   : > { %13405 = vmatpush3.bf16.msra.mxu1 %v14892_v33  ;;  %v14944_v33 = vld [vmem:[%s15840_s28 + $0x7c0] sm:$0xff]  }
  0xcb   : > { %13406 = vmatprep.subr.bf16.mxu1 %v14895_v36  ;;  %v14946_v36 = vld [vmem:[%s15840_s28 + $0x748] sm:$0xff]  }
  0xcc   : > { %13385 = vmatpush3.bf16.msra.mxu0 %v14894_v35  ;;  %v2579_v35 = vcombine.high %v2557_v29, %v2557_v29 }
  0xcd   : > { %13386 = vmatprep.subr.bf16.mxu0 %v14897_v38  ;;  %v2582_v38 = vcombine.high %v2578_v32, %v2578_v32 }
  0xce   : > { %13407 = vmatpush3.bf16.msra.mxu1 %v14896_v37  ;;  %v14947_v37 = vld [vmem:[%s15840_s28 + $0x708] sm:$0xff]  }
  0xcf   : > { %13408 = vmatprep.subr.bf16.mxu1 %v14899_v40  ;;  %v14949_v40 = vld [vmem:[%s15840_s28 + $0x788] sm:$0xff]  }
  0xd0   : > { %13387 = vmatpush3.bf16.msra.mxu0 %v14898_v39  ;;  %v14948_v39 = vld [vmem:[%s15840_s28 + $0x7c8] sm:$0xff]  }
  0xd1   : > { %13388 = vmatprep.subr.bf16.mxu0 %v14901_v42  ;;  %v14951_v42 = vld [vmem:[%s15840_s28 + $0x710] sm:$0xff]  }
  0xd2   : > { %13409 = vmatpush3.bf16.msra.mxu1 %v14900_v41  ;;  %v14950_v41 = vld [vmem:[%s15840_s28 + $0x750] sm:$0xff]  }
  0xd3   : > { %13410 = vmatprep.subr.bf16.mxu1 %v14903_v45  ;;  %v14953_v45 = vld [vmem:[%s15840_s28 + $0x790] sm:$0xff]  }
  0xd4   : > { %13389 = vmatpush3.bf16.msra.mxu0 %v14902_v44  ;;  %v14952_v44 = vld [vmem:[%s15840_s28 + $0x7d0] sm:$0xff]  }
  0xd5   : > { %13390 = vmatprep.subr.bf16.mxu0 %v14905_v47  ;;  %v14955_v47 = vld [vmem:[%s15840_s28 + $0x718] sm:$0xff]  }
  0xd6   : > { %13411 = vmatpush3.bf16.msra.mxu1 %v14904_v46  ;;  %v14954_v46 = vld [vmem:[%s15840_s28 + $0x758] sm:$0xff]  }
  0xd7   : > { %13412 = vmatprep.subr.bf16.mxu1 %v14907_v49  ;;  %v14957_v49 = vld [vmem:[%s15840_s28 + $0x798] sm:$0xff]  }
  0xd8   : > { %13391 = vmatpush3.bf16.msra.mxu0 %v14906_v48  ;;  %v14956_v48 = vld [vmem:[%s15840_s28 + $0x7d8] sm:$0xff]  }
  0xd9   : > { %13420 = vmatprep.subr.bf16.mxu0 %v14910_v52  ;;  %v14960_v52 = vld [vmem:[%s15840_s28 + $0x7e0] sm:$0xff]  }
  0xda   : > { %13413 = vmatpush3.bf16.msra.mxu1 %v14909_v50  ;;  %v14958_v50 = vld [vmem:[%s15840_s28 + $0x760] sm:$0xff]  }
  0xdb   : > { %9555 = vmatmul.mubr.bf16.vlgmr.msra.gmra.mrb[20].mxu0 %v2515_v51  ;;  %13442 = vmatprep.subr.bf16.mxu1 %v14912_v54  ;;  %v14959_v51 = vld [vmem:[%s15840_s28 + $0x720] sm:$0xff]   ;;  %v14962_v54 = vld [vmem:[%s15840_s28 + $0x768] sm:$0xff]  }
  0xdc   : > { %13421 = vmatpush3.bf16.msra.mxu0 %v14911_v53  ;;  %9634 = vmatprep.mubr.bf16.mxu0 %v2571_v24  ;;  %v14961_v53 = vld [vmem:[%s15840_s28 + $0x7a0] sm:$0xff]   ;;  %v14984_v24 = vld [vmem:[%s15840_s28 + $0x810] sm:$0xff]  }
  0xdd   : > { %9595 = vmatmul.mubr.bf16.vlgmr.msra.gmra.mrb[20].mxu1 %v2531_v56  ;;  %13422 = vmatprep.subr.bf16.mxu0 %v14914_v57  ;;  %v14964_v56 = vld [vmem:[%s15840_s28 + $0x7e8] sm:$0xff]  }
  0xde   : > { %13443 = vmatpush3.bf16.msra.mxu1 %v14913_v55  ;;  %9674 = vmatprep.mubr.bf16.mxu1 %v2581_v28  ;;  %v14963_v55 = vld [vmem:[%s15840_s28 + $0x728] sm:$0xff]   ;;  %v14988_v28 = vld [vmem:[%s15840_s28 + $0x818] sm:$0xff]  }
  0xdf   : > { %13444 = vmatprep.subr.bf16.mxu1 %v14916_v59  ;;  %v14965_v57 = vld [vmem:[%s15840_s28 + $0x7a8] sm:$0xff]  }
  0xe0   : > { %13423 = vmatpush3.bf16.msra.mxu0 %v14915_v58  ;;  %v14966_v58 = vld [vmem:[%s15840_s28 + $0x770] sm:$0xff]  }
  0xe1   : > { %13424 = vmatprep.subr.bf16.mxu0 %v14918_v61 }
  0xe2   : > { %13445 = vmatpush3.bf16.msra.mxu1 %v14917_v60  ;;  %v14967_v60 = vld [vmem:[%s15840_s28 + $0x730] sm:$0xff]  }
  0xe3   : > { %13446 = vmatprep.subr.bf16.mxu1 %v14920_v63 }
  0xe4   : > { %13425 = vmatpush3.bf16.msra.mxu0 %v14919_v62  ;;  %v14968_v62 = vld [vmem:[%s15840_s28 + $0x7f0] sm:$0xff]  }
  0xe5   : > { %13426 = vmatprep.subr.bf16.mxu0 %v14922_v1 }
  0xe6   : > { %13447 = vmatpush3.bf16.msra.mxu1 %v14921_v0 }
  0xe7   : > { %13448 = vmatprep.subr.bf16.mxu1 %v14924_v3  ;;  %v14970_v3 = vld [vmem:[%s15840_s28 + $0x778] sm:$0xff]  }
  0xe8   : > { %13427 = vmatpush3.bf16.msra.mxu0 %v14923_v2  ;;  %v14969_v2 = vld [vmem:[%s15840_s28 + $0x7b0] sm:$0xff]  }
  0xe9   : > { %13428 = vmatprep.subr.bf16.mxu0 %v14926_v5 }
  0xea   : > { %13449 = vmatpush3.bf16.msra.mxu1 %v14925_v4 }
  0xeb   : > { %13450 = vmatprep.subr.bf16.mxu1 %v14928_v7  ;;  %v14971_v7 = vld [vmem:[%s15840_s28 + $0x738] sm:$0xff]  }
  0xec   : > { %13429 = vmatpush3.bf16.msra.mxu0 %v14927_v6 }
  0xed   : > { %13430 = vmatprep.subr.bf16.mxu0 %v14930_v9  ;;  %v14972_v9 = vld [vmem:[%s15840_s28 + $0x7f8] sm:$0xff]  }
  0xee   : > { %13451 = vmatpush3.bf16.msra.mxu1 %v14929_v8 }
  0xef   : > { %13452 = vmatprep.subr.bf16.mxu1 %v14932_v11 }
  0xf0   : > { %13431 = vmatpush3.bf16.msra.mxu0 %v14931_v10 }
  0xf1   : > { %13432 = vmatprep.subr.bf16.mxu0 %v14934_v13  ;;  %v2564_v13 = vrot.slane %v16104_v21, %v15878_v43  ;;  %v14981_v21 = vld [vmem:[%s15840_s28 + $0x8c8] sm:$0xff]  }
  0xf2   : > { %13453 = vmatpush3.bf16.msra.mxu1 %v14933_v12  ;;  %v14974_v12 = vld [vmem:[%s15840_s28 + $0x7b8] sm:$0xff]  }
  0xf3   : > { %13454 = vmatprep.subr.bf16.mxu1 %v14936_v18  ;;  %v2580_v18 = vcombine.high %v2564_v13, %v2564_v13 }
  0xf4   : > { %13433 = vmatpush3.bf16.msra.mxu0 %v14935_v15  ;;  %v14976_v15 = vld [vmem:[%s15840_s28 + $0x800] sm:$0xff]  }
  0xf5   : > { %13434 = vmatprep.subr.bf16.mxu0 %v14938_v22  ;;  %v14982_v22 = vld [vmem:[%s15840_s28 + $0x888] sm:$0xff]  }
  0xf6   : > { %13455 = vmatpush3.bf16.msra.mxu1 %v14937_v19  ;;  %v14979_v19 = vld [vmem:[%s15840_s28 + $0x848] sm:$0xff]  }
  0xf7   : > { %13456 = vmatprep.subr.bf16.mxu1 %v14940_v26  ;;  %v14986_v26 = vld [vmem:[%s15840_s28 + $0x890] sm:$0xff]  }
  0xf8   : > { %13435 = vmatpush3.bf16.msra.mxu0 %v14939_v23  ;;  %v14983_v23 = vld [vmem:[%s15840_s28 + $0x850] sm:$0xff]  }
  0xf9   : > { %13464 = vmatprep.subr.bf16.mxu0 %v14942_v30  ;;  %v14990_v30 = vld [vmem:[%s15840_s28 + $0x898] sm:$0xff]  }
  0xfa   : > { %13457 = vmatpush3.bf16.msra.mxu1 %v14941_v27  ;;  %v14987_v27 = vld [vmem:[%s15840_s28 + $0x858] sm:$0xff]  }
  0xfb   : > { %9635 = vmatmul.mubr.bf16.vlgmr.msra.gmra.mrb[24].mxu0 %v2557_v29  ;;  %13486 = vmatprep.subr.bf16.mxu1 %v14944_v33  ;;  %v14989_v29 = vld [vmem:[%s15840_s28 + $0x8d8] sm:$0xff]   ;;  %v14993_v33 = vld [vmem:[%s15840_s28 + $0x8e0] sm:$0xff]  }
  0xfc   : > { %13465 = vmatpush3.bf16.msra.mxu0 %v14943_v31  ;;  %9714 = vmatprep.mubr.bf16.mxu0 %v2578_v32  ;;  %v14991_v31 = vld [vmem:[%s15840_s28 + $0x860] sm:$0xff]  }
  0xfd   : > { %9675 = vmatmul.mubr.bf16.vlgmr.msra.gmra.mrb[24].mxu1 %v2579_v35  ;;  %13466 = vmatprep.subr.bf16.mxu0 %v14946_v36  ;;  %v14992_v32 = vld [vmem:[%s15840_s28 + $0x820] sm:$0xff]   ;;  %v14995_v35 = vld [vmem:[%s15840_s28 + $0x868] sm:$0xff]  }
  0xfe   : > { %13487 = vmatpush3.bf16.msra.mxu1 %v14945_v34  ;;  %9754 = vmatprep.mubr.bf16.mxu1 %v2582_v38  ;;  %v14994_v34 = vld [vmem:[%s15840_s28 + $0x8a0] sm:$0xff]   ;;  %v14996_v36 = vld [vmem:[%s15840_s28 + $0x828] sm:$0xff]  }
  0xff   : > { %13488 = vmatprep.subr.bf16.mxu1 %v14948_v39  ;;  %v14998_v38 = vld [vmem:[%s15840_s28 + $0x8a8] sm:$0xff]   ;;  %v14999_v39 = vld [vmem:[%s15840_s28 + $0x870] sm:$0xff]  }
 0x100   : > { %13467 = vmatpush3.bf16.msra.mxu0 %v14947_v37  ;;  %v14997_v37 = vld [vmem:[%s15840_s28 + $0x8e8] sm:$0xff]  }
 0x101   : > { %13468 = vmatprep.subr.bf16.mxu0 %v14950_v41 }
 0x102   : > { %13489 = vmatpush3.bf16.msra.mxu1 %v14949_v40  ;;  %v407_v40 = vld [vmem:[%s15835_s24 + $0x20] sm:$0xff] }
 0x103   : > { %13490 = vmatprep.subr.bf16.mxu1 %v14952_v44  ;;  %v2590_v44 = vrot.slane %v407_v40, %v15878_v43 }
 0x104   : > { %13469 = vmatpush3.bf16.msra.mxu0 %v14951_v42  ;;  %v15000_v42 = vld [vmem:[%s15840_s28 + $0x830] sm:$0xff]  }
 0x105   : > { %13470 = vmatprep.subr.bf16.mxu0 %v14954_v46 }
 0x106   : > { %13491 = vmatpush3.bf16.msra.mxu1 %v14953_v45  ;;  %v2583_v45 = vcombine.high %v407_v40, %v407_v40  ;;  %v15034_v40 = vld [vmem:[%s15840_s28 + $0x9b0] sm:$0xff]  }
 0x107   : > { %13492 = vmatprep.subr.bf16.mxu1 %v14956_v48 }
 0x108   : > { %13471 = vmatpush3.bf16.msra.mxu0 %v14955_v47  ;;  %v15001_v47 = vld [vmem:[%s15840_s28 + $0x8f0] sm:$0xff]  }
 0x109   : > { %13472 = vmatprep.subr.bf16.mxu0 %v14958_v50 }
 0x10a   : > { %13493 = vmatpush3.bf16.msra.mxu1 %v14957_v49 }
 0x10b   : > { %13494 = vmatprep.subr.bf16.mxu1 %v14960_v52  ;;  %v16181_v52 = vrot.slane %v2583_v45, %v15878_v43 }
 0x10c   : > { %13473 = vmatpush3.bf16.msra.mxu0 %v14959_v51  ;;  %v2598_v51 = vcombine.high %v2590_v44, %v2590_v44 }
 0x10d   : > { %13474 = vmatprep.subr.bf16.mxu0 %v14962_v54 }
 0x10e   : > { %v13172_v59 = vpop.f32.mrb[0].mxu0  ;;  %13495 = vmatpush3.bf16.msra.mxu1 %v14961_v53 }
 0x10f   : > { %v13173_v61 = vpop.f32.mrb[1].mxu0  ;;  %13496 = vmatprep.subr.bf16.mxu1 %v14964_v56  ;;  %v13194_v63 = vpop.f32.mrb[0].mxu1  ;;  %v15003_v56 = vld [vmem:[%s15840_s28 + $0x878] sm:$0xff]  }
 0x110   : > { %v13174_v0 = vadd.f32 %v13173_v61, %v13172_v59  ;;  %v13175_v1 = vpop.f32.mrb[2].mxu0  ;;  %13475 = vmatpush3.bf16.msra.mxu0 %v14963_v55  ;;  %v13195_v4 = vpop.f32.mrb[1].mxu1  ;;  %v15002_v55 = vld [vmem:[%s15840_s28 + $0x8b0] sm:$0xff]   ;;  %v15004_v59 = vld [vmem:[%s15840_s28 + $0x838] sm:$0xff]  }
 0x111   : > { %v13176_v5 = vpop.f32.mrb[3].mxu0  ;;  %13476 = vmatprep.subr.bf16.mxu0 %v14966_v58  ;;  %v13196_v6 = vadd.f32 %v13195_v4, %v13194_v63  ;;  %v13197_v8 = vpop.f32.mrb[2].mxu1  ;;  %v15005_v61 = vld [vmem:[%s15840_s28 + $0x8f8] sm:$0xff]   ;;  %v2599_v63 = vcombine.high %v16181_v52, %v16181_v52  ;;  %v2606_v4 = vrot.slane %v2590_v44, %v15878_v43 }
 0x112   : > { %13497 = vmatpush3.bf16.msra.mxu1 %v14965_v57  ;;  %v13198_v10 = vpop.f32.mrb[3].mxu1  ;;  %v15006_v1 = vld [vmem:[%s15840_s28 + $0x8b8] sm:$0xff]   ;;  %v15007_v5 = vld [vmem:[%s15840_s28 + $0x940] sm:$0xff]  }
 0x113   : > { %13498 = vmatprep.subr.bf16.mxu1 %v14968_v62  ;;  %v16146_v11 = vadd.f32 %v13196_v6, %v13174_v0  ;;  %v15008_v6 = vld [vmem:[%s15840_s28 + $0x900] sm:$0xff]   ;;  %v2628_v10 = vcombine.high %v2606_v4, %v2606_v4 }
 0x114   : > { %13477 = vmatpush3.bf16.msra.mxu0 %v14967_v60  ;;  %v2620_v60 = vrot.slane %v2598_v51, %v15878_v43  ;;  %v15009_v8 = vld [vmem:[%s15840_s28 + $0x9c0] sm:$0xff]  }
 0x115   : > { %13478 = vmatprep.subr.bf16.mxu0 %v14970_v3 }
 0x116   : > { %13499 = vmatpush3.bf16.msra.mxu1 %v14969_v2  ;;  %v2630_v2 = vcombine.high %v2620_v60, %v2620_v60 }
 0x117   : > { %13500 = vmatprep.subr.bf16.mxu1 %v14972_v9  ;;  %v15010_v9 = vld [vmem:[%s15840_s28 + $0x980] sm:$0xff]  }
 0x118   : > { %13479 = vmatpush3.bf16.msra.mxu0 %v14971_v7  ;;  %v2627_v7 = vrot.slane %v2599_v63, %v15878_v43  ;;  %v15048_v63 = vld [vmem:[%s15840_s28 + $0xa50] sm:$0xff]  }
 0x119   : > { %13508 = vmatprep.subr.bf16.mxu0 %v14975_v14  ;;  %v15013_v14 = vld [vmem:[%s15840_s28 + $0x9c8] sm:$0xff]  }
 0x11a   : > { %13501 = vmatpush3.bf16.msra.mxu1 %v14974_v12  ;;  %v15012_v12 = vld [vmem:[%s15840_s28 + $0x908] sm:$0xff]  }
 0x11b   : > { %9715 = vmatmul.mubr.bf16.vlgmr.msra.gmra.mrb[28].mxu0 %v2564_v13  ;;  %13530 = vmatprep.subr.bf16.mxu1 %v14977_v16  ;;  %v2631_v13 = vcombine.high %v2627_v7, %v2627_v7  ;;  %v15015_v16 = vld [vmem:[%s15840_s28 + $0x950] sm:$0xff]  }
 0x11c   : > { %13509 = vmatpush3.bf16.msra.mxu0 %v14976_v15  ;;  %9794 = vmatprep.mubr.bf16.mxu0 %v2620_v60  ;;  %v15014_v15 = vld [vmem:[%s15840_s28 + $0x988] sm:$0xff]  }
 0x11d   : > { %9755 = vmatmul.mubr.bf16.vlgmr.msra.gmra.mrb[28].mxu1 %v2580_v18  ;;  %13510 = vmatprep.subr.bf16.mxu0 %v14979_v19  ;;  %v15017_v18 = vld [vmem:[%s15840_s28 + $0x9d0] sm:$0xff]   ;;  %v15044_v60 = vld [vmem:[%s15840_s28 + $0xa48] sm:$0xff]  }
 0x11e   : > { %13531 = vmatpush3.bf16.msra.mxu1 %v14978_v17  ;;  %9834 = vmatprep.mubr.bf16.mxu1 %v2630_v2  ;;  %v15016_v17 = vld [vmem:[%s15840_s28 + $0x910] sm:$0xff]  }
 0x11f   : > { %13532 = vmatprep.subr.bf16.mxu1 %v14981_v21  ;;  %v15018_v19 = vld [vmem:[%s15840_s28 + $0x990] sm:$0xff]   ;;  %v15020_v21 = vld [vmem:[%s15840_s28 + $0x918] sm:$0xff]  }
 0x120   : > { %13511 = vmatpush3.bf16.msra.mxu0 %v14980_v20  ;;  %v15019_v20 = vld [vmem:[%s15840_s28 + $0x958] sm:$0xff]   ;;  %v15051_v2 = vld [vmem:[%s15840_s28 + $0xa90] sm:$0xff]  }
 0x121   : > { %13512 = vmatprep.subr.bf16.mxu0 %v14983_v23  ;;  %v15022_v23 = vld [vmem:[%s15840_s28 + $0x998] sm:$0xff]  }
 0x122   : > { %13533 = vmatpush3.bf16.msra.mxu1 %v14982_v22  ;;  %v15021_v22 = vld [vmem:[%s15840_s28 + $0x9d8] sm:$0xff]  }
 0x123   : > { %13534 = vmatprep.subr.bf16.mxu1 %v14985_v25  ;;  %v15024_v25 = vld [vmem:[%s15840_s28 + $0x920] sm:$0xff]  }
 0x124   : > { %13513 = vmatpush3.bf16.msra.mxu0 %v14984_v24  ;;  %v15023_v24 = vld [vmem:[%s15840_s28 + $0x960] sm:$0xff]  }
 0x125   : > { %13514 = vmatprep.subr.bf16.mxu0 %v14987_v27  ;;  %v15026_v27 = vld [vmem:[%s15840_s28 + $0x9a0] sm:$0xff]  }
 0x126   : > { %13535 = vmatpush3.bf16.msra.mxu1 %v14986_v26  ;;  %v15025_v26 = vld [vmem:[%s15840_s28 + $0x9e0] sm:$0xff]  }
 0x127   : > { %13536 = vmatprep.subr.bf16.mxu1 %v14989_v29  ;;  %v15028_v29 = vld [vmem:[%s15840_s28 + $0x928] sm:$0xff]  }
 0x128   : > { %13515 = vmatpush3.bf16.msra.mxu0 %v14988_v28  ;;  %v15027_v28 = vld [vmem:[%s15840_s28 + $0x968] sm:$0xff]  }
 0x129   : > { %13516 = vmatprep.subr.bf16.mxu0 %v14991_v31  ;;  %v15030_v31 = vld [vmem:[%s15840_s28 + $0x9a8] sm:$0xff]  }
 0x12a   : > { %13537 = vmatpush3.bf16.msra.mxu1 %v14990_v30  ;;  %v15029_v30 = vld [vmem:[%s15840_s28 + $0x9e8] sm:$0xff]  }
 0x12b   : > { %13538 = vmatprep.subr.bf16.mxu1 %v14993_v33 }
 0x12c   : > { %13517 = vmatpush3.bf16.msra.mxu0 %v14992_v32  ;;  %v15031_v32 = vld [vmem:[%s15840_s28 + $0x970] sm:$0xff]  }
 0x12d   : > { %13518 = vmatprep.subr.bf16.mxu0 %v14995_v35 }
 0x12e   : > { %v13216_v41 = vpop.f32.mrb[4].mxu0  ;;  %13539 = vmatpush3.bf16.msra.mxu1 %v14994_v34  ;;  %v15032_v34 = vld [vmem:[%s15840_s28 + $0x930] sm:$0xff]  }
 0x12f   : > { %v13217_v46 = vpop.f32.mrb[5].mxu0  ;;  %13540 = vmatprep.subr.bf16.mxu1 %v14997_v37  ;;  %v13238_v50 = vpop.f32.mrb[4].mxu1 }
 0x130   : > { %v13218_v48 = vadd.f32 %v13217_v46, %v13216_v41  ;;  %v13219_v49 = vpop.f32.mrb[6].mxu0  ;;  %13519 = vmatpush3.bf16.msra.mxu0 %v14996_v36  ;;  %v13239_v54 = vpop.f32.mrb[5].mxu1  ;;  %v15033_v36 = vld [vmem:[%s15840_s28 + $0x9f0] sm:$0xff]   ;;  %v15035_v41 = vld [vmem:[%s15840_s28 + $0x978] sm:$0xff]  }
 0x131   : > { %v13220_v53 = vpop.f32.mrb[7].mxu0  ;;  %13520 = vmatprep.subr.bf16.mxu0 %v14999_v39  ;;  %v13240_v58 = vadd.f32 %v13239_v54, %v13238_v50  ;;  %v13241_v62 = vpop.f32.mrb[6].mxu1  ;;  %v15037_v49 = vld [vmem:[%s15840_s28 + $0x9f8] sm:$0xff]   ;;  %v2613_v54 = vrot.slane %v16181_v52, %v15878_v43  ;;  %v15046_v52 = vld [vmem:[%s15840_s28 + $0xac8] sm:$0xff]  }
 0x132   : > { %v9237_v57 = vadd.f32 %v13218_v48, %v16146_v11  ;;  %13541 = vmatpush3.bf16.msra.mxu1 %v14998_v38  ;;  %v13242_v3 = vpop.f32.mrb[7].mxu1  ;;  %v15011_v11 = vld [vmem:[%s15840_s28 + $0x948] sm:$0xff]   ;;  %v15039_v53 = vld [vmem:[%s15840_s28 + $0x9b8] sm:$0xff]  }
 0x133   : > { %13542 = vmatprep.subr.bf16.mxu1 %v15001_v47  ;;  %v15036_v47 = vld [vmem:[%s15840_s28 + $0x938] sm:$0xff]   ;;  %v15047_v62 = vld [vmem:[%s15840_s28 + $0xa88] sm:$0xff]  }
 0x134   : > { %v16191_v0 = vadd.f32 %v13240_v58, %v9237_v57  ;;  %13521 = vmatpush3.bf16.msra.mxu0 %v15000_v42  ;;  %v15042_v57 = vld [vmem:[%s15840_s28 + $0xac0] sm:$0xff]   ;;  %v15052_v3 = vld [vmem:[%s15840_s28 + $0xa58] sm:$0xff]  }
 0x135   : > { %13522 = vmatprep.subr.bf16.mxu0 %v15003_v56  ;;  %v15041_v56 = vld [vmem:[%s15840_s28 + $0xa00] sm:$0xff]  }
 0x136   : > { %13543 = vmatpush3.bf16.msra.mxu1 %v15002_v55  ;;  %v15040_v55 = vld [vmem:[%s15840_s28 + $0xa40] sm:$0xff]  }
 0x137   : > { %13544 = vmatprep.subr.bf16.mxu1 %v15005_v61  ;;  %v15043_v58 = vld [vmem:[%s15840_s28 + $0xa80] sm:$0xff]   ;;  %v15045_v61 = vld [vmem:[%s15840_s28 + $0xa08] sm:$0xff]  }
 0x138   : > { %13523 = vmatpush3.bf16.msra.mxu0 %v15004_v59  ;;  %v2629_v59 = vcombine.high %v2613_v54, %v2613_v54 }
 0x139   : > { %13552 = vmatprep.subr.bf16.mxu0 %v15007_v5  ;;  %v15054_v5 = vld [vmem:[%s15840_s28 + $0xad8] sm:$0xff]  }
 0x13a   : > { %13545 = vmatpush3.bf16.msra.mxu1 %v15006_v1  ;;  %v15050_v1 = vld [vmem:[%s15840_s28 + $0xad0] sm:$0xff]  }
 0x13b   : > { %9795 = vmatmul.mubr.bf16.vlgmr.msra.gmra.mrb[32].mxu0 %v2606_v4  ;;  %13574 = vmatprep.subr.bf16.mxu1 %v15009_v8  ;;  %v15053_v4 = vld [vmem:[%s15840_s28 + $0xa18] sm:$0xff]   ;;  %v15057_v8 = vld [vmem:[%s15840_s28 + $0xa20] sm:$0xff]  }
 0x13c   : > { %13553 = vmatpush3.bf16.msra.mxu0 %v15008_v6  ;;  %9874 = vmatprep.mubr.bf16.mxu0 %v2627_v7  ;;  %v15055_v6 = vld [vmem:[%s15840_s28 + $0xa98] sm:$0xff]   ;;  %v15056_v7 = vld [vmem:[%s15840_s28 + $0xa60] sm:$0xff]  }
 0x13d   : > { %9835 = vmatmul.mubr.bf16.vlgmr.msra.gmra.mrb[32].mxu1 %v2628_v10  ;;  %13554 = vmatprep.subr.bf16.mxu0 %v15011_v11  ;;  %v15059_v10 = vld [vmem:[%s15840_s28 + $0xaa0] sm:$0xff]   ;;  %v15060_v11 = vld [vmem:[%s15840_s28 + $0xa68] sm:$0xff]  }
 0x13e   : > { %13575 = vmatpush3.bf16.msra.mxu1 %v15010_v9  ;;  %9914 = vmatprep.mubr.bf16.mxu1 %v2631_v13  ;;  %v15058_v9 = vld [vmem:[%s15840_s28 + $0xae0] sm:$0xff]   ;;  %v15062_v13 = vld [vmem:[%s15840_s28 + $0xae8] sm:$0xff]  }
 0x13f   : > { %13576 = vmatprep.subr.bf16.mxu1 %v15013_v14  ;;  %v15063_v14 = vld [vmem:[%s15840_s28 + $0xaa8] sm:$0xff]  }
 0x140   : > { %13555 = vmatpush3.bf16.msra.mxu0 %v15012_v12  ;;  %v15061_v12 = vld [vmem:[%s15840_s28 + $0xa28] sm:$0xff]  }
 0x141   : > { %13556 = vmatprep.subr.bf16.mxu0 %v15015_v16 }
 0x142   : > { %13577 = vmatpush3.bf16.msra.mxu1 %v15014_v15  ;;  %v15064_v15 = vld [vmem:[%s15840_s28 + $0xa70] sm:$0xff]  }
 0x143   : > { %13578 = vmatprep.subr.bf16.mxu1 %v15017_v18  ;;  %v408_v18 = vld [vmem:[%s15835_s24 + $0x28] sm:$0xff] }
 0x144   : > { %13557 = vmatpush3.bf16.msra.mxu0 %v15016_v17  ;;  %v15065_v17 = vld [vmem:[%s15840_s28 + $0xa30] sm:$0xff]  }
 0x145   : > { %13558 = vmatprep.subr.bf16.mxu0 %v15019_v20  ;;  %v15066_v20 = vld [vmem:[%s15840_s28 + $0xaf0] sm:$0xff]  }
 0x146   : > { %13579 = vmatpush3.bf16.msra.mxu1 %v15018_v19 }
 0x147   : > { %13580 = vmatprep.subr.bf16.mxu1 %v15021_v22  ;;  %v2632_v22 = vcombine.high %v408_v18, %v408_v18 }
 0x148   : > { %13559 = vmatpush3.bf16.msra.mxu0 %v15020_v21  ;;  %v2639_v21 = vrot.slane %v408_v18, %v15878_v43 }
 0x149   : > { %13560 = vmatprep.subr.bf16.mxu0 %v15023_v24 }
 0x14a   : > { %13581 = vmatpush3.bf16.msra.mxu1 %v15022_v23 }
 0x14b   : > { %13582 = vmatprep.subr.bf16.mxu1 %v15025_v26 }
 0x14c   : > { %13561 = vmatpush3.bf16.msra.mxu0 %v15024_v25 }
 0x14d   : > { %13562 = vmatprep.subr.bf16.mxu0 %v15027_v28  ;;  %v15067_v28 = vld [vmem:[%s15840_s28 + $0xab0] sm:$0xff]  }
 0x14e   : > { %v13260_v33 = vpop.f32.mrb[8].mxu0  ;;  %13583 = vmatpush3.bf16.msra.mxu1 %v15026_v27 }
 0x14f   : > { %v13261_v35 = vpop.f32.mrb[9].mxu0  ;;  %13584 = vmatprep.subr.bf16.mxu1 %v15029_v30  ;;  %v2647_v30 = vcombine.high %v2639_v21, %v2639_v21 }
 0x150   : > { %v13262_v37 = vadd.f32 %v13261_v35, %v13260_v33  ;;  %v13263_v38 = vpop.f32.mrb[10].mxu0  ;;  %v13282_v39 = vpop.f32.mrb[8].mxu1  ;;  %13563 = vmatpush3.bf16.msra.mxu0 %v15028_v29  ;;  %v15068_v29 = vld [vmem:[%s15840_s28 + $0xa78] sm:$0xff]  }
 0x151   : > { %v13264_v42 = vpop.f32.mrb[11].mxu0  ;;  %v13283_v44 = vpop.f32.mrb[9].mxu1  ;;  %13564 = vmatprep.subr.bf16.mxu0 %v15031_v32  ;;  %v15070_v35 = vld [vmem:[%s15840_s28 + $0xaf8] sm:$0xff]  }
 0x152   : > { %v9317_v45 = vadd.f32 %v13262_v37, %v16191_v0  ;;  %v13284_v46 = vadd.f32 %v13283_v44, %v13282_v39  ;;  %13585 = vmatpush3.bf16.msra.mxu1 %v15030_v31  ;;  %v13285_v48 = vpop.f32.mrb[10].mxu1  ;;  %v15049_v0 = vld [vmem:[%s15840_s28 + $0xa10] sm:$0xff]   ;;  %v16265_v31 = vrot.slane %v2632_v22, %v15878_v43  ;;  %v2655_v42 = vrot.slane %v2639_v21, %v15878_v43  ;;  %v15072_v44 = vld [vmem:[%s15840_s28 + $0xb40] sm:$0xff]   ;;  %v15101_v22 = vld [vmem:[%s15840_s28 + $0xb38] sm:$0xff]  }
 0x153   : > { %13586 = vmatprep.subr.bf16.mxu1 %v15033_v36  ;;  %v13286_v50 = vpop.f32.mrb[11].mxu1  ;;  %v2669_v36 = vrot.slane %v2647_v30, %v15878_v43  ;;  %v15074_v48 = vld [vmem:[%s15840_s28 + $0xbc0] sm:$0xff]  }
 0x154   : > { %v16228_v51 = vadd.f32 %v13284_v46, %v9317_v45  ;;  %13565 = vmatpush3.bf16.msra.mxu0 %v15032_v34  ;;  %v15069_v34 = vld [vmem:[%s15840_s28 + $0xa38] sm:$0xff]   ;;  %v2648_v38 = vcombine.high %v16265_v31, %v16265_v31  ;;  %v15073_v46 = vld [vmem:[%s15840_s28 + $0xb00] sm:$0xff]   ;;  %v2677_v50 = vcombine.high %v2655_v42, %v2655_v42 }
 0x155   : > { %13566 = vmatprep.subr.bf16.mxu0 %v15035_v41  ;;  %v2679_v45 = vcombine.high %v2669_v36, %v2669_v36  ;;  %v15106_v30 = vld [vmem:[%s15840_s28 + $0xc00] sm:$0xff]  }
 0x156   : > { %13587 = vmatpush3.bf16.msra.mxu1 %v15034_v40  ;;  %v15071_v40 = vld [vmem:[%s15840_s28 + $0xab8] sm:$0xff]  }
 0x157   : > { %13588 = vmatprep.subr.bf16.mxu1 %v15037_v49  ;;  %v15075_v49 = vld [vmem:[%s15840_s28 + $0xb80] sm:$0xff]  }
 0x158   : > { %13567 = vmatpush3.bf16.msra.mxu0 %v15036_v47  ;;  %v2676_v47 = vrot.slane %v2648_v38, %v15878_v43  ;;  %v15113_v38 = vld [vmem:[%s15840_s28 + $0xc50] sm:$0xff]  }
 0x159   : > { %13596 = vmatprep.subr.bf16.mxu0 %v15040_v55  ;;  %v15078_v55 = vld [vmem:[%s15840_s28 + $0xbc8] sm:$0xff]  }
 0x15a   : > { %13589 = vmatpush3.bf16.msra.mxu1 %v15039_v53  ;;  %v15077_v53 = vld [vmem:[%s15840_s28 + $0xb08] sm:$0xff]  }
 0x15b   : > { %9875 = vmatmul.mubr.bf16.vlgmr.msra.gmra.mrb[36].mxu0 %v2613_v54  ;;  %13618 = vmatprep.subr.bf16.mxu1 %v15042_v57  ;;  %v2680_v54 = vcombine.high %v2676_v47, %v2676_v47  ;;  %v15080_v57 = vld [vmem:[%s15840_s28 + $0xb50] sm:$0xff]  }
 0x15c   : > { %13597 = vmatpush3.bf16.msra.mxu0 %v15041_v56  ;;  %9954 = vmatprep.mubr.bf16.mxu0 %v2669_v36  ;;  %v15079_v56 = vld [vmem:[%s15840_s28 + $0xb88] sm:$0xff]  }
 0x15d   : > { %9915 = vmatmul.mubr.bf16.vlgmr.msra.gmra.mrb[36].mxu1 %v2629_v59  ;;  %13598 = vmatprep.subr.bf16.mxu0 %v15044_v60  ;;  %v15082_v59 = vld [vmem:[%s15840_s28 + $0xbd0] sm:$0xff]   ;;  %v15110_v36 = vld [vmem:[%s15840_s28 + $0xc08] sm:$0xff]  }
 0x15e   : > { %13619 = vmatpush3.bf16.msra.mxu1 %v15043_v58  ;;  %9994 = vmatprep.mubr.bf16.mxu1 %v2679_v45  ;;  %v15081_v58 = vld [vmem:[%s15840_s28 + $0xb10] sm:$0xff]   ;;  %v15119_v45 = vld [vmem:[%s15840_s28 + $0xcd8] sm:$0xff]  }
 0x15f   : > { %13620 = vmatprep.subr.bf16.mxu1 %v15046_v52  ;;  %v15083_v60 = vld [vmem:[%s15840_s28 + $0xb90] sm:$0xff]   ;;  %v15085_v52 = vld [vmem:[%s15840_s28 + $0xb18] sm:$0xff]  }
 0x160   : > { %13599 = vmatpush3.bf16.msra.mxu0 %v15045_v61  ;;  %v15084_v61 = vld [vmem:[%s15840_s28 + $0xb58] sm:$0xff]  }
 0x161   : > { %13600 = vmatprep.subr.bf16.mxu0 %v15048_v63  ;;  %v15087_v63 = vld [vmem:[%s15840_s28 + $0xb98] sm:$0xff]  }
 0x162   : > { %13621 = vmatpush3.bf16.msra.mxu1 %v15047_v62  ;;  %v15086_v62 = vld [vmem:[%s15840_s28 + $0xbd8] sm:$0xff]  }
 0x163   : > { %13622 = vmatprep.subr.bf16.mxu1 %v15050_v1  ;;  %v15089_v1 = vld [vmem:[%s15840_s28 + $0xb20] sm:$0xff]  }
 0x164   : > { %13601 = vmatpush3.bf16.msra.mxu0 %v15049_v0  ;;  %v15088_v0 = vld [vmem:[%s15840_s28 + $0xb60] sm:$0xff]  }
 0x165   : > { %13602 = vmatprep.subr.bf16.mxu0 %v15052_v3  ;;  %v15091_v3 = vld [vmem:[%s15840_s28 + $0xba0] sm:$0xff]  }
 0x166   : > { %13623 = vmatpush3.bf16.msra.mxu1 %v15051_v2  ;;  %v15090_v2 = vld [vmem:[%s15840_s28 + $0xbe0] sm:$0xff]  }
 0x167   : > { %13624 = vmatprep.subr.bf16.mxu1 %v15054_v5  ;;  %v15093_v5 = vld [vmem:[%s15840_s28 + $0xb28] sm:$0xff]  }
 0x168   : > { %13603 = vmatpush3.bf16.msra.mxu0 %v15053_v4  ;;  %v15092_v4 = vld [vmem:[%s15840_s28 + $0xb68] sm:$0xff]  }
 0x169   : > { %13604 = vmatprep.subr.bf16.mxu0 %v15056_v7  ;;  %v15095_v7 = vld [vmem:[%s15840_s28 + $0xba8] sm:$0xff]  }
 0x16a   : > { %13625 = vmatpush3.bf16.msra.mxu1 %v15055_v6  ;;  %v15094_v6 = vld [vmem:[%s15840_s28 + $0xbe8] sm:$0xff]  }
 0x16b   : > { %13626 = vmatprep.subr.bf16.mxu1 %v15058_v9 }
 0x16c   : > { %13605 = vmatpush3.bf16.msra.mxu0 %v15057_v8  ;;  %v15096_v8 = vld [vmem:[%s15840_s28 + $0xb70] sm:$0xff]  }
 0x16d   : > { %13606 = vmatprep.subr.bf16.mxu0 %v15060_v11 }
 0x16e   : > { %v13304_v16 = vpop.f32.mrb[12].mxu0  ;;  %13627 = vmatpush3.bf16.msra.mxu1 %v15059_v10  ;;  %v15097_v10 = vld [vmem:[%s15840_s28 + $0xb30] sm:$0xff]  }
 0x16f   : > { %v13305_v19 = vpop.f32.mrb[13].mxu0  ;;  %13628 = vmatprep.subr.bf16.mxu1 %v15062_v13 }
 0x170   : > { %v13306_v23 = vadd.f32 %v13305_v19, %v13304_v16  ;;  %v13307_v24 = vpop.f32.mrb[14].mxu0  ;;  %v13326_v25 = vpop.f32.mrb[12].mxu1  ;;  %13607 = vmatpush3.bf16.msra.mxu0 %v15061_v12  ;;  %v15098_v12 = vld [vmem:[%s15840_s28 + $0xbf0] sm:$0xff]  }
 0x171   : > { %v13308_v26 = vpop.f32.mrb[15].mxu0  ;;  %v13327_v27 = vpop.f32.mrb[13].mxu1  ;;  %13608 = vmatprep.subr.bf16.mxu0 %v15064_v15  ;;  %v15099_v16 = vld [vmem:[%s15840_s28 + $0xbb0] sm:$0xff]   ;;  %v15102_v24 = vld [vmem:[%s15840_s28 + $0xbf8] sm:$0xff]  }
 0x172   : > { %v9397_v32 = vadd.f32 %v13306_v23, %v16228_v51  ;;  %v13328_v33 = vadd.f32 %v13327_v27, %v13326_v25  ;;  %13629 = vmatpush3.bf16.msra.mxu1 %v15063_v14  ;;  %v13329_v37 = vpop.f32.mrb[14].mxu1  ;;  %v15076_v51 = vld [vmem:[%s15840_s28 + $0xb48] sm:$0xff]   ;;  %v15104_v27 = vld [vmem:[%s15840_s28 + $0xbb8] sm:$0xff]  }
 0x173   : > { %13630 = vmatprep.subr.bf16.mxu1 %v15066_v20  ;;  %v13330_v41 = vpop.f32.mrb[15].mxu1  ;;  %v15112_v37 = vld [vmem:[%s15840_s28 + $0xc88] sm:$0xff]  }
 0x174   : > { %v16273_v39 = vadd.f32 %v13328_v33, %v9397_v32  ;;  %13609 = vmatpush3.bf16.msra.mxu0 %v15065_v17  ;;  %v15100_v17 = vld [vmem:[%s15840_s28 + $0xb78] sm:$0xff]   ;;  %v15107_v32 = vld [vmem:[%s15840_s28 + $0xcc0] sm:$0xff]   ;;  %v15116_v41 = vld [vmem:[%s15840_s28 + $0xc90] sm:$0xff]  }
 0x175   : > { %13610 = vmatprep.subr.bf16.mxu0 %v15068_v29  ;;  %v15105_v29 = vld [vmem:[%s15840_s28 + $0xc40] sm:$0xff]  }
 0x176   : > { %13631 = vmatpush3.bf16.msra.mxu1 %v15067_v28  ;;  %v2662_v28 = vrot.slane %v16265_v31, %v15878_v43  ;;  %v15108_v33 = vld [vmem:[%s15840_s28 + $0xc80] sm:$0xff]   ;;  %v15111_v31 = vld [vmem:[%s15840_s28 + $0xcc8] sm:$0xff]  }
 0x177   : > { %13632 = vmatprep.subr.bf16.mxu1 %v15070_v35  ;;  %v15109_v35 = vld [vmem:[%s15840_s28 + $0xc48] sm:$0xff]  }
 0x178   : > { %13611 = vmatpush3.bf16.msra.mxu0 %v15069_v34  ;;  %v2678_v34 = vcombine.high %v2662_v28, %v2662_v28 }
 0x179   : > { %13640 = vmatprep.subr.bf16.mxu0 %v15072_v44  ;;  %v15118_v44 = vld [vmem:[%s15840_s28 + $0xc18] sm:$0xff]  }
 0x17a   : > { %13633 = vmatpush3.bf16.msra.mxu1 %v15071_v40  ;;  %v15115_v40 = vld [vmem:[%s15840_s28 + $0xcd0] sm:$0xff]  }
 0x17b   : > { %9955 = vmatmul.mubr.bf16.vlgmr.msra.gmra.mrb[40].mxu0 %v2655_v42  ;;  %13662 = vmatprep.subr.bf16.mxu1 %v15074_v48  ;;  %v15117_v42 = vld [vmem:[%s15840_s28 + $0xc58] sm:$0xff]   ;;  %v15122_v48 = vld [vmem:[%s15840_s28 + $0xc20] sm:$0xff]  }
 0x17c   : > { %13641 = vmatpush3.bf16.msra.mxu0 %v15073_v46  ;;  %10034 = vmatprep.mubr.bf16.mxu0 %v2676_v47  ;;  %v15120_v46 = vld [vmem:[%s15840_s28 + $0xc98] sm:$0xff]   ;;  %v15121_v47 = vld [vmem:[%s15840_s28 + $0xc60] sm:$0xff]  }
 0x17d   : > { %9995 = vmatmul.mubr.bf16.vlgmr.msra.gmra.mrb[40].mxu1 %v2677_v50  ;;  %13642 = vmatprep.subr.bf16.mxu0 %v15076_v51  ;;  %v15124_v50 = vld [vmem:[%s15840_s28 + $0xca0] sm:$0xff]   ;;  %v15125_v51 = vld [vmem:[%s15840_s28 + $0xc68] sm:$0xff]  }
 0x17e   : > { %13663 = vmatpush3.bf16.msra.mxu1 %v15075_v49  ;;  %10074 = vmatprep.mubr.bf16.mxu1 %v2680_v54  ;;  %v15123_v49 = vld [vmem:[%s15840_s28 + $0xce0] sm:$0xff]   ;;  %v15127_v54 = vld [vmem:[%s15840_s28 + $0xce8] sm:$0xff]  }
 0x17f   : > { %13664 = vmatprep.subr.bf16.mxu1 %v15078_v55  ;;  %v15128_v55 = vld [vmem:[%s15840_s28 + $0xca8] sm:$0xff]  }
 0x180   : > { %13643 = vmatpush3.bf16.msra.mxu0 %v15077_v53  ;;  %v15126_v53 = vld [vmem:[%s15840_s28 + $0xc28] sm:$0xff]  }
 0x181   : > { %13644 = vmatprep.subr.bf16.mxu0 %v15080_v57 }
 0x182   : > { %13665 = vmatpush3.bf16.msra.mxu1 %v15079_v56  ;;  %v15129_v56 = vld [vmem:[%s15840_s28 + $0xc70] sm:$0xff]  }
 0x183   : > { %13666 = vmatprep.subr.bf16.mxu1 %v15082_v59 }
 0x184   : > { %13645 = vmatpush3.bf16.msra.mxu0 %v15081_v58  ;;  %v15130_v58 = vld [vmem:[%s15840_s28 + $0xc30] sm:$0xff]  }
 0x185   : > { %13646 = vmatprep.subr.bf16.mxu0 %v15084_v61  ;;  %v409_v61 = vld [vmem:[%s15835_s24 + $0x30] sm:$0xff] }
 0x186   : > { %13667 = vmatpush3.bf16.msra.mxu1 %v15083_v60  ;;  %v15131_v60 = vld [vmem:[%s15840_s28 + $0xcf0] sm:$0xff]  }
 0x187   : > { %13668 = vmatprep.subr.bf16.mxu1 %v15086_v62 }
 0x188   : > { %13647 = vmatpush3.bf16.msra.mxu0 %v15085_v52 }
 0x189   : > { %13648 = vmatprep.subr.bf16.mxu0 %v15088_v0  ;;  %v2688_v0 = vrot.slane %v409_v61, %v15878_v43 }
 0x18a   : > { %13669 = vmatpush3.bf16.msra.mxu1 %v15087_v63 }
 0x18b   : > { %13670 = vmatprep.subr.bf16.mxu1 %v15090_v2 }
 0x18c   : > { %13649 = vmatpush3.bf16.msra.mxu0 %v15089_v1  ;;  %v2681_v1 = vcombine.high %v409_v61, %v409_v61 }
 0x18d   : > { %13650 = vmatprep.subr.bf16.mxu0 %v15092_v4  ;;  %v15132_v4 = vld [vmem:[%s15840_s28 + $0xcb0] sm:$0xff]  }
 0x18e   : > { %v13348_v9 = vpop.f32.mrb[16].mxu0  ;;  %13671 = vmatpush3.bf16.msra.mxu1 %v15091_v3 }
 0x18f   : > { %v13349_v11 = vpop.f32.mrb[17].mxu0  ;;  %13672 = vmatprep.subr.bf16.mxu1 %v15094_v6 }
 0x190   : > { %v13350_v13 = vadd.f32 %v13349_v11, %v13348_v9  ;;  %v13351_v14 = vpop.f32.mrb[18].mxu0  ;;  %v13370_v15 = vpop.f32.mrb[16].mxu1  ;;  %13651 = vmatpush3.bf16.msra.mxu0 %v15093_v5  ;;  %v15133_v5 = vld [vmem:[%s15840_s28 + $0xc78] sm:$0xff]   ;;  %v2696_v9 = vcombine.high %v2688_v0, %v2688_v0 }
 0x191   : > { %v13352_v18 = vpop.f32.mrb[19].mxu0  ;;  %v13371_v19 = vpop.f32.mrb[17].mxu1  ;;  %13652 = vmatprep.subr.bf16.mxu0 %v15096_v8  ;;  %v15134_v8 = vld [vmem:[%s15840_s28 + $0xc38] sm:$0xff]  }
 0x192   : > { %v9477_v20 = vadd.f32 %v13350_v13, %v16273_v39  ;;  %v13372_v21 = vadd.f32 %v13371_v19, %v13370_v15  ;;  %13673 = vmatpush3.bf16.msra.mxu1 %v15095_v7  ;;  %v13373_v23 = vpop.f32.mrb[18].mxu1  ;;  %v15114_v39 = vld [vmem:[%s15840_s28 + $0xc10] sm:$0xff]   ;;  %v2718_v14 = vrot.slane %v2696_v9, %v15878_v43  ;;  %v15136_v15 = vld [vmem:[%s15840_s28 + $0xcb8] sm:$0xff]   ;;  %v15137_v18 = vld [vmem:[%s15840_s28 + $0xd40] sm:$0xff]  }
 0x193   : > { %13674 = vmatprep.subr.bf16.mxu1 %v15098_v12  ;;  %v13374_v25 = vpop.f32.mrb[19].mxu1  ;;  %v16350_v12 = vrot.slane %v2681_v1, %v15878_v43 }
 0x194   : > { %v16310_v26 = vadd.f32 %v13372_v21, %v9477_v20  ;;  %13653 = vmatpush3.bf16.msra.mxu0 %v15097_v10  ;;  %v15135_v10 = vld [vmem:[%s15840_s28 + $0xcf8] sm:$0xff]   ;;  %v2728_v20 = vcombine.high %v2718_v14, %v2718_v14  ;;  %v15138_v21 = vld [vmem:[%s15840_s28 + $0xd00] sm:$0xff]  }
 0x195   : > { %13654 = vmatprep.subr.bf16.mxu0 %v15100_v17  ;;  %v2704_v17 = vrot.slane %v2688_v0, %v15878_v43  ;;  %v2697_v19 = vcombine.high %v16350_v12, %v16350_v12  ;;  %v15167_v0 = vld [vmem:[%s15840_s28 + $0xdf8] sm:$0xff]  }
 0x196   : > { %13675 = vmatpush3.bf16.msra.mxu1 %v15099_v16 }
 0x197   : > { %13676 = vmatprep.subr.bf16.mxu1 %v15102_v24  ;;  %v2725_v23 = vrot.slane %v2697_v19, %v15878_v43  ;;  %v15140_v24 = vld [vmem:[%s15840_s28 + $0xd80] sm:$0xff]   ;;  %v2726_v25 = vcombine.high %v2704_v17, %v2704_v17  ;;  %v15183_v19 = vld [vmem:[%s15840_s28 + $0xe18] sm:$0xff]  }
 0x198   : > { %13655 = vmatpush3.bf16.msra.mxu0 %v15101_v22  ;;  %v15139_v22 = vld [vmem:[%s15840_s28 + $0xdc0] sm:$0xff]  }
 0x199   : > { %13684 = vmatprep.subr.bf16.mxu0 %v15105_v29  ;;  %v15143_v29 = vld [vmem:[%s15840_s28 + $0xdc8] sm:$0xff]  }
 0x19a   : > { %13677 = vmatpush3.bf16.msra.mxu1 %v15104_v27  ;;  %v15142_v27 = vld [vmem:[%s15840_s28 + $0xd08] sm:$0xff]  }
 0x19b   : > { %10035 = vmatmul.mubr.bf16.vlgmr.msra.gmra.mrb[44].mxu0 %v2662_v28  ;;  %13706 = vmatprep.subr.bf16.mxu1 %v15107_v32  ;;  %v2729_v28 = vcombine.high %v2725_v23, %v2725_v23  ;;  %v15145_v32 = vld [vmem:[%s15840_s28 + $0xd50] sm:$0xff]  }
 0x19c   : > { %13685 = vmatpush3.bf16.msra.mxu0 %v15106_v30  ;;  %10114 = vmatprep.mubr.bf16.mxu0 %v2718_v14  ;;  %v15144_v30 = vld [vmem:[%s15840_s28 + $0xd88] sm:$0xff]   ;;  %v15178_v14 = vld [vmem:[%s15840_s28 + $0xe50] sm:$0xff]  }
 0x19d   : > { %10075 = vmatmul.mubr.bf16.vlgmr.msra.gmra.mrb[44].mxu1 %v2678_v34  ;;  %13686 = vmatprep.subr.bf16.mxu0 %v15109_v35  ;;  %v15147_v34 = vld [vmem:[%s15840_s28 + $0xdd0] sm:$0xff]  }
 0x19e   : > { %13707 = vmatpush3.bf16.msra.mxu1 %v15108_v33  ;;  %10154 = vmatprep.mubr.bf16.mxu1 %v2728_v20  ;;  %v15146_v33 = vld [vmem:[%s15840_s28 + $0xd10] sm:$0xff]   ;;  %v15184_v20 = vld [vmem:[%s15840_s28 + $0xed8] sm:$0xff]  }
 0x19f   : > { %13708 = vmatprep.subr.bf16.mxu1 %v15111_v31  ;;  %v15148_v35 = vld [vmem:[%s15840_s28 + $0xd90] sm:$0xff]   ;;  %v15150_v31 = vld [vmem:[%s15840_s28 + $0xd18] sm:$0xff]  }
 0x1a0   : > { %13687 = vmatpush3.bf16.msra.mxu0 %v15110_v36  ;;  %v15149_v36 = vld [vmem:[%s15840_s28 + $0xd58] sm:$0xff]  }
 0x1a1   : > { %13688 = vmatprep.subr.bf16.mxu0 %v15113_v38  ;;  %v15152_v38 = vld [vmem:[%s15840_s28 + $0xd98] sm:$0xff]  }
 0x1a2   : > { %13709 = vmatpush3.bf16.msra.mxu1 %v15112_v37  ;;  %v15151_v37 = vld [vmem:[%s15840_s28 + $0xdd8] sm:$0xff]  }
 0x1a3   : > { %13710 = vmatprep.subr.bf16.mxu1 %v15115_v40  ;;  %v15154_v40 = vld [vmem:[%s15840_s28 + $0xd20] sm:$0xff]  }
 0x1a4   : > { %13689 = vmatpush3.bf16.msra.mxu0 %v15114_v39  ;;  %v15153_v39 = vld [vmem:[%s15840_s28 + $0xd60] sm:$0xff]  }
 0x1a5   : > { %13690 = vmatprep.subr.bf16.mxu0 %v15117_v42  ;;  %v15156_v42 = vld [vmem:[%s15840_s28 + $0xda0] sm:$0xff]  }
 0x1a6   : > { %13711 = vmatpush3.bf16.msra.mxu1 %v15116_v41  ;;  %v15155_v41 = vld [vmem:[%s15840_s28 + $0xde0] sm:$0xff]  }
 0x1a7   : > { %13712 = vmatprep.subr.bf16.mxu1 %v15119_v45  ;;  %v15158_v45 = vld [vmem:[%s15840_s28 + $0xd28] sm:$0xff]  }
 0x1a8   : > { %13691 = vmatpush3.bf16.msra.mxu0 %v15118_v44  ;;  %v15157_v44 = vld [vmem:[%s15840_s28 + $0xd68] sm:$0xff]  }
 0x1a9   : > { %13692 = vmatprep.subr.bf16.mxu0 %v15121_v47  ;;  %v15160_v47 = vld [vmem:[%s15840_s28 + $0xda8] sm:$0xff]  }
 0x1aa   : > { %13713 = vmatpush3.bf16.msra.mxu1 %v15120_v46  ;;  %v15159_v46 = vld [vmem:[%s15840_s28 + $0xde8] sm:$0xff]  }
 0x1ab   : > { %13714 = vmatprep.subr.bf16.mxu1 %v15123_v49 }
 0x1ac   : > { %13693 = vmatpush3.bf16.msra.mxu0 %v15122_v48  ;;  %v15161_v48 = vld [vmem:[%s15840_s28 + $0xd70] sm:$0xff]  }
 0x1ad   : > { %13694 = vmatprep.subr.bf16.mxu0 %v15125_v51 }
 0x1ae   : > { %v13392_v57 = vpop.f32.mrb[20].mxu0  ;;  %13715 = vmatpush3.bf16.msra.mxu1 %v15124_v50  ;;  %v15162_v50 = vld [vmem:[%s15840_s28 + $0xd30] sm:$0xff]  }
 0x1af   : > { %v13393_v59 = vpop.f32.mrb[21].mxu0  ;;  %13716 = vmatprep.subr.bf16.mxu1 %v15127_v54 }
 0x1b0   : > { %v13394_v52 = vadd.f32 %v13393_v59, %v13392_v57  ;;  %v13395_v62 = vpop.f32.mrb[22].mxu0  ;;  %v13414_v63 = vpop.f32.mrb[20].mxu1  ;;  %13695 = vmatpush3.bf16.msra.mxu0 %v15126_v53  ;;  %v15163_v53 = vld [vmem:[%s15840_s28 + $0xdf0] sm:$0xff]  }
 0x1b1   : > { %v13396_v2 = vpop.f32.mrb[23].mxu0  ;;  %v13415_v3 = vpop.f32.mrb[21].mxu1  ;;  %13696 = vmatprep.subr.bf16.mxu0 %v15129_v56  ;;  %v15164_v57 = vld [vmem:[%s15840_s28 + $0xdb0] sm:$0xff]   ;;  %v15166_v62 = vld [vmem:[%s15840_s28 + $0xd38] sm:$0xff]  }
 0x1b2   : > { %v9557_v6 = vadd.f32 %v13394_v52, %v16310_v26  ;;  %v13416_v7 = vadd.f32 %v13415_v3, %v13414_v63  ;;  %13717 = vmatpush3.bf16.msra.mxu1 %v15128_v55  ;;  %v13417_v11 = vpop.f32.mrb[22].mxu1  ;;  %v15141_v26 = vld [vmem:[%s15840_s28 + $0xd48] sm:$0xff]   ;;  %v15169_v3 = vld [vmem:[%s15840_s28 + $0xdb8] sm:$0xff]  }
 0x1b3   : > { %13718 = vmatprep.subr.bf16.mxu1 %v15131_v60  ;;  %v13418_v16 = vpop.f32.mrb[23].mxu1  ;;  %v15175_v11 = vld [vmem:[%s15840_s28 + $0xe08] sm:$0xff]  }
 0x1b4   : > { %v16352_v13 = vadd.f32 %v13416_v7, %v9557_v6  ;;  %13697 = vmatpush3.bf16.msra.mxu0 %v15130_v58  ;;  %v15165_v58 = vld [vmem:[%s15840_s28 + $0xd78] sm:$0xff]   ;;  %v15171_v6 = vld [vmem:[%s15840_s28 + $0xe00] sm:$0xff]   ;;  %v15180_v16 = vld [vmem:[%s15840_s28 + $0xed0] sm:$0xff]  }
 0x1b5   : > { %13698 = vmatprep.subr.bf16.mxu0 %v15133_v5  ;;  %v15170_v5 = vld [vmem:[%s15840_s28 + $0xe40] sm:$0xff]  }
 0x1b6   : > { %13719 = vmatpush3.bf16.msra.mxu1 %v15132_v4  ;;  %v2711_v4 = vrot.slane %v16350_v12, %v15878_v43  ;;  %v15172_v7 = vld [vmem:[%s15840_s28 + $0xec0] sm:$0xff]   ;;  %v15176_v12 = vld [vmem:[%s15840_s28 + $0xec8] sm:$0xff]  }
 0x1b7   : > { %13720 = vmatprep.subr.bf16.mxu1 %v15135_v10  ;;  %v15174_v10 = vld [vmem:[%s15840_s28 + $0xe48] sm:$0xff]  }
 0x1b8   : > { %13699 = vmatpush3.bf16.msra.mxu0 %v15134_v8  ;;  %v15173_v8 = vld [vmem:[%s15840_s28 + $0xe80] sm:$0xff]   ;;  %v2727_v9 = vcombine.high %v2711_v4, %v2711_v4 }
 0x1b9   : > { %13728 = vmatprep.subr.bf16.mxu0 %v15137_v18  ;;  %v15182_v18 = vld [vmem:[%s15840_s28 + $0xe58] sm:$0xff]  }
 0x1ba   : > { %13721 = vmatpush3.bf16.msra.mxu1 %v15136_v15  ;;  %v15179_v15 = vld [vmem:[%s15840_s28 + $0xe10] sm:$0xff]  }
 0x1bb   : > { %10115 = vmatmul.mubr.bf16.vlgmr.msra.gmra.mrb[48].mxu0 %v2704_v17  ;;  %13750 = vmatprep.subr.bf16.mxu1 %v15139_v22  ;;  %v15181_v17 = vld [vmem:[%s15840_s28 + $0xe90] sm:$0xff]   ;;  %v15186_v22 = vld [vmem:[%s15840_s28 + $0xe60] sm:$0xff]  }
 0x1bc   : > { %13729 = vmatpush3.bf16.msra.mxu0 %v15138_v21  ;;  %10194 = vmatprep.mubr.bf16.mxu0 %v2725_v23  ;;  %v15185_v21 = vld [vmem:[%s15840_s28 + $0xe98] sm:$0xff]   ;;  %v15187_v23 = vld [vmem:[%s15840_s28 + $0xe20] sm:$0xff]  }
 0x1bd   : > { %10155 = vmatmul.mubr.bf16.vlgmr.msra.gmra.mrb[48].mxu1 %v2726_v25  ;;  %13730 = vmatprep.subr.bf16.mxu0 %v15141_v26  ;;  %v15189_v25 = vld [vmem:[%s15840_s28 + $0xea0] sm:$0xff]   ;;  %v15190_v26 = vld [vmem:[%s15840_s28 + $0xe68] sm:$0xff]  }
 0x1be   : > { %13751 = vmatpush3.bf16.msra.mxu1 %v15140_v24  ;;  %10234 = vmatprep.mubr.bf16.mxu1 %v2729_v28  ;;  %v15188_v24 = vld [vmem:[%s15840_s28 + $0xee0] sm:$0xff]   ;;  %v15192_v28 = vld [vmem:[%s15840_s28 + $0xee8] sm:$0xff]  }
 0x1bf   : > { %13752 = vmatprep.subr.bf16.mxu1 %v15143_v29  ;;  %v15193_v29 = vld [vmem:[%s15840_s28 + $0xea8] sm:$0xff]  }
 0x1c0   : > { %13731 = vmatpush3.bf16.msra.mxu0 %v15142_v27  ;;  %v15191_v27 = vld [vmem:[%s15840_s28 + $0xe28] sm:$0xff]  }
 0x1c1   : > { %13732 = vmatprep.subr.bf16.mxu0 %v15145_v32 }
 0x1c2   : > { %13753 = vmatpush3.bf16.msra.mxu1 %v15144_v30  ;;  %v15194_v30 = vld [vmem:[%s15840_s28 + $0xe70] sm:$0xff]  }
 0x1c3   : > { %13754 = vmatprep.subr.bf16.mxu1 %v15147_v34 }
 0x1c4   : > { %13733 = vmatpush3.bf16.msra.mxu0 %v15146_v33  ;;  %v15195_v33 = vld [vmem:[%s15840_s28 + $0xe30] sm:$0xff]  }
 0x1c5   : > { %13734 = vmatprep.subr.bf16.mxu0 %v15149_v36 }
 0x1c6   : > { %13755 = vmatpush3.bf16.msra.mxu1 %v15148_v35  ;;  %v15196_v35 = vld [vmem:[%s15840_s28 + $0xef0] sm:$0xff]  }
 0x1c7   : > { %13756 = vmatprep.subr.bf16.mxu1 %v15151_v37 }
 0x1c8   : > { %13735 = vmatpush3.bf16.msra.mxu0 %v15150_v31 }
 0x1c9   : > { %13736 = vmatprep.subr.bf16.mxu0 %v15153_v39  ;;  %v15198_v39 = vld [vmem:[%s15840_s28 + $0xe78] sm:$0xff]  }
 0x1ca   : > { %13757 = vmatpush3.bf16.msra.mxu1 %v15152_v38  ;;  %v15197_v38 = vld [vmem:[%s15840_s28 + $0xeb0] sm:$0xff]  }
 0x1cb   : > { %13758 = vmatprep.subr.bf16.mxu1 %v15155_v41 }
 0x1cc   : > { %13737 = vmatpush3.bf16.msra.mxu0 %v15154_v40  ;;  %v410_v40 = vld [vmem:[%s15835_s24 + $0x38] sm:$0xff] }
 0x1cd   : > { %13738 = vmatprep.subr.bf16.mxu0 %v15157_v44  ;;  %v2737_v44 = vrot.slane %v410_v40, %v15878_v43 }
 0x1ce   : > { %v13436_v49 = vpop.f32.mrb[24].mxu0  ;;  %13759 = vmatpush3.bf16.msra.mxu1 %v15156_v42 }
 0x1cf   : > { %v13437_v51 = vpop.f32.mrb[25].mxu0  ;;  %13760 = vmatprep.subr.bf16.mxu1 %v15159_v46 }
 0x1d0   : > { %v13438_v54 = vadd.f32 %v13437_v51, %v13436_v49  ;;  %v13439_v55 = vpop.f32.mrb[26].mxu0  ;;  %v13458_v56 = vpop.f32.mrb[24].mxu1  ;;  %13739 = vmatpush3.bf16.msra.mxu0 %v15158_v45  ;;  %v2730_v45 = vcombine.high %v410_v40, %v410_v40  ;;  %v2745_v51 = vcombine.high %v2737_v44, %v2737_v44 }
 0x1d1   : > { %v13440_v59 = vpop.f32.mrb[27].mxu0  ;;  %v13459_v60 = vpop.f32.mrb[25].mxu1  ;;  %13740 = vmatprep.subr.bf16.mxu0 %v15161_v48  ;;  %v15199_v48 = vld [vmem:[%s15840_s28 + $0xe38] sm:$0xff]  }
 0x1d2   : > { %v9637_v61 = vadd.f32 %v13438_v54, %v16352_v13  ;;  %v13460_v52 = vadd.f32 %v13459_v60, %v13458_v56  ;;  %13761 = vmatpush3.bf16.msra.mxu1 %v15160_v47  ;;  %v13461_v63 = vpop.f32.mrb[26].mxu1  ;;  %v15177_v13 = vld [vmem:[%s15840_s28 + $0xe88] sm:$0xff]   ;;  %v16432_v54 = vrot.slane %v2730_v45, %v15878_v43  ;;  %v15201_v56 = vld [vmem:[%s15840_s28 + $0xeb8] sm:$0xff]   ;;  %v15202_v59 = vld [vmem:[%s15840_s28 + $0xf40] sm:$0xff]  }
 0x1d3   : > { %13762 = vmatprep.subr.bf16.mxu1 %v15163_v53  ;;  %v13462_v1 = vpop.f32.mrb[27].mxu1  ;;  %v15235_v45 = vld [vmem:[%s15840_s28 + $0x1040] sm:$0xff]  }
 0x1d4   : > { %v16392_v2 = vadd.f32 %v13460_v52, %v9637_v61  ;;  %13741 = vmatpush3.bf16.msra.mxu0 %v15162_v50  ;;  %v15200_v50 = vld [vmem:[%s15840_s28 + $0xef8] sm:$0xff]   ;;  %v2746_v60 = vcombine.high %v16432_v54, %v16432_v54  ;;  %v15203_v61 = vld [vmem:[%s15840_s28 + $0xf00] sm:$0xff]  }
 0x1d5   : > { %13742 = vmatprep.subr.bf16.mxu0 %v15165_v58  ;;  %v2753_v58 = vrot.slane %v2737_v44, %v15878_v43  ;;  %v2760_v44 = vrot.slane %v16432_v54, %v15878_v43  ;;  %v15242_v54 = vld [vmem:[%s15840_s28 + $0x1088] sm:$0xff]  }
 0x1d6   : > { %13763 = vmatpush3.bf16.msra.mxu1 %v15164_v57  ;;  %v2767_v57 = vrot.slane %v2745_v51, %v15878_v43  ;;  %v2774_v63 = vrot.slane %v2746_v60, %v15878_v43  ;;  %v15240_v51 = vld [vmem:[%s15840_s28 + $0x1008] sm:$0xff]   ;;  %v15248_v60 = vld [vmem:[%s15840_s28 + $0x1018] sm:$0xff]  }
 0x1d7   : > { %13764 = vmatprep.subr.bf16.mxu1 %v15167_v0  ;;  %v15205_v0 = vld [vmem:[%s15840_s28 + $0xf80] sm:$0xff]   ;;  %v2775_v1 = vcombine.high %v2753_v58, %v2753_v58 }
 0x1d8   : > { %13743 = vmatpush3.bf16.msra.mxu0 %v15166_v62  ;;  %v2777_v52 = vcombine.high %v2767_v57, %v2767_v57  ;;  %v15204_v62 = vld [vmem:[%s15840_s28 + $0xfc0] sm:$0xff]  }
 0x1d9   : > { %13772 = vmatprep.subr.bf16.mxu0 %v15170_v5  ;;  %v15208_v5 = vld [vmem:[%s15840_s28 + $0xfc8] sm:$0xff]  }
 0x1da   : > { %13765 = vmatpush3.bf16.msra.mxu1 %v15169_v3  ;;  %v15207_v3 = vld [vmem:[%s15840_s28 + $0xf08] sm:$0xff]  }
 0x1db   : > { %10195 = vmatmul.mubr.bf16.vlgmr.msra.gmra.mrb[52].mxu0 %v2711_v4  ;;  %13794 = vmatprep.subr.bf16.mxu1 %v15172_v7  ;;  %v2778_v4 = vcombine.high %v2774_v63, %v2774_v63  ;;  %v15210_v7 = vld [vmem:[%s15840_s28 + $0xf50] sm:$0xff]  }
 0x1dc   : > { %13773 = vmatpush3.bf16.msra.mxu0 %v15171_v6  ;;  %10274 = vmatprep.mubr.bf16.mxu0 %v2767_v57  ;;  %v15209_v6 = vld [vmem:[%s15840_s28 + $0xf88] sm:$0xff]   ;;  %v15245_v57 = vld [vmem:[%s15840_s28 + $0x10d0] sm:$0xff]  }
 0x1dd   : > { %10235 = vmatmul.mubr.bf16.vlgmr.msra.gmra.mrb[52].mxu1 %v2727_v9  ;;  %13774 = vmatprep.subr.bf16.mxu0 %v15174_v10  ;;  %v15212_v9 = vld [vmem:[%s15840_s28 + $0xfd0] sm:$0xff]  }
 0x1de   : > { %13795 = vmatpush3.bf16.msra.mxu1 %v15173_v8  ;;  %10314 = vmatprep.mubr.bf16.mxu1 %v2777_v52  ;;  %v15211_v8 = vld [vmem:[%s15840_s28 + $0xf10] sm:$0xff]   ;;  %v15250_v52 = vld [vmem:[%s15840_s28 + $0x1098] sm:$0xff]  }
 0x1df   : > { %13796 = vmatprep.subr.bf16.mxu1 %v15176_v12  ;;  %v15213_v10 = vld [vmem:[%s15840_s28 + $0xf90] sm:$0xff]   ;;  %v15215_v12 = vld [vmem:[%s15840_s28 + $0xf18] sm:$0xff]  }
 0x1e0   : > { %13775 = vmatpush3.bf16.msra.mxu0 %v15175_v11  ;;  %v15214_v11 = vld [vmem:[%s15840_s28 + $0xf58] sm:$0xff]  }
 0x1e1   : > { %13776 = vmatprep.subr.bf16.mxu0 %v15178_v14  ;;  %v15217_v14 = vld [vmem:[%s15840_s28 + $0xf98] sm:$0xff]  }
 0x1e2   : > { %13797 = vmatpush3.bf16.msra.mxu1 %v15177_v13  ;;  %v15216_v13 = vld [vmem:[%s15840_s28 + $0xfd8] sm:$0xff]  }
 0x1e3   : > { %13798 = vmatprep.subr.bf16.mxu1 %v15180_v16  ;;  %v15219_v16 = vld [vmem:[%s15840_s28 + $0xf20] sm:$0xff]  }
 0x1e4   : > { %13777 = vmatpush3.bf16.msra.mxu0 %v15179_v15  ;;  %v15218_v15 = vld [vmem:[%s15840_s28 + $0xf60] sm:$0xff]  }
 0x1e5   : > { %13778 = vmatprep.subr.bf16.mxu0 %v15182_v18  ;;  %v15221_v18 = vld [vmem:[%s15840_s28 + $0xfa0] sm:$0xff]  }
 0x1e6   : > { %13799 = vmatpush3.bf16.msra.mxu1 %v15181_v17  ;;  %v15220_v17 = vld [vmem:[%s15840_s28 + $0xfe0] sm:$0xff]  }
 0x1e7   : > { %13800 = vmatprep.subr.bf16.mxu1 %v15184_v20  ;;  %v15223_v20 = vld [vmem:[%s15840_s28 + $0xf28] sm:$0xff]  }
 0x1e8   : > { %13779 = vmatpush3.bf16.msra.mxu0 %v15183_v19  ;;  %v15222_v19 = vld [vmem:[%s15840_s28 + $0xf68] sm:$0xff]  }
 0x1e9   : > { %13780 = vmatprep.subr.bf16.mxu0 %v15186_v22  ;;  %v15225_v22 = vld [vmem:[%s15840_s28 + $0xfa8] sm:$0xff]  }
 0x1ea   : > { %13801 = vmatpush3.bf16.msra.mxu1 %v15185_v21  ;;  %v15224_v21 = vld [vmem:[%s15840_s28 + $0xfe8] sm:$0xff]  }
 0x1eb   : > { %13802 = vmatprep.subr.bf16.mxu1 %v15188_v24 }
 0x1ec   : > { %13781 = vmatpush3.bf16.msra.mxu0 %v15187_v23  ;;  %v15226_v23 = vld [vmem:[%s15840_s28 + $0xf70] sm:$0xff]  }
 0x1ed   : > { %13782 = vmatprep.subr.bf16.mxu0 %v15190_v26 }
 0x1ee   : > { %v13480_v32 = vpop.f32.mrb[28].mxu0  ;;  %13803 = vmatpush3.bf16.msra.mxu1 %v15189_v25  ;;  %v15227_v25 = vld [vmem:[%s15840_s28 + $0xf30] sm:$0xff]  }
 0x1ef   : > { %v13481_v34 = vpop.f32.mrb[29].mxu0  ;;  %13804 = vmatprep.subr.bf16.mxu1 %v15192_v28 }
 0x1f0   : > { %v13482_v36 = vadd.f32 %v13481_v34, %v13480_v32  ;;  %v13483_v31 = vpop.f32.mrb[30].mxu0  ;;  %v13502_v37 = vpop.f32.mrb[28].mxu1  ;;  %13783 = vmatpush3.bf16.msra.mxu0 %v15191_v27  ;;  %v15228_v27 = vld [vmem:[%s15840_s28 + $0xff0] sm:$0xff]  }
 0x1f1   : > { %v13484_v41 = vpop.f32.mrb[31].mxu0  ;;  %v13503_v42 = vpop.f32.mrb[29].mxu1  ;;  %13784 = vmatprep.subr.bf16.mxu0 %v15194_v30  ;;  %v15229_v32 = vld [vmem:[%s15840_s28 + $0xfb0] sm:$0xff]  }
 0x1f2   : > { %v9717_v46 = vadd.f32 %v13482_v36, %v16392_v2  ;;  %v13504_v47 = vadd.f32 %v13503_v42, %v13502_v37  ;;  %13805 = vmatpush3.bf16.msra.mxu1 %v15193_v29  ;;  %v13505_v49 = vpop.f32.mrb[30].mxu1  ;;  %v15206_v2 = vld [vmem:[%s15840_s28 + $0xf48] sm:$0xff]   ;;  %v15231_v37 = vld [vmem:[%s15840_s28 + $0xf38] sm:$0xff]  }
 0x1f3   : > { %13806 = vmatprep.subr.bf16.mxu1 %v15196_v35  ;;  %v13506_v53 = vpop.f32.mrb[31].mxu1  ;;  %v15234_v42 = vld [vmem:[%s15840_s28 + $0xfb8] sm:$0xff]   ;;  %v2776_v49 = vcombine.high %v2760_v44, %v2760_v44 }
 0x1f4   : > { %v16434_v55 = vadd.f32 %v13504_v47, %v9717_v46  ;;  %13785 = vmatpush3.bf16.msra.mxu0 %v15195_v33  ;;  %v15230_v33 = vld [vmem:[%s15840_s28 + $0xf78] sm:$0xff]   ;;  %v15236_v46 = vld [vmem:[%s15840_s28 + $0x1000] sm:$0xff]   ;;  %v15241_v53 = vld [vmem:[%s15840_s28 + $0x10c8] sm:$0xff]  }
 0x1f5   : > { %13786 = vmatprep.subr.bf16.mxu0 %v15198_v39  ;;  %v15232_v39 = vld [vmem:[%s15840_s28 + $0xff8] sm:$0xff]   ;;  %v15237_v47 = vld [vmem:[%s15840_s28 + $0x10c0] sm:$0xff]  }
 0x1f6   : > { %13807 = vmatpush3.bf16.msra.mxu1 %v15197_v38 }
 0x1f7   : > { %13808 = vmatprep.subr.bf16.mxu1 %v15200_v50  ;;  %v15239_v50 = vld [vmem:[%s15840_s28 + $0x1048] sm:$0xff]  }
 0x1f8   : > { %13787 = vmatpush3.bf16.msra.mxu0 %v15199_v48  ;;  %v15238_v48 = vld [vmem:[%s15840_s28 + $0x1080] sm:$0xff]  }
 0x1f9   : > { %13816 = vmatprep.subr.bf16.mxu0 %v15202_v59  ;;  %v15247_v59 = vld [vmem:[%s15840_s28 + $0x1058] sm:$0xff]  }
 0x1fa   : > { %13809 = vmatpush3.bf16.msra.mxu1 %v15201_v56  ;;  %v15244_v56 = vld [vmem:[%s15840_s28 + $0x1010] sm:$0xff]  }
 0x1fb   : > { %10275 = vmatmul.mubr.bf16.vlgmr.msra.gmra.mrb[56].mxu0 %v2753_v58  ;;  %13838 = vmatprep.subr.bf16.mxu1 %v15204_v62  ;;  %v15246_v58 = vld [vmem:[%s15840_s28 + $0x1090] sm:$0xff]   ;;  %v15251_v62 = vld [vmem:[%s15840_s28 + $0x1060] sm:$0xff]  }
 0x1fc   : > { %13817 = vmatpush3.bf16.msra.mxu0 %v15203_v61  ;;  %10354 = vmatprep.mubr.bf16.mxu0 %v2774_v63  ;;  %v15249_v61 = vld [vmem:[%s15840_s28 + $0x10d8] sm:$0xff]   ;;  %v15252_v63 = vld [vmem:[%s15840_s28 + $0x1020] sm:$0xff]  }
 0x1fd   : > { %10315 = vmatmul.mubr.bf16.vlgmr.msra.gmra.mrb[56].mxu1 %v2775_v1  ;;  %13818 = vmatprep.subr.bf16.mxu0 %v15206_v2  ;;  %v15254_v1 = vld [vmem:[%s15840_s28 + $0x10a0] sm:$0xff]   ;;  %v15255_v2 = vld [vmem:[%s15840_s28 + $0x1068] sm:$0xff]  }
 0x1fe   : > { %13839 = vmatpush3.bf16.msra.mxu1 %v15205_v0  ;;  %10394 = vmatprep.mubr.bf16.mxu1 %v2778_v4  ;;  %v15253_v0 = vld [vmem:[%s15840_s28 + $0x10e0] sm:$0xff]   ;;  %v15257_v4 = vld [vmem:[%s15840_s28 + $0x10e8] sm:$0xff]  }
 0x1ff   : > { %13840 = vmatprep.subr.bf16.mxu1 %v15208_v5  ;;  %v15258_v5 = vld [vmem:[%s15840_s28 + $0x10a8] sm:$0xff]  }
 0x200   : > { %13819 = vmatpush3.bf16.msra.mxu0 %v15207_v3  ;;  %v15256_v3 = vld [vmem:[%s15840_s28 + $0x1028] sm:$0xff]  }
 0x201   : > { %13820 = vmatprep.subr.bf16.mxu0 %v15210_v7 }
 0x202   : > { %13841 = vmatpush3.bf16.msra.mxu1 %v15209_v6  ;;  %v15259_v6 = vld [vmem:[%s15840_s28 + $0x1070] sm:$0xff]  }
 0x203   : > { %13842 = vmatprep.subr.bf16.mxu1 %v15212_v9 }
 0x204   : > { %13821 = vmatpush3.bf16.msra.mxu0 %v15211_v8  ;;  %v15260_v8 = vld [vmem:[%s15840_s28 + $0x1030] sm:$0xff]  }
 0x205   : > { %13822 = vmatprep.subr.bf16.mxu0 %v15214_v11 }
 0x206   : > { %13843 = vmatpush3.bf16.msra.mxu1 %v15213_v10  ;;  %v15261_v10 = vld [vmem:[%s15840_s28 + $0x10f0] sm:$0xff]  }
 0x207   : > { %13844 = vmatprep.subr.bf16.mxu1 %v15216_v13 }
 0x208   : > { %13823 = vmatpush3.bf16.msra.mxu0 %v15215_v12 }
 0x209   : > { %13824 = vmatprep.subr.bf16.mxu0 %v15218_v15  ;;  %v15263_v15 = vld [vmem:[%s15840_s28 + $0x1078] sm:$0xff]  }
 0x20a   : > { %13845 = vmatpush3.bf16.msra.mxu1 %v15217_v14  ;;  %v15262_v14 = vld [vmem:[%s15840_s28 + $0x10b0] sm:$0xff]  }
 0x20b   : > { %13846 = vmatprep.subr.bf16.mxu1 %v15220_v17 }
 0x20c   : > { %13825 = vmatpush3.bf16.msra.mxu0 %v15219_v16 }
 0x20d   : > { %13826 = vmatprep.subr.bf16.mxu0 %v15222_v19 }
 0x20e   : > { %v13524_v24 = vpop.f32.mrb[32].mxu0  ;;  %13847 = vmatpush3.bf16.msra.mxu1 %v15221_v18 }
 0x20f   : > { %v13525_v26 = vpop.f32.mrb[33].mxu0  ;;  %13848 = vmatprep.subr.bf16.mxu1 %v15224_v21  ;;  %v411_v21 = vld [vmem:[%s15835_s24 + $0x40] sm:$0xff] }
 0x210   : > { %v13526_v28 = vadd.f32 %v13525_v26, %v13524_v24  ;;  %v13527_v29 = vpop.f32.mrb[34].mxu0  ;;  %v13546_v30 = vpop.f32.mrb[32].mxu1  ;;  %13827 = vmatpush3.bf16.msra.mxu0 %v15223_v20  ;;  %v15264_v20 = vld [vmem:[%s15840_s28 + $0x1038] sm:$0xff]   ;;  %v2786_v24 = vrot.slane %v411_v21, %v15878_v43  ;;  %v2779_v26 = vcombine.high %v411_v21, %v411_v21  ;;  %v15301_v21 = vld [vmem:[%s15840_s28 + $0x1200] sm:$0xff]  }
 0x211   : > { %v13528_v34 = vpop.f32.mrb[35].mxu0  ;;  %v13547_v35 = vpop.f32.mrb[33].mxu1  ;;  %13828 = vmatprep.subr.bf16.mxu0 %v15226_v23  ;;  %v15265_v23 = vld [vmem:[%s15840_s28 + $0x10f8] sm:$0xff]  }
 0x212   : > { %v9797_v36 = vadd.f32 %v13526_v28, %v16434_v55  ;;  %v13548_v31 = vadd.f32 %v13547_v35, %v13546_v30  ;;  %13849 = vmatpush3.bf16.msra.mxu1 %v15225_v22  ;;  %v13549_v38 = vpop.f32.mrb[34].mxu1  ;;  %v15243_v55 = vld [vmem:[%s15840_s28 + $0x1050] sm:$0xff]   ;;  %v15266_v28 = vld [vmem:[%s15840_s28 + $0x10b8] sm:$0xff]   ;;  %v2794_v29 = vcombine.high %v2786_v24, %v2786_v24  ;;  %v2802_v30 = vrot.slane %v2786_v24, %v15878_v43  ;;  %v15268_v34 = vld [vmem:[%s15840_s28 + $0x1100] sm:$0xff]  }
 0x213   : > { %13850 = vmatprep.subr.bf16.mxu1 %v15228_v27  ;;  %v13550_v40 = vpop.f32.mrb[35].mxu1 }
 0x214   : > { %v16474_v41 = vadd.f32 %v13548_v31, %v9797_v36  ;;  %13829 = vmatpush3.bf16.msra.mxu0 %v15227_v25  ;;  %v2816_v35 = vrot.slane %v2794_v29, %v15878_v43  ;;  %v15269_v36 = vld [vmem:[%s15840_s28 + $0x11c0] sm:$0xff]   ;;  %v15271_v40 = vld [vmem:[%s15840_s28 + $0x1148] sm:$0xff]   ;;  %v15308_v29 = vld [vmem:[%s15840_s28 + $0x1250] sm:$0xff]  }
 0x215   : > { %13830 = vmatprep.subr.bf16.mxu0 %v15230_v33  ;;  %v16519_v33 = vrot.slane %v2779_v26, %v15878_v43  ;;  %v15305_v26 = vld [vmem:[%s15840_s28 + $0x1208] sm:$0xff]  }
 0x216   : > { %13851 = vmatpush3.bf16.msra.mxu1 %v15229_v32  ;;  %v15267_v32 = vld [vmem:[%s15840_s28 + $0x1140] sm:$0xff]   ;;  %v2826_v38 = vcombine.high %v2816_v35, %v2816_v35 }
 0x217   : > { %13852 = vmatprep.subr.bf16.mxu1 %v15232_v39  ;;  %v2795_v31 = vcombine.high %v16519_v33, %v16519_v33  ;;  %v2824_v39 = vcombine.high %v2802_v30, %v2802_v30 }
 0x218   : > { %13831 = vmatpush3.bf16.msra.mxu0 %v15231_v37  ;;  %v15270_v37 = vld [vmem:[%s15840_s28 + $0x1180] sm:$0xff]  }
 0x219   : > { %13860 = vmatprep.subr.bf16.mxu0 %v15235_v45 }
 0x21a   : > { %13853 = vmatpush3.bf16.msra.mxu1 %v15234_v42  ;;  %v15272_v42 = vld [vmem:[%s15840_s28 + $0x1108] sm:$0xff]  }
 0x21b   : > { %10355 = vmatmul.mubr.bf16.vlgmr.msra.gmra.mrb[60].mxu0 %v2760_v44  ;;  %13882 = vmatprep.subr.bf16.mxu1 %v15237_v47  ;;  %v15273_v44 = vld [vmem:[%s15840_s28 + $0x11c8] sm:$0xff]   ;;  %v15275_v47 = vld [vmem:[%s15840_s28 + $0x1150] sm:$0xff]  }
 0x21c   : > { %13861 = vmatpush3.bf16.msra.mxu0 %v15236_v46  ;;  %10434 = vmatprep.mubr.bf16.mxu0 %v2816_v35  ;;  %v15274_v46 = vld [vmem:[%s15840_s28 + $0x1188] sm:$0xff]   ;;  %v15313_v35 = vld [vmem:[%s15840_s28 + $0x1218] sm:$0xff]  }
 0x21d   : > { %10395 = vmatmul.mubr.bf16.vlgmr.msra.gmra.mrb[60].mxu1 %v2776_v49  ;;  %13862 = vmatprep.subr.bf16.mxu0 %v15239_v50  ;;  %v15277_v49 = vld [vmem:[%s15840_s28 + $0x11d0] sm:$0xff]  }
 0x21e   : > { %13883 = vmatpush3.bf16.msra.mxu1 %v15238_v48  ;;  %10474 = vmatprep.mubr.bf16.mxu1 %v2826_v38  ;;  %v15276_v48 = vld [vmem:[%s15840_s28 + $0x1110] sm:$0xff]   ;;  %v15317_v38 = vld [vmem:[%s15840_s28 + $0x1220] sm:$0xff]  }
 0x21f   : > { %13884 = vmatprep.subr.bf16.mxu1 %v15241_v53  ;;  %v15278_v50 = vld [vmem:[%s15840_s28 + $0x1190] sm:$0xff]   ;;  %v15280_v53 = vld [vmem:[%s15840_s28 + $0x1118] sm:$0xff]  }
 0x220   : > { %13863 = vmatpush3.bf16.msra.mxu0 %v15240_v51  ;;  %v15279_v51 = vld [vmem:[%s15840_s28 + $0x1158] sm:$0xff]  }
 0x221   : > { %13864 = vmatprep.subr.bf16.mxu0 %v15243_v55  ;;  %v15282_v55 = vld [vmem:[%s15840_s28 + $0x1198] sm:$0xff]  }
 0x222   : > { %13885 = vmatpush3.bf16.msra.mxu1 %v15242_v54  ;;  %v15281_v54 = vld [vmem:[%s15840_s28 + $0x11d8] sm:$0xff]  }
 0x223   : > { %13886 = vmatprep.subr.bf16.mxu1 %v15245_v57  ;;  %v15284_v57 = vld [vmem:[%s15840_s28 + $0x1120] sm:$0xff]  }
 0x224   : > { %13865 = vmatpush3.bf16.msra.mxu0 %v15244_v56  ;;  %v15283_v56 = vld [vmem:[%s15840_s28 + $0x1160] sm:$0xff]  }
 0x225   : > { %13866 = vmatprep.subr.bf16.mxu0 %v15247_v59  ;;  %v15286_v59 = vld [vmem:[%s15840_s28 + $0x11a0] sm:$0xff]  }
 0x226   : > { %13887 = vmatpush3.bf16.msra.mxu1 %v15246_v58  ;;  %v15285_v58 = vld [vmem:[%s15840_s28 + $0x11e0] sm:$0xff]  }
 0x227   : > { %13888 = vmatprep.subr.bf16.mxu1 %v15249_v61  ;;  %v15288_v61 = vld [vmem:[%s15840_s28 + $0x1128] sm:$0xff]  }
 0x228   : > { %13867 = vmatpush3.bf16.msra.mxu0 %v15248_v60  ;;  %v15287_v60 = vld [vmem:[%s15840_s28 + $0x1168] sm:$0xff]  }
 0x229   : > { %13868 = vmatprep.subr.bf16.mxu0 %v15251_v62  ;;  %v15290_v62 = vld [vmem:[%s15840_s28 + $0x11a8] sm:$0xff]  }
 0x22a   : > { %13889 = vmatpush3.bf16.msra.mxu1 %v15250_v52  ;;  %v15289_v52 = vld [vmem:[%s15840_s28 + $0x11e8] sm:$0xff]  }
 0x22b   : > { %13890 = vmatprep.subr.bf16.mxu1 %v15253_v0 }
 0x22c   : > { %13869 = vmatpush3.bf16.msra.mxu0 %v15252_v63  ;;  %v15291_v63 = vld [vmem:[%s15840_s28 + $0x1170] sm:$0xff]  }
 0x22d   : > { %13870 = vmatprep.subr.bf16.mxu0 %v15255_v2 }
 0x22e   : > { %v13568_v7 = vpop.f32.mrb[36].mxu0  ;;  %13891 = vmatpush3.bf16.msra.mxu1 %v15254_v1  ;;  %v15292_v1 = vld [vmem:[%s15840_s28 + $0x1130] sm:$0xff]  }
 0x22f   : > { %v13569_v9 = vpop.f32.mrb[37].mxu0  ;;  %13892 = vmatprep.subr.bf16.mxu1 %v15257_v4 }
 0x230   : > { %v13570_v11 = vadd.f32 %v13569_v9, %v13568_v7  ;;  %v13571_v12 = vpop.f32.mrb[38].mxu0  ;;  %v13590_v13 = vpop.f32.mrb[36].mxu1  ;;  %13871 = vmatpush3.bf16.msra.mxu0 %v15256_v3  ;;  %v15293_v3 = vld [vmem:[%s15840_s28 + $0x11f0] sm:$0xff]  }
 0x231   : > { %v13572_v16 = vpop.f32.mrb[39].mxu0  ;;  %v13591_v17 = vpop.f32.mrb[37].mxu1  ;;  %13872 = vmatprep.subr.bf16.mxu0 %v15259_v6  ;;  %v15294_v7 = vld [vmem:[%s15840_s28 + $0x11b0] sm:$0xff]  }
 0x232   : > { %v9877_v18 = vadd.f32 %v13570_v11, %v16474_v41  ;;  %v13592_v19 = vadd.f32 %v13591_v17, %v13590_v13  ;;  %13893 = vmatpush3.bf16.msra.mxu1 %v15258_v5  ;;  %v13593_v22 = vpop.f32.mrb[38].mxu1  ;;  %v2823_v41 = vrot.slane %v2795_v31, %v15878_v43  ;;  %v15296_v13 = vld [vmem:[%s15840_s28 + $0x1138] sm:$0xff]  }
 0x233   : > { %13894 = vmatprep.subr.bf16.mxu1 %v15261_v10  ;;  %v13594_v25 = vpop.f32.mrb[39].mxu1  ;;  %v15302_v22 = vld [vmem:[%s15840_s28 + $0x12c0] sm:$0xff]   ;;  %v15315_v31 = vld [vmem:[%s15840_s28 + $0x1298] sm:$0xff]  }
 0x234   : > { %v16513_v27 = vadd.f32 %v13592_v19, %v9877_v18  ;;  %13873 = vmatpush3.bf16.msra.mxu0 %v15260_v8  ;;  %v2827_v45 = vcombine.high %v2823_v41, %v2823_v41  ;;  %v15295_v8 = vld [vmem:[%s15840_s28 + $0x1178] sm:$0xff]   ;;  %v2809_v19 = vrot.slane %v16519_v33, %v15878_v43  ;;  %v15304_v25 = vld [vmem:[%s15840_s28 + $0x1248] sm:$0xff]   ;;  %v15311_v33 = vld [vmem:[%s15840_s28 + $0x1290] sm:$0xff]  }
 0x235   : > { %13874 = vmatprep.subr.bf16.mxu0 %v15263_v15  ;;  %v15297_v15 = vld [vmem:[%s15840_s28 + $0x11f8] sm:$0xff]  }
 0x236   : > { %13895 = vmatpush3.bf16.msra.mxu1 %v15262_v14  ;;  %v15299_v18 = vld [vmem:[%s15840_s28 + $0x11b8] sm:$0xff]   ;;  %v2825_v24 = vcombine.high %v2809_v19, %v2809_v19 }
 0x237   : > { %13896 = vmatprep.subr.bf16.mxu1 %v15265_v23  ;;  %v15303_v23 = vld [vmem:[%s15840_s28 + $0x1280] sm:$0xff]  }
 0x238   : > { %13875 = vmatpush3.bf16.msra.mxu0 %v15264_v20  ;;  %v15300_v20 = vld [vmem:[%s15840_s28 + $0x1240] sm:$0xff]  }
 0x239   : > { %13904 = vmatprep.subr.bf16.mxu0 %v15267_v32  ;;  %v15310_v32 = vld [vmem:[%s15840_s28 + $0x12d0] sm:$0xff]  }
 0x23a   : > { %13897 = vmatpush3.bf16.msra.mxu1 %v15266_v28  ;;  %v15307_v28 = vld [vmem:[%s15840_s28 + $0x1288] sm:$0xff]  }
 0x23b   : > { %10435 = vmatmul.mubr.bf16.vlgmr.msra.gmra.mrb[64].mxu0 %v2802_v30  ;;  %13926 = vmatprep.subr.bf16.mxu1 %v15269_v36  ;;  %v15309_v30 = vld [vmem:[%s15840_s28 + $0x1210] sm:$0xff]   ;;  %v15314_v36 = vld [vmem:[%s15840_s28 + $0x12d8] sm:$0xff]  }
 0x23c   : > { %13905 = vmatpush3.bf16.msra.mxu0 %v15268_v34  ;;  %10514 = vmatprep.mubr.bf16.mxu0 %v2823_v41  ;;  %v15312_v34 = vld [vmem:[%s15840_s28 + $0x1258] sm:$0xff]   ;;  %v15320_v41 = vld [vmem:[%s15840_s28 + $0x1268] sm:$0xff]  }
 0x23d   : > { %10475 = vmatmul.mubr.bf16.vlgmr.msra.gmra.mrb[64].mxu1 %v2824_v39  ;;  %13906 = vmatprep.subr.bf16.mxu0 %v15271_v40  ;;  %v15318_v39 = vld [vmem:[%s15840_s28 + $0x12e0] sm:$0xff]  }
 0x23e   : > { %13927 = vmatpush3.bf16.msra.mxu1 %v15270_v37  ;;  %10554 = vmatprep.mubr.bf16.mxu1 %v2827_v45  ;;  %v15316_v37 = vld [vmem:[%s15840_s28 + $0x1260] sm:$0xff]   ;;  %v15323_v45 = vld [vmem:[%s15840_s28 + $0x12a8] sm:$0xff]  }
 0x23f   : > { %13928 = vmatprep.subr.bf16.mxu1 %v15273_v44  ;;  %v15319_v40 = vld [vmem:[%s15840_s28 + $0x12a0] sm:$0xff]   ;;  %v15322_v44 = vld [vmem:[%s15840_s28 + $0x12e8] sm:$0xff]  }
 0x240   : > { %13907 = vmatpush3.bf16.msra.mxu0 %v15272_v42  ;;  %v15321_v42 = vld [vmem:[%s15840_s28 + $0x1228] sm:$0xff]  }
 0x241   : > { %13908 = vmatprep.subr.bf16.mxu0 %v15275_v47 }
 0x242   : > { %13929 = vmatpush3.bf16.msra.mxu1 %v15274_v46  ;;  %v15324_v46 = vld [vmem:[%s15840_s28 + $0x1270] sm:$0xff]  }
 0x243   : > { %13930 = vmatprep.subr.bf16.mxu1 %v15277_v49 }
 0x244   : > { %13909 = vmatpush3.bf16.msra.mxu0 %v15276_v48  ;;  %v15325_v48 = vld [vmem:[%s15840_s28 + $0x1230] sm:$0xff]  }
 0x245   : > { %13910 = vmatprep.subr.bf16.mxu0 %v15279_v51 }
 0x246   : > { %13931 = vmatpush3.bf16.msra.mxu1 %v15278_v50  ;;  %v15326_v50 = vld [vmem:[%s15840_s28 + $0x12f0] sm:$0xff]  }
 0x247   : > { %13932 = vmatprep.subr.bf16.mxu1 %v15281_v54 }
 0x248   : > { %13911 = vmatpush3.bf16.msra.mxu0 %v15280_v53 }
 0x249   : > { %13912 = vmatprep.subr.bf16.mxu0 %v15283_v56  ;;  %v15328_v56 = vld [vmem:[%s15840_s28 + $0x1278] sm:$0xff]  }
 0x24a   : > { %13933 = vmatpush3.bf16.msra.mxu1 %v15282_v55  ;;  %v15327_v55 = vld [vmem:[%s15840_s28 + $0x12b0] sm:$0xff]  }
 0x24b   : > { %13934 = vmatprep.subr.bf16.mxu1 %v15285_v58 }
 0x24c   : > { %13913 = vmatpush3.bf16.msra.mxu0 %v15284_v57 }
 0x24d   : > { %13914 = vmatprep.subr.bf16.mxu0 %v15287_v60 }
 0x24e   : > { %v13612_v0 = vpop.f32.mrb[40].mxu0  ;;  %13935 = vmatpush3.bf16.msra.mxu1 %v15286_v59 }
 0x24f   : > { %v13613_v2 = vpop.f32.mrb[41].mxu0  ;;  %13936 = vmatprep.subr.bf16.mxu1 %v15289_v52  ;;  %v15330_v52 = vld [vmem:[%s15840_s28 + $0x12f8] sm:$0xff]  }
 0x250   : > { %v13614_v4 = vadd.f32 %v13613_v2, %v13612_v0  ;;  %v13615_v5 = vpop.f32.mrb[42].mxu0  ;;  %v13634_v6 = vpop.f32.mrb[40].mxu1  ;;  %13915 = vmatpush3.bf16.msra.mxu0 %v15288_v61  ;;  %v15329_v61 = vld [vmem:[%s15840_s28 + $0x1238] sm:$0xff]  }
 0x251   : > { %v13616_v9 = vpop.f32.mrb[43].mxu0  ;;  %v13635_v10 = vpop.f32.mrb[41].mxu1  ;;  %13916 = vmatprep.subr.bf16.mxu0 %v15291_v63  ;;  %v412_v63 = vld [vmem:[%s15835_s24 + $0x48] sm:$0xff]  ;;  %v15332_v5 = vld [vmem:[%s15840_s28 + $0x1340] sm:$0xff]  }
 0x252   : > { %v9957_v11 = vadd.f32 %v13614_v4, %v16513_v27  ;;  %v13636_v12 = vadd.f32 %v13635_v10, %v13634_v6  ;;  %13937 = vmatpush3.bf16.msra.mxu1 %v15290_v62  ;;  %v13637_v14 = vpop.f32.mrb[42].mxu1  ;;  %v15306_v27 = vld [vmem:[%s15840_s28 + $0x12c8] sm:$0xff]   ;;  %v2835_v2 = vrot.slane %v412_v63, %v15878_v43  ;;  %v2828_v4 = vcombine.high %v412_v63, %v412_v63  ;;  %v15334_v10 = vld [vmem:[%s15840_s28 + $0x13c0] sm:$0xff]  }
 0x253   : > { %13938 = vmatprep.subr.bf16.mxu1 %v15293_v3  ;;  %v13638_v16 = vpop.f32.mrb[43].mxu1  ;;  %v15331_v3 = vld [vmem:[%s15840_s28 + $0x12b8] sm:$0xff]   ;;  %v15368_v63 = vld [vmem:[%s15840_s28 + $0x1480] sm:$0xff]  }
 0x254   : > { %v16556_v17 = vadd.f32 %v13636_v12, %v9957_v11  ;;  %13917 = vmatpush3.bf16.msra.mxu0 %v15292_v1  ;;  %v2843_v6 = vcombine.high %v2835_v2, %v2835_v2  ;;  %v16602_v9 = vrot.slane %v2828_v4, %v15878_v43  ;;  %v15335_v12 = vld [vmem:[%s15840_s28 + $0x1380] sm:$0xff]   ;;  %v15372_v4 = vld [vmem:[%s15840_s28 + $0x1488] sm:$0xff]  }
 0x255   : > { %13918 = vmatprep.subr.bf16.mxu0 %v15295_v8  ;;  %v15333_v8 = vld [vmem:[%s15840_s28 + $0x1300] sm:$0xff]  }
 0x256   : > { %13939 = vmatpush3.bf16.msra.mxu1 %v15294_v7  ;;  %v2851_v7 = vrot.slane %v2835_v2, %v15878_v43  ;;  %v2865_v11 = vrot.slane %v2843_v6, %v15878_v43  ;;  %v15370_v2 = vld [vmem:[%s15840_s28 + $0x1408] sm:$0xff]   ;;  %v15374_v6 = vld [vmem:[%s15840_s28 + $0x1410] sm:$0xff]  }
 0x257   : > { %13940 = vmatprep.subr.bf16.mxu1 %v15297_v15  ;;  %v15336_v15 = vld [vmem:[%s15840_s28 + $0x1348] sm:$0xff]  }
 0x258   : > { %13919 = vmatpush3.bf16.msra.mxu0 %v15296_v13  ;;  %v2844_v13 = vcombine.high %v16602_v9, %v16602_v9  ;;  %v2873_v14 = vcombine.high %v2851_v7, %v2851_v7  ;;  %v2875_v16 = vcombine.high %v2865_v11, %v2865_v11 }
 0x259   : > { %13948 = vmatprep.subr.bf16.mxu0 %v15300_v20  ;;  %v15339_v20 = vld [vmem:[%s15840_s28 + $0x1388] sm:$0xff]  }
 0x25a   : > { %13941 = vmatpush3.bf16.msra.mxu1 %v15299_v18  ;;  %v2872_v18 = vrot.slane %v2844_v13, %v15878_v43  ;;  %v15381_v13 = vld [vmem:[%s15840_s28 + $0x1460] sm:$0xff]  }
 0x25b   : > { %10515 = vmatmul.mubr.bf16.vlgmr.msra.gmra.mrb[68].mxu0 %v2809_v19  ;;  %13970 = vmatprep.subr.bf16.mxu1 %v15302_v22  ;;  %v15338_v19 = vld [vmem:[%s15840_s28 + $0x13c8] sm:$0xff]   ;;  %v15340_v22 = vld [vmem:[%s15840_s28 + $0x1350] sm:$0xff]  }
 0x25c   : > { %13949 = vmatpush3.bf16.msra.mxu0 %v15301_v21  ;;  %10594 = vmatprep.mubr.bf16.mxu0 %v2865_v11  ;;  %v2876_v21 = vcombine.high %v2872_v18, %v2872_v18  ;;  %v15379_v11 = vld [vmem:[%s15840_s28 + $0x14d8] sm:$0xff]  }
 0x25d   : > { %10555 = vmatmul.mubr.bf16.vlgmr.msra.gmra.mrb[68].mxu1 %v2825_v24  ;;  %13950 = vmatprep.subr.bf16.mxu0 %v15304_v25  ;;  %v15342_v24 = vld [vmem:[%s15840_s28 + $0x13d0] sm:$0xff]  }
 0x25e   : > { %13971 = vmatpush3.bf16.msra.mxu1 %v15303_v23  ;;  %10634 = vmatprep.mubr.bf16.mxu1 %v2875_v16  ;;  %v15341_v23 = vld [vmem:[%s15840_s28 + $0x1310] sm:$0xff]   ;;  %v15384_v16 = vld [vmem:[%s15840_s28 + $0x14a0] sm:$0xff]  }
 0x25f   : > { %13972 = vmatprep.subr.bf16.mxu1 %v15306_v27  ;;  %v15343_v25 = vld [vmem:[%s15840_s28 + $0x1390] sm:$0xff]   ;;  %v15345_v27 = vld [vmem:[%s15840_s28 + $0x1318] sm:$0xff]  }
 0x260   : > { %13951 = vmatpush3.bf16.msra.mxu0 %v15305_v26  ;;  %v15344_v26 = vld [vmem:[%s15840_s28 + $0x1358] sm:$0xff]  }
 0x261   : > { %13952 = vmatprep.subr.bf16.mxu0 %v15308_v29  ;;  %v15347_v29 = vld [vmem:[%s15840_s28 + $0x1398] sm:$0xff]  }
 0x262   : > { %13973 = vmatpush3.bf16.msra.mxu1 %v15307_v28  ;;  %v15346_v28 = vld [vmem:[%s15840_s28 + $0x13d8] sm:$0xff]  }
 0x263   : > { %13974 = vmatprep.subr.bf16.mxu1 %v15310_v32  ;;  %v15349_v32 = vld [vmem:[%s15840_s28 + $0x1320] sm:$0xff]  }
 0x264   : > { %13953 = vmatpush3.bf16.msra.mxu0 %v15309_v30  ;;  %v15348_v30 = vld [vmem:[%s15840_s28 + $0x1360] sm:$0xff]  }
 0x265   : > { %13954 = vmatprep.subr.bf16.mxu0 %v15312_v34  ;;  %v15351_v34 = vld [vmem:[%s15840_s28 + $0x13a0] sm:$0xff]  }
 0x266   : > { %13975 = vmatpush3.bf16.msra.mxu1 %v15311_v33  ;;  %v15350_v33 = vld [vmem:[%s15840_s28 + $0x13e0] sm:$0xff]  }
 0x267   : > { %13976 = vmatprep.subr.bf16.mxu1 %v15314_v36  ;;  %v15353_v36 = vld [vmem:[%s15840_s28 + $0x1328] sm:$0xff]  }
 0x268   : > { %13955 = vmatpush3.bf16.msra.mxu0 %v15313_v35  ;;  %v15352_v35 = vld [vmem:[%s15840_s28 + $0x1368] sm:$0xff]  }
 0x269   : > { %13956 = vmatprep.subr.bf16.mxu0 %v15316_v37  ;;  %v15355_v37 = vld [vmem:[%s15840_s28 + $0x13a8] sm:$0xff]  }
 0x26a   : > { %13977 = vmatpush3.bf16.msra.mxu1 %v15315_v31  ;;  %v15354_v31 = vld [vmem:[%s15840_s28 + $0x13e8] sm:$0xff]  }
 0x26b   : > { %13978 = vmatprep.subr.bf16.mxu1 %v15318_v39 }
 0x26c   : > { %13957 = vmatpush3.bf16.msra.mxu0 %v15317_v38  ;;  %v15356_v38 = vld [vmem:[%s15840_s28 + $0x1370] sm:$0xff]  }
 0x26d   : > { %13958 = vmatprep.subr.bf16.mxu0 %v15320_v41 }
 0x26e   : > { %v13656_v47 = vpop.f32.mrb[44].mxu0  ;;  %13979 = vmatpush3.bf16.msra.mxu1 %v15319_v40  ;;  %v15357_v40 = vld [vmem:[%s15840_s28 + $0x1330] sm:$0xff]  }
 0x26f   : > { %v13657_v49 = vpop.f32.mrb[45].mxu0  ;;  %13980 = vmatprep.subr.bf16.mxu1 %v15322_v44 }
 0x270   : > { %v13658_v51 = vadd.f32 %v13657_v49, %v13656_v47  ;;  %v13659_v53 = vpop.f32.mrb[46].mxu0  ;;  %v13678_v54 = vpop.f32.mrb[44].mxu1  ;;  %13959 = vmatpush3.bf16.msra.mxu0 %v15321_v42  ;;  %v15358_v42 = vld [vmem:[%s15840_s28 + $0x13f0] sm:$0xff]  }
 0x271   : > { %v13660_v57 = vpop.f32.mrb[47].mxu0  ;;  %v13679_v58 = vpop.f32.mrb[45].mxu1  ;;  %13960 = vmatprep.subr.bf16.mxu0 %v15324_v46  ;;  %v15359_v47 = vld [vmem:[%s15840_s28 + $0x13b0] sm:$0xff]  }
 0x272   : > { %v10037_v59 = vadd.f32 %v13658_v51, %v16556_v17  ;;  %v13680_v60 = vadd.f32 %v13679_v58, %v13678_v54  ;;  %13981 = vmatpush3.bf16.msra.mxu1 %v15323_v45  ;;  %v13681_v62 = vpop.f32.mrb[46].mxu1  ;;  %v15337_v17 = vld [vmem:[%s15840_s28 + $0x1308] sm:$0xff]   ;;  %v15361_v54 = vld [vmem:[%s15840_s28 + $0x1338] sm:$0xff]  }
 0x273   : > { %13982 = vmatprep.subr.bf16.mxu1 %v15326_v50  ;;  %v13682_v0 = vpop.f32.mrb[47].mxu1  ;;  %v15367_v62 = vld [vmem:[%s15840_s28 + $0x14c0] sm:$0xff]  }
 0x274   : > { %v16594_v1 = vadd.f32 %v13680_v60, %v10037_v59  ;;  %13961 = vmatpush3.bf16.msra.mxu0 %v15325_v48  ;;  %v15360_v48 = vld [vmem:[%s15840_s28 + $0x1378] sm:$0xff]   ;;  %v2858_v60 = vrot.slane %v16602_v9, %v15878_v43 }
 0x275   : > { %13962 = vmatprep.subr.bf16.mxu0 %v15328_v56  ;;  %v15362_v56 = vld [vmem:[%s15840_s28 + $0x13f8] sm:$0xff]  }
 0x276   : > { %13983 = vmatpush3.bf16.msra.mxu1 %v15327_v55  ;;  %v15364_v59 = vld [vmem:[%s15840_s28 + $0x13b8] sm:$0xff]   ;;  %v2874_v0 = vcombine.high %v2858_v60, %v2858_v60 }
 0x277   : > { %13984 = vmatprep.subr.bf16.mxu1 %v15330_v52  ;;  %v15366_v52 = vld [vmem:[%s15840_s28 + $0x1400] sm:$0xff]   ;;  %v15377_v9 = vld [vmem:[%s15840_s28 + $0x1458] sm:$0xff]  }
 0x278   : > { %13963 = vmatpush3.bf16.msra.mxu0 %v15329_v61  ;;  %v15365_v61 = vld [vmem:[%s15840_s28 + $0x1440] sm:$0xff]  }
 0x279   : > { %13992 = vmatprep.subr.bf16.mxu0 %v15332_v5  ;;  %v15373_v5 = vld [vmem:[%s15840_s28 + $0x1450] sm:$0xff]  }
 0x27a   : > { %13985 = vmatpush3.bf16.msra.mxu1 %v15331_v3  ;;  %v15371_v3 = vld [vmem:[%s15840_s28 + $0x14c8] sm:$0xff]  }
 0x27b   : > { %10595 = vmatmul.mubr.bf16.vlgmr.msra.gmra.mrb[72].mxu0 %v2851_v7  ;;  %14014 = vmatprep.subr.bf16.mxu1 %v15334_v10  ;;  %v15375_v7 = vld [vmem:[%s15840_s28 + $0x14d0] sm:$0xff]   ;;  %v15378_v10 = vld [vmem:[%s15840_s28 + $0x1418] sm:$0xff]  }
 0x27c   : > { %13993 = vmatpush3.bf16.msra.mxu0 %v15333_v8  ;;  %10674 = vmatprep.mubr.bf16.mxu0 %v2872_v18  ;;  %v15376_v8 = vld [vmem:[%s15840_s28 + $0x1490] sm:$0xff]   ;;  %v15386_v18 = vld [vmem:[%s15840_s28 + $0x1428] sm:$0xff]  }
 0x27d   : > { %10635 = vmatmul.mubr.bf16.vlgmr.msra.gmra.mrb[72].mxu1 %v2873_v14  ;;  %13994 = vmatprep.subr.bf16.mxu0 %v15336_v15  ;;  %v15382_v14 = vld [vmem:[%s15840_s28 + $0x1420] sm:$0xff]  }
 0x27e   : > { %14015 = vmatpush3.bf16.msra.mxu1 %v15335_v12  ;;  %10714 = vmatprep.mubr.bf16.mxu1 %v2876_v21  ;;  %v15380_v12 = vld [vmem:[%s15840_s28 + $0x1498] sm:$0xff]   ;;  %v15383_v15 = vld [vmem:[%s15840_s28 + $0x14e0] sm:$0xff]   ;;  %v15389_v21 = vld [vmem:[%s15840_s28 + $0x1470] sm:$0xff]  }
 0x27f   : > { %14016 = vmatprep.subr.bf16.mxu1 %v15338_v19  ;;  %v15387_v19 = vld [vmem:[%s15840_s28 + $0x14e8] sm:$0xff]  }
 0x280   : > { %13995 = vmatpush3.bf16.msra.mxu0 %v15337_v17  ;;  %v15385_v17 = vld [vmem:[%s15840_s28 + $0x1468] sm:$0xff]  }
 0x281   : > { %13996 = vmatprep.subr.bf16.mxu0 %v15340_v22 }
 0x282   : > { %14017 = vmatpush3.bf16.msra.mxu1 %v15339_v20  ;;  %v15388_v20 = vld [vmem:[%s15840_s28 + $0x14a8] sm:$0xff]  }
 0x283   : > { %14018 = vmatprep.subr.bf16.mxu1 %v15342_v24 }
 0x284   : > { %13997 = vmatpush3.bf16.msra.mxu0 %v15341_v23  ;;  %v15390_v23 = vld [vmem:[%s15840_s28 + $0x1430] sm:$0xff]  }
 0x285   : > { %13998 = vmatprep.subr.bf16.mxu0 %v15344_v26 }
 0x286   : > { %14019 = vmatpush3.bf16.msra.mxu1 %v15343_v25  ;;  %v15391_v25 = vld [vmem:[%s15840_s28 + $0x14f0] sm:$0xff]  }
 0x287   : > { %14020 = vmatprep.subr.bf16.mxu1 %v15346_v28 }
 0x288   : > { %13999 = vmatpush3.bf16.msra.mxu0 %v15345_v27 }
 0x289   : > { %14000 = vmatprep.subr.bf16.mxu0 %v15348_v30  ;;  %v15393_v30 = vld [vmem:[%s15840_s28 + $0x1478] sm:$0xff]  }
 0x28a   : > { %14021 = vmatpush3.bf16.msra.mxu1 %v15347_v29  ;;  %v15392_v29 = vld [vmem:[%s15840_s28 + $0x14b0] sm:$0xff]  }
 0x28b   : > { %14022 = vmatprep.subr.bf16.mxu1 %v15350_v33 }
 0x28c   : > { %14001 = vmatpush3.bf16.msra.mxu0 %v15349_v32 }
 0x28d   : > { %14002 = vmatprep.subr.bf16.mxu0 %v15352_v35 }
 0x28e   : > { %v13700_v39 = vpop.f32.mrb[48].mxu0  ;;  %14023 = vmatpush3.bf16.msra.mxu1 %v15351_v34 }
 0x28f   : > { %v13701_v41 = vpop.f32.mrb[49].mxu0  ;;  %14024 = vmatprep.subr.bf16.mxu1 %v15354_v31 }
 0x290   : > { %v13702_v44 = vadd.f32 %v13701_v41, %v13700_v39  ;;  %v13703_v45 = vpop.f32.mrb[50].mxu0  ;;  %v13722_v46 = vpop.f32.mrb[48].mxu1  ;;  %14003 = vmatpush3.bf16.msra.mxu0 %v15353_v36  ;;  %v15394_v36 = vld [vmem:[%s15840_s28 + $0x1438] sm:$0xff]  }
 0x291   : > { %v13704_v49 = vpop.f32.mrb[51].mxu0  ;;  %v13723_v50 = vpop.f32.mrb[49].mxu1  ;;  %14004 = vmatprep.subr.bf16.mxu0 %v15356_v38  ;;  %v15397_v45 = vld [vmem:[%s15840_s28 + $0x1540] sm:$0xff]  }
 0x292   : > { %v10117_v51 = vadd.f32 %v13702_v44, %v16594_v1  ;;  %v13724_v53 = vadd.f32 %v13723_v50, %v13722_v46  ;;  %14025 = vmatpush3.bf16.msra.mxu1 %v15355_v37  ;;  %v13725_v55 = vpop.f32.mrb[50].mxu1  ;;  %v15369_v1 = vld [vmem:[%s15840_s28 + $0x1448] sm:$0xff]   ;;  %v15395_v37 = vld [vmem:[%s15840_s28 + $0x14f8] sm:$0xff]   ;;  %v15399_v49 = vld [vmem:[%s15840_s28 + $0x15c0] sm:$0xff]  }
 0x293   : > { %14026 = vmatprep.subr.bf16.mxu1 %v15358_v42  ;;  %v13726_v57 = vpop.f32.mrb[51].mxu1  ;;  %v15396_v42 = vld [vmem:[%s15840_s28 + $0x14b8] sm:$0xff]   ;;  %v15401_v55 = vld [vmem:[%s15840_s28 + $0x1548] sm:$0xff]  }
 0x294   : > { %v16638_v58 = vadd.f32 %v13724_v53, %v10117_v51  ;;  %14005 = vmatpush3.bf16.msra.mxu0 %v15357_v40  ;;  %v413_v40 = vld [vmem:[%s15835_s24 + $0x50] sm:$0xff]  ;;  %v15398_v51 = vld [vmem:[%s15840_s28 + $0x1500] sm:$0xff]  }
 0x295   : > { %14006 = vmatprep.subr.bf16.mxu0 %v15360_v48  ;;  %v2884_v41 = vrot.slane %v413_v40, %v15878_v43  ;;  %v2877_v44 = vcombine.high %v413_v40, %v413_v40  ;;  %v15400_v57 = vld [vmem:[%s15840_s28 + $0x1580] sm:$0xff]  }
 0x296   : > { %14027 = vmatpush3.bf16.msra.mxu1 %v15359_v47  ;;  %v15433_v40 = vld [vmem:[%s15840_s28 + $0x1680] sm:$0xff]  }
 0x297   : > { %14028 = vmatprep.subr.bf16.mxu1 %v15362_v56  ;;  %v2892_v46 = vcombine.high %v2884_v41, %v2884_v41  ;;  %v2900_v47 = vrot.slane %v2884_v41, %v15878_v43  ;;  %v16683_v48 = vrot.slane %v2877_v44, %v15878_v43  ;;  %v15436_v41 = vld [vmem:[%s15840_s28 + $0x16c8] sm:$0xff]   ;;  %v15438_v44 = vld [vmem:[%s15840_s28 + $0x1650] sm:$0xff]  }
 0x298   : > { %14007 = vmatpush3.bf16.msra.mxu0 %v15361_v54 }
 0x299   : > { %14036 = vmatprep.subr.bf16.mxu0 %v15365_v61  ;;  %v2914_v50 = vrot.slane %v2892_v46, %v15878_v43  ;;  %v2893_v53 = vcombine.high %v16683_v48, %v16683_v48  ;;  %v2922_v54 = vcombine.high %v2900_v47, %v2900_v47  ;;  %v15440_v46 = vld [vmem:[%s15840_s28 + $0x16d0] sm:$0xff]  }
 0x29a   : > { %14029 = vmatpush3.bf16.msra.mxu1 %v15364_v59  ;;  %v15403_v59 = vld [vmem:[%s15840_s28 + $0x15c8] sm:$0xff]  }
 0x29b   : > { %10675 = vmatmul.mubr.bf16.vlgmr.msra.gmra.mrb[76].mxu0 %v2858_v60  ;;  %14058 = vmatprep.subr.bf16.mxu1 %v15367_v62  ;;  %v2924_v56 = vcombine.high %v2914_v50, %v2914_v50  ;;  %v15402_v60 = vld [vmem:[%s15840_s28 + $0x1508] sm:$0xff]  }
 0x29c   : > { %14037 = vmatpush3.bf16.msra.mxu0 %v15366_v52  ;;  %10754 = vmatprep.mubr.bf16.mxu0 %v2914_v50  ;;  %v15405_v52 = vld [vmem:[%s15840_s28 + $0x1550] sm:$0xff]   ;;  %v15404_v62 = vld [vmem:[%s15840_s28 + $0x1588] sm:$0xff]   ;;  %v15444_v50 = vld [vmem:[%s15840_s28 + $0x16d8] sm:$0xff]  }
 0x29d   : > { %10715 = vmatmul.mubr.bf16.vlgmr.msra.gmra.mrb[76].mxu1 %v2874_v0  ;;  %14038 = vmatprep.subr.bf16.mxu0 %v15369_v1  ;;  %v15406_v0 = vld [vmem:[%s15840_s28 + $0x1510] sm:$0xff]   ;;  %v15409_v1 = vld [vmem:[%s15840_s28 + $0x1558] sm:$0xff]  }
 0x29e   : > { %14059 = vmatpush3.bf16.msra.mxu1 %v15368_v63  ;;  %10794 = vmatprep.mubr.bf16.mxu1 %v2924_v56  ;;  %v15407_v63 = vld [vmem:[%s15840_s28 + $0x15d0] sm:$0xff]   ;;  %v15447_v56 = vld [vmem:[%s15840_s28 + $0x1620] sm:$0xff]  }
 0x29f   : > { %14060 = vmatprep.subr.bf16.mxu1 %v15371_v3  ;;  %v15411_v3 = vld [vmem:[%s15840_s28 + $0x15d8] sm:$0xff]  }
 0x2a0   : > { %14039 = vmatpush3.bf16.msra.mxu0 %v15370_v2  ;;  %v15408_v2 = vld [vmem:[%s15840_s28 + $0x1590] sm:$0xff]  }
 0x2a1   : > { %14040 = vmatprep.subr.bf16.mxu0 %v15373_v5  ;;  %v15413_v5 = vld [vmem:[%s15840_s28 + $0x1560] sm:$0xff]  }
 0x2a2   : > { %14061 = vmatpush3.bf16.msra.mxu1 %v15372_v4  ;;  %v15410_v4 = vld [vmem:[%s15840_s28 + $0x1518] sm:$0xff]  }
 0x2a3   : > { %14062 = vmatprep.subr.bf16.mxu1 %v15375_v7  ;;  %v15415_v7 = vld [vmem:[%s15840_s28 + $0x15e0] sm:$0xff]  }
 0x2a4   : > { %14041 = vmatpush3.bf16.msra.mxu0 %v15374_v6  ;;  %v15412_v6 = vld [vmem:[%s15840_s28 + $0x1598] sm:$0xff]  }
 0x2a5   : > { %14042 = vmatprep.subr.bf16.mxu0 %v15377_v9  ;;  %v15417_v9 = vld [vmem:[%s15840_s28 + $0x1568] sm:$0xff]  }
 0x2a6   : > { %14063 = vmatpush3.bf16.msra.mxu1 %v15376_v8  ;;  %v15414_v8 = vld [vmem:[%s15840_s28 + $0x1520] sm:$0xff]  }
 0x2a7   : > { %14064 = vmatprep.subr.bf16.mxu1 %v15379_v11  ;;  %v15419_v11 = vld [vmem:[%s15840_s28 + $0x15e8] sm:$0xff]  }
 0x2a8   : > { %14043 = vmatpush3.bf16.msra.mxu0 %v15378_v10  ;;  %v15416_v10 = vld [vmem:[%s15840_s28 + $0x15a0] sm:$0xff]  }
 0x2a9   : > { %14044 = vmatprep.subr.bf16.mxu0 %v15381_v13 }
 0x2aa   : > { %14065 = vmatpush3.bf16.msra.mxu1 %v15380_v12  ;;  %v15418_v12 = vld [vmem:[%s15840_s28 + $0x1528] sm:$0xff]  }
 0x2ab   : > { %14066 = vmatprep.subr.bf16.mxu1 %v15383_v15 }
 0x2ac   : > { %14045 = vmatpush3.bf16.msra.mxu0 %v15382_v14  ;;  %v15421_v14 = vld [vmem:[%s15840_s28 + $0x1570] sm:$0xff]  }
 0x2ad   : > { %14046 = vmatprep.subr.bf16.mxu0 %v15385_v17 }
 0x2ae   : > { %v13744_v22 = vpop.f32.mrb[52].mxu0  ;;  %14067 = vmatpush3.bf16.msra.mxu1 %v15384_v16  ;;  %v15420_v16 = vld [vmem:[%s15840_s28 + $0x15a8] sm:$0xff]  }
 0x2af   : > { %v13745_v24 = vpop.f32.mrb[53].mxu0  ;;  %14068 = vmatprep.subr.bf16.mxu1 %v15387_v19 }
 0x2b0   : > { %v13746_v26 = vadd.f32 %v13745_v24, %v13744_v22  ;;  %v13747_v27 = vpop.f32.mrb[54].mxu0  ;;  %v13766_v28 = vpop.f32.mrb[52].mxu1  ;;  %14047 = vmatpush3.bf16.msra.mxu0 %v15386_v18 }
 0x2b1   : > { %v13748_v32 = vpop.f32.mrb[55].mxu0  ;;  %v13767_v33 = vpop.f32.mrb[53].mxu1  ;;  %14048 = vmatprep.subr.bf16.mxu0 %v15389_v21  ;;  %v15423_v21 = vld [vmem:[%s15840_s28 + $0x15f0] sm:$0xff]  }
 0x2b2   : > { %v10197_v34 = vadd.f32 %v13746_v26, %v16638_v58  ;;  %v13768_v35 = vadd.f32 %v13767_v33, %v13766_v28  ;;  %14069 = vmatpush3.bf16.msra.mxu1 %v15388_v20  ;;  %v13769_v31 = vpop.f32.mrb[54].mxu1  ;;  %v2921_v58 = vrot.slane %v2893_v53, %v15878_v43  ;;  %v15422_v20 = vld [vmem:[%s15840_s28 + $0x1530] sm:$0xff]   ;;  %v15425_v26 = vld [vmem:[%s15840_s28 + $0x1578] sm:$0xff]   ;;  %v15446_v53 = vld [vmem:[%s15840_s28 + $0x1660] sm:$0xff]  }
 0x2b3   : > { %14070 = vmatprep.subr.bf16.mxu1 %v15391_v25  ;;  %v13770_v38 = vpop.f32.mrb[55].mxu1  ;;  %v15424_v28 = vld [vmem:[%s15840_s28 + $0x15b0] sm:$0xff]   ;;  %v15427_v32 = vld [vmem:[%s15840_s28 + $0x15f8] sm:$0xff]   ;;  %v15432_v31 = vld [vmem:[%s15840_s28 + $0x16c0] sm:$0xff]  }
 0x2b4   : > { %v16675_v39 = vadd.f32 %v13768_v35, %v10197_v34  ;;  %14049 = vmatpush3.bf16.msra.mxu0 %v15390_v23  ;;  %v2925_v61 = vcombine.high %v2921_v58, %v2921_v58  ;;  %v15426_v33 = vld [vmem:[%s15840_s28 + $0x1538] sm:$0xff]   ;;  %v2907_v34 = vrot.slane %v16683_v48, %v15878_v43  ;;  %v15430_v35 = vld [vmem:[%s15840_s28 + $0x1640] sm:$0xff]  }
 0x2b5   : > { %14050 = vmatprep.subr.bf16.mxu0 %v15393_v30  ;;  %v15442_v48 = vld [vmem:[%s15840_s28 + $0x1658] sm:$0xff]  }
 0x2b6   : > { %14071 = vmatpush3.bf16.msra.mxu1 %v15392_v29  ;;  %v2923_v38 = vcombine.high %v2907_v34, %v2907_v34 }
 0x2b7   : > { %14072 = vmatprep.subr.bf16.mxu1 %v15395_v37  ;;  %v15431_v37 = vld [vmem:[%s15840_s28 + $0x1600] sm:$0xff]  }
 0x2b8   : > { %14051 = vmatpush3.bf16.msra.mxu0 %v15394_v36  ;;  %v15429_v36 = vld [vmem:[%s15840_s28 + $0x15b8] sm:$0xff]  }
 0x2b9   : > { %14080 = vmatprep.subr.bf16.mxu0 %v15397_v45  ;;  %v15437_v45 = vld [vmem:[%s15840_s28 + $0x1688] sm:$0xff]  }
 0x2ba   : > { %14073 = vmatpush3.bf16.msra.mxu1 %v15396_v42  ;;  %v15435_v42 = vld [vmem:[%s15840_s28 + $0x1608] sm:$0xff]  }
 0x2bb   : > { %14102 = vmatprep.subr.bf16.mxu1 %v15399_v49  ;;  %10755 = vmatmul.mubr.bf16.vlgmr.msra.gmra.mrb[80].mxu0 %v2900_v47  ;;  %v15439_v47 = vld [vmem:[%s15840_s28 + $0x1610] sm:$0xff]  }
 0x2bc   : > { %14081 = vmatpush3.bf16.msra.mxu0 %v15398_v51  ;;  %10834 = vmatprep.mubr.bf16.mxu0 %v2921_v58  ;;  %v15441_v49 = vld [vmem:[%s15840_s28 + $0x1690] sm:$0xff]   ;;  %v15443_v51 = vld [vmem:[%s15840_s28 + $0x1618] sm:$0xff]   ;;  %v15449_v58 = vld [vmem:[%s15840_s28 + $0x16a0] sm:$0xff]  }
 0x2bd   : > { %10795 = vmatmul.mubr.bf16.vlgmr.msra.gmra.mrb[80].mxu1 %v2922_v54  ;;  %14082 = vmatprep.subr.bf16.mxu0 %v15401_v55  ;;  %v15445_v54 = vld [vmem:[%s15840_s28 + $0x1698] sm:$0xff]   ;;  %v15448_v55 = vld [vmem:[%s15840_s28 + $0x16e0] sm:$0xff]  }
 0x2be   : > { %14103 = vmatpush3.bf16.msra.mxu1 %v15400_v57  ;;  %10874 = vmatprep.mubr.bf16.mxu1 %v2925_v61  ;;  %v15450_v57 = vld [vmem:[%s15840_s28 + $0x1668] sm:$0xff]  }
 0x2bf   : > { %14104 = vmatprep.subr.bf16.mxu1 %v15403_v59  ;;  %v15452_v59 = vld [vmem:[%s15840_s28 + $0x16e8] sm:$0xff]  }
 0x2c0   : > { %14083 = vmatpush3.bf16.msra.mxu0 %v15402_v60  ;;  %v15451_v60 = vld [vmem:[%s15840_s28 + $0x1628] sm:$0xff]  }
 0x2c1   : > { %14084 = vmatprep.subr.bf16.mxu0 %v15405_v52  ;;  %v15454_v52 = vld [vmem:[%s15840_s28 + $0x1670] sm:$0xff]  }
 0x2c2   : > { %14105 = vmatpush3.bf16.msra.mxu1 %v15404_v62 }
 0x2c3   : > { %14106 = vmatprep.subr.bf16.mxu1 %v15407_v63  ;;  %v15453_v63 = vld [vmem:[%s15840_s28 + $0x16a8] sm:$0xff]  }
 0x2c4   : > { %14085 = vmatpush3.bf16.msra.mxu0 %v15406_v0 }
 0x2c5   : > { %14086 = vmatprep.subr.bf16.mxu0 %v15409_v1 }
 0x2c6   : > { %14107 = vmatpush3.bf16.msra.mxu1 %v15408_v2 }
 0x2c7   : > { %14108 = vmatprep.subr.bf16.mxu1 %v15411_v3  ;;  %v15455_v3 = vld [vmem:[%s15840_s28 + $0x1630] sm:$0xff]  }
 0x2c8   : > { %14087 = vmatpush3.bf16.msra.mxu0 %v15410_v4  ;;  %v15456_v4 = vld [vmem:[%s15840_s28 + $0x16f0] sm:$0xff]  }
 0x2c9   : > { %14088 = vmatprep.subr.bf16.mxu0 %v15413_v5 }
 0x2ca   : > { %14109 = vmatpush3.bf16.msra.mxu1 %v15412_v6 }
 0x2cb   : > { %14110 = vmatprep.subr.bf16.mxu1 %v15415_v7  ;;  %v15457_v7 = vld [vmem:[%s15840_s28 + $0x16b0] sm:$0xff]  }
 0x2cc   : > { %14089 = vmatpush3.bf16.msra.mxu0 %v15414_v8 }
 0x2cd   : > { %14090 = vmatprep.subr.bf16.mxu0 %v15417_v9 }
 0x2ce   : > { %v13788_v13 = vpop.f32.mrb[56].mxu0  ;;  %14111 = vmatpush3.bf16.msra.mxu1 %v15416_v10  ;;  %v15458_v10 = vld [vmem:[%s15840_s28 + $0x1678] sm:$0xff]  }
 0x2cf   : > { %v13789_v15 = vpop.f32.mrb[57].mxu0  ;;  %14112 = vmatprep.subr.bf16.mxu1 %v15419_v11 }
 0x2d0   : > { %v13790_v17 = vadd.f32 %v13789_v15, %v13788_v13  ;;  %v13791_v18 = vpop.f32.mrb[58].mxu0  ;;  %v13810_v19 = vpop.f32.mrb[56].mxu1  ;;  %14091 = vmatpush3.bf16.msra.mxu0 %v15418_v12  ;;  %v15459_v12 = vld [vmem:[%s15840_s28 + $0x1638] sm:$0xff]  }
 0x2d1   : > { %v13792_v22 = vpop.f32.mrb[59].mxu0  ;;  %v13811_v23 = vpop.f32.mrb[57].mxu1  ;;  %14092 = vmatprep.subr.bf16.mxu0 %v15421_v14  ;;  %v15460_v15 = vld [vmem:[%s15840_s28 + $0x16f8] sm:$0xff]  }
 0x2d2   : > { %v10277_v24 = vadd.f32 %v13790_v17, %v16675_v39  ;;  %v13812_v25 = vadd.f32 %v13811_v23, %v13810_v19  ;;  %v13813_v27 = vpop.f32.mrb[58].mxu1  ;;  %14113 = vmatpush3.bf16.msra.mxu1 %v15420_v16  ;;  %v15434_v39 = vld [vmem:[%s15840_s28 + $0x1648] sm:$0xff]   ;;  %v414_v16 = vld [vmem:[%s15835_s24 + $0x58] sm:$0xff]  ;;  %v15463_v23 = vld [vmem:[%s15840_s28 + $0x1700] sm:$0xff]  }
 0x2d3   : > { %v13814_v29 = vpop.f32.mrb[59].mxu1  ;;  %14114 = vmatprep.subr.bf16.mxu1 %v15423_v21  ;;  %v2933_v17 = vrot.slane %v414_v16, %v15878_v43  ;;  %v15461_v18 = vld [vmem:[%s15840_s28 + $0x16b8] sm:$0xff]   ;;  %v2926_v19 = vcombine.high %v414_v16, %v414_v16  ;;  %v15465_v27 = vld [vmem:[%s15840_s28 + $0x1780] sm:$0xff]   ;;  %v15499_v16 = vld [vmem:[%s15840_s28 + $0x1848] sm:$0xff]  }
 0x2d4   : > { %v16718_v30 = vadd.f32 %v13812_v25, %v10277_v24  ;;  %14093 = vmatpush3.bf16.msra.mxu0 %v15422_v20  ;;  %v15462_v20 = vld [vmem:[%s15840_s28 + $0x1740] sm:$0xff]  }
 0x2d5   : > { %14094 = vmatprep.subr.bf16.mxu0 %v15425_v26  ;;  %v2941_v21 = vcombine.high %v2933_v17, %v2933_v17  ;;  %v2949_v22 = vrot.slane %v2933_v17, %v15878_v43  ;;  %v16766_v24 = vrot.slane %v2926_v19, %v15878_v43  ;;  %v15464_v25 = vld [vmem:[%s15840_s28 + $0x17c0] sm:$0xff]   ;;  %v15500_v17 = vld [vmem:[%s15840_s28 + $0x1808] sm:$0xff]  }
 0x2d6   : > { %14115 = vmatpush3.bf16.msra.mxu1 %v15424_v28  ;;  %v15502_v19 = vld [vmem:[%s15840_s28 + $0x1888] sm:$0xff]  }
 0x2d7   : > { %14116 = vmatprep.subr.bf16.mxu1 %v15427_v32  ;;  %v2963_v26 = vrot.slane %v2941_v21, %v15878_v43  ;;  %v2942_v28 = vcombine.high %v16766_v24, %v16766_v24  ;;  %v2971_v29 = vcombine.high %v2949_v22, %v2949_v22  ;;  %v15504_v21 = vld [vmem:[%s15840_s28 + $0x1810] sm:$0xff]  }
 0x2d8   : > { %14095 = vmatpush3.bf16.msra.mxu0 %v15426_v33  ;;  %v15467_v33 = vld [vmem:[%s15840_s28 + $0x1708] sm:$0xff]  }
 0x2d9   : > { %14124 = vmatprep.subr.bf16.mxu0 %v15430_v35  ;;  %v2973_v32 = vcombine.high %v2963_v26, %v2963_v26  ;;  %v15468_v35 = vld [vmem:[%s15840_s28 + $0x17c8] sm:$0xff]  }
 0x2da   : > { %14117 = vmatpush3.bf16.msra.mxu1 %v15429_v36  ;;  %v15469_v36 = vld [vmem:[%s15840_s28 + $0x1788] sm:$0xff]  }
 0x2db   : > { %10835 = vmatmul.mubr.bf16.vlgmr.msra.gmra.mrb[84].mxu0 %v2907_v34  ;;  %14146 = vmatprep.subr.bf16.mxu1 %v15432_v31  ;;  %v2970_v34 = vrot.slane %v2942_v28, %v15878_v43  ;;  %v15511_v28 = vld [vmem:[%s15840_s28 + $0x1860] sm:$0xff]  }
 0x2dc   : > { %14125 = vmatpush3.bf16.msra.mxu0 %v15431_v37  ;;  %10914 = vmatprep.mubr.bf16.mxu0 %v2963_v26  ;;  %v15470_v37 = vld [vmem:[%s15840_s28 + $0x1750] sm:$0xff]   ;;  %v15509_v26 = vld [vmem:[%s15840_s28 + $0x18d8] sm:$0xff]  }
 0x2dd   : > { %10875 = vmatmul.mubr.bf16.vlgmr.msra.gmra.mrb[84].mxu1 %v2923_v38  ;;  %14126 = vmatprep.subr.bf16.mxu0 %v15434_v39  ;;  %v2974_v31 = vcombine.high %v2970_v34, %v2970_v34  ;;  %v15471_v38 = vld [vmem:[%s15840_s28 + $0x1710] sm:$0xff]  }
 0x2de   : > { %14147 = vmatpush3.bf16.msra.mxu1 %v15433_v40  ;;  %10954 = vmatprep.mubr.bf16.mxu1 %v2973_v32  ;;  %v15472_v39 = vld [vmem:[%s15840_s28 + $0x17d0] sm:$0xff]   ;;  %v15514_v32 = vld [vmem:[%s15840_s28 + $0x18a0] sm:$0xff]  }
 0x2df   : > { %14148 = vmatprep.subr.bf16.mxu1 %v15436_v41  ;;  %v15473_v40 = vld [vmem:[%s15840_s28 + $0x1790] sm:$0xff]   ;;  %v15474_v41 = vld [vmem:[%s15840_s28 + $0x1758] sm:$0xff]  }
 0x2e0   : > { %14127 = vmatpush3.bf16.msra.mxu0 %v15435_v42  ;;  %v15475_v42 = vld [vmem:[%s15840_s28 + $0x1718] sm:$0xff]  }
 0x2e1   : > { %14128 = vmatprep.subr.bf16.mxu0 %v15438_v44  ;;  %v15476_v44 = vld [vmem:[%s15840_s28 + $0x17d8] sm:$0xff]  }
 0x2e2   : > { %14149 = vmatpush3.bf16.msra.mxu1 %v15437_v45  ;;  %v15477_v45 = vld [vmem:[%s15840_s28 + $0x1798] sm:$0xff]  }
 0x2e3   : > { %14150 = vmatprep.subr.bf16.mxu1 %v15440_v46  ;;  %v15478_v46 = vld [vmem:[%s15840_s28 + $0x1760] sm:$0xff]  }
 0x2e4   : > { %14129 = vmatpush3.bf16.msra.mxu0 %v15439_v47  ;;  %v15479_v47 = vld [vmem:[%s15840_s28 + $0x1720] sm:$0xff]  }
 0x2e5   : > { %14130 = vmatprep.subr.bf16.mxu0 %v15442_v48  ;;  %v15480_v48 = vld [vmem:[%s15840_s28 + $0x17e0] sm:$0xff]  }
 0x2e6   : > { %14151 = vmatpush3.bf16.msra.mxu1 %v15441_v49  ;;  %v15481_v49 = vld [vmem:[%s15840_s28 + $0x17a0] sm:$0xff]  }
 0x2e7   : > { %14152 = vmatprep.subr.bf16.mxu1 %v15444_v50  ;;  %v15482_v50 = vld [vmem:[%s15840_s28 + $0x1768] sm:$0xff]  }
 0x2e8   : > { %14131 = vmatpush3.bf16.msra.mxu0 %v15443_v51  ;;  %v15483_v51 = vld [vmem:[%s15840_s28 + $0x1728] sm:$0xff]  }
 0x2e9   : > { %14132 = vmatprep.subr.bf16.mxu0 %v15446_v53  ;;  %v15484_v53 = vld [vmem:[%s15840_s28 + $0x17e8] sm:$0xff]  }
 0x2ea   : > { %14153 = vmatpush3.bf16.msra.mxu1 %v15445_v54 }
 0x2eb   : > { %14154 = vmatprep.subr.bf16.mxu1 %v15448_v55  ;;  %v15485_v55 = vld [vmem:[%s15840_s28 + $0x17a8] sm:$0xff]  }
 0x2ec   : > { %14133 = vmatpush3.bf16.msra.mxu0 %v15447_v56 }
 0x2ed   : > { %14134 = vmatprep.subr.bf16.mxu0 %v15450_v57  ;;  %v15486_v57 = vld [vmem:[%s15840_s28 + $0x1770] sm:$0xff]  }
 0x2ee   : > { %v13832_v61 = vpop.f32.mrb[60].mxu0  ;;  %14155 = vmatpush3.bf16.msra.mxu1 %v15449_v58 }
 0x2ef   : > { %v13833_v62 = vpop.f32.mrb[61].mxu0  ;;  %14156 = vmatprep.subr.bf16.mxu1 %v15452_v59 }
 0x2f0   : > { %v13834_v0 = vadd.f32 %v13833_v62, %v13832_v61  ;;  %v13835_v1 = vpop.f32.mrb[62].mxu0  ;;  %v13854_v2 = vpop.f32.mrb[60].mxu1  ;;  %14135 = vmatpush3.bf16.msra.mxu0 %v15451_v60  ;;  %v15487_v61 = vld [vmem:[%s15840_s28 + $0x1730] sm:$0xff]  }
 0x2f1   : > { %v13836_v5 = vpop.f32.mrb[63].mxu0  ;;  %v13855_v6 = vpop.f32.mrb[61].mxu1  ;;  %14136 = vmatprep.subr.bf16.mxu0 %v15454_v52  ;;  %v15488_v52 = vld [vmem:[%s15840_s28 + $0x17f0] sm:$0xff]  }
 0x2f2   : > { %v10357_v8 = vadd.f32 %v13834_v0, %v16718_v30  ;;  %v13856_v9 = vadd.f32 %v13855_v6, %v13854_v2  ;;  %v13857_v11 = vpop.f32.mrb[62].mxu1  ;;  %14157 = vmatpush3.bf16.msra.mxu1 %v15453_v63  ;;  %v15466_v30 = vld [vmem:[%s15840_s28 + $0x1748] sm:$0xff]   ;;  %v15489_v2 = vld [vmem:[%s15840_s28 + $0x17b0] sm:$0xff]  }
 0x2f3   : > { %v13858_v13 = vpop.f32.mrb[63].mxu1  ;;  %14158 = vmatprep.subr.bf16.mxu1 %v15456_v4  ;;  %v15490_v4 = vld [vmem:[%s15840_s28 + $0x1778] sm:$0xff]   ;;  %v15495_v11 = vld [vmem:[%s15840_s28 + $0x1840] sm:$0xff]  }
 0x2f4   : > { %v16756_v14 = vadd.f32 %v13856_v9, %v10357_v8  ;;  %14137 = vmatpush3.bf16.msra.mxu0 %v15455_v3  ;;  %v15492_v8 = vld [vmem:[%s15840_s28 + $0x17f8] sm:$0xff]   ;;  %v15497_v13 = vld [vmem:[%s15840_s28 + $0x18c0] sm:$0xff]  }
 0x2f5   : > { %14138 = vmatprep.subr.bf16.mxu0 %v15458_v10  ;;  %v15494_v9 = vld [vmem:[%s15840_s28 + $0x17b8] sm:$0xff]   ;;  %v2956_v10 = vrot.slane %v16766_v24, %v15878_v43 }
 0x2f6   : > { %14159 = vmatpush3.bf16.msra.mxu1 %v15457_v7  ;;  %v15491_v7 = vld [vmem:[%s15840_s28 + $0x1738] sm:$0xff]  }
 0x2f7   : > { %14160 = vmatprep.subr.bf16.mxu1 %v15460_v15  ;;  %v2972_v15 = vcombine.high %v2956_v10, %v2956_v10  ;;  %v15507_v24 = vld [vmem:[%s15840_s28 + $0x1858] sm:$0xff]  }
 0x2f8   : > { %14139 = vmatpush3.bf16.msra.mxu0 %v15459_v12  ;;  %v15496_v12 = vld [vmem:[%s15840_s28 + $0x1800] sm:$0xff]  }
 0x2f9   : > { %14168 = vmatprep.subr.bf16.mxu0 %v15462_v20  ;;  %v15503_v20 = vld [vmem:[%s15840_s28 + $0x1850] sm:$0xff]  }
 0x2fa   : > { %14161 = vmatpush3.bf16.msra.mxu1 %v15461_v18  ;;  %v15501_v18 = vld [vmem:[%s15840_s28 + $0x18c8] sm:$0xff]  }
 0x2fb   : > { %14190 = vmatprep.subr.bf16.mxu1 %v15464_v25  ;;  %10915 = vmatmul.mubr.bf16.vlgmr.msra.gmra.mrb[88].mxu0 %v2949_v22  ;;  %v15505_v22 = vld [vmem:[%s15840_s28 + $0x18d0] sm:$0xff]   ;;  %v15508_v25 = vld [vmem:[%s15840_s28 + $0x1818] sm:$0xff]  }
 0x2fc   : > { %14169 = vmatpush3.bf16.msra.mxu0 %v15463_v23  ;;  %10994 = vmatprep.mubr.bf16.mxu0 %v2970_v34  ;;  %v15506_v23 = vld [vmem:[%s15840_s28 + $0x1890] sm:$0xff]   ;;  %v15516_v34 = vld [vmem:[%s15840_s28 + $0x1828] sm:$0xff]  }
 0x2fd   : > { %10955 = vmatmul.mubr.bf16.vlgmr.msra.gmra.mrb[88].mxu1 %v2971_v29  ;;  %14170 = vmatprep.subr.bf16.mxu0 %v15466_v30  ;;  %v15512_v29 = vld [vmem:[%s15840_s28 + $0x1820] sm:$0xff]  }
 0x2fe   : > { %14191 = vmatpush3.bf16.msra.mxu1 %v15465_v27  ;;  %11034 = vmatprep.mubr.bf16.mxu1 %v2974_v31  ;;  %v15510_v27 = vld [vmem:[%s15840_s28 + $0x1898] sm:$0xff]   ;;  %v15513_v30 = vld [vmem:[%s15840_s28 + $0x18e0] sm:$0xff]   ;;  %v15518_v31 = vld [vmem:[%s15840_s28 + $0x18a8] sm:$0xff]  }
 0x2ff   : > { %14192 = vmatprep.subr.bf16.mxu1 %v15468_v35  ;;  %v15517_v35 = vld [vmem:[%s15840_s28 + $0x18e8] sm:$0xff]  }
 0x300   : > { %14171 = vmatpush3.bf16.msra.mxu0 %v15467_v33  ;;  %v15515_v33 = vld [vmem:[%s15840_s28 + $0x1868] sm:$0xff]  }
 0x301   : > { %14172 = vmatprep.subr.bf16.mxu0 %v15470_v37 }
 0x302   : > { %14193 = vmatpush3.bf16.msra.mxu1 %v15469_v36 }
 0x303   : > { %14194 = vmatprep.subr.bf16.mxu1 %v15472_v39 }
 0x304   : > { %14173 = vmatpush3.bf16.msra.mxu0 %v15471_v38  ;;  %v15519_v38 = vld [vmem:[%s15840_s28 + $0x1870] sm:$0xff]  }
 0x305   : > { %14174 = vmatprep.subr.bf16.mxu0 %v15474_v41 }
 0x306   : > { %14195 = vmatpush3.bf16.msra.mxu1 %v15473_v40 }
 0x307   : > { %14196 = vmatprep.subr.bf16.mxu1 %v15476_v44  ;;  %v15521_v44 = vld [vmem:[%s15840_s28 + $0x18f0] sm:$0xff]  }
 0x308   : > { %14175 = vmatpush3.bf16.msra.mxu0 %v15475_v42  ;;  %v15520_v42 = vld [vmem:[%s15840_s28 + $0x1830] sm:$0xff]  }
 0x309   : > { %14176 = vmatprep.subr.bf16.mxu0 %v15478_v46 }
 0x30a   : > { %14197 = vmatpush3.bf16.msra.mxu1 %v15477_v45 }
 0x30b   : > { %14198 = vmatprep.subr.bf16.mxu1 %v15480_v48 }
 0x30c   : > { %14177 = vmatpush3.bf16.msra.mxu0 %v15479_v47 }
 0x30d   : > { %14178 = vmatprep.subr.bf16.mxu0 %v15482_v50 }
 0x30e   : > { %v13876_v54 = vpop.f32.mrb[64].mxu0  ;;  %14199 = vmatpush3.bf16.msra.mxu1 %v15481_v49  ;;  %v15522_v49 = vld [vmem:[%s15840_s28 + $0x18b0] sm:$0xff]  }
 0x30f   : > { %v13877_v56 = vpop.f32.mrb[65].mxu0  ;;  %14200 = vmatprep.subr.bf16.mxu1 %v15484_v53 }
 0x310   : > { %v13878_v58 = vadd.f32 %v13877_v56, %v13876_v54  ;;  %v13879_v59 = vpop.f32.mrb[66].mxu0  ;;  %v13898_v60 = vpop.f32.mrb[64].mxu1  ;;  %14179 = vmatpush3.bf16.msra.mxu0 %v15483_v51  ;;  %v15523_v51 = vld [vmem:[%s15840_s28 + $0x1878] sm:$0xff]  }
 0x311   : > { %v13880_v62 = vpop.f32.mrb[67].mxu0  ;;  %v13899_v63 = vpop.f32.mrb[65].mxu1  ;;  %14180 = vmatprep.subr.bf16.mxu0 %v15486_v57  ;;  %v15525_v56 = vld [vmem:[%s15840_s28 + $0x18f8] sm:$0xff]   ;;  %v415_v57 = vld [vmem:[%s15835_s24 + $0x60] sm:$0xff] }
 0x312   : > { %v10437_v0 = vadd.f32 %v13878_v58, %v16756_v14  ;;  %v13900_v1 = vadd.f32 %v13899_v63, %v13898_v60  ;;  %v13901_v3 = vpop.f32.mrb[66].mxu1  ;;  %14201 = vmatpush3.bf16.msra.mxu1 %v15485_v55  ;;  %v15498_v14 = vld [vmem:[%s15840_s28 + $0x1880] sm:$0xff]   ;;  %v15524_v55 = vld [vmem:[%s15840_s28 + $0x1838] sm:$0xff]   ;;  %v2982_v58 = vrot.slane %v415_v57, %v15878_v43  ;;  %v2975_v60 = vcombine.high %v415_v57, %v415_v57 }
 0x313   : > { %v13902_v5 = vpop.f32.mrb[67].mxu1  ;;  %14202 = vmatprep.subr.bf16.mxu1 %v15488_v52  ;;  %v15526_v59 = vld [vmem:[%s15840_s28 + $0x18b8] sm:$0xff]   ;;  %v15563_v57 = vld [vmem:[%s15840_s28 + $0x1a80] sm:$0xff]  }
 0x314   : > { %v16800_v6 = vadd.f32 %v13900_v1, %v10437_v0  ;;  %14181 = vmatpush3.bf16.msra.mxu0 %v15487_v61  ;;  %v15527_v61 = vld [vmem:[%s15840_s28 + $0x1940] sm:$0xff]   ;;  %v2990_v52 = vcombine.high %v2982_v58, %v2982_v58  ;;  %v2998_v62 = vrot.slane %v2982_v58, %v15878_v43  ;;  %v16847_v63 = vrot.slane %v2975_v60, %v15878_v43  ;;  %v15531_v5 = vld [vmem:[%s15840_s28 + $0x1948] sm:$0xff]   ;;  %v15568_v60 = vld [vmem:[%s15840_s28 + $0x1a50] sm:$0xff]  }
 0x315   : > { %14182 = vmatprep.subr.bf16.mxu0 %v15490_v4  ;;  %v15529_v0 = vld [vmem:[%s15840_s28 + $0x19c0] sm:$0xff]   ;;  %v15566_v58 = vld [vmem:[%s15840_s28 + $0x1ac8] sm:$0xff]  }
 0x316   : > { %14203 = vmatpush3.bf16.msra.mxu1 %v15489_v2  ;;  %v3012_v1 = vrot.slane %v2990_v52, %v15878_v43  ;;  %v15528_v2 = vld [vmem:[%s15840_s28 + $0x1900] sm:$0xff]   ;;  %v2991_v3 = vcombine.high %v16847_v63, %v16847_v63  ;;  %v3020_v4 = vcombine.high %v2998_v62, %v2998_v62  ;;  %v15570_v52 = vld [vmem:[%s15840_s28 + $0x1ad0] sm:$0xff]  }
 0x317   : > { %14204 = vmatprep.subr.bf16.mxu1 %v15492_v8 }
 0x318   : > { %14183 = vmatpush3.bf16.msra.mxu0 %v15491_v7  ;;  %v15530_v7 = vld [vmem:[%s15840_s28 + $0x1980] sm:$0xff]   ;;  %v3019_v8 = vrot.slane %v2991_v3, %v15878_v43 }
 0x319   : > { %14212 = vmatprep.subr.bf16.mxu0 %v15495_v11  ;;  %v15576_v3 = vld [vmem:[%s15840_s28 + $0x1a60] sm:$0xff]  }
 0x31a   : > { %14205 = vmatpush3.bf16.msra.mxu1 %v15494_v9  ;;  %v15533_v9 = vld [vmem:[%s15840_s28 + $0x19c8] sm:$0xff]   ;;  %v3023_v11 = vcombine.high %v3019_v8, %v3019_v8 }
 0x31b   : > { %10995 = vmatmul.mubr.bf16.vlgmr.msra.gmra.mrb[92].mxu0 %v2956_v10  ;;  %14234 = vmatprep.subr.bf16.mxu1 %v15497_v13  ;;  %v15532_v10 = vld [vmem:[%s15840_s28 + $0x1908] sm:$0xff]  }
 0x31c   : > { %14213 = vmatpush3.bf16.msra.mxu0 %v15496_v12  ;;  %11074 = vmatprep.mubr.bf16.mxu0 %v3012_v1  ;;  %v15535_v12 = vld [vmem:[%s15840_s28 + $0x1950] sm:$0xff]   ;;  %v15534_v13 = vld [vmem:[%s15840_s28 + $0x1988] sm:$0xff]  }
 0x31d   : > { %11035 = vmatmul.mubr.bf16.vlgmr.msra.gmra.mrb[92].mxu1 %v2972_v15  ;;  %14214 = vmatprep.subr.bf16.mxu0 %v15499_v16  ;;  %v15536_v15 = vld [vmem:[%s15840_s28 + $0x1910] sm:$0xff]   ;;  %v15539_v16 = vld [vmem:[%s15840_s28 + $0x1958] sm:$0xff]  }
 0x31e   : > { %14235 = vmatpush3.bf16.msra.mxu1 %v15498_v14  ;;  %v15537_v14 = vld [vmem:[%s15840_s28 + $0x19d0] sm:$0xff]  }
 0x31f   : > { %14236 = vmatprep.subr.bf16.mxu1 %v15501_v18  ;;  %v15541_v18 = vld [vmem:[%s15840_s28 + $0x19d8] sm:$0xff]  }
 0x320   : > { %14215 = vmatpush3.bf16.msra.mxu0 %v15500_v17  ;;  %v15538_v17 = vld [vmem:[%s15840_s28 + $0x1990] sm:$0xff]  }
 0x321   : > { %14216 = vmatprep.subr.bf16.mxu0 %v15503_v20  ;;  %v15543_v20 = vld [vmem:[%s15840_s28 + $0x1960] sm:$0xff]  }
 0x322   : > { %14237 = vmatpush3.bf16.msra.mxu1 %v15502_v19  ;;  %v15540_v19 = vld [vmem:[%s15840_s28 + $0x1918] sm:$0xff]  }
 0x323   : > { %14238 = vmatprep.subr.bf16.mxu1 %v15505_v22  ;;  %v15545_v22 = vld [vmem:[%s15840_s28 + $0x19e0] sm:$0xff]  }
 0x324   : > { %14217 = vmatpush3.bf16.msra.mxu0 %v15504_v21  ;;  %v15542_v21 = vld [vmem:[%s15840_s28 + $0x1998] sm:$0xff]  }
 0x325   : > { %14218 = vmatprep.subr.bf16.mxu0 %v15507_v24  ;;  %v15547_v24 = vld [vmem:[%s15840_s28 + $0x1968] sm:$0xff]  }
 0x326   : > { %14239 = vmatpush3.bf16.msra.mxu1 %v15506_v23  ;;  %v15544_v23 = vld [vmem:[%s15840_s28 + $0x1920] sm:$0xff]  }
 0x327   : > { %14240 = vmatprep.subr.bf16.mxu1 %v15509_v26 }
 0x328   : > { %14219 = vmatpush3.bf16.msra.mxu0 %v15508_v25  ;;  %v15546_v25 = vld [vmem:[%s15840_s28 + $0x19a0] sm:$0xff]  }
 0x329   : > { %14220 = vmatprep.subr.bf16.mxu0 %v15511_v28 }
 0x32a   : > { %14241 = vmatpush3.bf16.msra.mxu1 %v15510_v27  ;;  %v15549_v27 = vld [vmem:[%s15840_s28 + $0x19e8] sm:$0xff]  }
 0x32b   : > { %14242 = vmatprep.subr.bf16.mxu1 %v15513_v30 }
 0x32c   : > { %14221 = vmatpush3.bf16.msra.mxu0 %v15512_v29  ;;  %v15548_v29 = vld [vmem:[%s15840_s28 + $0x1928] sm:$0xff]  }
 0x32d   : > { %14222 = vmatprep.subr.bf16.mxu0 %v15515_v33 }
 0x32e   : > { %v13920_v36 = vpop.f32.mrb[68].mxu0  ;;  %14243 = vmatpush3.bf16.msra.mxu1 %v15514_v32 }
 0x32f   : > { %v13921_v37 = vpop.f32.mrb[69].mxu0  ;;  %14244 = vmatprep.subr.bf16.mxu1 %v15517_v35  ;;  %v15551_v35 = vld [vmem:[%s15840_s28 + $0x1970] sm:$0xff]  }
 0x330   : > { %v13922_v39 = vadd.f32 %v13921_v37, %v13920_v36  ;;  %v13923_v40 = vpop.f32.mrb[70].mxu0  ;;  %v13942_v41 = vpop.f32.mrb[68].mxu1  ;;  %14223 = vmatpush3.bf16.msra.mxu0 %v15516_v34  ;;  %v15550_v34 = vld [vmem:[%s15840_s28 + $0x19a8] sm:$0xff]  }
 0x331   : > { %v13924_v45 = vpop.f32.mrb[71].mxu0  ;;  %v13943_v46 = vpop.f32.mrb[69].mxu1  ;;  %14224 = vmatprep.subr.bf16.mxu0 %v15519_v38 }
 0x332   : > { %v10517_v47 = vadd.f32 %v13922_v39, %v16800_v6  ;;  %v13944_v48 = vadd.f32 %v13943_v46, %v13942_v41  ;;  %v13945_v50 = vpop.f32.mrb[70].mxu1  ;;  %14245 = vmatpush3.bf16.msra.mxu1 %v15518_v31  ;;  %v3022_v6 = vcombine.high %v3012_v1, %v3012_v1  ;;  %v15553_v39 = vld [vmem:[%s15840_s28 + $0x19f0] sm:$0xff]   ;;  %v15555_v45 = vld [vmem:[%s15840_s28 + $0x1978] sm:$0xff]  }
 0x333   : > { %v13946_v53 = vpop.f32.mrb[71].mxu1  ;;  %14246 = vmatprep.subr.bf16.mxu1 %v15521_v44  ;;  %v15552_v41 = vld [vmem:[%s15840_s28 + $0x1930] sm:$0xff]   ;;  %v15560_v50 = vld [vmem:[%s15840_s28 + $0x1a40] sm:$0xff]   ;;  %v15574_v1 = vld [vmem:[%s15840_s28 + $0x1ad8] sm:$0xff]  }
 0x334   : > { %v16837_v54 = vadd.f32 %v13944_v48, %v10517_v47  ;;  %14225 = vmatpush3.bf16.msra.mxu0 %v15520_v42  ;;  %11114 = vmatprep.mubr.bf16.mxu1 %v3022_v6  ;;  %v15554_v46 = vld [vmem:[%s15840_s28 + $0x19b0] sm:$0xff]   ;;  %v15557_v47 = vld [vmem:[%s15840_s28 + $0x19f8] sm:$0xff]   ;;  %v15562_v53 = vld [vmem:[%s15840_s28 + $0x1ac0] sm:$0xff]  }
 0x335   : > { %14226 = vmatprep.subr.bf16.mxu0 %v15523_v51  ;;  %v15556_v48 = vld [vmem:[%s15840_s28 + $0x1938] sm:$0xff]   ;;  %v15577_v6 = vld [vmem:[%s15840_s28 + $0x1a20] sm:$0xff]  }
 0x336   : > { %14247 = vmatpush3.bf16.msra.mxu1 %v15522_v49  ;;  %v3005_v49 = vrot.slane %v16847_v63, %v15878_v43  ;;  %v15559_v51 = vld [vmem:[%s15840_s28 + $0x19b8] sm:$0xff]  }
 0x337   : > { %14248 = vmatprep.subr.bf16.mxu1 %v15525_v56  ;;  %v15564_v56 = vld [vmem:[%s15840_s28 + $0x1a48] sm:$0xff]   ;;  %v15572_v63 = vld [vmem:[%s15840_s28 + $0x1a58] sm:$0xff]  }
 0x338   : > { %14227 = vmatpush3.bf16.msra.mxu0 %v15524_v55  ;;  %v3021_v55 = vcombine.high %v3005_v49, %v3005_v49 }
 0x339   : > { %14256 = vmatprep.subr.bf16.mxu0 %v15527_v61  ;;  %v15567_v61 = vld [vmem:[%s15840_s28 + $0x1a88] sm:$0xff]  }
 0x33a   : > { %14249 = vmatpush3.bf16.msra.mxu1 %v15526_v59  ;;  %v15565_v59 = vld [vmem:[%s15840_s28 + $0x1a08] sm:$0xff]  }
 0x33b   : > { %14278 = vmatprep.subr.bf16.mxu1 %v15529_v0  ;;  %11075 = vmatmul.mubr.bf16.vlgmr.msra.gmra.mrb[96].mxu0 %v2998_v62  ;;  %v15569_v62 = vld [vmem:[%s15840_s28 + $0x1a10] sm:$0xff]  }
 0x33c   : > { %14257 = vmatpush3.bf16.msra.mxu0 %v15528_v2  ;;  %11154 = vmatprep.mubr.bf16.mxu0 %v3019_v8  ;;  %v15571_v0 = vld [vmem:[%s15840_s28 + $0x1a90] sm:$0xff]   ;;  %v15573_v2 = vld [vmem:[%s15840_s28 + $0x1a18] sm:$0xff]   ;;  %v15579_v8 = vld [vmem:[%s15840_s28 + $0x1aa0] sm:$0xff]  }
 0x33d   : > { %11115 = vmatmul.mubr.bf16.vlgmr.msra.gmra.mrb[96].mxu1 %v3020_v4  ;;  %14258 = vmatprep.subr.bf16.mxu0 %v15531_v5  ;;  %v15575_v4 = vld [vmem:[%s15840_s28 + $0x1a98] sm:$0xff]   ;;  %v15578_v5 = vld [vmem:[%s15840_s28 + $0x1ae0] sm:$0xff]  }
 0x33e   : > { %14279 = vmatpush3.bf16.msra.mxu1 %v15530_v7  ;;  %11194 = vmatprep.mubr.bf16.mxu1 %v3023_v11  ;;  %v15580_v7 = vld [vmem:[%s15840_s28 + $0x1a68] sm:$0xff]  }
 0x33f   : > { %14280 = vmatprep.subr.bf16.mxu1 %v15533_v9 }
 0x340   : > { %14259 = vmatpush3.bf16.msra.mxu0 %v15532_v10  ;;  %v15582_v10 = vld [vmem:[%s15840_s28 + $0x1ae8] sm:$0xff]  }
 0x341   : > { %14260 = vmatprep.subr.bf16.mxu0 %v15535_v12  ;;  %v15581_v12 = vld [vmem:[%s15840_s28 + $0x1a28] sm:$0xff]  }
 0x342   : > { %14281 = vmatpush3.bf16.msra.mxu1 %v15534_v13 }
 0x343   : > { %14282 = vmatprep.subr.bf16.mxu1 %v15537_v14 }
 0x344   : > { %14261 = vmatpush3.bf16.msra.mxu0 %v15536_v15 }
 0x345   : > { %14262 = vmatprep.subr.bf16.mxu0 %v15539_v16  ;;  %v15583_v16 = vld [vmem:[%s15840_s28 + $0x1aa8] sm:$0xff]  }
 0x346   : > { %14283 = vmatpush3.bf16.msra.mxu1 %v15538_v17  ;;  %v15584_v17 = vld [vmem:[%s15840_s28 + $0x1a70] sm:$0xff]  }
 0x347   : > { %14284 = vmatprep.subr.bf16.mxu1 %v15541_v18 }
 0x348   : > { %14263 = vmatpush3.bf16.msra.mxu0 %v15540_v19 }
 0x349   : > { %14264 = vmatprep.subr.bf16.mxu0 %v15543_v20  ;;  %v15585_v20 = vld [vmem:[%s15840_s28 + $0x1a30] sm:$0xff]  }
 0x34a   : > { %14285 = vmatpush3.bf16.msra.mxu1 %v15542_v21 }
 0x34b   : > { %14286 = vmatprep.subr.bf16.mxu1 %v15545_v22 }
 0x34c   : > { %14265 = vmatpush3.bf16.msra.mxu0 %v15544_v23  ;;  %v15586_v23 = vld [vmem:[%s15840_s28 + $0x1af0] sm:$0xff]  }
 0x34d   : > { %14266 = vmatprep.subr.bf16.mxu0 %v15547_v24 }
 0x34e   : > { %v13964_v26 = vpop.f32.mrb[72].mxu0  ;;  %14287 = vmatpush3.bf16.msra.mxu1 %v15546_v25  ;;  %v15587_v25 = vld [vmem:[%s15840_s28 + $0x1ab0] sm:$0xff]  }
 0x34f   : > { %v13965_v28 = vpop.f32.mrb[73].mxu0  ;;  %14288 = vmatprep.subr.bf16.mxu1 %v15549_v27 }
 0x350   : > { %v13966_v30 = vadd.f32 %v13965_v28, %v13964_v26  ;;  %v13967_v32 = vpop.f32.mrb[74].mxu0  ;;  %v13986_v33 = vpop.f32.mrb[72].mxu1  ;;  %14267 = vmatpush3.bf16.msra.mxu0 %v15548_v29  ;;  %v15588_v28 = vld [vmem:[%s15840_s28 + $0x1a78] sm:$0xff]  }
 0x351   : > { %v13968_v36 = vpop.f32.mrb[75].mxu0  ;;  %v13987_v31 = vpop.f32.mrb[73].mxu1  ;;  %14268 = vmatprep.subr.bf16.mxu0 %v15551_v35  ;;  %v15589_v29 = vld [vmem:[%s15840_s28 + $0x1a38] sm:$0xff]   ;;  %v416_v32 = vld [vmem:[%s15835_s24 + $0x68] sm:$0xff] }
 0x352   : > { %v10597_v37 = vadd.f32 %v13966_v30, %v16837_v54  ;;  %v13988_v38 = vadd.f32 %v13987_v31, %v13986_v33  ;;  %v13989_v40 = vpop.f32.mrb[74].mxu1  ;;  %14289 = vmatpush3.bf16.msra.mxu1 %v15550_v34  ;;  %v15561_v54 = vld [vmem:[%s15840_s28 + $0x1a00] sm:$0xff]   ;;  %v15590_v30 = vld [vmem:[%s15840_s28 + $0x1af8] sm:$0xff]   ;;  %v3031_v33 = vrot.slane %v416_v32, %v15878_v43  ;;  %v3024_v35 = vcombine.high %v416_v32, %v416_v32 }
 0x353   : > { %v13990_v42 = vpop.f32.mrb[75].mxu1  ;;  %14290 = vmatprep.subr.bf16.mxu1 %v15553_v39  ;;  %v15591_v34 = vld [vmem:[%s15840_s28 + $0x1ab8] sm:$0xff]   ;;  %v15592_v36 = vld [vmem:[%s15840_s28 + $0x1b40] sm:$0xff]  }
 0x354   : > { %v16880_v44 = vadd.f32 %v13988_v38, %v10597_v37  ;;  %14269 = vmatpush3.bf16.msra.mxu0 %v15552_v41  ;;  %v3039_v31 = vcombine.high %v3031_v33, %v3031_v33  ;;  %v3047_v37 = vrot.slane %v3031_v33, %v15878_v43  ;;  %v16929_v38 = vrot.slane %v3024_v35, %v15878_v43  ;;  %v15594_v39 = vld [vmem:[%s15840_s28 + $0x1bc0] sm:$0xff]   ;;  %v15631_v33 = vld [vmem:[%s15840_s28 + $0x1cc8] sm:$0xff]   ;;  %v15633_v35 = vld [vmem:[%s15840_s28 + $0x1c50] sm:$0xff]  }
 0x355   : > { %14270 = vmatprep.subr.bf16.mxu0 %v15555_v45  ;;  %v15593_v41 = vld [vmem:[%s15840_s28 + $0x1b00] sm:$0xff]   ;;  %v15596_v45 = vld [vmem:[%s15840_s28 + $0x1b48] sm:$0xff]  }
 0x356   : > { %14291 = vmatpush3.bf16.msra.mxu1 %v15554_v46  ;;  %v3061_v40 = vrot.slane %v3039_v31, %v15878_v43  ;;  %v3040_v42 = vcombine.high %v16929_v38, %v16929_v38  ;;  %v15628_v32 = vld [vmem:[%s15840_s28 + $0x1c80] sm:$0xff]   ;;  %v15635_v31 = vld [vmem:[%s15840_s28 + $0x1cd0] sm:$0xff]  }
 0x357   : > { %14292 = vmatprep.subr.bf16.mxu1 %v15557_v47  ;;  %v15595_v47 = vld [vmem:[%s15840_s28 + $0x1b80] sm:$0xff]  }
 0x358   : > { %14271 = vmatpush3.bf16.msra.mxu0 %v15556_v48  ;;  %v3071_v46 = vcombine.high %v3061_v40, %v3061_v40  ;;  %v3068_v48 = vrot.slane %v3040_v42, %v15878_v43  ;;  %v15641_v42 = vld [vmem:[%s15840_s28 + $0x1c60] sm:$0xff]  }
 0x359   : > { %14300 = vmatprep.subr.bf16.mxu0 %v15560_v50  ;;  %v15597_v50 = vld [vmem:[%s15840_s28 + $0x1b08] sm:$0xff]  }
 0x35a   : > { %14293 = vmatpush3.bf16.msra.mxu1 %v15559_v51  ;;  %v3072_v51 = vcombine.high %v3068_v48, %v3068_v48 }
 0x35b   : > { %11155 = vmatmul.mubr.bf16.vlgmr.msra.gmra.mrb[100].mxu0 %v3005_v49  ;;  %14322 = vmatprep.subr.bf16.mxu1 %v15562_v53  ;;  %v15598_v49 = vld [vmem:[%s15840_s28 + $0x1bc8] sm:$0xff]   ;;  %v15600_v53 = vld [vmem:[%s15840_s28 + $0x1b50] sm:$0xff]  }
 0x35c   : > { %14301 = vmatpush3.bf16.msra.mxu0 %v15561_v54  ;;  %11234 = vmatprep.mubr.bf16.mxu0 %v3061_v40  ;;  %v15599_v54 = vld [vmem:[%s15840_s28 + $0x1b88] sm:$0xff]   ;;  %v15639_v40 = vld [vmem:[%s15840_s28 + $0x1cd8] sm:$0xff]  }
 0x35d   : > { %11195 = vmatmul.mubr.bf16.vlgmr.msra.gmra.mrb[100].mxu1 %v3021_v55  ;;  %14302 = vmatprep.subr.bf16.mxu0 %v15564_v56  ;;  %v15602_v55 = vld [vmem:[%s15840_s28 + $0x1bd0] sm:$0xff]  }
 0x35e   : > { %14323 = vmatpush3.bf16.msra.mxu1 %v15563_v57  ;;  %11274 = vmatprep.mubr.bf16.mxu1 %v3071_v46  ;;  %v15601_v56 = vld [vmem:[%s15840_s28 + $0x1b10] sm:$0xff]   ;;  %v15604_v57 = vld [vmem:[%s15840_s28 + $0x1b58] sm:$0xff]   ;;  %v15642_v46 = vld [vmem:[%s15840_s28 + $0x1c20] sm:$0xff]  }
 0x35f   : > { %14324 = vmatprep.subr.bf16.mxu1 %v15566_v58  ;;  %v15603_v58 = vld [vmem:[%s15840_s28 + $0x1b90] sm:$0xff]  }
 0x360   : > { %14303 = vmatpush3.bf16.msra.mxu0 %v15565_v59  ;;  %v15606_v59 = vld [vmem:[%s15840_s28 + $0x1bd8] sm:$0xff]  }
 0x361   : > { %14304 = vmatprep.subr.bf16.mxu0 %v15568_v60  ;;  %v15605_v60 = vld [vmem:[%s15840_s28 + $0x1b18] sm:$0xff]  }
 0x362   : > { %14325 = vmatpush3.bf16.msra.mxu1 %v15567_v61  ;;  %v15608_v61 = vld [vmem:[%s15840_s28 + $0x1b60] sm:$0xff]  }
 0x363   : > { %14326 = vmatprep.subr.bf16.mxu1 %v15570_v52  ;;  %v15607_v52 = vld [vmem:[%s15840_s28 + $0x1b98] sm:$0xff]  }
 0x364   : > { %14305 = vmatpush3.bf16.msra.mxu0 %v15569_v62  ;;  %v15610_v62 = vld [vmem:[%s15840_s28 + $0x1be0] sm:$0xff]  }
 0x365   : > { %14306 = vmatprep.subr.bf16.mxu0 %v15572_v63  ;;  %v15609_v63 = vld [vmem:[%s15840_s28 + $0x1b20] sm:$0xff]  }
 0x366   : > { %14327 = vmatpush3.bf16.msra.mxu1 %v15571_v0  ;;  %v15612_v0 = vld [vmem:[%s15840_s28 + $0x1b68] sm:$0xff]  }
 0x367   : > { %14328 = vmatprep.subr.bf16.mxu1 %v15574_v1  ;;  %v15611_v1 = vld [vmem:[%s15840_s28 + $0x1ba0] sm:$0xff]  }
 0x368   : > { %14307 = vmatpush3.bf16.msra.mxu0 %v15573_v2 }
 0x369   : > { %14308 = vmatprep.subr.bf16.mxu0 %v15576_v3  ;;  %v15614_v3 = vld [vmem:[%s15840_s28 + $0x1be8] sm:$0xff]  }
 0x36a   : > { %14329 = vmatpush3.bf16.msra.mxu1 %v15575_v4 }
 0x36b   : > { %14330 = vmatprep.subr.bf16.mxu1 %v15578_v5  ;;  %v15613_v5 = vld [vmem:[%s15840_s28 + $0x1b28] sm:$0xff]  }
 0x36c   : > { %14309 = vmatpush3.bf16.msra.mxu0 %v15577_v6 }
 0x36d   : > { %14310 = vmatprep.subr.bf16.mxu0 %v15580_v7 }
 0x36e   : > { %v14008_v9 = vpop.f32.mrb[76].mxu0  ;;  %14331 = vmatpush3.bf16.msra.mxu1 %v15579_v8 }
 0x36f   : > { %v14009_v11 = vpop.f32.mrb[77].mxu0  ;;  %14332 = vmatprep.subr.bf16.mxu1 %v15582_v10  ;;  %v15616_v10 = vld [vmem:[%s15840_s28 + $0x1b70] sm:$0xff]  }
 0x370   : > { %v14010_v13 = vadd.f32 %v14009_v11, %v14008_v9  ;;  %v14011_v14 = vpop.f32.mrb[78].mxu0  ;;  %v14030_v15 = vpop.f32.mrb[76].mxu1  ;;  %14311 = vmatpush3.bf16.msra.mxu0 %v15581_v12  ;;  %v15615_v9 = vld [vmem:[%s15840_s28 + $0x1ba8] sm:$0xff]  }
 0x371   : > { %v14012_v18 = vpop.f32.mrb[79].mxu0  ;;  %v14031_v19 = vpop.f32.mrb[77].mxu1  ;;  %14312 = vmatprep.subr.bf16.mxu0 %v15584_v17  ;;  %v15617_v17 = vld [vmem:[%s15840_s28 + $0x1b30] sm:$0xff]  }
 0x372   : > { %v10677_v21 = vadd.f32 %v14010_v13, %v16880_v44  ;;  %v14032_v22 = vadd.f32 %v14031_v19, %v14030_v15  ;;  %v14033_v24 = vpop.f32.mrb[78].mxu1  ;;  %14333 = vmatpush3.bf16.msra.mxu1 %v15583_v16  ;;  %v3069_v44 = vcombine.high %v3047_v37, %v3047_v37  ;;  %v15618_v15 = vld [vmem:[%s15840_s28 + $0x1bf0] sm:$0xff]  }
 0x373   : > { %v14034_v26 = vpop.f32.mrb[79].mxu1  ;;  %14334 = vmatprep.subr.bf16.mxu1 %v15586_v23  ;;  %v15621_v23 = vld [vmem:[%s15840_s28 + $0x1b38] sm:$0xff]   ;;  %v3054_v24 = vrot.slane %v16929_v38, %v15878_v43 }
 0x374   : > { %v16918_v27 = vadd.f32 %v14032_v22, %v10677_v21  ;;  %14313 = vmatpush3.bf16.msra.mxu0 %v15585_v20  ;;  %v15620_v20 = vld [vmem:[%s15840_s28 + $0x1b78] sm:$0xff]   ;;  %v15619_v21 = vld [vmem:[%s15840_s28 + $0x1bb0] sm:$0xff]  }
 0x375   : > { %14314 = vmatprep.subr.bf16.mxu0 %v15588_v28  ;;  %v15622_v22 = vld [vmem:[%s15840_s28 + $0x1bf8] sm:$0xff]   ;;  %v15626_v28 = vld [vmem:[%s15840_s28 + $0x1c00] sm:$0xff]  }
 0x376   : > { %14335 = vmatpush3.bf16.msra.mxu1 %v15587_v25  ;;  %v15625_v25 = vld [vmem:[%s15840_s28 + $0x1c40] sm:$0xff]   ;;  %v15624_v26 = vld [vmem:[%s15840_s28 + $0x1bb8] sm:$0xff]  }
 0x377   : > { %14336 = vmatprep.subr.bf16.mxu1 %v15590_v30  ;;  %v15629_v30 = vld [vmem:[%s15840_s28 + $0x1c48] sm:$0xff]   ;;  %v15637_v38 = vld [vmem:[%s15840_s28 + $0x1c58] sm:$0xff]  }
 0x378   : > { %14315 = vmatpush3.bf16.msra.mxu0 %v15589_v29  ;;  %v3070_v29 = vcombine.high %v3054_v24, %v3054_v24 }
 0x379   : > { %14344 = vmatprep.subr.bf16.mxu0 %v15592_v36  ;;  %v15632_v36 = vld [vmem:[%s15840_s28 + $0x1c88] sm:$0xff]  }
 0x37a   : > { %14337 = vmatpush3.bf16.msra.mxu1 %v15591_v34  ;;  %v15630_v34 = vld [vmem:[%s15840_s28 + $0x1c08] sm:$0xff]  }
 0x37b   : > { %14366 = vmatprep.subr.bf16.mxu1 %v15594_v39  ;;  %11235 = vmatmul.mubr.bf16.vlgmr.msra.gmra.mrb[104].mxu0 %v3047_v37  ;;  %v15634_v37 = vld [vmem:[%s15840_s28 + $0x1c10] sm:$0xff]  }
 0x37c   : > { %14345 = vmatpush3.bf16.msra.mxu0 %v15593_v41  ;;  %11314 = vmatprep.mubr.bf16.mxu0 %v3068_v48  ;;  %v15636_v39 = vld [vmem:[%s15840_s28 + $0x1c90] sm:$0xff]   ;;  %v15638_v41 = vld [vmem:[%s15840_s28 + $0x1c18] sm:$0xff]   ;;  %v15644_v48 = vld [vmem:[%s15840_s28 + $0x1ca0] sm:$0xff]  }
 0x37d   : > { %11275 = vmatmul.mubr.bf16.vlgmr.msra.gmra.mrb[104].mxu1 %v3069_v44  ;;  %14346 = vmatprep.subr.bf16.mxu0 %v15596_v45  ;;  %v15640_v44 = vld [vmem:[%s15840_s28 + $0x1c98] sm:$0xff]   ;;  %v15643_v45 = vld [vmem:[%s15840_s28 + $0x1ce0] sm:$0xff]  }
 0x37e   : > { %14367 = vmatpush3.bf16.msra.mxu1 %v15595_v47  ;;  %11354 = vmatprep.mubr.bf16.mxu1 %v3072_v51  ;;  %v15645_v47 = vld [vmem:[%s15840_s28 + $0x1c68] sm:$0xff]  }
 0x37f   : > { %14368 = vmatprep.subr.bf16.mxu1 %v15598_v49 }
 0x380   : > { %14347 = vmatpush3.bf16.msra.mxu0 %v15597_v50  ;;  %v15647_v50 = vld [vmem:[%s15840_s28 + $0x1ce8] sm:$0xff]  }
 0x381   : > { %14348 = vmatprep.subr.bf16.mxu0 %v15600_v53  ;;  %v15646_v53 = vld [vmem:[%s15840_s28 + $0x1c28] sm:$0xff]  }
 0x382   : > { %14369 = vmatpush3.bf16.msra.mxu1 %v15599_v54 }
 0x383   : > { %14370 = vmatprep.subr.bf16.mxu1 %v15602_v55 }
 0x384   : > { %14349 = vmatpush3.bf16.msra.mxu0 %v15601_v56 }
 0x385   : > { %14350 = vmatprep.subr.bf16.mxu0 %v15604_v57  ;;  %v15648_v57 = vld [vmem:[%s15840_s28 + $0x1ca8] sm:$0xff]  }
 0x386   : > { %14371 = vmatpush3.bf16.msra.mxu1 %v15603_v58  ;;  %v15649_v58 = vld [vmem:[%s15840_s28 + $0x1c70] sm:$0xff]  }
 0x387   : > { %14372 = vmatprep.subr.bf16.mxu1 %v15606_v59 }
 0x388   : > { %14351 = vmatpush3.bf16.msra.mxu0 %v15605_v60 }
 0x389   : > { %14352 = vmatprep.subr.bf16.mxu0 %v15608_v61  ;;  %v15650_v61 = vld [vmem:[%s15840_s28 + $0x1c30] sm:$0xff]  }
 0x38a   : > { %14373 = vmatpush3.bf16.msra.mxu1 %v15607_v52 }
 0x38b   : > { %14374 = vmatprep.subr.bf16.mxu1 %v15610_v62 }
 0x38c   : > { %14353 = vmatpush3.bf16.msra.mxu0 %v15609_v63  ;;  %v15651_v63 = vld [vmem:[%s15840_s28 + $0x1cf0] sm:$0xff]  }
 0x38d   : > { %14354 = vmatprep.subr.bf16.mxu0 %v15612_v0 }
 0x38e   : > { %v14052_v2 = vpop.f32.mrb[80].mxu0  ;;  %14375 = vmatpush3.bf16.msra.mxu1 %v15611_v1  ;;  %v15652_v1 = vld [vmem:[%s15840_s28 + $0x1cb0] sm:$0xff]  }
 0x38f   : > { %v14053_v4 = vpop.f32.mrb[81].mxu0  ;;  %14376 = vmatprep.subr.bf16.mxu1 %v15614_v3 }
 0x390   : > { %v14054_v6 = vadd.f32 %v14053_v4, %v14052_v2  ;;  %v14055_v7 = vpop.f32.mrb[82].mxu0  ;;  %v14074_v8 = vpop.f32.mrb[80].mxu1  ;;  %14355 = vmatpush3.bf16.msra.mxu0 %v15613_v5  ;;  %v15653_v4 = vld [vmem:[%s15840_s28 + $0x1c78] sm:$0xff]  }
 0x391   : > { %v14056_v11 = vpop.f32.mrb[83].mxu0  ;;  %v14075_v12 = vpop.f32.mrb[81].mxu1  ;;  %14356 = vmatprep.subr.bf16.mxu0 %v15616_v10  ;;  %v15654_v5 = vld [vmem:[%s15840_s28 + $0x1c38] sm:$0xff]   ;;  %v417_v7 = vld [vmem:[%s15835_s24 + $0x70] sm:$0xff] }
 0x392   : > { %v10757_v13 = vadd.f32 %v14054_v6, %v16918_v27  ;;  %v14076_v14 = vadd.f32 %v14075_v12, %v14074_v8  ;;  %v14077_v16 = vpop.f32.mrb[82].mxu1  ;;  %14377 = vmatpush3.bf16.msra.mxu1 %v15615_v9  ;;  %v15627_v27 = vld [vmem:[%s15840_s28 + $0x1cc0] sm:$0xff]   ;;  %v15655_v6 = vld [vmem:[%s15840_s28 + $0x1cf8] sm:$0xff]   ;;  %v3080_v8 = vrot.slane %v417_v7, %v15878_v43  ;;  %v3073_v10 = vcombine.high %v417_v7, %v417_v7  ;;  %v15694_v7 = vld [vmem:[%s15840_s28 + $0x1e50] sm:$0xff]  }
 0x393   : > { %v14078_v18 = vpop.f32.mrb[83].mxu1  ;;  %14378 = vmatprep.subr.bf16.mxu1 %v15618_v15  ;;  %v15656_v9 = vld [vmem:[%s15840_s28 + $0x1cb8] sm:$0xff]   ;;  %v15657_v11 = vld [vmem:[%s15840_s28 + $0x1d40] sm:$0xff]  }
 0x394   : > { %v16962_v19 = vadd.f32 %v14076_v14, %v10757_v13  ;;  %14357 = vmatpush3.bf16.msra.mxu0 %v15617_v17  ;;  %v3088_v12 = vcombine.high %v3080_v8, %v3080_v8  ;;  %v3096_v13 = vrot.slane %v3080_v8, %v15878_v43  ;;  %v17011_v14 = vrot.slane %v3073_v10, %v15878_v43  ;;  %v15659_v15 = vld [vmem:[%s15840_s28 + $0x1dc0] sm:$0xff]   ;;  %v15695_v8 = vld [vmem:[%s15840_s28 + $0x1e10] sm:$0xff]   ;;  %v15697_v10 = vld [vmem:[%s15840_s28 + $0x1e18] sm:$0xff]  }
 0x395   : > { %14358 = vmatprep.subr.bf16.mxu0 %v15620_v20  ;;  %v15658_v17 = vld [vmem:[%s15840_s28 + $0x1d00] sm:$0xff]   ;;  %v15661_v20 = vld [vmem:[%s15840_s28 + $0x1d48] sm:$0xff]  }
 0x396   : > { %14379 = vmatpush3.bf16.msra.mxu1 %v15619_v21  ;;  %v3110_v16 = vrot.slane %v3088_v12, %v15878_v43  ;;  %v3089_v18 = vcombine.high %v17011_v14, %v17011_v14  ;;  %v12071_v12 = vld.sshfl [vmem:[%s15835_s24 + $0x78] sm:$0x11 pattern:$0x75316420] }
 0x397   : > { %14380 = vmatprep.subr.bf16.mxu1 %v15622_v22  ;;  %v15660_v22 = vld [vmem:[%s15840_s28 + $0x1d80] sm:$0xff]  }
 0x398   : > { %14359 = vmatpush3.bf16.msra.mxu0 %v15621_v23  ;;  %v3120_v21 = vcombine.high %v3110_v16, %v3110_v16  ;;  %v3117_v23 = vrot.slane %v3089_v18, %v15878_v43 }
 0x399   : > { %14388 = vmatprep.subr.bf16.mxu0 %v15625_v25  ;;  %v15662_v25 = vld [vmem:[%s15840_s28 + $0x1d08] sm:$0xff]  }
 0x39a   : > { %14381 = vmatpush3.bf16.msra.mxu1 %v15624_v26  ;;  %v3121_v26 = vcombine.high %v3117_v23, %v3117_v23 }
 0x39b   : > { %11315 = vmatmul.mubr.bf16.vlgmr.msra.gmra.mrb[108].mxu0 %v3054_v24  ;;  %14410 = vmatprep.subr.bf16.mxu1 %v15627_v27  ;;  %v15663_v24 = vld [vmem:[%s15840_s28 + $0x1dc8] sm:$0xff]   ;;  %v15665_v27 = vld [vmem:[%s15840_s28 + $0x1d50] sm:$0xff]  }
 0x39c   : > { %14389 = vmatpush3.bf16.msra.mxu0 %v15626_v28  ;;  %11394 = vmatprep.mubr.bf16.mxu0 %v3110_v16  ;;  %v15664_v28 = vld [vmem:[%s15840_s28 + $0x1d88] sm:$0xff]  }
 0x39d   : > { %11355 = vmatmul.mubr.bf16.vlgmr.msra.gmra.mrb[108].mxu1 %v3070_v29  ;;  %14390 = vmatprep.subr.bf16.mxu0 %v15629_v30  ;;  %v15667_v29 = vld [vmem:[%s15840_s28 + $0x1dd0] sm:$0xff]   ;;  %v15700_v16 = vld [vmem:[%s15840_s28 + $0x1e68] sm:$0xff]  }
 0x39e   : > { %14411 = vmatpush3.bf16.msra.mxu1 %v15628_v32  ;;  %11434 = vmatprep.mubr.bf16.mxu1 %v3120_v21  ;;  %v15666_v30 = vld [vmem:[%s15840_s28 + $0x1d10] sm:$0xff]   ;;  %v15669_v32 = vld [vmem:[%s15840_s28 + $0x1d58] sm:$0xff]  }
 0x39f   : > { %14412 = vmatprep.subr.bf16.mxu1 %v15631_v33  ;;  %v15668_v33 = vld [vmem:[%s15840_s28 + $0x1d90] sm:$0xff]  }
 0x3a0   : > { %14391 = vmatpush3.bf16.msra.mxu0 %v15630_v34  ;;  %v15671_v34 = vld [vmem:[%s15840_s28 + $0x1dd8] sm:$0xff]  }
 0x3a1   : > { %14392 = vmatprep.subr.bf16.mxu0 %v15633_v35  ;;  %v15670_v35 = vld [vmem:[%s15840_s28 + $0x1d18] sm:$0xff]  }
 0x3a2   : > { %14413 = vmatpush3.bf16.msra.mxu1 %v15632_v36  ;;  %v15673_v36 = vld [vmem:[%s15840_s28 + $0x1d60] sm:$0xff]  }
 0x3a3   : > { %14414 = vmatprep.subr.bf16.mxu1 %v15635_v31  ;;  %v15672_v31 = vld [vmem:[%s15840_s28 + $0x1d98] sm:$0xff]  }
 0x3a4   : > { %14393 = vmatpush3.bf16.msra.mxu0 %v15634_v37  ;;  %v15675_v37 = vld [vmem:[%s15840_s28 + $0x1de0] sm:$0xff]  }
 0x3a5   : > { %14394 = vmatprep.subr.bf16.mxu0 %v15637_v38  ;;  %v15674_v38 = vld [vmem:[%s15840_s28 + $0x1d20] sm:$0xff]  }
 0x3a6   : > { %14415 = vmatpush3.bf16.msra.mxu1 %v15636_v39  ;;  %v15677_v39 = vld [vmem:[%s15840_s28 + $0x1d68] sm:$0xff]  }
 0x3a7   : > { %14416 = vmatprep.subr.bf16.mxu1 %v15639_v40  ;;  %v15676_v40 = vld [vmem:[%s15840_s28 + $0x1da0] sm:$0xff]  }
 0x3a8   : > { %14395 = vmatpush3.bf16.msra.mxu0 %v15638_v41 }
 0x3a9   : > { %14396 = vmatprep.subr.bf16.mxu0 %v15641_v42  ;;  %v15679_v42 = vld [vmem:[%s15840_s28 + $0x1de8] sm:$0xff]  }
 0x3aa   : > { %14417 = vmatpush3.bf16.msra.mxu1 %v15640_v44 }
 0x3ab   : > { %14418 = vmatprep.subr.bf16.mxu1 %v15643_v45  ;;  %v15678_v45 = vld [vmem:[%s15840_s28 + $0x1d28] sm:$0xff]  }
 0x3ac   : > { %14397 = vmatpush3.bf16.msra.mxu0 %v15642_v46 }
 0x3ad   : > { %14398 = vmatprep.subr.bf16.mxu0 %v15645_v47 }
 0x3ae   : > { %v14096_v49 = vpop.f32.mrb[84].mxu0  ;;  %14419 = vmatpush3.bf16.msra.mxu1 %v15644_v48 }
 0x3af   : > { %v14097_v51 = vpop.f32.mrb[85].mxu0  ;;  %14420 = vmatprep.subr.bf16.mxu1 %v15647_v50  ;;  %v15681_v50 = vld [vmem:[%s15840_s28 + $0x1d70] sm:$0xff]  }
 0x3b0   : > { %v14098_v54 = vadd.f32 %v14097_v51, %v14096_v49  ;;  %v14099_v55 = vpop.f32.mrb[86].mxu0  ;;  %v14118_v56 = vpop.f32.mrb[84].mxu1  ;;  %14399 = vmatpush3.bf16.msra.mxu0 %v15646_v53  ;;  %v15680_v49 = vld [vmem:[%s15840_s28 + $0x1da8] sm:$0xff]  }
 0x3b1   : > { %v14100_v59 = vpop.f32.mrb[87].mxu0  ;;  %v14119_v60 = vpop.f32.mrb[85].mxu1  ;;  %14400 = vmatprep.subr.bf16.mxu0 %v15649_v58  ;;  %v15682_v58 = vld [vmem:[%s15840_s28 + $0x1d30] sm:$0xff]  }
 0x3b2   : > { %v10837_v52 = vadd.f32 %v14098_v54, %v16962_v19  ;;  %v14120_v62 = vadd.f32 %v14119_v60, %v14118_v56  ;;  %v14121_v0 = vpop.f32.mrb[86].mxu1  ;;  %14421 = vmatpush3.bf16.msra.mxu1 %v15648_v57  ;;  %v3118_v19 = vcombine.high %v3096_v13, %v3096_v13  ;;  %v15683_v56 = vld [vmem:[%s15840_s28 + $0x1df0] sm:$0xff]  }
 0x3b3   : > { %v14122_v2 = vpop.f32.mrb[87].mxu1  ;;  %14422 = vmatprep.subr.bf16.mxu1 %v15651_v63  ;;  %v15686_v63 = vld [vmem:[%s15840_s28 + $0x1d38] sm:$0xff]   ;;  %v3103_v0 = vrot.slane %v17011_v14, %v15878_v43  ;;  %v15699_v14 = vld [vmem:[%s15840_s28 + $0x1e20] sm:$0xff]  }
 0x3b4   : > { %v17000_v3 = vadd.f32 %v14120_v62, %v10837_v52  ;;  %14401 = vmatpush3.bf16.msra.mxu0 %v15650_v61  ;;  %v15685_v61 = vld [vmem:[%s15840_s28 + $0x1d78] sm:$0xff]   ;;  %v15684_v52 = vld [vmem:[%s15840_s28 + $0x1db0] sm:$0xff]  }
 0x3b5   : > { %14402 = vmatprep.subr.bf16.mxu0 %v15653_v4  ;;  %v15687_v62 = vld [vmem:[%s15840_s28 + $0x1df8] sm:$0xff]   ;;  %v3119_v4 = vcombine.high %v3103_v0, %v3103_v0 }
 0x3b6   : > { %14423 = vmatpush3.bf16.msra.mxu1 %v15652_v1  ;;  %v15690_v1 = vld [vmem:[%s15840_s28 + $0x1e40] sm:$0xff]   ;;  %v15689_v2 = vld [vmem:[%s15840_s28 + $0x1db8] sm:$0xff]  }
 0x3b7   : > { %14424 = vmatprep.subr.bf16.mxu1 %v15655_v6  ;;  %v15693_v6 = vld [vmem:[%s15840_s28 + $0x1e08] sm:$0xff]  }
 0x3b8   : > { %14403 = vmatpush3.bf16.msra.mxu0 %v15654_v5  ;;  %v15692_v5 = vld [vmem:[%s15840_s28 + $0x1e48] sm:$0xff]  }
 0x3b9   : > { %14432 = vmatprep.subr.bf16.mxu0 %v15657_v11  ;;  %v15698_v11 = vld [vmem:[%s15840_s28 + $0x1e60] sm:$0xff]  }
 0x3ba   : > { %14425 = vmatpush3.bf16.msra.mxu1 %v15656_v9  ;;  %v15696_v9 = vld [vmem:[%s15840_s28 + $0x1e58] sm:$0xff]  }
 0x3bb   : > { %14454 = vmatprep.subr.bf16.mxu1 %v15659_v15  ;;  %11395 = vmatmul.mubr.bf16.vlgmr.msra.gmra.mrb[112].mxu0 %v3096_v13  ;;  %v3129_v13 = vcombine.high %v12071_v12, %v12071_v12 }
 0x3bc   : > { %14433 = vmatpush3.bf16.msra.mxu0 %v15658_v17  ;;  %11474 = vmatprep.mubr.bf16.mxu0 %v3117_v23  ;;  %v15702_v23 = vld [vmem:[%s15840_s28 + $0x1e70] sm:$0xff]  }
 0x3bd   : > { %11435 = vmatmul.mubr.bf16.vlgmr.msra.gmra.mrb[112].mxu1 %v3118_v19  ;;  %14434 = vmatprep.subr.bf16.mxu0 %v15661_v20  ;;  %v3143_v15 = vrot.slane %v3129_v13, %v15878_v43  ;;  %v15701_v19 = vld [vmem:[%s15840_s28 + $0x1e28] sm:$0xff]  }
 0x3be   : > { %14455 = vmatpush3.bf16.msra.mxu1 %v15660_v22  ;;  %11514 = vmatprep.mubr.bf16.mxu1 %v3121_v26 }
 0x3bf   : > { %14456 = vmatprep.subr.bf16.mxu1 %v15663_v24 }
 0x3c0   : > { %14435 = vmatpush3.bf16.msra.mxu0 %v15662_v25 }
 0x3c1   : > { %14436 = vmatprep.subr.bf16.mxu0 %v15665_v27 }
 0x3c2   : > { %14457 = vmatpush3.bf16.msra.mxu1 %v15664_v28 }
 0x3c3   : > { %14458 = vmatprep.subr.bf16.mxu1 %v15667_v29  ;;  %v15703_v29 = vld [vmem:[%s15840_s28 + $0x1e30] sm:$0xff]  }
 0x3c4   : > { %14437 = vmatpush3.bf16.msra.mxu0 %v15666_v30 }
 0x3c5   : > { %14438 = vmatprep.subr.bf16.mxu0 %v15669_v32 }
 0x3c6   : > { %14459 = vmatpush3.bf16.msra.mxu1 %v15668_v33  ;;  %v15704_v33 = vld [vmem:[%s15840_s28 + $0x1e78] sm:$0xff]  }
 0x3c7   : > { %14460 = vmatprep.subr.bf16.mxu1 %v15671_v34  ;;  %v15705_v34 = vld [vmem:[%s15840_s28 + $0x1e38] sm:$0xff]  }
 0x3c8   : > { %14439 = vmatpush3.bf16.msra.mxu0 %v15670_v35  ;;  %v3136_v35 = vrot.slane %v12071_v12, %v15878_v43 }
 0x3c9   : > { %14440 = vmatprep.subr.bf16.mxu0 %v15673_v36 }
 0x3ca   : > { %14461 = vmatpush3.bf16.msra.mxu1 %v15672_v31 }
 0x3cb   : > { %14462 = vmatprep.subr.bf16.mxu1 %v15675_v37 }
 0x3cc   : > { %14441 = vmatpush3.bf16.msra.mxu0 %v15674_v38 }
 0x3cd   : > { %14442 = vmatprep.subr.bf16.mxu0 %v15677_v39 }
 0x3ce   : > { %v14140_v41 = vpop.f32.mrb[88].mxu0  ;;  %14463 = vmatpush3.bf16.msra.mxu1 %v15676_v40 }
 0x3cf   : > { %v14141_v44 = vpop.f32.mrb[89].mxu0  ;;  %14464 = vmatprep.subr.bf16.mxu1 %v15679_v42 }
 0x3d0   : > { %v14142_v46 = vadd.f32 %v14141_v44, %v14140_v41  ;;  %v14143_v47 = vpop.f32.mrb[90].mxu0  ;;  %v14162_v48 = vpop.f32.mrb[88].mxu1  ;;  %14443 = vmatpush3.bf16.msra.mxu0 %v15678_v45 }
 0x3d1   : > { %v14144_v51 = vpop.f32.mrb[91].mxu0  ;;  %v14163_v53 = vpop.f32.mrb[89].mxu1  ;;  %14444 = vmatprep.subr.bf16.mxu0 %v15681_v50 }
 0x3d2   : > { %v10917_v54 = vadd.f32 %v14142_v46, %v17000_v3  ;;  %v14164_v55 = vadd.f32 %v14163_v53, %v14162_v48  ;;  %v14165_v57 = vpop.f32.mrb[90].mxu1  ;;  %14465 = vmatpush3.bf16.msra.mxu1 %v15680_v49  ;;  %v15691_v3 = vld [vmem:[%s15840_s28 + $0x1e00] sm:$0xff]  }
 0x3d3   : > { %v14166_v59 = vpop.f32.mrb[91].mxu1  ;;  %14466 = vmatprep.subr.bf16.mxu1 %v15683_v56 }
 0x3d4   : > { %v10957_v60 = vadd.f32 %v14164_v55, %v10917_v54  ;;  %14445 = vmatpush3.bf16.msra.mxu0 %v15682_v58 }
 0x3d5   : > { %14446 = vmatprep.subr.bf16.mxu0 %v15685_v61 }
 0x3d6   : > { %14467 = vmatpush3.bf16.msra.mxu1 %v15684_v52 }
 0x3d7   : > { %14468 = vmatprep.subr.bf16.mxu1 %v15687_v62 }
 0x3d8   : > { %14447 = vmatpush3.bf16.msra.mxu0 %v15686_v63 }
 0x3d9   : > { %14476 = vmatprep.subr.bf16.mxu0 %v15690_v1 }
 0x3da   : > { %14469 = vmatpush3.bf16.msra.mxu1 %v15689_v2 }
 0x3db   : > { %11475 = vmatmul.mubr.bf16.vlgmr.msra.gmra.mrb[116].mxu0 %v3103_v0 }
 0x3dc   : > { %14477 = vmatpush3.bf16.msra.mxu0 %v15691_v3  ;;  %11554 = vmatprep.mubr.bf16.mxu0 %v3143_v15 }
 0x3dd   : > { %11515 = vmatmul.mubr.bf16.vlgmr.msra.gmra.mrb[116].mxu1 %v3119_v4  ;;  %14478 = vmatprep.subr.bf16.mxu0 %v15692_v5 }
 0x3e0   : > { %14479 = vmatpush3.bf16.msra.mxu0 %v15693_v6 }
 0x3e1   : > { %14480 = vmatprep.subr.bf16.mxu0 %v15694_v7 }
 0x3e4   : > { %14481 = vmatpush3.bf16.msra.mxu0 %v15695_v8 }
 0x3e5   : > { %14482 = vmatprep.subr.bf16.mxu0 %v15696_v9 }
 0x3e8   : > { %14483 = vmatpush3.bf16.msra.mxu0 %v15697_v10 }
 0x3e9   : > { %14484 = vmatprep.subr.bf16.mxu0 %v15698_v11 }
 0x3ec   : > { %14485 = vmatpush3.bf16.msra.mxu0 %v15699_v14 }
 0x3ed   : > { %14486 = vmatprep.subr.bf16.mxu0 %v15700_v16 }
 0x3ee   : > { %v14184_v17 = vpop.f32.mrb[92].mxu0 }
 0x3ef   : > { %v14185_v18 = vpop.f32.mrb[93].mxu0 }
 0x3f0   : > { %v14186_v20 = vadd.f32 %v14185_v18, %v14184_v17  ;;  %v14187_v21 = vpop.f32.mrb[94].mxu0  ;;  %v14206_v22 = vpop.f32.mrb[92].mxu1  ;;  %14487 = vmatpush3.bf16.msra.mxu0 %v15701_v19 }
 0x3f1   : > { %v14188_v24 = vpop.f32.mrb[95].mxu0  ;;  %v14207_v25 = vpop.f32.mrb[93].mxu1  ;;  %14488 = vmatprep.subr.bf16.mxu0 %v15702_v23 }
 0x3f2   : > { %v10997_v26 = vadd.f32 %v14186_v20, %v10957_v60  ;;  %v14208_v27 = vadd.f32 %v14207_v25, %v14206_v22  ;;  %v14209_v28 = vpop.f32.mrb[94].mxu1 }
 0x3f3   : > { %v14210_v30 = vpop.f32.mrb[95].mxu1 }
 0x3f4   : > { %v11037_v32 = vadd.f32 %v14208_v27, %v10997_v26  ;;  %14489 = vmatpush3.bf16.msra.mxu0 %v15703_v29 }
 0x3f5   : > { %14490 = vmatprep.subr.bf16.mxu0 %v15704_v33 }
 0x3f8   : > { %14491 = vmatpush3.bf16.msra.mxu0 %v15705_v34 }
 0x3fb   : > { %11555 = vmatmul.mubr.bf16.vlgmr.msra.gmra.mrb[120].mxu0 %v3136_v35 }
 0x40e   : > { %v14228_v36 = vpop.f32.mrb[96].mxu0 }
 0x40f   : > { %v14229_v31 = vpop.f32.mrb[97].mxu0 }
 0x410   : > { %v14230_v37 = vadd.f32 %v14229_v31, %v14228_v36  ;;  %v14231_v38 = vpop.f32.mrb[98].mxu0  ;;  %v14250_v39 = vpop.f32.mrb[96].mxu1 }
 0x411   : > { %v14232_v40 = vpop.f32.mrb[99].mxu0  ;;  %v14251_v41 = vpop.f32.mrb[97].mxu1 }
 0x412   : > { %v11077_v42 = vadd.f32 %v14230_v37, %v11037_v32  ;;  %v14252_v44 = vadd.f32 %v14251_v41, %v14250_v39  ;;  %v14253_v45 = vpop.f32.mrb[98].mxu1 }
 0x413   : > { %v14254_v46 = vpop.f32.mrb[99].mxu1 }
 0x414   : > { %v11117_v47 = vadd.f32 %v14252_v44, %v11077_v42 }
 0x42e   : > { %v14272_v48 = vpop.f32.mrb[100].mxu0 }
 0x42f   : > { %v14273_v49 = vpop.f32.mrb[101].mxu0 }
 0x430   : > { %v14274_v50 = vadd.f32 %v14273_v49, %v14272_v48  ;;  %v14275_v51 = vpop.f32.mrb[102].mxu0  ;;  %v14294_v53 = vpop.f32.mrb[100].mxu1  ;;  %v402_v48 = vld [vmem:[#allocation2] sm:$0x3] }
 0x431   : > { %v14276_v43 = vpop.f32.mrb[103].mxu0  ;;  %v14295_v54 = vpop.f32.mrb[101].mxu1 }
 0x432   : > { %v11157_v55 = vadd.f32 %v14274_v50, %v11117_v47  ;;  %v14296_v56 = vadd.f32 %v14295_v54, %v14294_v53  ;;  %v14297_v57 = vpop.f32.mrb[102].mxu1  ;;  %v13061_v53 = vld [vmem:[%s17204_s3] sm:$0xff] (!%p13048_p6)   ;;  %v15752_v43 = vmov (!%p13048_p6), 0.0|0.0   ;;  %v15754_v54 = vmov (!%p13048_p6), 0.0  }
 0x433   : > { %v14298_v58 = vpop.f32.mrb[103].mxu1  ;;  %14634 = vmatprep.subr.bf16.mxu0 (!%p13048_p6), %v15752_v43  ;;  %14574 = vmatprep.mubr.msk.f32.mxu0 (!%p13048_p6), %vm15753_vm0, %v15754_v54  ;;  %v13142_v57 = vld [vmem:[%s17204_s3 + $0x18] sm:$0xff] (!%p13048_p6)  }
 0x434   : > { %v11197_v59 = vadd.f32 %v14296_v56, %v11157_v55  ;;  %14636 = vmatpush3.bf16.msra.mxu0 (!%p13048_p6), %v13061_v53  ;;  %14658 = vmatprep.subr.bf16.mxu1 (!%p13048_p6), %v15752_v43  ;;  %v13140_v55 = vld [vmem:[%s17204_s3 + $0x8] sm:$0xff] (!%p13048_p6)   ;;  %v13141_v56 = vld [vmem:[%s17204_s3 + $0x10] sm:$0xff] (!%p13048_p6)   ;;  %v13143_v58 = vld [vmem:[%s17204_s3 + $0x20] sm:$0xff] (!%p13048_p6)  }
 0x435   : > { %14637 = vmatprep.subr.bf16.mxu0 (!%p13048_p6), %v15752_v43  ;;  %14609 = vmatprep.mubr.msk.f32.mxu1 (!%p13048_p6), %vm15753_vm0, %v15754_v54 }
 0x438   : > { %14639 = vmatpush3.bf16.msra.mxu0 (!%p13048_p6), %v13140_v55 }
 0x439   : > { %14640 = vmatprep.subr.bf16.mxu0 (!%p13048_p6), %v15752_v43 }
 0x43c   : > { %14642 = vmatpush3.bf16.msra.mxu0 (!%p13048_p6), %v13141_v56 }
 0x43d   : > { %14643 = vmatprep.subr.bf16.mxu0 (!%p13048_p6), %v15752_v43 }
 0x440   : > { %14645 = vmatpush3.bf16.msra.mxu0 (!%p13048_p6), %v13142_v57 }
 0x441   : > { %14646 = vmatprep.subr.bf16.mxu0 (!%p13048_p6), %v15752_v43 }
 0x444   : > { %14648 = vmatpush3.bf16.msra.mxu0 (!%p13048_p6), %v13143_v58 }
 0x445   : > { %14649 = vmatprep.subr.bf16.mxu0 (!%p13048_p6), %v15752_v43 }
 0x44e   : > { %v14316_v60 = vpop.f32.mrb[104].mxu0 }
 0x44f   : > { %v14317_v61 = vpop.f32.mrb[105].mxu0 }
 0x450   : > { %v14318_v52 = vadd.f32 %v14317_v61, %v14316_v60  ;;  %v14319_v62 = vpop.f32.mrb[106].mxu0  ;;  %v14338_v63 = vpop.f32.mrb[104].mxu1  ;;  %v13049_v61 = vld [vmem:[%s17203_s2] ss:$0 sm:$0xff] (!%p13048_p6) }
 0x451   : > { %v14320_v0 = vpop.f32.mrb[107].mxu0  ;;  %v14339_v1 = vpop.f32.mrb[105].mxu1 }
 0x452   : > { %v11237_v2 = vadd.f32 %v14318_v52, %v11197_v59  ;;  %v14340_v3 = vadd.f32 %v14339_v1, %v14338_v63  ;;  %v14341_v4 = vpop.f32.mrb[106].mxu1  ;;  %v13144_v59 = vld [vmem:[%s17204_s3 + $0x28] sm:$0xff] (!%p13048_p6)   ;;  %v13145_v52 = vld [vmem:[%s17204_s3 + $0x30] sm:$0xff] (!%p13048_p6)   ;;  %v13146_v63 = vld [vmem:[%s17204_s3 + $0x38] sm:$0xff] (!%p13048_p6)  }
 0x453   : > { %v14342_v5 = vpop.f32.mrb[107].mxu1  ;;  %14651 = vmatpush3.bf16.msra.mxu0 (!%p13048_p6), %v13144_v59  ;;  %v13125_v1 = vld [vmem:[%s17208_s7] sm:$0xff] (!%p13048_p6)   ;;  %v13147_v4 = vld [vmem:[%s17206_s5 + $0x8] sm:$0xff] (!%p13048_p6)  }
 0x454   : > { %v11277_v6 = vadd.f32 %v14340_v3, %v11237_v2  ;;  %14652 = vmatprep.subr.bf16.mxu0 (!%p13048_p6), %v15752_v43  ;;  %v13154_v2 = vld [vmem:[%s17208_s7 + $0x8] sm:$0xff] (!%p13048_p6)   ;;  %v13093_v3 = vld [vmem:[%s17206_s5] sm:$0xff] (!%p13048_p6)   ;;  %v13148_v5 = vld [vmem:[%s17206_s5 + $0x10] sm:$0xff] (!%p13048_p6)  }
 0x455   : > { %14660 = vmatpush3.bf16.msra.mxu1 (!%p13048_p6), %v13093_v3 }
 0x456   : > { %14661 = vmatprep.subr.bf16.mxu1 (!%p13048_p6), %v15752_v43 }
 0x457   : > { %14654 = vmatpush3.bf16.msra.mxu0 (!%p13048_p6), %v13145_v52 }
 0x458   : > { %14655 = vmatprep.subr.bf16.mxu0 (!%p13048_p6), %v15752_v43 }
 0x459   : > { %14663 = vmatpush3.bf16.msra.mxu1 (!%p13048_p6), %v13147_v4 }
 0x45a   : > { %14664 = vmatprep.subr.bf16.mxu1 (!%p13048_p6), %v15752_v43 }
 0x45b   : > { %14657 = vmatpush3.bf16.msra.mxu0 (!%p13048_p6), %v13146_v63 }
 0x45c   : > { %14682 = vmatprep.subr.bf16.mxu0 (!%p13048_p6), %v15752_v43 }
 0x45d   : > { %14666 = vmatpush3.bf16.msra.mxu1 (!%p13048_p6), %v13148_v5 }
 0x45e   : > { %14667 = vmatprep.subr.bf16.mxu1 (!%p13048_p6), %v15752_v43 }
 0x46e   : > { %v14360_v7 = vpop.f32.mrb[108].mxu0 }
 0x46f   : > { %v14361_v8 = vpop.f32.mrb[109].mxu0 }
 0x470   : > { %v14362_v9 = vadd.f32 %v14361_v8, %v14360_v7  ;;  %v14363_v10 = vpop.f32.mrb[110].mxu0  ;;  %v14382_v11 = vpop.f32.mrb[108].mxu1  ;;  %v13150_v7 = vld [vmem:[%s17206_s5 + $0x20] sm:$0xff] (!%p13048_p6)   ;;  %v13151_v8 = vld [vmem:[%s17206_s5 + $0x28] sm:$0xff] (!%p13048_p6)  }
 0x471   : > { %v14364_v12 = vpop.f32.mrb[111].mxu0  ;;  %v14383_v13 = vpop.f32.mrb[109].mxu1  ;;  %v13153_v10 = vld [vmem:[%s17206_s5 + $0x38] sm:$0xff] (!%p13048_p6)  }
 0x472   : > { %v11317_v14 = vadd.f32 %v14362_v9, %v11277_v6  ;;  %v14384_v15 = vadd.f32 %v14383_v13, %v14382_v11  ;;  %v14385_v16 = vpop.f32.mrb[110].mxu1  ;;  %v13149_v6 = vld [vmem:[%s17206_s5 + $0x18] sm:$0xff] (!%p13048_p6)   ;;  %v13152_v9 = vld [vmem:[%s17206_s5 + $0x30] sm:$0xff] (!%p13048_p6)   ;;  %v13050_v11 = vld [vmem:[%s17205_s4] ss:$0 sm:$0xff] (!%p13048_p6) }
 0x473   : > { %v14386_v17 = vpop.f32.mrb[111].mxu1  ;;  %14669 = vmatpush3.bf16.msra.mxu1 (!%p13048_p6), %v13149_v6  ;;  %v13133_v16 = vld [vmem:[%s17210_s9] sm:$0xff] (!%p13048_p6)  }
 0x474   : > { %v11357_v18 = vadd.f32 %v14384_v15, %v11317_v14  ;;  %14670 = vmatprep.subr.bf16.mxu1 (!%p13048_p6), %v15752_v43  ;;  %v13155_v17 = vld [vmem:[%s17210_s9 + $0x8] sm:$0xff] (!%p13048_p6)  }
 0x477   : > { %14672 = vmatpush3.bf16.msra.mxu1 (!%p13048_p6), %v13150_v7 }
 0x478   : > { %14673 = vmatprep.subr.bf16.mxu1 (!%p13048_p6), %v15752_v43 }
 0x47b   : > { %14675 = vmatpush3.bf16.msra.mxu1 (!%p13048_p6), %v13151_v8 }
 0x47c   : > { %14676 = vmatprep.subr.bf16.mxu1 (!%p13048_p6), %v15752_v43 }
 0x47f   : > { %14678 = vmatpush3.bf16.msra.mxu1 (!%p13048_p6), %v13152_v9 }
 0x480   : > { %14679 = vmatprep.subr.bf16.mxu1 (!%p13048_p6), %v15752_v43 }
 0x483   : > { %14681 = vmatpush3.bf16.msra.mxu1 (!%p13048_p6), %v13153_v10 }
 0x484   : > { %14688 = vmatprep.subr.bf16.mxu1 (!%p13048_p6), %v15752_v43 }
 0x48e   : > { %v14404_v19 = vpop.f32.mrb[112].mxu0 }
 0x48f   : > { %v14405_v20 = vpop.f32.mrb[113].mxu0 }
 0x490   : > { %v14406_v21 = vadd.f32 %v14405_v20, %v14404_v19  ;;  %v14407_v22 = vpop.f32.mrb[114].mxu0  ;;  %v14426_v23 = vpop.f32.mrb[112].mxu1 }
 0x491   : > { %v14408_v24 = vpop.f32.mrb[115].mxu0  ;;  %v14427_v25 = vpop.f32.mrb[113].mxu1 }
 0x492   : > { %v11397_v26 = vadd.f32 %v14406_v21, %v11357_v18  ;;  %v14428_v27 = vadd.f32 %v14427_v25, %v14426_v23  ;;  %v14429_v28 = vpop.f32.mrb[114].mxu1  ;;  %v13051_v18 = vld [vmem:[%s17207_s6] ss:$0 sm:$0xff] (!%p13048_p6) }
 0x493   : > { %v14430_v29 = vpop.f32.mrb[115].mxu1  ;;  %v13052_v23 = vld [vmem:[%s17209_s8] ss:$0 sm:$0xff] (!%p13048_p6) }
 0x494   : > { %v11437_v30 = vadd.f32 %v14428_v27, %v11397_v26 }
 0x4ae   : > { %v14448_v32 = vpop.f32.mrb[116].mxu0 }
 0x4af   : > { %v14449_v33 = vpop.f32.mrb[117].mxu0 }
 0x4b0   : > { %v14450_v34 = vadd.f32 %v14449_v33, %v14448_v32  ;;  %v14451_v35 = vpop.f32.mrb[118].mxu0  ;;  %v14470_v36 = vpop.f32.mrb[116].mxu1 }
 0x4b1   : > { %v14452_v31 = vpop.f32.mrb[119].mxu0  ;;  %v14471_v37 = vpop.f32.mrb[117].mxu1 }
 0x4b2   : > { %v11477_v38 = vadd.f32 %v14450_v34, %v11437_v30  ;;  %v14472_v39 = vadd.f32 %v14471_v37, %v14470_v36  ;;  %v14473_v40 = vpop.f32.mrb[118].mxu1  ;;  %v15755_v36 = vmov (!%p13048_p6), 0  }
 0x4b3   : > { %v14474_v41 = vpop.f32.mrb[119].mxu1  ;;  %15706 = vset.pattern.permute.xlu1 (!%p13048_p6), %v15755_v36  ;;  %15707 = vset.pattern.permute.xlu0 (!%p13048_p6), %v15755_v36 }
 0x4b4   : > { %v11517_v42 = vadd.f32 %v14472_v39, %v11477_v38 }
 0x4ce   : > { %v14492_v44 = vpop.f32.mrb[120].mxu0 }
 0x4cf   : > { %v14493_v45 = vpop.f32.mrb[121].mxu0 }
 0x4d0   : > { %v14494_v46 = vadd.f32 %v14493_v45, %v14492_v44  ;;  %v14495_v47 = vpop.f32.mrb[122].mxu0  ;;  %11567 = sbr.rel (%p13048_p6) target bundleno = 2154 (0x86a), region = 72 }
 0x4d1   : > { %v14496_v49 = vpop.f32.mrb[123].mxu0 }
 0x4d2   : > { %v11557_v50 = vadd.f32 %v14494_v46, %v11517_v42 }
 0x4d4   : > { %v11562_v51 = vadd.f32 %v11557_v50, %v402_v48  ;;  %v13054_v48 = vld [vmem:[#allocation3] ss:$0 sm:$0xff] (!%p13048_p6) }
 0x4d6   : > { %11563 = vst [vmem:[#allocation2] sm:$0x3] %v11562_v51 }
 0x4dd   : > { %v11568_v60 = vld [vmem:[#allocation2] sm:$0x3] }
 0x4de   : > { %v11576_v62 = vadd.f32 %v13049_v61, %v11568_v60 }
 0x4e0   : > { %v11577_v0 = vmax.f32 %v11576_v62, 0.0 }
 0x4e2   : > { %14575 = vmatmul.mubr.f32.vlgmr.msra.gmra.mrb[0].mxu0 %v11577_v0  ;;  %14610 = vmatmul.mubr.f32.vlgmr.msra.gmra.mrb[0].mxu1 %v11577_v0 }
 0x4e3   : > { %14684 = vmatpush3.bf16.msra.mxu0 %v13125_v1  ;;  %14620 = vmatprep.mubr.msk.f32.mxu0 %vm15753_vm0, %v15754_v54 }
 0x4e4   : > { %14685 = vmatprep.subr.bf16.mxu0 %v15752_v43  ;;  %14631 = vmatprep.mubr.msk.f32.mxu1 %vm15753_vm0, %v15754_v54 }
 0x4e5   : > { %14690 = vmatpush3.bf16.msra.mxu1 %v13133_v16 }
 0x4e6   : > { %14691 = vmatprep.subr.bf16.mxu1 %v15752_v43 }
 0x4e7   : > { %14687 = vmatpush3.bf16.msra.mxu0 %v13154_v2 }
 0x4e9   : > { %14693 = vmatpush3.bf16.msra.mxu1 %v13155_v17 }
 0x5b5   : > { %v11683_v12 = vpop.f32.mrb[0].mxu0  ;;  %v11793_v19 = vpop.f32.mrb[0].mxu1 }
 0x5b6   : > { %v11684_v13 = vadd.f32 %v13050_v11, %v11683_v12  ;;  %v14576_v14 = vpop.f32.mrb[1].mxu0  ;;  %v11794_v20 = vadd.f32 %v13051_v18, %v11793_v19  ;;  %v14611_v21 = vpop.f32.mrb[1].mxu1 }
 0x5b8   : > { %v11687_v15 = vmax.f32 %v11684_v13, 0.0  ;;  %v11797_v22 = vmax.f32 %v11794_v20, 0.0 }
 0x5ba   : > { %14621 = vmatmul.mubr.msk.f32.vlgmr.msra.gmra.mrb[2].mxu0 %vm11813_vm1, %v11687_v15  ;;  %14632 = vmatmul.mubr.msk.f32.vlgmr.msra.gmra.mrb[2].mxu1 %vm11813_vm1, %v11797_v22 }
 0x68d   : > { %v11883_v24 = vpop.f32.mrb[2].mxu0  ;;  %v11971_v34 = vpop.f32.mrb[2].mxu1 }
 0x68e   : > { %v11884_v25 = vadd.f32 %v13052_v23, %v11883_v24  ;;  %v14622_v26 = vpop.f32.mrb[3].mxu0  ;;  %v14633_v35 = vpop.f32.mrb[3].mxu1  ;;  %v11972_v49 = vadd.f32 %v13054_v48, %v11971_v34 }
 0x690   : > { %v11976_v27 = vsel %vm11975_vm2, %v11884_v25, 0.0 }
 0x691   : > { %11977 = vadd.xlane.f32.xlu0 %v11976_v27 }
 0x71e   : > { %v11978_v28 = vpop.xlane.xlu0 %11977 }
 0x71f   : > { %v11980_v29 = vmul.f32 0.25, %v11978_v28 }
 0x721   : > { %v11981_v30 = vsub.f32 %v11884_v25, %v11980_v29 }
 0x723   : > { %v11982_v32 = vmul.f32 %v11981_v30, %v11981_v30 }
 0x725   : > { %v11983_v33 = vsel %vm11975_vm2, %v11982_v32, 0.0 }
 0x726   : > { %11984 = vadd.xlane.f32.xlu0 %v11983_v33 }
 0x7b3   : > { %v11985_v31 = vpop.xlane.xlu0 %11984 }
 0x7b4   : > { %v11987_v37 = vmul.f32 0.33333334, %v11985_v31 }
 0x7b6   : > { %15708 = vrsqrt.f32 %v11987_v37  ;;  %vm11990_vm3 = vcmp.eq.f32.partialorder %v11987_v37, inf  ;;  %v11993_v40 = vand.u32 2147483648, %v11987_v37  ;;  %vm11992_vm4 = vcmp.eq.f32.partialorder %v11987_v37, 0.0 }
 0x7c0   : > { %v15709_v38 = vpop.eup %15708 }
 0x7c1   : > { %v11989_v39 = vmul.f32 %v15709_v38, %v11987_v37 }
 0x7c3   : > { %v11991_v41 = vsel %vm11990_vm3, %v11987_v37, %v11989_v39 }
 0x7c4   : > { %v11994_v42 = vsel %vm11992_vm4, %v11993_v40, %v11991_v41 }
 0x7c5   : > { %v11995_v44 = vadd.f32 1e-05, %v11994_v42 }
 0x7c7   : > { %15710 = vrcp.f32 %v11995_v44 }
 0x7d1   : > { %v15711_v45 = vpop.eup %15710 }
 0x7d2   : > { %v11997_v46 = vmul.f32 %v15711_v45, %v11981_v30 }
 0x7d4   : > { %v11998_v47 = vsel %vm11975_vm2, %v11997_v46, 0.0 }
 0x7d5   : > { %11999 = vadd.xlane.f32.xlu1 %v11998_v47 }
 0x7e6   : > { %12005 = vperm.xlu1 %15706, %v11972_v49  }
 0x862   : > { %v12000_v50 = vpop.xlane.xlu1 %11999 }
 0x863   : > { %v12001_v51 = vmul.f32 0.25, %v12000_v50 }
 0x865   : > { %v12002_v53 = vsub.f32 %v11997_v46, %v12001_v51 }
 0x866   : > { %v12006_v43 = vpop.permute.xlu1 %12005 }
 0x867   : > { %v12008_v54 = vadd.f32 %v12006_v43, %v12002_v53 }
 0x869   : > { %12009 = vst.msk [vmem:[#allocation4] sm:$0x3] %vm11975_vm2, %v12008_v54 }
 0x86a PF: > { %p14698_p7 = scmp.eq.s32.totalorder %s15826_s20, 5  ;;  %s15756_s23 = smov [#allocation4]  }
 0x86b   : > { %s12017_s24 = sshll.u32 %s15756_s23, 4  ;;  %s12018_s24 = int_to_ptr.vmem [resolvable:$true] %s12017_s24 }
 0x86c   : > { %s15712_s25 = scalar_lea.vmem %s12018_s24, 32  ;;  %p15719_p11 = scmp.lt.s32.totalorder %s12018_s24, %s12018_s24 }
 0x86d   : > { %p15713_p8 = scmp.ne.s32.totalorder %s12018_s24, %s15712_s25  ;;  %p15720_p12 = scmp.lt.s32.totalorder %s15712_s25, %s15712_s25 }
 0x86f   : > { %p15714_p9 = pnand %p15713_p8, %p14698_p7  ;;  %p15721_p13 = por %p15720_p12, %p15719_p11 }
 0x871   : > { %p15715_p10 = pneg %p15714_p9 }
 0x873   : > { %p15722_p0 = pnand %p15721_p13, %p15715_p10 }
 0x875   : > { %15725 = shalt.err (!%p15722_p0)
}
 0x876   : > { %s15726_s28 = scalar_lea.hbm %s17212_s11, 32 }
 0x877   : > { %p15727_p1 = scmp.ne.s32.totalorder %s17212_s11, %s15726_s28  ;;  %p15732_p4 = scmp.lt.u32.totalorder %s15726_s28, %s17212_s11 }
 0x879   : > { %p15728_p2 = pnand %p15727_p1, %p14698_p7 }
 0x87b   : > { %p15729_p3 = pneg %p15728_p2 }
 0x87d   : > { %p15734_p5 = pnand %p15732_p4, %p15729_p3 }
 0x87f   : > { %15737 = shalt.err (!%p15734_p5)
}
 0x880   : > { %14695 = dma.vmem_to_hbm [thread:$0]  (%p14698_p7), %s12018_s24, 32, %s17212_s11, [#allocation5]  }
 0x881   : > { %15743 = dma.done.wait (%p14698_p7), [#allocation5], 32  }
 0x882   : > { %15745 = vsyncadd (%p14698_p7), [#allocation5], 4294967264 }
 0x883 PF: > { %s24_s19 = sadd.s32 1, %s15748_s19  }
 0x884   : > { %p21_p6 = scmp.ge.s32.totalorder %s24_s19, 8  }
 0x886   :  { %23 = sbr.rel (!%p21_p6) target bundleno = 4 (0x4), region = 102 }
 0x88d   :  { %12030 = vsyncpa [#allocation5], 1 }
 0x88e   :  { %12032 = vsyncpa [#allocation5 + $0x1], 1 }

</bundles_post_ra>
